<compile_context>
chip_gen: v7x
topology: tpu7x:2x2x1
jax: 0.10.0
libtpu: 0.0.40
codegen_flags: <defaults>
</compile_context>

<pallas_src>
import jax
import jax.numpy as jnp
from jax.experimental import pallas as pl
from jax.experimental.pallas import tpu as pltpu

IN_FEATURES = 10
OUT_FEATURES = 1

_LANES = 128                      # output lanes / batch rows folded per reshaped row
_K = IN_FEATURES * _LANES         # 1280: lane-dense contraction dim
_R_TILE_MAX = 1024                # reshaped rows per grid step -> 5 MiB x tile,
                                  # i.e. 131072 batch rows of useful data per step
_PALLAS_MIN_BATCH = 16384         # below this, plain XLA beats any Pallas launch


def _linear_kernel(x_ref, w_ref, b_ref, o_ref):
    # x_ref: (r_tile, 1280) VMEM   w_ref: (1280, 128) VMEM (block-diagonal weight)
    # b_ref: (1, 1) SMEM scalar    o_ref: (r_tile, 128) VMEM (lane-dense store)
    acc = jnp.dot(x_ref[...], w_ref[...], preferred_element_type=jnp.float32)
    o_ref[...] = (acc + b_ref[0, 0]).astype(o_ref.dtype)


def simple_model_forward(x, weight, bias):
    """y = x @ weight.T + bias  (PyTorch nn.Linear(10, 1) semantics).

    x:      (B, IN_FEATURES)             float32
    weight: (OUT_FEATURES, IN_FEATURES)  float32 (PyTorch layout)
    bias:   (OUT_FEATURES,)              float32
    returns (B, OUT_FEATURES)            float32
    """
    B = x.shape[0]

    # Small-batch fast path: launch overhead + layout plumbing would dominate.
    if B < _PALLAS_MIN_BATCH:
        return x @ weight.T + bias

    # --- tile selection (static, per-shape) -------------------------------
    R_full = B // _LANES                             # whole 128-row groups
    n_steps = max(2, pl.cdiv(R_full, _R_TILE_MAX))   # >=2 so both v7x TCs work
    r_tile = max(8, (R_full // n_steps) // 8 * 8)    # multiple of 8, <= 1024
    n_steps = R_full // r_tile
    R_main = n_steps * r_tile
    B_main = R_main * _LANES                         # rows handled by the kernel

    # Lane-dense reshape of the contiguous prefix: (B_main, 10) -> (R_main, 1280).
    x_main = x[:B_main].reshape(R_main, _K)

    # Block-diagonal weight: 128 copies of the (10, 1) weight column on the
    # diagonal, so (R, 1280) @ (1280, 128) computes 128 independent rows' dots.
    w_bd = jnp.kron(jnp.eye(_LANES, dtype=jnp.float32), weight.T).astype(jnp.float32)
    b_smem = bias.reshape(1, 1).astype(jnp.float32)

    cost = pl.CostEstimate(
        flops=2 * R_main * _K * _LANES,
        bytes_accessed=(R_main * _K * 4            # x read
                        + _K * _LANES * 4          # block-diagonal weight
                        + R_main * _LANES * 4      # output write
                        + 4),                      # bias
        transcendentals=0,
    )

    y_main = pl.pallas_call(
        _linear_kernel,
        out_shape=jax.ShapeDtypeStruct((R_main, _LANES), jnp.float32),
        grid=(n_steps,),
        in_specs=[
            pl.BlockSpec((r_tile, _K), lambda i: (i, 0)),        # x tile (pipelined)
            pl.BlockSpec((_K, _LANES), lambda i: (0, 0)),        # weight (resident)
            pl.BlockSpec(memory_space=pltpu.MemorySpace.SMEM),   # bias scalar
        ],
        out_specs=pl.BlockSpec((r_tile, _LANES), lambda i: (i, 0)),
        compiler_params=pltpu.CompilerParams(
            dimension_semantics=("parallel",),       # shard tiles across v7x's 2 TCs
            vmem_limit_bytes=32 * 1024 * 1024,       # fits v5e/v6e/v7x comfortably
        ),
        cost_estimate=cost,
    )(x_main, w_bd, b_smem)

    # (R_main, 128) row-major flatten is exactly batch order -> (B_main, 1).
    y_main = y_main.reshape(B_main, OUT_FEATURES)

    if B_main == B:
        return y_main
    # Tail (< one tile of rows): plain XLA instead of padding the whole array.
    y_tail = x[B_main:] @ weight.T + bias
    return jnp.concatenate([y_main, y_tail], axis=0)


def init_params(key):
    """Deterministic init mimicking nn.Linear's uniform(-1/sqrt(fan_in), +)."""
    kw, kb = jax.random.split(key)
    bound = 1.0 / (IN_FEATURES ** 0.5)
    weight = jax.random.uniform(
        kw, (OUT_FEATURES, IN_FEATURES), jnp.float32, -bound, bound)
    bias = jax.random.uniform(
        kb, (OUT_FEATURES,), jnp.float32, -bound, bound)
    return weight, bias


if __name__ == "__main__":
    key = jax.random.PRNGKey(0)
    k_small, k_params, k_big = jax.random.split(key, 3)

    weight, bias = init_params(k_params)

    # Module-scale input (batch=2, 10 features): exercises the small-batch
    # fast path, matching the original SimpleModel usage.
    x_small = jax.random.normal(k_small, (2, IN_FEATURES), dtype=jnp.float32)
    y_small = simple_model_forward(x_small, weight, bias)
    jax.block_until_ready(y_small)
    assert y_small.shape == (2, OUT_FEATURES)
    ref_small = x_small @ weight.T + bias
    assert jnp.allclose(y_small, ref_small, atol=1e-5, rtol=1e-5)

    # Large batch: exercises the Pallas lane-dense kernel (grid >= 2, pipelined
    # 5 MiB tiles) plus the no-pad XLA tail for the trailing 77 rows.
    big = 262144 + 77
    x_big = jax.random.normal(k_big, (big, IN_FEATURES), dtype=jnp.float32)
    y_big = simple_model_forward(x_big, weight, bias)
    jax.block_until_ready(y_big)
    assert y_big.shape == (big, OUT_FEATURES)
    ref_big = jnp.sum(x_big * weight[0], axis=1, keepdims=True) + bias
    assert jnp.allclose(y_big, ref_big, atol=1e-4, rtol=1e-4)

    print("KERNEL_OK")
</pallas_src>

<mosaic_0001>
module attributes {stable_mosaic.version = 11 : i64} {
  func.func @_linear_kernel(%arg0: i32, %arg1: memref<1024x1280xf32, #tpu.memory_space<vmem>>, %arg2: memref<1280x128xf32, #tpu.memory_space<vmem>>, %arg3: memref<1x1xf32, #tpu.memory_space<smem>>, %arg4: memref<1024x128xf32, #tpu.memory_space<vmem>>) attributes {dimension_semantics = [#tpu.dimension_semantics<parallel>], iteration_bounds = array<i64: 2>, scalar_prefetch = 0 : i64, scratch_operands = 0 : i64, tpu.core_type = #tpu.core_type<tc>, window_params = [{transform_indices = @transform_0, window_bounds = array<i64: 1024, 1280>}, {pipeline_mode = #tpu.pipeline_mode<synchronous>, transform_indices = @transform_1, window_bounds = array<i64: 1280, 128>}, {transform_indices = @transform_2, window_bounds = array<i64: 1, 1>}, {transform_indices = @transform_3, window_bounds = array<i64: 1024, 128>}]} {
    %c0 = arith.constant 0 : index
    %c0_0 = arith.constant 0 : index
    %0 = vector.load %arg1[%c0, %c0_0] : memref<1024x1280xf32, #tpu.memory_space<vmem>>, vector<1024x1280xf32>
    %c0_1 = arith.constant 0 : index
    %c0_2 = arith.constant 0 : index
    %1 = vector.load %arg2[%c0_1, %c0_2] : memref<1280x128xf32, #tpu.memory_space<vmem>>, vector<1280x128xf32>
    %cst = arith.constant dense<0.000000e+00> : vector<1024x128xf32>
    %2 = tpu.matmul %0, %1, %cst {dimension_numbers = #tpu.dot_dimension_numbers<[1], [0], [0], [1], [0, 0, 1, 1], [], []>} : vector<1024x1280xf32>, vector<1280x128xf32>, vector<1024x128xf32> -> vector<1024x128xf32>
    %c0_3 = arith.constant 0 : index
    %c0_4 = arith.constant 0 : index
    %3 = memref.load %arg3[%c0_3, %c0_4] : memref<1x1xf32, #tpu.memory_space<smem>>
    %4 = vector.broadcast %3 : f32 to vector<1024x128xf32>
    %5 = arith.addf %2, %4 : vector<1024x128xf32>
    %c0_5 = arith.constant 0 : index
    %c0_6 = arith.constant 0 : index
    %6 = vector.load %arg4[%c0_5, %c0_6] : memref<1024x128xf32, #tpu.memory_space<vmem>>, vector<1024x128xf32>
    tpu.vector_store %arg4[%c0_5, %c0_6], %5 {strides = array<i32>} : memref<1024x128xf32, #tpu.memory_space<vmem>>, vector<1024x128xf32>,
    return
  }
  func.func @transform_0(%arg0: i32) -> (i32, i32) {
    %c0_i32 = arith.constant 0 : i32
    %c0_i32_0 = arith.constant 0 : i32
    return %arg0, %c0_i32 : i32, i32
  }
  func.func @transform_1(%arg0: i32) -> (i32, i32) {
    %c0_i32 = arith.constant 0 : i32
    %c0_i32_0 = arith.constant 0 : i32
    %c0_i32_1 = arith.constant 0 : i32
    return %c0_i32, %c0_i32_0 : i32, i32
  }
  func.func @transform_2(%arg0: i32) -> (i32, i32) {
    %c0_i32 = arith.constant 0 : i32
    %c0_i32_0 = arith.constant 0 : i32
    %c0_i32_1 = arith.constant 0 : i32
    return %c0_i32, %c0_i32_0 : i32, i32
  }
  func.func @transform_3(%arg0: i32) -> (i32, i32) {
    %c0_i32 = arith.constant 0 : i32
    %c0_i32_0 = arith.constant 0 : i32
    return %arg0, %c0_i32 : i32, i32
  }
}

</mosaic_0001>

<bundles_post_ra>
// kernel: tpu_custom_call.1
= control target key start
LH: loop header
LB: loop body
LE: loop exit
PB: predicated region body
PF: predicated region fallthrough
CT: control target
= control target key end

     0   :  { %s9039_s0 = inlined_call_operand.hbm [shape: f32[2048,1280], index: 0, kind: input, shape index: {}]   ;;  %s9040_s1 = inlined_call_operand.hbm [shape: f32[1280,128], index: 1, kind: input, shape index: {}]   ;;  %s9041_s2 = inlined_call_operand.<no memory space> [shape: f32[1,1], index: 2, kind: input, shape index: {}]   ;;  %s9042_s3 = inlined_call_operand.hbm [shape: f32[2048,128], index: 3, kind: output, shape index: {}]  }
   0x1   :  { %8 = sst [smem:[#allocation2]] %s9041_s2 }
   0x2   :  { %9 = vsyncpa [#allocation4], 0 }
   0x3   :  { %11 = vsyncpa [#allocation4 + $0x1], 0 }
   0x4   :  { %12 = vsyncpa [#allocation7], 0 }
   0x5   :  { %13 = vsyncpa [#allocation5], 0 }
   0x6   :  { %15 = vsyncpa [#allocation5 + $0x1], 0  ;;  %s6942_s14 = smov 0   ;;  %s6944_s15 = smov 0  }
   0x7   :  { %s6946_s16 = smov 0   ;;  %s6948_s17 = smov 0  }
   0x8 LB: > { %s6963_s2 = sadd.s32 4294967295, %s6907_s17   ;;  %s5400_s18 = sadd.s32 4294967294, %s6907_s17   ;;  %s6907_s17 = sphi %s6948_s17, %s9088_s17   ;;  %s6903_s16 = sphi %s6946_s16, %s9087_s16   ;;  %s6899_s15 = sphi %s6944_s15, %s9086_s15   ;;  %s6895_s14 = sphi %s6942_s14, %s9085_s14  }
   0x9   : > { %p41_p0 = scmp.ne.s32.totalorder %s6899_s15, %s6895_s14  ;;  %p9043_p1 = scmp.eq.s32.totalorder %s6963_s2, 0 }
   0xa   : > { %p113_p3 = scmp.eq.s32.totalorder %s5400_s18, 1  ;;  %p5401_p5 = scmp.ge.s32.totalorder %s6907_s17, 1 }
   0xb   : > { %p6972_p4 = por %p9043_p1, %p41_p0  ;;  %p120_p7 = scmp.lt.s32.totalorder %s6907_s17, 3 }
   0xc   : > { %p6977_p6 = por %p113_p3, %p41_p0  ;;  %s6909_s22 = smov [#allocation6]  }
   0xd   : > { %s9046_s19 = scalar_select %p6972_p4, 1, 0 }
   0xe   : > { %s9047_s20 = scalar_select %p6977_p6, 1, 0 }
   0xf   : > { %p6982_p8 = pnand %p5401_p5, %p120_p7  ;;  %s132_s23 = sshll.u32 %s6909_s22, 4  ;;  %s6986_s23 = int_to_ptr.vmem [resolvable:$true] %s132_s23 }
  0x10   : > { %s6998_s25 = sadd.s32 1, %s6907_s17   ;;  %s28_s26 = sadd.s32 1, %s6903_s16 }
  0x11   : > { %s9048_s21 = scalar_select %p6982_p8, 1, 0 }
  0x12   : > { %p6723_p9 = pneg %p6982_p8  ;;  %s25_s27 = ssub.s32 %s6907_s17, %s6998_s25 }
  0x13   : > { %s6779_s30 = scalar_lea.hbm %s9040_s1, 20480 }
  0x14   : > { %p6993_p11 = pnand %p6723_p9, %p9043_p1  ;;  %p6780_p12 = scmp.ne.s32.totalorder %s9040_s1, %s6779_s30 }
  0x15   : > { %p6786_p5 = scmp.lt.u32.totalorder %s6779_s30, %s9040_s1 }
  0x16   : > { %p6781_p13 = pneg %p6993_p11 }
  0x18   : > { %p6782_p0 = pnand %p6781_p13, %p6780_p12 }
  0x1a   : > { %p6783_p3 = pneg %p6782_p0 }
  0x1c   : > { %p6788_p7 = pnand %p6786_p5, %p6783_p3 }
  0x1e   : > { %6791 = shalt.err (!%p6788_p7)
}
  0x1f   : > { %s6792_s8 = scalar_lea.vmem %s6986_s23, 20480  ;;  %p6800_p2 = scmp.lt.s32.totalorder %s6986_s23, %s6986_s23 }
  0x20   : > { %p6793_p9 = scmp.ne.s32.totalorder %s6986_s23, %s6792_s8  ;;  %p6801_p6 = scmp.lt.s32.totalorder %s6792_s8, %s6792_s8 }
  0x22   : > { %p6795_p10 = pnand %p6793_p9, %p6781_p13  ;;  %p6802_p4 = por %p6801_p6, %p6800_p2 }
  0x24   : > { %p6796_p1 = pneg %p6795_p10 }
  0x26   : > { %p6803_p8 = pnand %p6802_p4, %p6796_p1 }
  0x28   : > { %6806 = shalt.err (!%p6803_p8)
}
  0x29   : > { %s6910_s9 = smov 128   ;;  %s6911_s10 = smov 8  }
  0x2a   : > { %6726 = dma.hbm_to_vmem [thread:$0]  (!%p6993_p11), %s9040_s1, 20480, %s6986_s23, [#allocation7], %s6910_s9, %s6910_s9, %s6911_s10  }
  0x2b   : > { %p26_p2 = scmp.eq.s32.totalorder %s25_s27, 0  ;;  %p35_p1 = scmp.ne.s32.totalorder %s6903_s16, %s6899_s15 }
  0x2c   : > { %p36_p4 = scmp.eq.s32.totalorder %s6907_s17, 0  ;;  %p6736_p6 = scmp.lt.s32.totalorder %s6907_s17, 2 }
  0x2d   : > { %s7029_s13 = scalar_select %p26_p2, %s6903_s16, %s28_s26  }
  0x2e   : > { %p37_p8 = por %p36_p4, %p35_p1  ;;  %p9050_p10 = scmp.eq.s32.totalorder %s6963_s2, 1 }
  0x2f   : > { %s149_s22 = sand.u32 1, %s6903_s16   ;;  %s6713_s28 = smul.u32 163840, %s6907_s17 }
  0x30   : > { %p7033_p12 = por %p9050_p10, %p35_p1  ;;  %s6712_s29 = smul.u32 10240, %s149_s22 }
  0x31   : > { %s7042_s4 = scalar_lea.hbm %s9039_s0, %s6713_s28  ;;  %p7044_p11 = pnand %p6736_p6, %p37_p8 }
  0x32   : > { %s153_s26 = scalar_lea.vmem [#allocation3], %s6712_s29  ;;  %s7050_s5 = scalar_lea.sflag [#allocation4], %s149_s22 }
  0x33   : > { %s161_s27 = sshll.u32 %s153_s26, 4  ;;  %s6807_s6 = scalar_lea.hbm %s7042_s4, 163840  ;;  %s7048_s27 = int_to_ptr.vmem [resolvable:$true] %s161_s27 }
  0x34   : > { %p6808_p13 = scmp.ne.s32.totalorder %s7042_s4, %s6807_s6  ;;  %p6809_p0 = pneg %p7044_p11 }
  0x35   : > { %s6812_s9 = scalar_lea.hbm %s9039_s0, 327680  ;;  %p6813_p7 = scmp.lt.u32.totalorder %s7042_s4, %s9039_s0 }
  0x36   : > { %p6810_p3 = pnand %p6809_p0, %p6808_p13  ;;  %p6814_p9 = scmp.lt.u32.totalorder %s6812_s9, %s6807_s6 }
  0x37   : > { %p6816_p1 = scmp.lt.u32.totalorder %s6807_s6, %s7042_s4 }
  0x38   : > { %p6811_p5 = pneg %p6810_p3  ;;  %p6815_p2 = por %p6814_p9, %p6813_p7 }
  0x3a   : > { %p6817_p4 = por %p6816_p1, %p6815_p2 }
  0x3c   : > { %p6818_p6 = pnand %p6817_p4, %p6811_p5 }
  0x3e   : > { %6821 = shalt.err (!%p6818_p6)
}
  0x3f   : > { %s6822_s12 = scalar_lea.vmem %s7048_s27, 163840  ;;  %s6912_s22 = smov [#allocation3]  }
  0x40   : > { %p6823_p8 = scmp.ne.s32.totalorder %s7048_s27, %s6822_s12  ;;  %s6827_s28 = sshll.u32 %s6912_s22, 4  ;;  %s6828_s28 = int_to_ptr.vmem [resolvable:$false] %s6827_s28 }
  0x41   : > { %s6829_s29 = scalar_lea.vmem %s6828_s28, 327680  ;;  %p6830_p3 = scmp.lt.s32.totalorder %s7048_s27, %s6828_s28 }
  0x42   : > { %p6825_p10 = pnand %p6823_p8, %p6809_p0  ;;  %p6831_p7 = scmp.lt.s32.totalorder %s6829_s29, %s6822_s12 }
  0x44   : > { %p6826_p13 = pneg %p6825_p10  ;;  %p6832_p9 = por %p6831_p7, %p6830_p3 }
  0x46   : > { %p6833_p2 = pnand %p6832_p9, %p6826_p13 }
  0x48   : > { %6836 = shalt.err (!%p6833_p2)
}
  0x49   : > { %s6913_s24 = smov 1280   ;;  %s6914_s30 = smov 80  }
  0x4a   : > { %6730 = dma.hbm_to_vmem [thread:$0]  (!%p7044_p11), %s7042_s4, 163840, %s7048_s27, %s7050_s5, %s6913_s24, %s6913_s24, %s6914_s30  }
  0x4b   : > { %p9053_p0 = scmp.ne.s32.totalorder %s9048_s21, 0 }
  0x4d   : > { %173 = sbr.rel (%p9053_p0) target bundleno = 1665 (0x681), region = 32 }
  0x54   : > { %s7081_s26 = sand.u32 1, %s6899_s15   ;;  %p9054_p5 = scmp.ne.s32.totalorder %s9046_s19, 0 }
  0x55   : > { %s6714_s6 = smul.u32 10240, %s7081_s26  ;;  %s176_s7 = scalar_lea.sflag [#allocation4], %s7081_s26 }
  0x57   : > { %s7085_s8 = scalar_lea.vmem [#allocation3], %s6714_s6 }
  0x58   : > { %6882 = dma.done.wait (%p9054_p5), %s176_s7, 163840  }
  0x59   : > { %6884 = vsyncadd (%p9054_p5), %s176_s7, 4294803456  ;;  %p9055_p11 = scmp.eq.s32.totalorder %s6963_s2, 0 }
  0x5b   : > { %6886 = dma.done.wait (%p9055_p11), [#allocation7], 20480   ;;  %p9056_p1 = pmov %p9055_p11 }
  0x5c   : > { %v6915_v0 = vmov 0.0|0.0   ;;  %v1488_v1 = vld [vmem:[#allocation6] sm:$0xff]  ;;  %v1489_v2 = vld [vmem:[#allocation6 + $0x8] sm:$0xff]  ;;  %v1490_v6 = vld [vmem:[#allocation6 + $0x10] sm:$0xff]  ;;  %s1648_s19 = sld [smem:[#allocation2]]  ;;  %s5409_s21 = sshll.u32 %s7081_s26, 10 }
  0x5d   : > { %6888 = vsyncadd (%p9056_p1), [#allocation7], 4294946816  ;;  %5416 = vmatprep.subr.bf16.mxu1 %v6915_v0  ;;  %5512 = vmatprep.subr.bf16.mxu0 %v6915_v0  ;;  %v1552_v3 = vld [vmem:[#allocation6 + $0x200] sm:$0xff]  ;;  %v5417_v4 = vpack.c.bf16 %v1489_v2, %v1488_v1  ;;  %v1553_v5 = vld [vmem:[#allocation6 + $0x208] sm:$0xff]  ;;  %s8379_s4 = scalar_lea.vmem [#allocation8], %s5409_s21  ;;  %s5415_s23 = sshll.u32 %s6963_s2, 14 }
  0x5e   : > { %v1491_v7 = vld [vmem:[#allocation6 + $0x18] sm:$0xff]  ;;  %v7097_v8 = vpack.c.bf16 %v1553_v5, %v1552_v3  ;;  %v1554_v9 = vld [vmem:[#allocation6 + $0x210] sm:$0xff]  ;;  %v1492_v13 = vld [vmem:[#allocation6 + $0x20] sm:$0xff]  ;;  %s5317_s27 = sshll.u32 %s8379_s4, 4  ;;  %s8992_s10 = scalar_lea.hbm %s9042_s3, %s5415_s23  ;;  %s8994_s27 = int_to_ptr.vmem [resolvable:$true] %s5317_s27 }
  0x5f   : > { %v1555_v10 = vld [vmem:[#allocation6 + $0x218] sm:$0xff]  ;;  %5418 = vmatpush1.bf16.msra.mxu1 %v5417_v4  ;;  %v5420_v11 = vpack.c.bf16 %v1491_v7, %v1490_v6  ;;  %v1493_v14 = vld [vmem:[#allocation6 + $0x28] sm:$0xff]  ;;  %v1556_v15 = vld [vmem:[#allocation6 + $0x220] sm:$0xff]  ;;  %s5304_s2 = scalar_lea.sflag [#allocation5], %s7081_s26  ;;  %s6837_s11 = scalar_lea.vmem %s8994_s27, 16384 }
  0x60   : > { %5514 = vmatpush1.bf16.msra.mxu0 %v7097_v8  ;;  %5419 = vmatprep.subr.bf16.mxu1 %v6915_v0  ;;  %v7101_v12 = vpack.c.bf16 %v1555_v10, %v1554_v9  ;;  %v1557_v16 = vld [vmem:[#allocation6 + $0x228] sm:$0xff]  ;;  %v5423_v17 = vpack.c.bf16 %v1493_v14, %v1492_v13  ;;  %v1494_v19 = vld [vmem:[#allocation6 + $0x30] sm:$0xff]  ;;  %v1495_v20 = vld [vmem:[#allocation6 + $0x38] sm:$0xff]  ;;  %p6838_p4 = scmp.ne.s32.totalorder %s8994_s27, %s6837_s11  ;;  %s6916_s12 = smov [#allocation8]  }
  0x61   : > { %5515 = vmatprep.subr.bf16.mxu0 %v6915_v0  ;;  %v7106_v18 = vpack.c.bf16 %v1557_v16, %v1556_v15  ;;  %v1558_v21 = vld [vmem:[#allocation6 + $0x230] sm:$0xff]  ;;  %v1559_v22 = vld [vmem:[#allocation6 + $0x238] sm:$0xff]  ;;  %v5426_v23 = vpack.c.bf16 %v1495_v20, %v1494_v19  ;;  %v1496_v25 = vld [vmem:[#allocation6 + $0x40] sm:$0xff]  ;;  %s6841_s22 = sshll.u32 %s6916_s12, 4  ;;  %s6842_s22 = int_to_ptr.vmem [resolvable:$false] %s6841_s22 }
  0x62   : > { %v7111_v24 = vpack.c.bf16 %v1559_v22, %v1558_v21  ;;  %v1497_v26 = vld [vmem:[#allocation6 + $0x48] sm:$0xff]  ;;  %v1560_v27 = vld [vmem:[#allocation6 + $0x240] sm:$0xff]  ;;  %v1498_v31 = vld [vmem:[#allocation6 + $0x50] sm:$0xff]  ;;  %p6839_p6 = pnand %p6838_p4, %p7033_p12  ;;  %s6843_s28 = scalar_lea.vmem %s6842_s22, 32768 }
  0x63   : > { %5421 = vmatpush1.bf16.msra.mxu1 %v5420_v11  ;;  %v1561_v28 = vld [vmem:[#allocation6 + $0x248] sm:$0xff]  ;;  %v5429_v29 = vpack.c.bf16 %v1497_v26, %v1496_v25  ;;  %v1499_v32 = vld [vmem:[#allocation6 + $0x58] sm:$0xff]  ;;  %v1562_v33 = vld [vmem:[#allocation6 + $0x250] sm:$0xff]  ;;  %p6844_p10 = scmp.lt.s32.totalorder %s8994_s27, %s6842_s22  ;;  %p6845_p13 = scmp.lt.s32.totalorder %s6843_s28, %s6837_s11 }
  0x64   : > { %5517 = vmatpush1.bf16.msra.mxu0 %v7101_v12  ;;  %5422 = vmatprep.subr.bf16.mxu1 %v6915_v0  ;;  %v7116_v30 = vpack.c.bf16 %v1561_v28, %v1560_v27  ;;  %v1563_v34 = vld [vmem:[#allocation6 + $0x258] sm:$0xff]  ;;  %v5432_v35 = vpack.c.bf16 %v1499_v32, %v1498_v31  ;;  %v1500_v37 = vld [vmem:[#allocation6 + $0x60] sm:$0xff]  ;;  %v1501_v38 = vld [vmem:[#allocation6 + $0x68] sm:$0xff]  ;;  %p6840_p8 = pneg %p6839_p6 }
  0x65   : > { %5518 = vmatprep.subr.bf16.mxu0 %v6915_v0  ;;  %v7121_v36 = vpack.c.bf16 %v1563_v34, %v1562_v33  ;;  %v1564_v39 = vld [vmem:[#allocation6 + $0x260] sm:$0xff]  ;;  %v1565_v40 = vld [vmem:[#allocation6 + $0x268] sm:$0xff]  ;;  %v5435_v43 = vpack.c.bf16 %v1501_v38, %v1500_v37  ;;  %v1502_v45 = vld [vmem:[#allocation6 + $0x70] sm:$0xff]  ;;  %p6846_p3 = por %p6845_p13, %p6844_p10 }
  0x66   : > { %v209_v41 = vld [vmem:[%s7085_s8 + $0x8] sm:$0xff]  ;;  %v7128_v44 = vpack.c.bf16 %v1565_v40, %v1564_v39  ;;  %v1503_v46 = vld [vmem:[#allocation6 + $0x78] sm:$0xff]  ;;  %v1566_v47 = vld [vmem:[#allocation6 + $0x270] sm:$0xff] }
  0x67   : > { %5424 = vmatpush1.bf16.msra.mxu1 %v5423_v17  ;;  %v213_v42 = vld [vmem:[%s7085_s8 + $0x28] sm:$0xff]  ;;  %1714 = vmatprep.mubr.f32.mxu1 %v209_v41  ;;  %v1567_v48 = vld [vmem:[#allocation6 + $0x278] sm:$0xff]  ;;  %v5438_v49 = vpack.c.bf16 %v1503_v46, %v1502_v45  ;;  %v1504_v51 = vld [vmem:[#allocation6 + $0x80] sm:$0xff]  ;;  %p6847_p7 = pnand %p6846_p3, %p6840_p8 }
  0x68   : > { %5520 = vmatpush1.bf16.msra.mxu0 %v7106_v18  ;;  %5425 = vmatprep.subr.bf16.mxu1 %v6915_v0  ;;  %v7133_v50 = vpack.c.bf16 %v1567_v48, %v1566_v47  ;;  %v1505_v52 = vld [vmem:[#allocation6 + $0x88] sm:$0xff]  ;;  %v1568_v53 = vld [vmem:[#allocation6 + $0x280] sm:$0xff]  ;;  %v1506_v57 = vld [vmem:[#allocation6 + $0x90] sm:$0xff] }
  0x69   : > { %5521 = vmatprep.subr.bf16.mxu0 %v6915_v0  ;;  %3124 = vmatprep.mubr.f32.mxu0 %v213_v42  ;;  %v1569_v54 = vld [vmem:[#allocation6 + $0x288] sm:$0xff]  ;;  %v5441_v55 = vpack.c.bf16 %v1505_v52, %v1504_v51  ;;  %v1507_v58 = vld [vmem:[#allocation6 + $0x98] sm:$0xff]  ;;  %v1570_v59 = vld [vmem:[#allocation6 + $0x290] sm:$0xff] }
  0x6a   : > { %v7138_v56 = vpack.c.bf16 %v1569_v54, %v1568_v53  ;;  %v1571_v60 = vld [vmem:[#allocation6 + $0x298] sm:$0xff]  ;;  %v5444_v61 = vpack.c.bf16 %v1507_v58, %v1506_v57  ;;  %v1508_v63 = vld [vmem:[#allocation6 + $0xa0] sm:$0xff]  ;;  %v1509_v1 = vld [vmem:[#allocation6 + $0xa8] sm:$0xff] }
  0x6b   : > { %5427 = vmatpush1.bf16.msra.mxu1 %v5426_v23  ;;  %v7143_v62 = vpack.c.bf16 %v1571_v60, %v1570_v59  ;;  %v1572_v2 = vld [vmem:[#allocation6 + $0x2a0] sm:$0xff]  ;;  %v1573_v3 = vld [vmem:[#allocation6 + $0x2a8] sm:$0xff]  ;;  %v5447_v4 = vpack.c.bf16 %v1509_v1, %v1508_v63  ;;  %v1510_v6 = vld [vmem:[#allocation6 + $0xb0] sm:$0xff] }
  0x6c   : > { %5523 = vmatpush1.bf16.msra.mxu0 %v7111_v24  ;;  %5428 = vmatprep.subr.bf16.mxu1 %v6915_v0  ;;  %v7148_v5 = vpack.c.bf16 %v1573_v3, %v1572_v2  ;;  %v1511_v7 = vld [vmem:[#allocation6 + $0xb8] sm:$0xff]  ;;  %v1574_v9 = vld [vmem:[#allocation6 + $0x2b0] sm:$0xff]  ;;  %v1512_v14 = vld [vmem:[#allocation6 + $0xc0] sm:$0xff] }
  0x6d   : > { %5524 = vmatprep.subr.bf16.mxu0 %v6915_v0  ;;  %v1575_v10 = vld [vmem:[#allocation6 + $0x2b8] sm:$0xff]  ;;  %v5450_v11 = vpack.c.bf16 %v1511_v7, %v1510_v6  ;;  %v1513_v15 = vld [vmem:[#allocation6 + $0xc8] sm:$0xff]  ;;  %v1576_v16 = vld [vmem:[#allocation6 + $0x2c0] sm:$0xff] }
  0x6e   : > { %v7153_v13 = vpack.c.bf16 %v1575_v10, %v1574_v9  ;;  %v1577_v17 = vld [vmem:[#allocation6 + $0x2c8] sm:$0xff]  ;;  %v5453_v19 = vpack.c.bf16 %v1513_v15, %v1512_v14  ;;  %v1514_v21 = vld [vmem:[#allocation6 + $0xd0] sm:$0xff]  ;;  %v1515_v22 = vld [vmem:[#allocation6 + $0xd8] sm:$0xff] }
  0x6f   : > { %5430 = vmatpush1.bf16.msra.mxu1 %v5429_v29  ;;  %v7158_v20 = vpack.c.bf16 %v1577_v17, %v1576_v16  ;;  %v1578_v23 = vld [vmem:[#allocation6 + $0x2d0] sm:$0xff]  ;;  %v1579_v25 = vld [vmem:[#allocation6 + $0x2d8] sm:$0xff]  ;;  %v5456_v26 = vpack.c.bf16 %v1515_v22, %v1514_v21  ;;  %v1516_v28 = vld [vmem:[#allocation6 + $0xe0] sm:$0xff] }
  0x70   : > { %5526 = vmatpush1.bf16.msra.mxu0 %v7116_v30  ;;  %5431 = vmatprep.subr.bf16.mxu1 %v6915_v0  ;;  %v7163_v27 = vpack.c.bf16 %v1579_v25, %v1578_v23  ;;  %v1517_v29 = vld [vmem:[#allocation6 + $0xe8] sm:$0xff]  ;;  %v1580_v31 = vld [vmem:[#allocation6 + $0x2e0] sm:$0xff]  ;;  %v1519_v37 = vld [vmem:[#allocation6 + $0xf8] sm:$0xff] }
  0x71   : > { %5527 = vmatprep.subr.bf16.mxu0 %v6915_v0  ;;  %v1581_v32 = vld [vmem:[#allocation6 + $0x2e8] sm:$0xff]  ;;  %v5459_v33 = vpack.c.bf16 %v1517_v29, %v1516_v28  ;;  %v1582_v38 = vld [vmem:[#allocation6 + $0x2f0] sm:$0xff]  ;;  %v1583_v39 = vld [vmem:[#allocation6 + $0x2f8] sm:$0xff] }
  0x72   : > { %v7168_v34 = vpack.c.bf16 %v1581_v32, %v1580_v31  ;;  %v7173_v41 = vpack.c.bf16 %v1583_v39, %v1582_v38  ;;  %v1520_v42 = vld [vmem:[#allocation6 + $0x100] sm:$0xff]  ;;  %v1585_v46 = vld [vmem:[#allocation6 + $0x308] sm:$0xff]  ;;  %v219_v51 = vld [vmem:[%s7085_s8 + $0x58] sm:$0xff] }
  0x73   : > { %5433 = vmatpush1.bf16.msra.mxu1 %v5432_v35  ;;  %v1518_v35 = vld [vmem:[#allocation6 + $0xf0] sm:$0xff]  ;;  %v1584_v45 = vld [vmem:[#allocation6 + $0x300] sm:$0xff]  ;;  %v223_v52 = vld [vmem:[%s7085_s8 + $0x78] sm:$0xff] }
  0x74   : > { %5529 = vmatpush1.bf16.msra.mxu0 %v7121_v36  ;;  %5434 = vmatprep.subr.bf16.mxu1 %v6915_v0  ;;  %v5462_v40 = vpack.c.bf16 %v1519_v37, %v1518_v35  ;;  %v208_v47 = vld [vmem:[%s7085_s8] sm:$0xff]  ;;  %v5561_v53 = vpack.c.bf16 %v1585_v46, %v1584_v45  ;;  %v1522_v54 = vld [vmem:[#allocation6 + $0x110] sm:$0xff]  ;;  %v1587_v58 = vld [vmem:[#allocation6 + $0x318] sm:$0xff] }
  0x75   : > { %5530 = vmatprep.subr.bf16.mxu0 %v6915_v0  ;;  %v1586_v57 = vld [vmem:[#allocation6 + $0x310] sm:$0xff]  ;;  %v233_v1 = vld [vmem:[%s7085_s8 + $0xc8] sm:$0xff]  ;;  %v1524_v3 = vld [vmem:[#allocation6 + $0x120] sm:$0xff] }
  0x76   : > { %v218_v59 = vld [vmem:[%s7085_s8 + $0x50] sm:$0xff]  ;;  %v5564_v2 = vpack.c.bf16 %v1587_v58, %v1586_v57  ;;  %v1588_v6 = vld [vmem:[#allocation6 + $0x320] sm:$0xff]  ;;  %v1589_v7 = vld [vmem:[#allocation6 + $0x328] sm:$0xff] }
  0x77   : > { %5436 = vmatpush1.bf16.msra.mxu1 %v5435_v43  ;;  %v1521_v43 = vld [vmem:[#allocation6 + $0x108] sm:$0xff]  ;;  %v222_v60 = vld [vmem:[%s7085_s8 + $0x70] sm:$0xff]  ;;  %v228_v9 = vld [vmem:[%s7085_s8 + $0xa0] sm:$0xff]  ;;  %v5567_v16 = vpack.c.bf16 %v1589_v7, %v1588_v6 }
  0x78   : > { %5532 = vmatpush1.bf16.msra.mxu0 %v7128_v44  ;;  %5437 = vmatprep.subr.bf16.mxu1 %v6915_v0  ;;  %v5465_v48 = vpack.c.bf16 %v1521_v43, %v1520_v42  ;;  %v232_v10 = vld [vmem:[%s7085_s8 + $0xc0] sm:$0xff]  ;;  %v243_v15 = vld [vmem:[%s7085_s8 + $0x118] sm:$0xff]  ;;  %v1526_v17 = vld [vmem:[#allocation6 + $0x130] sm:$0xff] }
  0x79   : > { %5533 = vmatprep.subr.bf16.mxu0 %v6915_v0  ;;  %v1590_v21 = vld [vmem:[#allocation6 + $0x330] sm:$0xff]  ;;  %v1591_v22 = vld [vmem:[#allocation6 + $0x338] sm:$0xff]  ;;  %v253_v29 = vld [vmem:[%s7085_s8 + $0x168] sm:$0xff] }
  0x7a   : > { %v238_v23 = vld [vmem:[%s7085_s8 + $0xf0] sm:$0xff]  ;;  %v5570_v31 = vpack.c.bf16 %v1591_v22, %v1590_v21  ;;  %v1528_v32 = vld [vmem:[#allocation6 + $0x140] sm:$0xff]  ;;  %v1593_v37 = vld [vmem:[#allocation6 + $0x348] sm:$0xff] }
  0x7b   : > { %5439 = vmatpush1.bf16.msra.mxu1 %v5438_v49  ;;  %v212_v49 = vld [vmem:[%s7085_s8 + $0x20] sm:$0xff]  ;;  %v242_v25 = vld [vmem:[%s7085_s8 + $0x110] sm:$0xff]  ;;  %v263_v43 = vld [vmem:[%s7085_s8 + $0x1b8] sm:$0xff] }
  0x7c   : > { %5535 = vmatpush1.bf16.msra.mxu0 %v7133_v50  ;;  %5440 = vmatprep.subr.bf16.mxu1 %v6915_v0  ;;  %v1592_v35 = vld [vmem:[#allocation6 + $0x340] sm:$0xff]  ;;  %v1594_v46 = vld [vmem:[#allocation6 + $0x350] sm:$0xff]  ;;  %v293_v6 = vld [vmem:[%s7085_s8 + $0x2a8] sm:$0xff] }
  0x7d   : > { %5536 = vmatprep.subr.bf16.mxu0 %v6915_v0  ;;  %v248_v38 = vld [vmem:[%s7085_s8 + $0x140] sm:$0xff]  ;;  %v5573_v45 = vpack.c.bf16 %v1593_v37, %v1592_v35  ;;  %v1603_v21 = vld [vmem:[#allocation6 + $0x398] sm:$0xff]  ;;  %v298_v22 = vld [vmem:[%s7085_s8 + $0x2d0] sm:$0xff] }
  0x7e   : > { %v252_v39 = vld [vmem:[%s7085_s8 + $0x160] sm:$0xff]  ;;  %v1605_v35 = vld [vmem:[#allocation6 + $0x3a8] sm:$0xff] }
  0x7f   : > { %5442 = vmatpush1.bf16.msra.mxu1 %v5441_v55  ;;  %v1523_v55 = vld [vmem:[#allocation6 + $0x118] sm:$0xff]  ;;  %v268_v57 = vld [vmem:[%s7085_s8 + $0x1e0] sm:$0xff] }
  0x80   : > { %5538 = vmatpush1.bf16.msra.mxu0 %v7138_v56  ;;  %5443 = vmatprep.subr.bf16.mxu1 %v6915_v0  ;;  %v5468_v63 = vpack.c.bf16 %v1523_v55, %v1522_v54  ;;  %v1596_v54 = vld [vmem:[#allocation6 + $0x360] sm:$0xff]  ;;  %v1597_v55 = vld [vmem:[#allocation6 + $0x368] sm:$0xff] }
  0x81   : > { %5539 = vmatprep.subr.bf16.mxu0 %v6915_v0  ;;  %v272_v58 = vld [vmem:[%s7085_s8 + $0x200] sm:$0xff] }
  0x82   : > { %v308_v37 = vld [vmem:[%s7085_s8 + $0x320] sm:$0xff] }
  0x83   : > { %5445 = vmatpush1.bf16.msra.mxu1 %v5444_v61  ;;  %v229_v61 = vld [vmem:[%s7085_s8 + $0xa8] sm:$0xff] }
  0x84   : > { %5541 = vmatpush1.bf16.msra.mxu0 %v7143_v62  ;;  %5446 = vmatprep.subr.bf16.mxu1 %v6915_v0 }
  0x85   : > { %5542 = vmatprep.subr.bf16.mxu0 %v6915_v0 }
  0x87   : > { %5448 = vmatpush1.bf16.msra.mxu1 %v5447_v4  ;;  %v1525_v4 = vld [vmem:[#allocation6 + $0x128] sm:$0xff] }
  0x88   : > { %5544 = vmatpush1.bf16.msra.mxu0 %v7148_v5  ;;  %5449 = vmatprep.subr.bf16.mxu1 %v6915_v0  ;;  %v5471_v14 = vpack.c.bf16 %v1525_v4, %v1524_v3  ;;  %v282_v3 = vld [vmem:[%s7085_s8 + $0x250] sm:$0xff]  ;;  %v289_v4 = vld [vmem:[%s7085_s8 + $0x288] sm:$0xff] }
  0x89   : > { %5545 = vmatprep.subr.bf16.mxu0 %v6915_v0 }
  0x8b   : > { %5451 = vmatpush1.bf16.msra.mxu1 %v5450_v11  ;;  %v239_v11 = vld [vmem:[%s7085_s8 + $0xf8] sm:$0xff] }
  0x8c   : > { %5547 = vmatpush1.bf16.msra.mxu0 %v7153_v13  ;;  %5452 = vmatprep.subr.bf16.mxu1 %v6915_v0 }
  0x8d   : > { %5548 = vmatprep.subr.bf16.mxu0 %v6915_v0 }
  0x8f   : > { %5454 = vmatpush1.bf16.msra.mxu1 %v5453_v19  ;;  %v1527_v19 = vld [vmem:[#allocation6 + $0x138] sm:$0xff] }
  0x90   : > { %5550 = vmatpush1.bf16.msra.mxu0 %v7158_v20  ;;  %5455 = vmatprep.subr.bf16.mxu1 %v6915_v0  ;;  %v5474_v28 = vpack.c.bf16 %v1527_v19, %v1526_v17  ;;  %v1602_v19 = vld [vmem:[#allocation6 + $0x390] sm:$0xff] }
  0x91   : > { %5551 = vmatprep.subr.bf16.mxu0 %v6915_v0 }
  0x93   : > { %5457 = vmatpush1.bf16.msra.mxu1 %v5456_v26  ;;  %v249_v26 = vld [vmem:[%s7085_s8 + $0x148] sm:$0xff] }
  0x94   : > { %5553 = vmatpush1.bf16.msra.mxu0 %v7163_v27  ;;  %5458 = vmatprep.subr.bf16.mxu1 %v6915_v0 }
  0x95   : > { %5554 = vmatprep.subr.bf16.mxu0 %v6915_v0 }
  0x97   : > { %5460 = vmatpush1.bf16.msra.mxu1 %v5459_v33  ;;  %v1529_v33 = vld [vmem:[#allocation6 + $0x148] sm:$0xff] }
  0x98   : > { %5556 = vmatpush1.bf16.msra.mxu0 %v7168_v34  ;;  %5461 = vmatprep.subr.bf16.mxu1 %v6915_v0  ;;  %v5477_v42 = vpack.c.bf16 %v1529_v33, %v1528_v32  ;;  %v5588_v32 = vpack.c.bf16 %v1603_v21, %v1602_v19  ;;  %v1604_v33 = vld [vmem:[#allocation6 + $0x3a0] sm:$0xff]  ;;  %v1533_v19 = vld [vmem:[#allocation6 + $0x168] sm:$0xff] }
  0x99   : > { %5557 = vmatprep.subr.bf16.mxu0 %v6915_v0  ;;  %v389_v21 = vld [vmem:[%s7085_s8 + $0x5a8] sm:$0xff] }
  0x9b   : > { %5463 = vmatpush1.bf16.msra.mxu1 %v5462_v40  ;;  %v259_v40 = vld [vmem:[%s7085_s8 + $0x198] sm:$0xff] }
  0x9c   : > { %5559 = vmatpush1.bf16.msra.mxu0 %v7173_v41  ;;  %5464 = vmatprep.subr.bf16.mxu1 %v6915_v0 }
  0x9d   : > { %5560 = vmatprep.subr.bf16.mxu0 %v6915_v0 }
  0x9e   : > { %1715 = vmatmul.mubr.f32.vlgmr.msra.gmra.mrb[0].mxu1 %v208_v47  ;;  %v1595_v47 = vld [vmem:[#allocation6 + $0x358] sm:$0xff] }
  0x9f   : > { %3125 = vmatmul.mubr.f32.vlgmr.msra.gmra.mrb[0].mxu0 %v212_v49  ;;  %5466 = vmatpush1.bf16.msra.mxu1 %v5465_v48  ;;  %v258_v48 = vld [vmem:[%s7085_s8 + $0x190] sm:$0xff] }
  0xa0   : > { %1719 = vmatprep.mubr.f32.mxu1 %v219_v51  ;;  %3129 = vmatprep.mubr.f32.mxu0 %v223_v52  ;;  %v262_v49 = vld [vmem:[%s7085_s8 + $0x1b0] sm:$0xff]  ;;  %v269_v51 = vld [vmem:[%s7085_s8 + $0x1e8] sm:$0xff] }
  0xa1   : > { %5562 = vmatpush1.bf16.msra.mxu0 %v5561_v53  ;;  %5467 = vmatprep.subr.bf16.mxu1 %v6915_v0  ;;  %v273_v52 = vld [vmem:[%s7085_s8 + $0x208] sm:$0xff]  ;;  %v5576_v53 = vpack.c.bf16 %v1595_v47, %v1594_v46 }
  0xa2   : > { %1720 = vmatmul.mubr.f32.gmra.mrb[2].mxu1 %v218_v59  ;;  %5563 = vmatprep.subr.bf16.mxu0 %v6915_v0  ;;  %v279_v59 = vld [vmem:[%s7085_s8 + $0x238] sm:$0xff]  ;;  %v329_v46 = vld [vmem:[%s7085_s8 + $0x3c8] sm:$0xff] }
  0xa3   : > { %3130 = vmatmul.mubr.f32.gmra.mrb[2].mxu0 %v222_v60  ;;  %1724 = vmatprep.mubr.f32.mxu1 %v229_v61  ;;  %v283_v60 = vld [vmem:[%s7085_s8 + $0x258] sm:$0xff]  ;;  %v5579_v61 = vpack.c.bf16 %v1597_v55, %v1596_v54  ;;  %v333_v47 = vld [vmem:[%s7085_s8 + $0x3e8] sm:$0xff]  ;;  %v342_v54 = vld [vmem:[%s7085_s8 + $0x430] sm:$0xff] }
  0xa4   : > { %3134 = vmatprep.mubr.f32.mxu0 %v233_v1  ;;  %5469 = vmatpush1.bf16.msra.mxu1 %v5468_v63  ;;  %v1598_v63 = vld [vmem:[#allocation6 + $0x370] sm:$0xff]  ;;  %v1599_v1 = vld [vmem:[#allocation6 + $0x378] sm:$0xff]  ;;  %v349_v55 = vld [vmem:[%s7085_s8 + $0x468] sm:$0xff] }
  0xa5   : > { %5565 = vmatpush1.bf16.msra.mxu0 %v5564_v2  ;;  %5470 = vmatprep.subr.bf16.mxu1 %v6915_v0  ;;  %v278_v2 = vld [vmem:[%s7085_s8 + $0x230] sm:$0xff]  ;;  %v5582_v7 = vpack.c.bf16 %v1599_v1, %v1598_v63  ;;  %v352_v63 = vld [vmem:[%s7085_s8 + $0x480] sm:$0xff]  ;;  %v359_v1 = vld [vmem:[%s7085_s8 + $0x4b8] sm:$0xff] }
  0xa6   : > { %1725 = vmatmul.mubr.f32.gmra.mrb[4].mxu1 %v228_v9  ;;  %5566 = vmatprep.subr.bf16.mxu0 %v6915_v0  ;;  %v1600_v9 = vld [vmem:[#allocation6 + $0x380] sm:$0xff] }
  0xa7   : > { %3135 = vmatmul.mubr.f32.gmra.mrb[4].mxu0 %v232_v10  ;;  %1729 = vmatprep.mubr.f32.mxu1 %v239_v11  ;;  %v1601_v10 = vld [vmem:[#allocation6 + $0x388] sm:$0xff]  ;;  %v288_v11 = vld [vmem:[%s7085_s8 + $0x280] sm:$0xff] }
  0xa8   : > { %3139 = vmatprep.mubr.f32.mxu0 %v243_v15  ;;  %5472 = vmatpush1.bf16.msra.mxu1 %v5471_v14  ;;  %v292_v14 = vld [vmem:[%s7085_s8 + $0x2a0] sm:$0xff]  ;;  %v299_v15 = vld [vmem:[%s7085_s8 + $0x2d8] sm:$0xff]  ;;  %v5585_v17 = vpack.c.bf16 %v1601_v10, %v1600_v9 }
  0xa9   : > { %5568 = vmatpush1.bf16.msra.mxu0 %v5567_v16  ;;  %5473 = vmatprep.subr.bf16.mxu1 %v6915_v0  ;;  %v303_v16 = vld [vmem:[%s7085_s8 + $0x2f8] sm:$0xff]  ;;  %v368_v9 = vld [vmem:[%s7085_s8 + $0x500] sm:$0xff] }
  0xaa   : > { %1730 = vmatmul.mubr.f32.gmra.mrb[6].mxu1 %v238_v23  ;;  %5569 = vmatprep.subr.bf16.mxu0 %v6915_v0  ;;  %v1530_v23 = vld [vmem:[#allocation6 + $0x150] sm:$0xff]  ;;  %v372_v10 = vld [vmem:[%s7085_s8 + $0x520] sm:$0xff] }
  0xab   : > { %3140 = vmatmul.mubr.f32.gmra.mrb[6].mxu0 %v242_v25  ;;  %1734 = vmatprep.mubr.f32.mxu1 %v249_v26  ;;  %v1531_v25 = vld [vmem:[#allocation6 + $0x158] sm:$0xff]  ;;  %v302_v26 = vld [vmem:[%s7085_s8 + $0x2f0] sm:$0xff] }
  0xac   : > { %3144 = vmatprep.mubr.f32.mxu0 %v253_v29  ;;  %5475 = vmatpush1.bf16.msra.mxu1 %v5474_v28  ;;  %v309_v28 = vld [vmem:[%s7085_s8 + $0x328] sm:$0xff]  ;;  %v5480_v29 = vpack.c.bf16 %v1531_v25, %v1530_v23  ;;  %v1608_v23 = vld [vmem:[#allocation6 + $0x3c0] sm:$0xff] }
  0xad   : > { %5571 = vmatpush1.bf16.msra.mxu0 %v5570_v31  ;;  %5476 = vmatprep.subr.bf16.mxu1 %v6915_v0  ;;  %v313_v31 = vld [vmem:[%s7085_s8 + $0x348] sm:$0xff] }
  0xae   : > { %1735 = vmatmul.mubr.f32.gmra.mrb[8].mxu1 %v248_v38  ;;  %5572 = vmatprep.subr.bf16.mxu0 %v6915_v0  ;;  %v312_v38 = vld [vmem:[%s7085_s8 + $0x340] sm:$0xff]  ;;  %v1609_v25 = vld [vmem:[#allocation6 + $0x3c8] sm:$0xff] }
  0xaf   : > { %3145 = vmatmul.mubr.f32.gmra.mrb[8].mxu0 %v252_v39  ;;  %1739 = vmatprep.mubr.f32.mxu1 %v259_v40  ;;  %v319_v39 = vld [vmem:[%s7085_s8 + $0x378] sm:$0xff] }
  0xb0   : > { %3149 = vmatprep.mubr.f32.mxu0 %v263_v43  ;;  %5478 = vmatpush1.bf16.msra.mxu1 %v5477_v42  ;;  %v323_v40 = vld [vmem:[%s7085_s8 + $0x398] sm:$0xff]  ;;  %v5591_v42 = vpack.c.bf16 %v1605_v35, %v1604_v33  ;;  %v318_v43 = vld [vmem:[%s7085_s8 + $0x370] sm:$0xff] }
  0xb1   : > { %5574 = vmatpush1.bf16.msra.mxu0 %v5573_v45  ;;  %5479 = vmatprep.subr.bf16.mxu1 %v6915_v0  ;;  %v322_v45 = vld [vmem:[%s7085_s8 + $0x390] sm:$0xff]  ;;  %v403_v33 = vld [vmem:[%s7085_s8 + $0x618] sm:$0xff] }
  0xb2   : > { %1740 = vmatmul.mubr.f32.gmra.mrb[10].mxu1 %v258_v48  ;;  %5575 = vmatprep.subr.bf16.mxu0 %v6915_v0  ;;  %v328_v48 = vld [vmem:[%s7085_s8 + $0x3c0] sm:$0xff]  ;;  %v398_v35 = vld [vmem:[%s7085_s8 + $0x5f0] sm:$0xff] }
  0xb3   : > { %3150 = vmatmul.mubr.f32.gmra.mrb[10].mxu0 %v262_v49  ;;  %1744 = vmatprep.mubr.f32.mxu1 %v269_v51  ;;  %v332_v49 = vld [vmem:[%s7085_s8 + $0x3e0] sm:$0xff]  ;;  %v339_v51 = vld [vmem:[%s7085_s8 + $0x418] sm:$0xff] }
  0xb4   : > { %3154 = vmatprep.mubr.f32.mxu0 %v273_v52  ;;  %5481 = vmatpush1.bf16.msra.mxu1 %v5480_v29  ;;  %v343_v52 = vld [vmem:[%s7085_s8 + $0x438] sm:$0xff]  ;;  %v388_v29 = vld [vmem:[%s7085_s8 + $0x5a0] sm:$0xff] }
  0xb5   : > { %5577 = vmatpush1.bf16.msra.mxu0 %v5576_v53  ;;  %5482 = vmatprep.subr.bf16.mxu1 %v6915_v0  ;;  %v338_v53 = vld [vmem:[%s7085_s8 + $0x410] sm:$0xff] }
  0xb6   : > { %1745 = vmatmul.mubr.f32.gmra.mrb[12].mxu1 %v268_v57  ;;  %5578 = vmatprep.subr.bf16.mxu0 %v6915_v0  ;;  %v1606_v57 = vld [vmem:[#allocation6 + $0x3b0] sm:$0xff] }
  0xb7   : > { %3155 = vmatmul.mubr.f32.gmra.mrb[12].mxu0 %v272_v58  ;;  %1749 = vmatprep.mubr.f32.mxu1 %v279_v59  ;;  %v1607_v58 = vld [vmem:[#allocation6 + $0x3b8] sm:$0xff]  ;;  %v353_v59 = vld [vmem:[%s7085_s8 + $0x488] sm:$0xff] }
  0xb8   : > { %3159 = vmatprep.mubr.f32.mxu0 %v283_v60  ;;  %v5594_v60 = vpack.c.bf16 %v1607_v58, %v1606_v57  ;;  %v439_v57 = vld [vmem:[%s7085_s8 + $0x738] sm:$0xff] }
  0xb9   : > { %5580 = vmatpush1.bf16.msra.mxu0 %v5579_v61  ;;  %v348_v61 = vld [vmem:[%s7085_s8 + $0x460] sm:$0xff]  ;;  %v443_v58 = vld [vmem:[%s7085_s8 + $0x758] sm:$0xff] }
  0xba   : > { %1750 = vmatmul.mubr.f32.gmra.mrb[14].mxu1 %v278_v2  ;;  %5581 = vmatprep.subr.bf16.mxu0 %v6915_v0  ;;  %v363_v2 = vld [vmem:[%s7085_s8 + $0x4d8] sm:$0xff] }
  0xbb   : > { %3160 = vmatmul.mubr.f32.gmra.mrb[14].mxu0 %v282_v3  ;;  %1754 = vmatprep.mubr.f32.mxu1 %v289_v4  ;;  %v358_v3 = vld [vmem:[%s7085_s8 + $0x4b0] sm:$0xff] }
  0xbc   : > { %3164 = vmatprep.mubr.f32.mxu0 %v293_v6  ;;  %v362_v4 = vld [vmem:[%s7085_s8 + $0x4d0] sm:$0xff]  ;;  %v369_v6 = vld [vmem:[%s7085_s8 + $0x508] sm:$0xff] }
  0xbd   : > { %5583 = vmatpush1.bf16.msra.mxu0 %v5582_v7  ;;  %v373_v7 = vld [vmem:[%s7085_s8 + $0x528] sm:$0xff] }
  0xbe   : > { %1755 = vmatmul.mubr.f32.gmra.mrb[16].mxu1 %v288_v11  ;;  %5584 = vmatprep.subr.bf16.mxu0 %v6915_v0  ;;  %v379_v11 = vld [vmem:[%s7085_s8 + $0x558] sm:$0xff] }
  0xbf   : > { %3165 = vmatmul.mubr.f32.gmra.mrb[16].mxu0 %v292_v14  ;;  %1759 = vmatprep.mubr.f32.mxu1 %v299_v15  ;;  %v383_v14 = vld [vmem:[%s7085_s8 + $0x578] sm:$0xff]  ;;  %v378_v15 = vld [vmem:[%s7085_s8 + $0x550] sm:$0xff] }
  0xc0   : > { %3169 = vmatprep.mubr.f32.mxu0 %v303_v16  ;;  %v382_v16 = vld [vmem:[%s7085_s8 + $0x570] sm:$0xff] }
  0xc1   : > { %5586 = vmatpush1.bf16.msra.mxu0 %v5585_v17  ;;  %v1532_v17 = vld [vmem:[#allocation6 + $0x160] sm:$0xff] }
  0xc2   : > { %1760 = vmatmul.mubr.f32.gmra.mrb[18].mxu1 %v298_v22  ;;  %5587 = vmatprep.subr.bf16.mxu0 %v6915_v0  ;;  %v5483_v22 = vpack.c.bf16 %v1533_v19, %v1532_v17  ;;  %v473_v17 = vld [vmem:[%s7085_s8 + $0x848] sm:$0xff] }
  0xc3   : > { %3170 = vmatmul.mubr.f32.gmra.mrb[18].mxu0 %v302_v26  ;;  %1764 = vmatprep.mubr.f32.mxu1 %v309_v28  ;;  %v393_v26 = vld [vmem:[%s7085_s8 + $0x5c8] sm:$0xff]  ;;  %v5597_v28 = vpack.c.bf16 %v1609_v25, %v1608_v23  ;;  %v479_v23 = vld [vmem:[%s7085_s8 + $0x878] sm:$0xff] }
  0xc4   : > { %3174 = vmatprep.mubr.f32.mxu0 %v313_v31  ;;  %v392_v31 = vld [vmem:[%s7085_s8 + $0x5c0] sm:$0xff]  ;;  %5484 = vmatpush1.bf16.msra.mxu1 %v5483_v22  ;;  %v483_v25 = vld [vmem:[%s7085_s8 + $0x898] sm:$0xff] }
  0xc5   : > { %5589 = vmatpush1.bf16.msra.mxu0 %v5588_v32  ;;  %v399_v32 = vld [vmem:[%s7085_s8 + $0x5f8] sm:$0xff]  ;;  %5485 = vmatprep.subr.bf16.mxu1 %v6915_v0  ;;  %v472_v22 = vld [vmem:[%s7085_s8 + $0x840] sm:$0xff] }
  0xc6   : > { %1765 = vmatmul.mubr.f32.gmra.mrb[20].mxu1 %v308_v37  ;;  %5590 = vmatprep.subr.bf16.mxu0 %v6915_v0  ;;  %v402_v37 = vld [vmem:[%s7085_s8 + $0x610] sm:$0xff] }
  0xc7   : > { %3175 = vmatmul.mubr.f32.gmra.mrb[20].mxu0 %v312_v38  ;;  %1769 = vmatprep.mubr.f32.mxu1 %v319_v39  ;;  %v409_v38 = vld [vmem:[%s7085_s8 + $0x648] sm:$0xff] }
  0xc8   : > { %3179 = vmatprep.mubr.f32.mxu0 %v323_v40  ;;  %v413_v39 = vld [vmem:[%s7085_s8 + $0x668] sm:$0xff]  ;;  %v408_v40 = vld [vmem:[%s7085_s8 + $0x640] sm:$0xff] }
  0xc9   : > { %5592 = vmatpush1.bf16.msra.mxu0 %v5591_v42  ;;  %v412_v42 = vld [vmem:[%s7085_s8 + $0x660] sm:$0xff] }
  0xca   : > { %1770 = vmatmul.mubr.f32.gmra.mrb[22].mxu1 %v318_v43  ;;  %5593 = vmatprep.subr.bf16.mxu0 %v6915_v0  ;;  %v419_v43 = vld [vmem:[%s7085_s8 + $0x698] sm:$0xff] }
  0xcb   : > { %3180 = vmatmul.mubr.f32.gmra.mrb[22].mxu0 %v322_v45  ;;  %1774 = vmatprep.mubr.f32.mxu1 %v329_v46  ;;  %v423_v45 = vld [vmem:[%s7085_s8 + $0x6b8] sm:$0xff]  ;;  %v418_v46 = vld [vmem:[%s7085_s8 + $0x690] sm:$0xff] }
  0xcc   : > { %3184 = vmatprep.mubr.f32.mxu0 %v333_v47  ;;  %v422_v47 = vld [vmem:[%s7085_s8 + $0x6b0] sm:$0xff] }
  0xcd   : > { %5595 = vmatpush1.bf16.msra.mxu0 %v5594_v60  ;;  %v442_v60 = vld [vmem:[%s7085_s8 + $0x750] sm:$0xff] }
  0xce   : > { %1775 = vmatmul.mubr.f32.gmra.mrb[24].mxu1 %v328_v48  ;;  %5596 = vmatprep.subr.bf16.mxu0 %v6915_v0  ;;  %v429_v48 = vld [vmem:[%s7085_s8 + $0x6e8] sm:$0xff] }
  0xcf   : > { %3185 = vmatmul.mubr.f32.gmra.mrb[24].mxu0 %v332_v49  ;;  %1779 = vmatprep.mubr.f32.mxu1 %v339_v51  ;;  %v1610_v49 = vld [vmem:[#allocation6 + $0x3d0] sm:$0xff]  ;;  %v1611_v51 = vld [vmem:[#allocation6 + $0x3d8] sm:$0xff] }
  0xd0   : > { %3189 = vmatprep.mubr.f32.mxu0 %v343_v52  ;;  %v433_v52 = vld [vmem:[%s7085_s8 + $0x708] sm:$0xff] }
  0xd1   : > { %5598 = vmatpush1.bf16.msra.mxu0 %v5597_v28  ;;  %v482_v28 = vld [vmem:[%s7085_s8 + $0x890] sm:$0xff] }
  0xd2   : > { %1780 = vmatmul.mubr.f32.gmra.mrb[26].mxu1 %v338_v53  ;;  %5599 = vmatprep.subr.bf16.mxu0 %v6915_v0  ;;  %v5600_v53 = vpack.c.bf16 %v1611_v51, %v1610_v49  ;;  %v519_v49 = vld [vmem:[%s7085_s8 + $0x9b8] sm:$0xff] }
  0xd3   : > { %3190 = vmatmul.mubr.f32.gmra.mrb[26].mxu0 %v342_v54  ;;  %1784 = vmatprep.mubr.f32.mxu1 %v349_v55  ;;  %v428_v54 = vld [vmem:[%s7085_s8 + $0x6e0] sm:$0xff]  ;;  %v523_v51 = vld [vmem:[%s7085_s8 + $0x9d8] sm:$0xff] }
  0xd4   : > { %3194 = vmatprep.mubr.f32.mxu0 %v353_v59  ;;  %v432_v55 = vld [vmem:[%s7085_s8 + $0x700] sm:$0xff]  ;;  %v438_v59 = vld [vmem:[%s7085_s8 + $0x730] sm:$0xff] }
  0xd5   : > { %5601 = vmatpush1.bf16.msra.mxu0 %v5600_v53  ;;  %v522_v53 = vld [vmem:[%s7085_s8 + $0x9d0] sm:$0xff] }
  0xd6   : > { %1785 = vmatmul.mubr.f32.gmra.mrb[28].mxu1 %v348_v61  ;;  %5602 = vmatprep.subr.bf16.mxu0 %v6915_v0  ;;  %v449_v61 = vld [vmem:[%s7085_s8 + $0x788] sm:$0xff] }
  0xd7   : > { %3195 = vmatmul.mubr.f32.gmra.mrb[28].mxu0 %v352_v63  ;;  %1789 = vmatprep.mubr.f32.mxu1 %v359_v1  ;;  %v453_v63 = vld [vmem:[%s7085_s8 + $0x7a8] sm:$0xff]  ;;  %v448_v1 = vld [vmem:[%s7085_s8 + $0x780] sm:$0xff] }
  0xd8   : > { %3199 = vmatprep.mubr.f32.mxu0 %v363_v2  ;;  %v452_v2 = vld [vmem:[%s7085_s8 + $0x7a0] sm:$0xff] }
  0xda   : > { %1790 = vmatmul.mubr.f32.gmra.mrb[30].mxu1 %v358_v3  ;;  %v459_v3 = vld [vmem:[%s7085_s8 + $0x7d8] sm:$0xff] }
  0xdb   : > { %3200 = vmatmul.mubr.f32.gmra.mrb[30].mxu0 %v362_v4  ;;  %1794 = vmatprep.mubr.f32.mxu1 %v369_v6  ;;  %v463_v4 = vld [vmem:[%s7085_s8 + $0x7f8] sm:$0xff]  ;;  %v458_v6 = vld [vmem:[%s7085_s8 + $0x7d0] sm:$0xff] }
  0xdc   : > { %3204 = vmatprep.mubr.f32.mxu0 %v373_v7  ;;  %v462_v7 = vld [vmem:[%s7085_s8 + $0x7f0] sm:$0xff] }
  0xde   : > { %1795 = vmatmul.mubr.f32.gmra.mrb[32].mxu1 %v368_v9  ;;  %v1534_v9 = vld [vmem:[#allocation6 + $0x170] sm:$0xff] }
  0xdf   : > { %3205 = vmatmul.mubr.f32.gmra.mrb[32].mxu0 %v372_v10  ;;  %1799 = vmatprep.mubr.f32.mxu1 %v379_v11  ;;  %v1535_v10 = vld [vmem:[#allocation6 + $0x178] sm:$0xff]  ;;  %v469_v11 = vld [vmem:[%s7085_s8 + $0x828] sm:$0xff] }
  0xe0   : > { %3209 = vmatprep.mubr.f32.mxu0 %v383_v14  ;;  %v5486_v14 = vpack.c.bf16 %v1535_v10, %v1534_v9  ;;  %v552_v9 = vld [vmem:[%s7085_s8 + $0xac0] sm:$0xff]  ;;  %v559_v10 = vld [vmem:[%s7085_s8 + $0xaf8] sm:$0xff] }
  0xe2   : > { %1800 = vmatmul.mubr.f32.gmra.mrb[34].mxu1 %v378_v15  ;;  %v1612_v15 = vld [vmem:[#allocation6 + $0x3e0] sm:$0xff] }
  0xe3   : > { %3210 = vmatmul.mubr.f32.gmra.mrb[34].mxu0 %v382_v16  ;;  %1804 = vmatprep.mubr.f32.mxu1 %v389_v21  ;;  %v1613_v16 = vld [vmem:[#allocation6 + $0x3e8] sm:$0xff]  ;;  %v468_v21 = vld [vmem:[%s7085_s8 + $0x820] sm:$0xff] }
  0xe4   : > { %3214 = vmatprep.mubr.f32.mxu0 %v393_v26  ;;  %v5603_v19 = vpack.c.bf16 %v1613_v16, %v1612_v15  ;;  %5487 = vmatpush1.bf16.msra.mxu1 %v5486_v14  ;;  %v478_v26 = vld [vmem:[%s7085_s8 + $0x870] sm:$0xff]  ;;  %v569_v16 = vld [vmem:[%s7085_s8 + $0xb48] sm:$0xff] }
  0xe5   : > { %5488 = vmatprep.subr.bf16.mxu1 %v6915_v0  ;;  %v558_v14 = vld [vmem:[%s7085_s8 + $0xaf0] sm:$0xff] }
  0xe6   : > { %1805 = vmatmul.mubr.f32.gmra.mrb[36].mxu1 %v388_v29  ;;  %5604 = vmatpush1.bf16.msra.mxu0 %v5603_v19  ;;  %v489_v29 = vld [vmem:[%s7085_s8 + $0x8c8] sm:$0xff]  ;;  %v562_v15 = vld [vmem:[%s7085_s8 + $0xb10] sm:$0xff]  ;;  %v568_v19 = vld [vmem:[%s7085_s8 + $0xb40] sm:$0xff] }
  0xe7   : > { %3215 = vmatmul.mubr.f32.gmra.mrb[36].mxu0 %v392_v31  ;;  %1809 = vmatprep.mubr.f32.mxu1 %v399_v32  ;;  %v493_v31 = vld [vmem:[%s7085_s8 + $0x8e8] sm:$0xff]  ;;  %v488_v32 = vld [vmem:[%s7085_s8 + $0x8c0] sm:$0xff] }
  0xe8   : > { %3219 = vmatprep.mubr.f32.mxu0 %v403_v33  ;;  %5605 = vmatprep.subr.bf16.mxu0 %v6915_v0  ;;  %v492_v33 = vld [vmem:[%s7085_s8 + $0x8e0] sm:$0xff] }
  0xea   : > { %1810 = vmatmul.mubr.f32.gmra.mrb[38].mxu1 %v398_v35  ;;  %v499_v35 = vld [vmem:[%s7085_s8 + $0x918] sm:$0xff] }
  0xeb   : > { %3220 = vmatmul.mubr.f32.gmra.mrb[38].mxu0 %v402_v37  ;;  %1814 = vmatprep.mubr.f32.mxu1 %v409_v38  ;;  %v503_v37 = vld [vmem:[%s7085_s8 + $0x938] sm:$0xff]  ;;  %v498_v38 = vld [vmem:[%s7085_s8 + $0x910] sm:$0xff] }
  0xec   : > { %3224 = vmatprep.mubr.f32.mxu0 %v413_v39  ;;  %v502_v39 = vld [vmem:[%s7085_s8 + $0x930] sm:$0xff] }
  0xee   : > { %1815 = vmatmul.mubr.f32.gmra.mrb[40].mxu1 %v408_v40  ;;  %v509_v40 = vld [vmem:[%s7085_s8 + $0x968] sm:$0xff] }
  0xef   : > { %3225 = vmatmul.mubr.f32.gmra.mrb[40].mxu0 %v412_v42  ;;  %1819 = vmatprep.mubr.f32.mxu1 %v419_v43  ;;  %v1614_v42 = vld [vmem:[#allocation6 + $0x3f0] sm:$0xff]  ;;  %v1615_v43 = vld [vmem:[#allocation6 + $0x3f8] sm:$0xff] }
  0xf0   : > { %3229 = vmatprep.mubr.f32.mxu0 %v423_v45  ;;  %v513_v45 = vld [vmem:[%s7085_s8 + $0x988] sm:$0xff] }
  0xf2   : > { %1820 = vmatmul.mubr.f32.gmra.mrb[42].mxu1 %v418_v46  ;;  %v5606_v46 = vpack.c.bf16 %v1615_v43, %v1614_v42  ;;  %v608_v42 = vld [vmem:[%s7085_s8 + $0xc80] sm:$0xff] }
  0xf3   : > { %3230 = vmatmul.mubr.f32.gmra.mrb[42].mxu0 %v422_v47  ;;  %1824 = vmatprep.mubr.f32.mxu1 %v429_v48  ;;  %v508_v47 = vld [vmem:[%s7085_s8 + $0x960] sm:$0xff] }
  0xf4   : > { %3234 = vmatprep.mubr.f32.mxu0 %v433_v52  ;;  %v512_v48 = vld [vmem:[%s7085_s8 + $0x980] sm:$0xff]  ;;  %5607 = vmatpush1.bf16.msra.mxu0 %v5606_v46  ;;  %v518_v52 = vld [vmem:[%s7085_s8 + $0x9b0] sm:$0xff]  ;;  %v623_v46 = vld [vmem:[%s7085_s8 + $0xcf8] sm:$0xff] }
  0xf5   : > { %5608 = vmatprep.subr.bf16.mxu0 %v6915_v0  ;;  %v612_v43 = vld [vmem:[%s7085_s8 + $0xca0] sm:$0xff] }
  0xf6   : > { %1825 = vmatmul.mubr.f32.gmra.mrb[44].mxu1 %v428_v54  ;;  %v529_v54 = vld [vmem:[%s7085_s8 + $0xa08] sm:$0xff] }
  0xf7   : > { %3235 = vmatmul.mubr.f32.gmra.mrb[44].mxu0 %v432_v55  ;;  %1829 = vmatprep.mubr.f32.mxu1 %v439_v57  ;;  %v533_v55 = vld [vmem:[%s7085_s8 + $0xa28] sm:$0xff]  ;;  %v528_v57 = vld [vmem:[%s7085_s8 + $0xa00] sm:$0xff] }
  0xf8   : > { %3239 = vmatprep.mubr.f32.mxu0 %v443_v58  ;;  %v532_v58 = vld [vmem:[%s7085_s8 + $0xa20] sm:$0xff] }
  0xfa   : > { %1830 = vmatmul.mubr.f32.gmra.mrb[46].mxu1 %v438_v59  ;;  %v539_v59 = vld [vmem:[%s7085_s8 + $0xa58] sm:$0xff] }
  0xfb   : > { %3240 = vmatmul.mubr.f32.gmra.mrb[46].mxu0 %v442_v60  ;;  %1834 = vmatprep.mubr.f32.mxu1 %v449_v61  ;;  %v543_v60 = vld [vmem:[%s7085_s8 + $0xa78] sm:$0xff]  ;;  %v538_v61 = vld [vmem:[%s7085_s8 + $0xa50] sm:$0xff] }
  0xfc   : > { %3244 = vmatprep.mubr.f32.mxu0 %v453_v63  ;;  %v1536_v63 = vld [vmem:[#allocation6 + $0x180] sm:$0xff] }
  0xfe   : > { %1835 = vmatmul.mubr.f32.gmra.mrb[48].mxu1 %v448_v1  ;;  %v1537_v1 = vld [vmem:[#allocation6 + $0x188] sm:$0xff] }
  0xff   : > { %3245 = vmatmul.mubr.f32.gmra.mrb[48].mxu0 %v452_v2  ;;  %1839 = vmatprep.mubr.f32.mxu1 %v459_v3  ;;  %v542_v2 = vld [vmem:[%s7085_s8 + $0xa70] sm:$0xff]  ;;  %v549_v3 = vld [vmem:[%s7085_s8 + $0xaa8] sm:$0xff] }
 0x100   : > { %3249 = vmatprep.mubr.f32.mxu0 %v463_v4  ;;  %v5489_v4 = vpack.c.bf16 %v1537_v1, %v1536_v63  ;;  %v649_v63 = vld [vmem:[%s7085_s8 + $0xdc8] sm:$0xff] }
 0x101   : > { %v653_v1 = vld [vmem:[%s7085_s8 + $0xde8] sm:$0xff] }
 0x102   : > { %1840 = vmatmul.mubr.f32.gmra.mrb[50].mxu1 %v458_v6  ;;  %v553_v6 = vld [vmem:[%s7085_s8 + $0xac8] sm:$0xff] }
 0x103   : > { %3250 = vmatmul.mubr.f32.gmra.mrb[50].mxu0 %v462_v7  ;;  %1844 = vmatprep.mubr.f32.mxu1 %v469_v11  ;;  %v548_v7 = vld [vmem:[%s7085_s8 + $0xaa0] sm:$0xff]  ;;  %v563_v11 = vld [vmem:[%s7085_s8 + $0xb18] sm:$0xff] }
 0x104   : > { %3254 = vmatprep.mubr.f32.mxu0 %v473_v17  ;;  %5490 = vmatpush1.bf16.msra.mxu1 %v5489_v4  ;;  %v573_v17 = vld [vmem:[%s7085_s8 + $0xb68] sm:$0xff]  ;;  %v659_v4 = vld [vmem:[%s7085_s8 + $0xe18] sm:$0xff] }
 0x105   : > { %5491 = vmatprep.subr.bf16.mxu1 %v6915_v0 }
 0x106   : > { %1845 = vmatmul.mubr.f32.gmra.mrb[52].mxu1 %v468_v21  ;;  %v572_v21 = vld [vmem:[%s7085_s8 + $0xb60] sm:$0xff] }
 0x107   : > { %3255 = vmatmul.mubr.f32.gmra.mrb[52].mxu0 %v472_v22  ;;  %1849 = vmatprep.mubr.f32.mxu1 %v479_v23  ;;  %v579_v22 = vld [vmem:[%s7085_s8 + $0xb98] sm:$0xff] }
 0x108   : > { %3259 = vmatprep.mubr.f32.mxu0 %v483_v25  ;;  %v583_v23 = vld [vmem:[%s7085_s8 + $0xbb8] sm:$0xff]  ;;  %v578_v25 = vld [vmem:[%s7085_s8 + $0xb90] sm:$0xff] }
 0x10a   : > { %1850 = vmatmul.mubr.f32.gmra.mrb[54].mxu1 %v478_v26  ;;  %v582_v26 = vld [vmem:[%s7085_s8 + $0xbb0] sm:$0xff] }
 0x10b   : > { %3260 = vmatmul.mubr.f32.gmra.mrb[54].mxu0 %v482_v28  ;;  %1854 = vmatprep.mubr.f32.mxu1 %v489_v29  ;;  %v589_v28 = vld [vmem:[%s7085_s8 + $0xbe8] sm:$0xff] }
 0x10c   : > { %3264 = vmatprep.mubr.f32.mxu0 %v493_v31  ;;  %v593_v29 = vld [vmem:[%s7085_s8 + $0xc08] sm:$0xff]  ;;  %v588_v31 = vld [vmem:[%s7085_s8 + $0xbe0] sm:$0xff] }
 0x10e   : > { %1855 = vmatmul.mubr.f32.gmra.mrb[56].mxu1 %v488_v32  ;;  %v592_v32 = vld [vmem:[%s7085_s8 + $0xc00] sm:$0xff] }
 0x10f   : > { %3265 = vmatmul.mubr.f32.gmra.mrb[56].mxu0 %v492_v33  ;;  %1859 = vmatprep.mubr.f32.mxu1 %v499_v35  ;;  %v599_v33 = vld [vmem:[%s7085_s8 + $0xc38] sm:$0xff] }
 0x110   : > { %3269 = vmatprep.mubr.f32.mxu0 %v503_v37  ;;  %v603_v35 = vld [vmem:[%s7085_s8 + $0xc58] sm:$0xff]  ;;  %v598_v37 = vld [vmem:[%s7085_s8 + $0xc30] sm:$0xff] }
 0x112   : > { %1860 = vmatmul.mubr.f32.gmra.mrb[58].mxu1 %v498_v38  ;;  %v602_v38 = vld [vmem:[%s7085_s8 + $0xc50] sm:$0xff] }
 0x113   : > { %3270 = vmatmul.mubr.f32.gmra.mrb[58].mxu0 %v502_v39  ;;  %1864 = vmatprep.mubr.f32.mxu1 %v509_v40  ;;  %v609_v39 = vld [vmem:[%s7085_s8 + $0xc88] sm:$0xff] }
 0x114   : > { %3274 = vmatprep.mubr.f32.mxu0 %v513_v45  ;;  %v613_v40 = vld [vmem:[%s7085_s8 + $0xca8] sm:$0xff]  ;;  %v619_v45 = vld [vmem:[%s7085_s8 + $0xcd8] sm:$0xff] }
 0x116   : > { %1865 = vmatmul.mubr.f32.gmra.mrb[60].mxu1 %v508_v47  ;;  %v618_v47 = vld [vmem:[%s7085_s8 + $0xcd0] sm:$0xff] }
 0x117   : > { %3275 = vmatmul.mubr.f32.gmra.mrb[60].mxu0 %v512_v48  ;;  %1869 = vmatprep.mubr.f32.mxu1 %v519_v49  ;;  %v1538_v48 = vld [vmem:[#allocation6 + $0x190] sm:$0xff]  ;;  %v1539_v49 = vld [vmem:[#allocation6 + $0x198] sm:$0xff] }
 0x118   : > { %3279 = vmatprep.mubr.f32.mxu0 %v523_v51  ;;  %v622_v51 = vld [vmem:[%s7085_s8 + $0xcf0] sm:$0xff] }
 0x11a   : > { %1870 = vmatmul.mubr.f32.gmra.mrb[62].mxu1 %v518_v52  ;;  %v629_v52 = vld [vmem:[%s7085_s8 + $0xd28] sm:$0xff] }
 0x11b   : > { %3280 = vmatmul.mubr.f32.gmra.mrb[62].mxu0 %v522_v53  ;;  %1874 = vmatprep.mubr.f32.mxu1 %v529_v54  ;;  %v5492_v53 = vpack.c.bf16 %v1539_v49, %v1538_v48  ;;  %v633_v54 = vld [vmem:[%s7085_s8 + $0xd48] sm:$0xff] }
 0x11c   : > { %3284 = vmatprep.mubr.f32.mxu0 %v533_v55  ;;  %v628_v55 = vld [vmem:[%s7085_s8 + $0xd20] sm:$0xff]  ;;  %v729_v48 = vld [vmem:[%s7085_s8 + $0x1048] sm:$0xff] }
 0x11d   : > { %5493 = vmatpush1.bf16.msra.mxu1 %v5492_v53  ;;  %v733_v49 = vld [vmem:[%s7085_s8 + $0x1068] sm:$0xff]  ;;  %v739_v53 = vld [vmem:[%s7085_s8 + $0x1098] sm:$0xff] }
 0x11e   : > { %1875 = vmatmul.mubr.f32.gmra.mrb[64].mxu1 %v528_v57  ;;  %v632_v57 = vld [vmem:[%s7085_s8 + $0xd40] sm:$0xff]  ;;  %5494 = vmatprep.subr.bf16.mxu1 %v6915_v0 }
 0x11f   : > { %3285 = vmatmul.mubr.f32.gmra.mrb[64].mxu0 %v532_v58  ;;  %1879 = vmatprep.mubr.f32.mxu1 %v539_v59  ;;  %v639_v58 = vld [vmem:[%s7085_s8 + $0xd78] sm:$0xff] }
 0x120   : > { %3289 = vmatprep.mubr.f32.mxu0 %v543_v60  ;;  %v643_v59 = vld [vmem:[%s7085_s8 + $0xd98] sm:$0xff]  ;;  %v638_v60 = vld [vmem:[%s7085_s8 + $0xd70] sm:$0xff] }
 0x122   : > { %1880 = vmatmul.mubr.f32.gmra.mrb[66].mxu1 %v538_v61  ;;  %v642_v61 = vld [vmem:[%s7085_s8 + $0xd90] sm:$0xff] }
 0x123   : > { %3290 = vmatmul.mubr.f32.gmra.mrb[66].mxu0 %v542_v2  ;;  %1884 = vmatprep.mubr.f32.mxu1 %v549_v3  ;;  %v648_v2 = vld [vmem:[%s7085_s8 + $0xdc0] sm:$0xff] }
 0x124   : > { %3294 = vmatprep.mubr.f32.mxu0 %v553_v6  ;;  %v652_v3 = vld [vmem:[%s7085_s8 + $0xde0] sm:$0xff]  ;;  %v663_v6 = vld [vmem:[%s7085_s8 + $0xe38] sm:$0xff] }
 0x126   : > { %1885 = vmatmul.mubr.f32.gmra.mrb[68].mxu1 %v548_v7  ;;  %v658_v7 = vld [vmem:[%s7085_s8 + $0xe10] sm:$0xff] }
 0x127   : > { %3295 = vmatmul.mubr.f32.gmra.mrb[68].mxu0 %v552_v9  ;;  %1889 = vmatprep.mubr.f32.mxu1 %v559_v10  ;;  %v662_v9 = vld [vmem:[%s7085_s8 + $0xe30] sm:$0xff]  ;;  %v669_v10 = vld [vmem:[%s7085_s8 + $0xe68] sm:$0xff] }
 0x128   : > { %3299 = vmatprep.mubr.f32.mxu0 %v563_v11  ;;  %v673_v11 = vld [vmem:[%s7085_s8 + $0xe88] sm:$0xff] }
 0x12a   : > { %1890 = vmatmul.mubr.f32.gmra.mrb[70].mxu1 %v558_v14  ;;  %v668_v14 = vld [vmem:[%s7085_s8 + $0xe60] sm:$0xff] }
 0x12b   : > { %3300 = vmatmul.mubr.f32.gmra.mrb[70].mxu0 %v562_v15  ;;  %1894 = vmatprep.mubr.f32.mxu1 %v569_v16  ;;  %v672_v15 = vld [vmem:[%s7085_s8 + $0xe80] sm:$0xff]  ;;  %v679_v16 = vld [vmem:[%s7085_s8 + $0xeb8] sm:$0xff] }
 0x12c   : > { %3304 = vmatprep.mubr.f32.mxu0 %v573_v17  ;;  %v683_v17 = vld [vmem:[%s7085_s8 + $0xed8] sm:$0xff] }
 0x12e   : > { %1895 = vmatmul.mubr.f32.gmra.mrb[72].mxu1 %v568_v19  ;;  %v678_v19 = vld [vmem:[%s7085_s8 + $0xeb0] sm:$0xff] }
 0x12f   : > { %3305 = vmatmul.mubr.f32.gmra.mrb[72].mxu0 %v572_v21  ;;  %1899 = vmatprep.mubr.f32.mxu1 %v579_v22  ;;  %v682_v21 = vld [vmem:[%s7085_s8 + $0xed0] sm:$0xff]  ;;  %v689_v22 = vld [vmem:[%s7085_s8 + $0xf08] sm:$0xff] }
 0x130   : > { %3309 = vmatprep.mubr.f32.mxu0 %v583_v23  ;;  %v693_v23 = vld [vmem:[%s7085_s8 + $0xf28] sm:$0xff] }
 0x132   : > { %1900 = vmatmul.mubr.f32.gmra.mrb[74].mxu1 %v578_v25  ;;  %v688_v25 = vld [vmem:[%s7085_s8 + $0xf00] sm:$0xff] }
 0x133   : > { %3310 = vmatmul.mubr.f32.gmra.mrb[74].mxu0 %v582_v26  ;;  %1904 = vmatprep.mubr.f32.mxu1 %v589_v28  ;;  %v692_v26 = vld [vmem:[%s7085_s8 + $0xf20] sm:$0xff]  ;;  %v699_v28 = vld [vmem:[%s7085_s8 + $0xf58] sm:$0xff] }
 0x134   : > { %3314 = vmatprep.mubr.f32.mxu0 %v593_v29  ;;  %v703_v29 = vld [vmem:[%s7085_s8 + $0xf78] sm:$0xff] }
 0x136   : > { %1905 = vmatmul.mubr.f32.gmra.mrb[76].mxu1 %v588_v31  ;;  %v698_v31 = vld [vmem:[%s7085_s8 + $0xf50] sm:$0xff] }
 0x137   : > { %3315 = vmatmul.mubr.f32.gmra.mrb[76].mxu0 %v592_v32  ;;  %1909 = vmatprep.mubr.f32.mxu1 %v599_v33  ;;  %v1540_v32 = vld [vmem:[#allocation6 + $0x1a0] sm:$0xff]  ;;  %v1541_v33 = vld [vmem:[#allocation6 + $0x1a8] sm:$0xff] }
 0x138   : > { %3319 = vmatprep.mubr.f32.mxu0 %v603_v35  ;;  %v702_v35 = vld [vmem:[%s7085_s8 + $0xf70] sm:$0xff] }
 0x13a   : > { %1910 = vmatmul.mubr.f32.gmra.mrb[78].mxu1 %v598_v37  ;;  %v709_v37 = vld [vmem:[%s7085_s8 + $0xfa8] sm:$0xff] }
 0x13b   : > { %3320 = vmatmul.mubr.f32.gmra.mrb[78].mxu0 %v602_v38  ;;  %1914 = vmatprep.mubr.f32.mxu1 %v609_v39  ;;  %v5495_v38 = vpack.c.bf16 %v1541_v33, %v1540_v32  ;;  %v713_v39 = vld [vmem:[%s7085_s8 + $0xfc8] sm:$0xff] }
 0x13c   : > { %3324 = vmatprep.mubr.f32.mxu0 %v613_v40  ;;  %v708_v40 = vld [vmem:[%s7085_s8 + $0xfa0] sm:$0xff]  ;;  %v809_v32 = vld [vmem:[%s7085_s8 + $0x12c8] sm:$0xff] }
 0x13d   : > { %5496 = vmatpush1.bf16.msra.mxu1 %v5495_v38  ;;  %v813_v33 = vld [vmem:[%s7085_s8 + $0x12e8] sm:$0xff]  ;;  %v819_v38 = vld [vmem:[%s7085_s8 + $0x1318] sm:$0xff] }
 0x13e   : > { %1915 = vmatmul.mubr.f32.gmra.mrb[80].mxu1 %v608_v42  ;;  %v712_v42 = vld [vmem:[%s7085_s8 + $0xfc0] sm:$0xff]  ;;  %5497 = vmatprep.subr.bf16.mxu1 %v6915_v0 }
 0x13f   : > { %3325 = vmatmul.mubr.f32.gmra.mrb[80].mxu0 %v612_v43  ;;  %1919 = vmatprep.mubr.f32.mxu1 %v619_v45  ;;  %v719_v43 = vld [vmem:[%s7085_s8 + $0xff8] sm:$0xff] }
 0x140   : > { %3329 = vmatprep.mubr.f32.mxu0 %v623_v46  ;;  %v723_v45 = vld [vmem:[%s7085_s8 + $0x1018] sm:$0xff]  ;;  %v718_v46 = vld [vmem:[%s7085_s8 + $0xff0] sm:$0xff] }
 0x142   : > { %1920 = vmatmul.mubr.f32.gmra.mrb[82].mxu1 %v618_v47  ;;  %v722_v47 = vld [vmem:[%s7085_s8 + $0x1010] sm:$0xff] }
 0x143   : > { %3330 = vmatmul.mubr.f32.gmra.mrb[82].mxu0 %v622_v51  ;;  %1924 = vmatprep.mubr.f32.mxu1 %v629_v52  ;;  %v728_v51 = vld [vmem:[%s7085_s8 + $0x1040] sm:$0xff] }
 0x144   : > { %3334 = vmatprep.mubr.f32.mxu0 %v633_v54  ;;  %v732_v52 = vld [vmem:[%s7085_s8 + $0x1060] sm:$0xff]  ;;  %v743_v54 = vld [vmem:[%s7085_s8 + $0x10b8] sm:$0xff] }
 0x146   : > { %1925 = vmatmul.mubr.f32.gmra.mrb[84].mxu1 %v628_v55  ;;  %v738_v55 = vld [vmem:[%s7085_s8 + $0x1090] sm:$0xff] }
 0x147   : > { %3335 = vmatmul.mubr.f32.gmra.mrb[84].mxu0 %v632_v57  ;;  %1929 = vmatprep.mubr.f32.mxu1 %v639_v58  ;;  %v742_v57 = vld [vmem:[%s7085_s8 + $0x10b0] sm:$0xff]  ;;  %v749_v58 = vld [vmem:[%s7085_s8 + $0x10e8] sm:$0xff] }
 0x148   : > { %3339 = vmatprep.mubr.f32.mxu0 %v643_v59  ;;  %v753_v59 = vld [vmem:[%s7085_s8 + $0x1108] sm:$0xff] }
 0x14a   : > { %1930 = vmatmul.mubr.f32.gmra.mrb[86].mxu1 %v638_v60  ;;  %v748_v60 = vld [vmem:[%s7085_s8 + $0x10e0] sm:$0xff] }
 0x14b   : > { %3340 = vmatmul.mubr.f32.gmra.mrb[86].mxu0 %v642_v61  ;;  %1934 = vmatprep.mubr.f32.mxu1 %v649_v63  ;;  %v752_v61 = vld [vmem:[%s7085_s8 + $0x1100] sm:$0xff]  ;;  %v759_v63 = vld [vmem:[%s7085_s8 + $0x1138] sm:$0xff] }
 0x14c   : > { %3344 = vmatprep.mubr.f32.mxu0 %v653_v1  ;;  %v763_v1 = vld [vmem:[%s7085_s8 + $0x1158] sm:$0xff] }
 0x14e   : > { %1935 = vmatmul.mubr.f32.gmra.mrb[88].mxu1 %v648_v2  ;;  %v758_v2 = vld [vmem:[%s7085_s8 + $0x1130] sm:$0xff] }
 0x14f   : > { %3345 = vmatmul.mubr.f32.gmra.mrb[88].mxu0 %v652_v3  ;;  %1939 = vmatprep.mubr.f32.mxu1 %v659_v4  ;;  %v762_v3 = vld [vmem:[%s7085_s8 + $0x1150] sm:$0xff]  ;;  %v769_v4 = vld [vmem:[%s7085_s8 + $0x1188] sm:$0xff] }
 0x150   : > { %3349 = vmatprep.mubr.f32.mxu0 %v663_v6  ;;  %v773_v6 = vld [vmem:[%s7085_s8 + $0x11a8] sm:$0xff] }
 0x152   : > { %1940 = vmatmul.mubr.f32.gmra.mrb[90].mxu1 %v658_v7  ;;  %v768_v7 = vld [vmem:[%s7085_s8 + $0x1180] sm:$0xff] }
 0x153   : > { %3350 = vmatmul.mubr.f32.gmra.mrb[90].mxu0 %v662_v9  ;;  %1944 = vmatprep.mubr.f32.mxu1 %v669_v10  ;;  %v772_v9 = vld [vmem:[%s7085_s8 + $0x11a0] sm:$0xff]  ;;  %v779_v10 = vld [vmem:[%s7085_s8 + $0x11d8] sm:$0xff] }
 0x154   : > { %3354 = vmatprep.mubr.f32.mxu0 %v673_v11  ;;  %v783_v11 = vld [vmem:[%s7085_s8 + $0x11f8] sm:$0xff] }
 0x156   : > { %1945 = vmatmul.mubr.f32.gmra.mrb[92].mxu1 %v668_v14  ;;  %v778_v14 = vld [vmem:[%s7085_s8 + $0x11d0] sm:$0xff] }
 0x157   : > { %3355 = vmatmul.mubr.f32.gmra.mrb[92].mxu0 %v672_v15  ;;  %1949 = vmatprep.mubr.f32.mxu1 %v679_v16  ;;  %v1542_v15 = vld [vmem:[#allocation6 + $0x1b0] sm:$0xff]  ;;  %v1543_v16 = vld [vmem:[#allocation6 + $0x1b8] sm:$0xff] }
 0x158   : > { %3359 = vmatprep.mubr.f32.mxu0 %v683_v17  ;;  %v782_v17 = vld [vmem:[%s7085_s8 + $0x11f0] sm:$0xff] }
 0x15a   : > { %1950 = vmatmul.mubr.f32.gmra.mrb[94].mxu1 %v678_v19  ;;  %v789_v19 = vld [vmem:[%s7085_s8 + $0x1228] sm:$0xff] }
 0x15b   : > { %3360 = vmatmul.mubr.f32.gmra.mrb[94].mxu0 %v682_v21  ;;  %1954 = vmatprep.mubr.f32.mxu1 %v689_v22  ;;  %v5498_v21 = vpack.c.bf16 %v1543_v16, %v1542_v15  ;;  %v793_v22 = vld [vmem:[%s7085_s8 + $0x1248] sm:$0xff] }
 0x15c   : > { %3364 = vmatprep.mubr.f32.mxu0 %v693_v23  ;;  %v788_v23 = vld [vmem:[%s7085_s8 + $0x1220] sm:$0xff]  ;;  %v1621_v15 = vld [vmem:[#allocation6 + $0x428] sm:$0xff] }
 0x15d   : > { %5499 = vmatpush1.bf16.msra.mxu1 %v5498_v21  ;;  %v879_v21 = vld [vmem:[%s7085_s8 + $0x14f8] sm:$0xff] }
 0x15e   : > { %1955 = vmatmul.mubr.f32.gmra.mrb[96].mxu1 %v688_v25  ;;  %v792_v25 = vld [vmem:[%s7085_s8 + $0x1240] sm:$0xff]  ;;  %5500 = vmatprep.subr.bf16.mxu1 %v6915_v0 }
 0x15f   : > { %3365 = vmatmul.mubr.f32.gmra.mrb[96].mxu0 %v692_v26  ;;  %1959 = vmatprep.mubr.f32.mxu1 %v699_v28  ;;  %v799_v26 = vld [vmem:[%s7085_s8 + $0x1278] sm:$0xff] }
 0x160   : > { %3369 = vmatprep.mubr.f32.mxu0 %v703_v29  ;;  %v803_v28 = vld [vmem:[%s7085_s8 + $0x1298] sm:$0xff]  ;;  %v798_v29 = vld [vmem:[%s7085_s8 + $0x1270] sm:$0xff] }
 0x162   : > { %1960 = vmatmul.mubr.f32.gmra.mrb[98].mxu1 %v698_v31  ;;  %v802_v31 = vld [vmem:[%s7085_s8 + $0x1290] sm:$0xff] }
 0x163   : > { %3370 = vmatmul.mubr.f32.gmra.mrb[98].mxu0 %v702_v35  ;;  %1964 = vmatprep.mubr.f32.mxu1 %v709_v37  ;;  %v808_v35 = vld [vmem:[%s7085_s8 + $0x12c0] sm:$0xff] }
 0x164   : > { %3374 = vmatprep.mubr.f32.mxu0 %v713_v39  ;;  %v812_v37 = vld [vmem:[%s7085_s8 + $0x12e0] sm:$0xff]  ;;  %v823_v39 = vld [vmem:[%s7085_s8 + $0x1338] sm:$0xff] }
 0x166   : > { %1965 = vmatmul.mubr.f32.gmra.mrb[100].mxu1 %v708_v40  ;;  %v818_v40 = vld [vmem:[%s7085_s8 + $0x1310] sm:$0xff] }
 0x167   : > { %3375 = vmatmul.mubr.f32.gmra.mrb[100].mxu0 %v712_v42  ;;  %1969 = vmatprep.mubr.f32.mxu1 %v719_v43  ;;  %v822_v42 = vld [vmem:[%s7085_s8 + $0x1330] sm:$0xff]  ;;  %v829_v43 = vld [vmem:[%s7085_s8 + $0x1368] sm:$0xff] }
 0x168   : > { %3379 = vmatprep.mubr.f32.mxu0 %v723_v45  ;;  %v833_v45 = vld [vmem:[%s7085_s8 + $0x1388] sm:$0xff] }
 0x16a   : > { %1970 = vmatmul.mubr.f32.gmra.mrb[102].mxu1 %v718_v46  ;;  %v828_v46 = vld [vmem:[%s7085_s8 + $0x1360] sm:$0xff] }
 0x16b   : > { %3380 = vmatmul.mubr.f32.gmra.mrb[102].mxu0 %v722_v47  ;;  %1974 = vmatprep.mubr.f32.mxu1 %v729_v48  ;;  %v832_v47 = vld [vmem:[%s7085_s8 + $0x1380] sm:$0xff]  ;;  %v839_v48 = vld [vmem:[%s7085_s8 + $0x13b8] sm:$0xff] }
 0x16c   : > { %3384 = vmatprep.mubr.f32.mxu0 %v733_v49  ;;  %v843_v49 = vld [vmem:[%s7085_s8 + $0x13d8] sm:$0xff] }
 0x16e   : > { %1975 = vmatmul.mubr.f32.gmra.mrb[104].mxu1 %v728_v51  ;;  %v838_v51 = vld [vmem:[%s7085_s8 + $0x13b0] sm:$0xff] }
 0x16f   : > { %3385 = vmatmul.mubr.f32.gmra.mrb[104].mxu0 %v732_v52  ;;  %1979 = vmatprep.mubr.f32.mxu1 %v739_v53  ;;  %v842_v52 = vld [vmem:[%s7085_s8 + $0x13d0] sm:$0xff]  ;;  %v849_v53 = vld [vmem:[%s7085_s8 + $0x1408] sm:$0xff] }
 0x170   : > { %3389 = vmatprep.mubr.f32.mxu0 %v743_v54  ;;  %v215_v54 = vld [vmem:[%s7085_s8 + $0x38] sm:$0xff] }
 0x172   : > { %1980 = vmatmul.mubr.f32.gmra.mrb[106].mxu1 %v738_v55  ;;  %v1616_v55 = vld [vmem:[#allocation6 + $0x400] sm:$0xff] }
 0x173   : > { %3390 = vmatmul.mubr.f32.gmra.mrb[106].mxu0 %v742_v57  ;;  %1984 = vmatprep.mubr.f32.mxu1 %v749_v58  ;;  %v1617_v57 = vld [vmem:[#allocation6 + $0x408] sm:$0xff]  ;;  %v848_v58 = vld [vmem:[%s7085_s8 + $0x1400] sm:$0xff] }
 0x174   : > { %3394 = vmatprep.mubr.f32.mxu0 %v753_v59  ;;  %v214_v59 = vld [vmem:[%s7085_s8 + $0x30] sm:$0xff] }
 0x176   : > { %1985 = vmatmul.mubr.f32.gmra.mrb[108].mxu1 %v748_v60  ;;  %v859_v60 = vld [vmem:[%s7085_s8 + $0x1458] sm:$0xff] }
 0x177   : > { %3395 = vmatmul.mubr.f32.gmra.mrb[108].mxu0 %v752_v61  ;;  %1989 = vmatprep.mubr.f32.mxu1 %v759_v63  ;;  %v5609_v61 = vpack.c.bf16 %v1617_v57, %v1616_v55  ;;  %v225_v63 = vld [vmem:[%s7085_s8 + $0x88] sm:$0xff]  ;;  %v284_v55 = vld [vmem:[%s7085_s8 + $0x260] sm:$0xff] }
 0x178   : > { %3399 = vmatprep.mubr.f32.mxu0 %v763_v1  ;;  %v1618_v1 = vld [vmem:[#allocation6 + $0x410] sm:$0xff]  ;;  %v929_v57 = vld [vmem:[%s7085_s8 + $0x1688] sm:$0xff] }
 0x17a   : > { %1990 = vmatmul.mubr.f32.gmra.mrb[110].mxu1 %v758_v2  ;;  %v1619_v2 = vld [vmem:[#allocation6 + $0x418] sm:$0xff] }
 0x17b   : > { %3400 = vmatmul.mubr.f32.gmra.mrb[110].mxu0 %v762_v3  ;;  %1994 = vmatprep.mubr.f32.mxu1 %v769_v4  ;;  %v858_v3 = vld [vmem:[%s7085_s8 + $0x1450] sm:$0xff]  ;;  %v1544_v4 = vld [vmem:[#allocation6 + $0x1c0] sm:$0xff] }
 0x17c   : > { %3404 = vmatprep.mubr.f32.mxu0 %v773_v6  ;;  %v1545_v6 = vld [vmem:[#allocation6 + $0x1c8] sm:$0xff] }
 0x17d   : > { %v5501_v16 = vpack.c.bf16 %v1545_v6, %v1544_v4  ;;  %v1547_v4 = vld [vmem:[#allocation6 + $0x1d8] sm:$0xff]  ;;  %v949_v6 = vld [vmem:[%s7085_s8 + $0x1728] sm:$0xff] }
 0x17e   : > { %1995 = vmatmul.mubr.f32.gmra.mrb[112].mxu1 %v768_v7  ;;  %v224_v7 = vld [vmem:[%s7085_s8 + $0x80] sm:$0xff] }
 0x17f   : > { %3405 = vmatmul.mubr.f32.gmra.mrb[112].mxu0 %v772_v9  ;;  %1999 = vmatprep.mubr.f32.mxu1 %v779_v10  ;;  %v869_v9 = vld [vmem:[%s7085_s8 + $0x14a8] sm:$0xff]  ;;  %v5612_v10 = vpack.c.bf16 %v1619_v2, %v1618_v1  ;;  %v938_v1 = vld [vmem:[%s7085_s8 + $0x16d0] sm:$0xff]  ;;  %v304_v2 = vld [vmem:[%s7085_s8 + $0x300] sm:$0xff] }
 0x180   : > { %3409 = vmatprep.mubr.f32.mxu0 %v783_v11  ;;  %v235_v11 = vld [vmem:[%s7085_s8 + $0xd8] sm:$0xff]  ;;  %5502 = vmatpush1.bf16.msra.mxu1 %v5501_v16  ;;  %v314_v16 = vld [vmem:[%s7085_s8 + $0x350] sm:$0xff] }
 0x181   : > { %5503 = vmatprep.subr.bf16.mxu1 %v6915_v0 }
 0x182   : > { %2000 = vmatmul.mubr.f32.gmra.mrb[114].mxu1 %v778_v14  ;;  %v1620_v14 = vld [vmem:[#allocation6 + $0x420] sm:$0xff] }
 0x183   : > { %3410 = vmatmul.mubr.f32.gmra.mrb[114].mxu0 %v782_v17  ;;  %2004 = vmatprep.mubr.f32.mxu1 %v789_v19  ;;  %v868_v17 = vld [vmem:[%s7085_s8 + $0x14a0] sm:$0xff]  ;;  %v234_v19 = vld [vmem:[%s7085_s8 + $0xd0] sm:$0xff] }
 0x184   : > { %3414 = vmatprep.mubr.f32.mxu0 %v793_v22  ;;  %v5615_v22 = vpack.c.bf16 %v1621_v15, %v1620_v14  ;;  %v948_v15 = vld [vmem:[%s7085_s8 + $0x1720] sm:$0xff] }
 0x186   : > { %2005 = vmatmul.mubr.f32.gmra.mrb[116].mxu1 %v788_v23  ;;  %v245_v23 = vld [vmem:[%s7085_s8 + $0x128] sm:$0xff] }
 0x187   : > { %3415 = vmatmul.mubr.f32.gmra.mrb[116].mxu0 %v792_v25  ;;  %2009 = vmatprep.mubr.f32.mxu1 %v799_v26  ;;  %v1622_v25 = vld [vmem:[#allocation6 + $0x430] sm:$0xff]  ;;  %v1623_v26 = vld [vmem:[#allocation6 + $0x438] sm:$0xff] }
 0x188   : > { %3419 = vmatprep.mubr.f32.mxu0 %v803_v28  ;;  %v878_v28 = vld [vmem:[%s7085_s8 + $0x14f0] sm:$0xff] }
 0x18a   : > { %2010 = vmatmul.mubr.f32.gmra.mrb[118].mxu1 %v798_v29  ;;  %v244_v29 = vld [vmem:[%s7085_s8 + $0x120] sm:$0xff] }
 0x18b   : > { %3420 = vmatmul.mubr.f32.gmra.mrb[118].mxu0 %v802_v31  ;;  %2014 = vmatprep.mubr.f32.mxu1 %v809_v32  ;;  %v889_v31 = vld [vmem:[%s7085_s8 + $0x1548] sm:$0xff]  ;;  %v5618_v32 = vpack.c.bf16 %v1623_v26, %v1622_v25  ;;  %v335_v25 = vld [vmem:[%s7085_s8 + $0x3f8] sm:$0xff]  ;;  %v968_v26 = vld [vmem:[%s7085_s8 + $0x17c0] sm:$0xff] }
 0x18c   : > { %3424 = vmatprep.mubr.f32.mxu0 %v813_v33  ;;  %v255_v33 = vld [vmem:[%s7085_s8 + $0x178] sm:$0xff] }
 0x18e   : > { %2015 = vmatmul.mubr.f32.gmra.mrb[120].mxu1 %v808_v35  ;;  %v1624_v35 = vld [vmem:[#allocation6 + $0x440] sm:$0xff] }
 0x18f   : > { %3425 = vmatmul.mubr.f32.gmra.mrb[120].mxu0 %v812_v37  ;;  %2019 = vmatprep.mubr.f32.mxu1 %v819_v38  ;;  %v1625_v37 = vld [vmem:[#allocation6 + $0x448] sm:$0xff]  ;;  %v888_v38 = vld [vmem:[%s7085_s8 + $0x1540] sm:$0xff] }
 0x190   : > { %3429 = vmatprep.mubr.f32.mxu0 %v823_v39  ;;  %v254_v39 = vld [vmem:[%s7085_s8 + $0x170] sm:$0xff] }
 0x192   : > { %2020 = vmatmul.mubr.f32.gmra.mrb[122].mxu1 %v818_v40  ;;  %v899_v40 = vld [vmem:[%s7085_s8 + $0x1598] sm:$0xff] }
 0x193   : > { %3430 = vmatmul.mubr.f32.gmra.mrb[122].mxu0 %v822_v42  ;;  %2024 = vmatprep.mubr.f32.mxu1 %v829_v43  ;;  %v5621_v42 = vpack.c.bf16 %v1625_v37, %v1624_v35  ;;  %v265_v43 = vld [vmem:[%s7085_s8 + $0x1c8] sm:$0xff]  ;;  %v355_v37 = vld [vmem:[%s7085_s8 + $0x498] sm:$0xff] }
 0x194   : > { %3434 = vmatprep.mubr.f32.mxu0 %v833_v45  ;;  %v898_v45 = vld [vmem:[%s7085_s8 + $0x1590] sm:$0xff]  ;;  %v989_v35 = vld [vmem:[%s7085_s8 + $0x1868] sm:$0xff] }
 0x196   : > { %2025 = vmatmul.mubr.f32.gmra.mrb[124].mxu1 %v828_v46  ;;  %v264_v46 = vld [vmem:[%s7085_s8 + $0x1c0] sm:$0xff] }
 0x197   : > { %3435 = vmatmul.mubr.f32.gmra.mrb[124].mxu0 %v832_v47  ;;  %2029 = vmatprep.mubr.f32.mxu1 %v839_v48  ;;  %v909_v47 = vld [vmem:[%s7085_s8 + $0x15e8] sm:$0xff]  ;;  %v275_v48 = vld [vmem:[%s7085_s8 + $0x218] sm:$0xff] }
 0x198   : > { %3439 = vmatprep.mubr.f32.mxu0 %v843_v49  ;;  %v908_v49 = vld [vmem:[%s7085_s8 + $0x15e0] sm:$0xff] }
 0x19a   : > { %2030 = vmatmul.mubr.f32.gmra.mrb[126].mxu1 %v838_v51  ;;  %v274_v51 = vld [vmem:[%s7085_s8 + $0x210] sm:$0xff] }
 0x19b   : > { %3440 = vmatmul.mubr.f32.gmra.mrb[126].mxu0 %v842_v52  ;;  %2034 = vmatprep.mubr.f32.mxu1 %v849_v53  ;;  %v919_v52 = vld [vmem:[%s7085_s8 + $0x1638] sm:$0xff]  ;;  %v285_v53 = vld [vmem:[%s7085_s8 + $0x268] sm:$0xff] }
 0x19c   : > { %3829 = vmatprep.mubr.f32.mxu0 %v215_v54  ;;  %v918_v54 = vld [vmem:[%s7085_s8 + $0x1630] sm:$0xff] }
 0x19e   : > { %2035 = vmatmul.mubr.f32.gmra.mrb[128].mxu1 %v848_v58  ;;  %v295_v58 = vld [vmem:[%s7085_s8 + $0x2b8] sm:$0xff] }
 0x19f   : > { %3830 = vmatmul.mubr.f32.vlgmr.msra.gmra.mrb[0].mxu0 %v214_v59  ;;  %2039 = vmatprep.mubr.f32.mxu1 %v859_v60  ;;  %v928_v59 = vld [vmem:[%s7085_s8 + $0x1680] sm:$0xff]  ;;  %v294_v60 = vld [vmem:[%s7085_s8 + $0x2b0] sm:$0xff] }
 0x1a0   : > { %3834 = vmatprep.mubr.f32.mxu0 %v225_v63  ;;  %5610 = vmatpush1.bf16.msra.mxu0 %v5609_v61  ;;  %v939_v61 = vld [vmem:[%s7085_s8 + $0x16d8] sm:$0xff]  ;;  %v305_v63 = vld [vmem:[%s7085_s8 + $0x308] sm:$0xff] }
 0x1a1   : > { %5611 = vmatprep.subr.bf16.mxu0 %v6915_v0 }
 0x1a2   : > { %2040 = vmatmul.mubr.f32.gmra.mrb[130].mxu1 %v858_v3  ;;  %v1546_v3 = vld [vmem:[#allocation6 + $0x1d0] sm:$0xff] }
 0x1a3   : > { %3835 = vmatmul.mubr.f32.gmra.mrb[2].mxu0 %v224_v7  ;;  %2044 = vmatprep.mubr.f32.mxu1 %v869_v9  ;;  %v5504_v7 = vpack.c.bf16 %v1547_v4, %v1546_v3  ;;  %v1626_v9 = vld [vmem:[#allocation6 + $0x450] sm:$0xff]  ;;  %v1039_v4 = vld [vmem:[%s7085_s8 + $0x19f8] sm:$0xff] }
 0x1a4   : > { %3839 = vmatprep.mubr.f32.mxu0 %v235_v11  ;;  %5613 = vmatpush1.bf16.msra.mxu0 %v5612_v10  ;;  %v1627_v10 = vld [vmem:[#allocation6 + $0x458] sm:$0xff]  ;;  %v394_v3 = vld [vmem:[%s7085_s8 + $0x5d0] sm:$0xff] }
 0x1a5   : > { %5614 = vmatprep.subr.bf16.mxu0 %v6915_v0  ;;  %v315_v11 = vld [vmem:[%s7085_s8 + $0x358] sm:$0xff]  ;;  %v5624_v14 = vpack.c.bf16 %v1627_v10, %v1626_v9  ;;  %5505 = vmatpush1.bf16.msra.mxu1 %v5504_v7  ;;  %v1038_v7 = vld [vmem:[%s7085_s8 + $0x19f0] sm:$0xff]  ;;  %v404_v9 = vld [vmem:[%s7085_s8 + $0x620] sm:$0xff] }
 0x1a6   : > { %2045 = vmatmul.mubr.f32.gmra.mrb[132].mxu1 %v868_v17  ;;  %v959_v17 = vld [vmem:[%s7085_s8 + $0x1778] sm:$0xff]  ;;  %5506 = vmatprep.subr.bf16.mxu1 %v6915_v0  ;;  %v1049_v10 = vld [vmem:[%s7085_s8 + $0x1a48] sm:$0xff] }
 0x1a7   : > { %3840 = vmatmul.mubr.f32.gmra.mrb[4].mxu0 %v234_v19  ;;  %2049 = vmatprep.mubr.f32.mxu1 %v879_v21  ;;  %v325_v19 = vld [vmem:[%s7085_s8 + $0x3a8] sm:$0xff]  ;;  %v958_v21 = vld [vmem:[%s7085_s8 + $0x1770] sm:$0xff] }
 0x1a8   : > { %3844 = vmatprep.mubr.f32.mxu0 %v245_v23  ;;  %5616 = vmatpush1.bf16.msra.mxu0 %v5615_v22  ;;  %v324_v22 = vld [vmem:[%s7085_s8 + $0x3a0] sm:$0xff]  ;;  %v969_v23 = vld [vmem:[%s7085_s8 + $0x17c8] sm:$0xff] }
 0x1a9   : > { %5617 = vmatprep.subr.bf16.mxu0 %v6915_v0 }
 0x1aa   : > { %2050 = vmatmul.mubr.f32.gmra.mrb[134].mxu1 %v878_v28  ;;  %v334_v28 = vld [vmem:[%s7085_s8 + $0x3f0] sm:$0xff] }
 0x1ab   : > { %3845 = vmatmul.mubr.f32.gmra.mrb[6].mxu0 %v244_v29  ;;  %2054 = vmatprep.mubr.f32.mxu1 %v889_v31  ;;  %v979_v29 = vld [vmem:[%s7085_s8 + $0x1818] sm:$0xff]  ;;  %v345_v31 = vld [vmem:[%s7085_s8 + $0x448] sm:$0xff] }
 0x1ac   : > { %3849 = vmatprep.mubr.f32.mxu0 %v255_v33  ;;  %5619 = vmatpush1.bf16.msra.mxu0 %v5618_v32  ;;  %v978_v32 = vld [vmem:[%s7085_s8 + $0x1810] sm:$0xff]  ;;  %v344_v33 = vld [vmem:[%s7085_s8 + $0x440] sm:$0xff] }
 0x1ad   : > { %5620 = vmatprep.subr.bf16.mxu0 %v6915_v0 }
 0x1ae   : > { %2055 = vmatmul.mubr.f32.gmra.mrb[136].mxu1 %v888_v38  ;;  %v988_v38 = vld [vmem:[%s7085_s8 + $0x1860] sm:$0xff] }
 0x1af   : > { %3850 = vmatmul.mubr.f32.gmra.mrb[8].mxu0 %v254_v39  ;;  %2059 = vmatprep.mubr.f32.mxu1 %v899_v40  ;;  %v354_v39 = vld [vmem:[%s7085_s8 + $0x490] sm:$0xff]  ;;  %v999_v40 = vld [vmem:[%s7085_s8 + $0x18b8] sm:$0xff] }
 0x1b0   : > { %3854 = vmatprep.mubr.f32.mxu0 %v265_v43  ;;  %5622 = vmatpush1.bf16.msra.mxu0 %v5621_v42  ;;  %v365_v42 = vld [vmem:[%s7085_s8 + $0x4e8] sm:$0xff]  ;;  %v998_v43 = vld [vmem:[%s7085_s8 + $0x18b0] sm:$0xff] }
 0x1b1   : > { %5623 = vmatprep.subr.bf16.mxu0 %v6915_v0 }
 0x1b2   : > { %2060 = vmatmul.mubr.f32.gmra.mrb[138].mxu1 %v898_v45  ;;  %v364_v45 = vld [vmem:[%s7085_s8 + $0x4e0] sm:$0xff] }
 0x1b3   : > { %3855 = vmatmul.mubr.f32.gmra.mrb[10].mxu0 %v264_v46  ;;  %2064 = vmatprep.mubr.f32.mxu1 %v909_v47  ;;  %v1009_v46 = vld [vmem:[%s7085_s8 + $0x1908] sm:$0xff]  ;;  %v375_v47 = vld [vmem:[%s7085_s8 + $0x538] sm:$0xff] }
 0x1b4   : > { %3859 = vmatprep.mubr.f32.mxu0 %v275_v48  ;;  %5625 = vmatpush1.bf16.msra.mxu0 %v5624_v14  ;;  %v1008_v48 = vld [vmem:[%s7085_s8 + $0x1900] sm:$0xff] }
 0x1b5   : > { %5626 = vmatprep.subr.bf16.mxu0 %v6915_v0  ;;  %v1048_v14 = vld [vmem:[%s7085_s8 + $0x1a40] sm:$0xff] }
 0x1b6   : > { %2065 = vmatmul.mubr.f32.gmra.mrb[140].mxu1 %v908_v49  ;;  %v374_v49 = vld [vmem:[%s7085_s8 + $0x530] sm:$0xff] }
 0x1b7   : > { %3860 = vmatmul.mubr.f32.gmra.mrb[12].mxu0 %v274_v51  ;;  %2069 = vmatprep.mubr.f32.mxu1 %v919_v52  ;;  %v1019_v51 = vld [vmem:[%s7085_s8 + $0x1958] sm:$0xff]  ;;  %v385_v52 = vld [vmem:[%s7085_s8 + $0x588] sm:$0xff] }
 0x1b8   : > { %3864 = vmatprep.mubr.f32.mxu0 %v285_v53  ;;  %v1018_v53 = vld [vmem:[%s7085_s8 + $0x1950] sm:$0xff] }
 0x1ba   : > { %2070 = vmatmul.mubr.f32.gmra.mrb[142].mxu1 %v918_v54  ;;  %v384_v54 = vld [vmem:[%s7085_s8 + $0x580] sm:$0xff] }
 0x1bb   : > { %3865 = vmatmul.mubr.f32.gmra.mrb[14].mxu0 %v284_v55  ;;  %2074 = vmatprep.mubr.f32.mxu1 %v929_v57  ;;  %v1548_v55 = vld [vmem:[#allocation6 + $0x1e0] sm:$0xff]  ;;  %v1549_v57 = vld [vmem:[#allocation6 + $0x1e8] sm:$0xff] }
 0x1bc   : > { %3869 = vmatprep.mubr.f32.mxu0 %v295_v58  ;;  %v1029_v58 = vld [vmem:[%s7085_s8 + $0x19a8] sm:$0xff] }
 0x1be   : > { %2075 = vmatmul.mubr.f32.gmra.mrb[144].mxu1 %v928_v59  ;;  %v5507_v59 = vpack.c.bf16 %v1549_v57, %v1548_v55  ;;  %v474_v55 = vld [vmem:[%s7085_s8 + $0x850] sm:$0xff]  ;;  %v1119_v57 = vld [vmem:[%s7085_s8 + $0x1c78] sm:$0xff] }
 0x1bf   : > { %3870 = vmatmul.mubr.f32.gmra.mrb[16].mxu0 %v294_v60  ;;  %2079 = vmatprep.mubr.f32.mxu1 %v939_v61  ;;  %v1628_v60 = vld [vmem:[#allocation6 + $0x460] sm:$0xff]  ;;  %v1629_v61 = vld [vmem:[#allocation6 + $0x468] sm:$0xff] }
 0x1c0   : > { %3874 = vmatprep.mubr.f32.mxu0 %v305_v63  ;;  %v395_v63 = vld [vmem:[%s7085_s8 + $0x5d8] sm:$0xff]  ;;  %5508 = vmatpush1.bf16.msra.mxu1 %v5507_v59  ;;  %v1118_v59 = vld [vmem:[%s7085_s8 + $0x1c70] sm:$0xff] }
 0x1c1   : > { %5509 = vmatprep.subr.bf16.mxu1 %v6915_v0 }
 0x1c2   : > { %2080 = vmatmul.mubr.f32.gmra.mrb[146].mxu1 %v938_v1  ;;  %v5627_v1 = vpack.c.bf16 %v1629_v61, %v1628_v60  ;;  %v484_v60 = vld [vmem:[%s7085_s8 + $0x8a0] sm:$0xff]  ;;  %v1129_v61 = vld [vmem:[%s7085_s8 + $0x1cc8] sm:$0xff] }
 0x1c3   : > { %3875 = vmatmul.mubr.f32.gmra.mrb[18].mxu0 %v304_v2  ;;  %2084 = vmatprep.mubr.f32.mxu1 %v949_v6  ;;  %v1028_v2 = vld [vmem:[%s7085_s8 + $0x19a0] sm:$0xff]  ;;  %v405_v6 = vld [vmem:[%s7085_s8 + $0x628] sm:$0xff] }
 0x1c4   : > { %3879 = vmatprep.mubr.f32.mxu0 %v315_v11  ;;  %5628 = vmatpush1.bf16.msra.mxu0 %v5627_v1  ;;  %v415_v11 = vld [vmem:[%s7085_s8 + $0x678] sm:$0xff]  ;;  %v1128_v1 = vld [vmem:[%s7085_s8 + $0x1cc0] sm:$0xff] }
 0x1c5   : > { %5629 = vmatprep.subr.bf16.mxu0 %v6915_v0 }
 0x1c6   : > { %2085 = vmatmul.mubr.f32.gmra.mrb[148].mxu1 %v948_v15  ;;  %v414_v15 = vld [vmem:[%s7085_s8 + $0x670] sm:$0xff] }
 0x1c7   : > { %3880 = vmatmul.mubr.f32.gmra.mrb[20].mxu0 %v314_v16  ;;  %2089 = vmatprep.mubr.f32.mxu1 %v959_v17  ;;  %v1059_v16 = vld [vmem:[%s7085_s8 + $0x1a98] sm:$0xff]  ;;  %v425_v17 = vld [vmem:[%s7085_s8 + $0x6c8] sm:$0xff] }
 0x1c8   : > { %3884 = vmatprep.mubr.f32.mxu0 %v325_v19  ;;  %v1058_v19 = vld [vmem:[%s7085_s8 + $0x1a90] sm:$0xff] }
 0x1ca   : > { %2090 = vmatmul.mubr.f32.gmra.mrb[150].mxu1 %v958_v21  ;;  %v424_v21 = vld [vmem:[%s7085_s8 + $0x6c0] sm:$0xff] }
 0x1cb   : > { %3885 = vmatmul.mubr.f32.gmra.mrb[22].mxu0 %v324_v22  ;;  %2094 = vmatprep.mubr.f32.mxu1 %v969_v23  ;;  %v1069_v22 = vld [vmem:[%s7085_s8 + $0x1ae8] sm:$0xff]  ;;  %v435_v23 = vld [vmem:[%s7085_s8 + $0x718] sm:$0xff] }
 0x1cc   : > { %3889 = vmatprep.mubr.f32.mxu0 %v335_v25  ;;  %v1068_v25 = vld [vmem:[%s7085_s8 + $0x1ae0] sm:$0xff] }
 0x1ce   : > { %2095 = vmatmul.mubr.f32.gmra.mrb[152].mxu1 %v968_v26  ;;  %v434_v26 = vld [vmem:[%s7085_s8 + $0x710] sm:$0xff] }
 0x1cf   : > { %3890 = vmatmul.mubr.f32.gmra.mrb[24].mxu0 %v334_v28  ;;  %2099 = vmatprep.mubr.f32.mxu1 %v979_v29  ;;  %v1079_v28 = vld [vmem:[%s7085_s8 + $0x1b38] sm:$0xff]  ;;  %v445_v29 = vld [vmem:[%s7085_s8 + $0x768] sm:$0xff] }
 0x1d0   : > { %3894 = vmatprep.mubr.f32.mxu0 %v345_v31  ;;  %v1078_v31 = vld [vmem:[%s7085_s8 + $0x1b30] sm:$0xff] }
 0x1d2   : > { %2100 = vmatmul.mubr.f32.gmra.mrb[154].mxu1 %v978_v32  ;;  %v444_v32 = vld [vmem:[%s7085_s8 + $0x760] sm:$0xff] }
 0x1d3   : > { %3895 = vmatmul.mubr.f32.gmra.mrb[26].mxu0 %v344_v33  ;;  %2104 = vmatprep.mubr.f32.mxu1 %v989_v35  ;;  %v1089_v33 = vld [vmem:[%s7085_s8 + $0x1b88] sm:$0xff]  ;;  %v455_v35 = vld [vmem:[%s7085_s8 + $0x7b8] sm:$0xff] }
 0x1d4   : > { %3899 = vmatprep.mubr.f32.mxu0 %v355_v37  ;;  %v1088_v37 = vld [vmem:[%s7085_s8 + $0x1b80] sm:$0xff] }
 0x1d6   : > { %2105 = vmatmul.mubr.f32.gmra.mrb[156].mxu1 %v988_v38  ;;  %v454_v38 = vld [vmem:[%s7085_s8 + $0x7b0] sm:$0xff] }
 0x1d7   : > { %3900 = vmatmul.mubr.f32.gmra.mrb[28].mxu0 %v354_v39  ;;  %2109 = vmatprep.mubr.f32.mxu1 %v999_v40  ;;  %v1099_v39 = vld [vmem:[%s7085_s8 + $0x1bd8] sm:$0xff]  ;;  %v465_v40 = vld [vmem:[%s7085_s8 + $0x808] sm:$0xff] }
 0x1d8   : > { %3904 = vmatprep.mubr.f32.mxu0 %v365_v42  ;;  %v1098_v42 = vld [vmem:[%s7085_s8 + $0x1bd0] sm:$0xff] }
 0x1da   : > { %2110 = vmatmul.mubr.f32.gmra.mrb[158].mxu1 %v998_v43  ;;  %v464_v43 = vld [vmem:[%s7085_s8 + $0x800] sm:$0xff] }
 0x1db   : > { %3905 = vmatmul.mubr.f32.gmra.mrb[30].mxu0 %v364_v45  ;;  %2114 = vmatprep.mubr.f32.mxu1 %v1009_v46  ;;  %v1550_v45 = vld [vmem:[#allocation6 + $0x1f0] sm:$0xff]  ;;  %v1551_v46 = vld [vmem:[#allocation6 + $0x1f8] sm:$0xff] }
 0x1dc   : > { %3909 = vmatprep.mubr.f32.mxu0 %v375_v47  ;;  %v1109_v47 = vld [vmem:[%s7085_s8 + $0x1c28] sm:$0xff] }
 0x1de   : > { %2115 = vmatmul.mubr.f32.gmra.mrb[160].mxu1 %v1008_v48  ;;  %v5510_v48 = vpack.c.bf16 %v1551_v46, %v1550_v45  ;;  %v1198_v45 = vld [vmem:[%s7085_s8 + $0x1ef0] sm:$0xff]  ;;  %v564_v46 = vld [vmem:[%s7085_s8 + $0xb20] sm:$0xff] }
 0x1df   : > { %3910 = vmatmul.mubr.f32.gmra.mrb[32].mxu0 %v374_v49  ;;  %2119 = vmatprep.mubr.f32.mxu1 %v1019_v51  ;;  %v1630_v49 = vld [vmem:[#allocation6 + $0x470] sm:$0xff]  ;;  %v1631_v51 = vld [vmem:[#allocation6 + $0x478] sm:$0xff] }
 0x1e0   : > { %3914 = vmatprep.mubr.f32.mxu0 %v385_v52  ;;  %v475_v52 = vld [vmem:[%s7085_s8 + $0x858] sm:$0xff]  ;;  %5511 = vmatpush1.bf16.msra.mxu1 %v5510_v48 }
 0x1e1   : > { %5656 = vmatprep.subr.bf16.mxu1 %v6915_v0  ;;  %v575_v48 = vld [vmem:[%s7085_s8 + $0xb78] sm:$0xff] }
 0x1e2   : > { %2120 = vmatmul.mubr.f32.gmra.mrb[162].mxu1 %v1018_v53  ;;  %v5630_v53 = vpack.c.bf16 %v1631_v51, %v1630_v49  ;;  %v1208_v49 = vld [vmem:[%s7085_s8 + $0x1f40] sm:$0xff]  ;;  %v574_v51 = vld [vmem:[%s7085_s8 + $0xb70] sm:$0xff] }
 0x1e3   : > { %3915 = vmatmul.mubr.f32.gmra.mrb[34].mxu0 %v384_v54  ;;  %2124 = vmatprep.mubr.f32.mxu1 %v1029_v58  ;;  %v1108_v54 = vld [vmem:[%s7085_s8 + $0x1c20] sm:$0xff]  ;;  %v485_v58 = vld [vmem:[%s7085_s8 + $0x8a8] sm:$0xff] }
 0x1e4   : > { %3919 = vmatprep.mubr.f32.mxu0 %v395_v63  ;;  %5631 = vmatpush1.bf16.msra.mxu0 %v5630_v53  ;;  %v495_v63 = vld [vmem:[%s7085_s8 + $0x8f8] sm:$0xff]  ;;  %v585_v53 = vld [vmem:[%s7085_s8 + $0xbc8] sm:$0xff] }
 0x1e5   : > { %5632 = vmatprep.subr.bf16.mxu0 %v6915_v0 }
 0x1e6   : > { %2125 = vmatmul.mubr.f32.gmra.mrb[164].mxu1 %v1028_v2  ;;  %v494_v2 = vld [vmem:[%s7085_s8 + $0x8f0] sm:$0xff] }
 0x1e7   : > { %3920 = vmatmul.mubr.f32.gmra.mrb[36].mxu0 %v394_v3  ;;  %2129 = vmatprep.mubr.f32.mxu1 %v1039_v4  ;;  %v1139_v3 = vld [vmem:[%s7085_s8 + $0x1d18] sm:$0xff]  ;;  %v505_v4 = vld [vmem:[%s7085_s8 + $0x948] sm:$0xff] }
 0x1e8   : > { %3924 = vmatprep.mubr.f32.mxu0 %v405_v6  ;;  %v1138_v6 = vld [vmem:[%s7085_s8 + $0x1d10] sm:$0xff] }
 0x1ea   : > { %2130 = vmatmul.mubr.f32.gmra.mrb[166].mxu1 %v1038_v7  ;;  %v504_v7 = vld [vmem:[%s7085_s8 + $0x940] sm:$0xff] }
 0x1eb   : > { %3925 = vmatmul.mubr.f32.gmra.mrb[38].mxu0 %v404_v9  ;;  %2134 = vmatprep.mubr.f32.mxu1 %v1049_v10  ;;  %v1149_v9 = vld [vmem:[%s7085_s8 + $0x1d68] sm:$0xff]  ;;  %v515_v10 = vld [vmem:[%s7085_s8 + $0x998] sm:$0xff] }
 0x1ec   : > { %3929 = vmatprep.mubr.f32.mxu0 %v415_v11  ;;  %v1148_v11 = vld [vmem:[%s7085_s8 + $0x1d60] sm:$0xff] }
 0x1ee   : > { %2135 = vmatmul.mubr.f32.gmra.mrb[168].mxu1 %v1048_v14  ;;  %v514_v14 = vld [vmem:[%s7085_s8 + $0x990] sm:$0xff] }
 0x1ef   : > { %3930 = vmatmul.mubr.f32.gmra.mrb[40].mxu0 %v414_v15  ;;  %2139 = vmatprep.mubr.f32.mxu1 %v1059_v16  ;;  %v1159_v15 = vld [vmem:[%s7085_s8 + $0x1db8] sm:$0xff]  ;;  %v525_v16 = vld [vmem:[%s7085_s8 + $0x9e8] sm:$0xff] }
 0x1f0   : > { %3934 = vmatprep.mubr.f32.mxu0 %v425_v17  ;;  %v1158_v17 = vld [vmem:[%s7085_s8 + $0x1db0] sm:$0xff] }
 0x1f2   : > { %2140 = vmatmul.mubr.f32.gmra.mrb[170].mxu1 %v1058_v19  ;;  %v524_v19 = vld [vmem:[%s7085_s8 + $0x9e0] sm:$0xff] }
 0x1f3   : > { %3935 = vmatmul.mubr.f32.gmra.mrb[42].mxu0 %v424_v21  ;;  %2144 = vmatprep.mubr.f32.mxu1 %v1069_v22  ;;  %v1169_v21 = vld [vmem:[%s7085_s8 + $0x1e08] sm:$0xff]  ;;  %v535_v22 = vld [vmem:[%s7085_s8 + $0xa38] sm:$0xff] }
 0x1f4   : > { %3939 = vmatprep.mubr.f32.mxu0 %v435_v23  ;;  %v1168_v23 = vld [vmem:[%s7085_s8 + $0x1e00] sm:$0xff] }
 0x1f6   : > { %2145 = vmatmul.mubr.f32.gmra.mrb[172].mxu1 %v1068_v25  ;;  %v534_v25 = vld [vmem:[%s7085_s8 + $0xa30] sm:$0xff] }
 0x1f7   : > { %3940 = vmatmul.mubr.f32.gmra.mrb[44].mxu0 %v434_v26  ;;  %2149 = vmatprep.mubr.f32.mxu1 %v1079_v28  ;;  %v1179_v26 = vld [vmem:[%s7085_s8 + $0x1e58] sm:$0xff]  ;;  %v545_v28 = vld [vmem:[%s7085_s8 + $0xa88] sm:$0xff] }
 0x1f8   : > { %3944 = vmatprep.mubr.f32.mxu0 %v445_v29  ;;  %v1178_v29 = vld [vmem:[%s7085_s8 + $0x1e50] sm:$0xff] }
 0x1fa   : > { %2150 = vmatmul.mubr.f32.gmra.mrb[174].mxu1 %v1078_v31  ;;  %v544_v31 = vld [vmem:[%s7085_s8 + $0xa80] sm:$0xff] }
 0x1fb   : > { %3945 = vmatmul.mubr.f32.gmra.mrb[46].mxu0 %v444_v32  ;;  %2154 = vmatprep.mubr.f32.mxu1 %v1089_v33  ;;  %v1189_v32 = vld [vmem:[%s7085_s8 + $0x1ea8] sm:$0xff]  ;;  %v1632_v33 = vld [vmem:[#allocation6 + $0x480] sm:$0xff] }
 0x1fc   : > { %3949 = vmatprep.mubr.f32.mxu0 %v455_v35  ;;  %v1633_v35 = vld [vmem:[#allocation6 + $0x488] sm:$0xff] }
 0x1fe   : > { %2155 = vmatmul.mubr.f32.gmra.mrb[176].mxu1 %v1088_v37  ;;  %v555_v37 = vld [vmem:[%s7085_s8 + $0xad8] sm:$0xff] }
 0x1ff   : > { %3950 = vmatmul.mubr.f32.gmra.mrb[48].mxu0 %v454_v38  ;;  %2159 = vmatprep.mubr.f32.mxu1 %v1099_v39  ;;  %v5633_v38 = vpack.c.bf16 %v1633_v35, %v1632_v33  ;;  %v1188_v39 = vld [vmem:[%s7085_s8 + $0x1ea0] sm:$0xff]  ;;  %v654_v35 = vld [vmem:[%s7085_s8 + $0xdf0] sm:$0xff] }
 0x200   : > { %3954 = vmatprep.mubr.f32.mxu0 %v465_v40  ;;  %v554_v40 = vld [vmem:[%s7085_s8 + $0xad0] sm:$0xff]  ;;  %v1288_v33 = vld [vmem:[%s7085_s8 + $0x21c0] sm:$0xff] }
 0x201   : > { %5634 = vmatpush1.bf16.msra.mxu0 %v5633_v38  ;;  %v665_v38 = vld [vmem:[%s7085_s8 + $0xe48] sm:$0xff] }
 0x202   : > { %2160 = vmatmul.mubr.f32.gmra.mrb[178].mxu1 %v1098_v42  ;;  %v1199_v42 = vld [vmem:[%s7085_s8 + $0x1ef8] sm:$0xff]  ;;  %5635 = vmatprep.subr.bf16.mxu0 %v6915_v0 }
 0x203   : > { %3955 = vmatmul.mubr.f32.gmra.mrb[50].mxu0 %v464_v43  ;;  %2164 = vmatprep.mubr.f32.mxu1 %v1109_v47  ;;  %v565_v43 = vld [vmem:[%s7085_s8 + $0xb28] sm:$0xff] }
 0x204   : > { %3959 = vmatprep.mubr.f32.mxu0 %v475_v52  ;;  %v1209_v47 = vld [vmem:[%s7085_s8 + $0x1f48] sm:$0xff]  ;;  %v1219_v52 = vld [vmem:[%s7085_s8 + $0x1f98] sm:$0xff] }
 0x206   : > { %2165 = vmatmul.mubr.f32.gmra.mrb[180].mxu1 %v1108_v54  ;;  %v1218_v54 = vld [vmem:[%s7085_s8 + $0x1f90] sm:$0xff] }
 0x207   : > { %3960 = vmatmul.mubr.f32.gmra.mrb[52].mxu0 %v474_v55  ;;  %2169 = vmatprep.mubr.f32.mxu1 %v1119_v57  ;;  %v584_v55 = vld [vmem:[%s7085_s8 + $0xbc0] sm:$0xff]  ;;  %v1229_v57 = vld [vmem:[%s7085_s8 + $0x1fe8] sm:$0xff] }
 0x208   : > { %3964 = vmatprep.mubr.f32.mxu0 %v485_v58  ;;  %v595_v58 = vld [vmem:[%s7085_s8 + $0xc18] sm:$0xff] }
 0x20a   : > { %2170 = vmatmul.mubr.f32.gmra.mrb[182].mxu1 %v1118_v59  ;;  %v1228_v59 = vld [vmem:[%s7085_s8 + $0x1fe0] sm:$0xff] }
 0x20b   : > { %3965 = vmatmul.mubr.f32.gmra.mrb[54].mxu0 %v484_v60  ;;  %2174 = vmatprep.mubr.f32.mxu1 %v1129_v61  ;;  %v594_v60 = vld [vmem:[%s7085_s8 + $0xc10] sm:$0xff]  ;;  %v1239_v61 = vld [vmem:[%s7085_s8 + $0x2038] sm:$0xff] }
 0x20c   : > { %3969 = vmatprep.mubr.f32.mxu0 %v495_v63  ;;  %v605_v63 = vld [vmem:[%s7085_s8 + $0xc68] sm:$0xff] }
 0x20e   : > { %2175 = vmatmul.mubr.f32.gmra.mrb[184].mxu1 %v1128_v1  ;;  %v1238_v1 = vld [vmem:[%s7085_s8 + $0x2030] sm:$0xff] }
 0x20f   : > { %3970 = vmatmul.mubr.f32.gmra.mrb[56].mxu0 %v494_v2  ;;  %2179 = vmatprep.mubr.f32.mxu1 %v1139_v3  ;;  %v604_v2 = vld [vmem:[%s7085_s8 + $0xc60] sm:$0xff]  ;;  %v1249_v3 = vld [vmem:[%s7085_s8 + $0x2088] sm:$0xff] }
 0x210   : > { %3974 = vmatprep.mubr.f32.mxu0 %v505_v4  ;;  %v615_v4 = vld [vmem:[%s7085_s8 + $0xcb8] sm:$0xff] }
 0x212   : > { %2180 = vmatmul.mubr.f32.gmra.mrb[186].mxu1 %v1138_v6  ;;  %v1248_v6 = vld [vmem:[%s7085_s8 + $0x2080] sm:$0xff] }
 0x213   : > { %3975 = vmatmul.mubr.f32.gmra.mrb[58].mxu0 %v504_v7  ;;  %2184 = vmatprep.mubr.f32.mxu1 %v1149_v9  ;;  %v614_v7 = vld [vmem:[%s7085_s8 + $0xcb0] sm:$0xff]  ;;  %v1259_v9 = vld [vmem:[%s7085_s8 + $0x20d8] sm:$0xff] }
 0x214   : > { %3979 = vmatprep.mubr.f32.mxu0 %v515_v10  ;;  %v625_v10 = vld [vmem:[%s7085_s8 + $0xd08] sm:$0xff] }
 0x216   : > { %2185 = vmatmul.mubr.f32.gmra.mrb[188].mxu1 %v1148_v11  ;;  %v1258_v11 = vld [vmem:[%s7085_s8 + $0x20d0] sm:$0xff] }
 0x217   : > { %3980 = vmatmul.mubr.f32.gmra.mrb[60].mxu0 %v514_v14  ;;  %2189 = vmatprep.mubr.f32.mxu1 %v1159_v15  ;;  %v624_v14 = vld [vmem:[%s7085_s8 + $0xd00] sm:$0xff]  ;;  %v1269_v15 = vld [vmem:[%s7085_s8 + $0x2128] sm:$0xff] }
 0x218   : > { %3984 = vmatprep.mubr.f32.mxu0 %v525_v16  ;;  %v1634_v16 = vld [vmem:[#allocation6 + $0x490] sm:$0xff] }
 0x21a   : > { %2190 = vmatmul.mubr.f32.gmra.mrb[190].mxu1 %v1158_v17  ;;  %v1635_v17 = vld [vmem:[#allocation6 + $0x498] sm:$0xff] }
 0x21b   : > { %3985 = vmatmul.mubr.f32.gmra.mrb[62].mxu0 %v524_v19  ;;  %2194 = vmatprep.mubr.f32.mxu1 %v1169_v21  ;;  %v635_v19 = vld [vmem:[%s7085_s8 + $0xd58] sm:$0xff]  ;;  %v5636_v21 = vpack.c.bf16 %v1635_v17, %v1634_v16  ;;  %v1368_v16 = vld [vmem:[%s7085_s8 + $0x2440] sm:$0xff]  ;;  %v734_v17 = vld [vmem:[%s7085_s8 + $0x1070] sm:$0xff] }
 0x21c   : > { %3989 = vmatprep.mubr.f32.mxu0 %v535_v22  ;;  %v1268_v22 = vld [vmem:[%s7085_s8 + $0x2120] sm:$0xff] }
 0x21d   : > { %5637 = vmatpush1.bf16.msra.mxu0 %v5636_v21  ;;  %v745_v21 = vld [vmem:[%s7085_s8 + $0x10c8] sm:$0xff] }
 0x21e   : > { %2195 = vmatmul.mubr.f32.gmra.mrb[192].mxu1 %v1168_v23  ;;  %v634_v23 = vld [vmem:[%s7085_s8 + $0xd50] sm:$0xff]  ;;  %5638 = vmatprep.subr.bf16.mxu0 %v6915_v0 }
 0x21f   : > { %3990 = vmatmul.mubr.f32.gmra.mrb[64].mxu0 %v534_v25  ;;  %2199 = vmatprep.mubr.f32.mxu1 %v1179_v26  ;;  %v1279_v25 = vld [vmem:[%s7085_s8 + $0x2178] sm:$0xff]  ;;  %v645_v26 = vld [vmem:[%s7085_s8 + $0xda8] sm:$0xff] }
 0x220   : > { %3994 = vmatprep.mubr.f32.mxu0 %v545_v28  ;;  %v1278_v28 = vld [vmem:[%s7085_s8 + $0x2170] sm:$0xff] }
 0x222   : > { %2200 = vmatmul.mubr.f32.gmra.mrb[194].mxu1 %v1178_v29  ;;  %v644_v29 = vld [vmem:[%s7085_s8 + $0xda0] sm:$0xff] }
 0x223   : > { %3995 = vmatmul.mubr.f32.gmra.mrb[66].mxu0 %v544_v31  ;;  %2204 = vmatprep.mubr.f32.mxu1 %v1189_v32  ;;  %v1289_v31 = vld [vmem:[%s7085_s8 + $0x21c8] sm:$0xff]  ;;  %v655_v32 = vld [vmem:[%s7085_s8 + $0xdf8] sm:$0xff] }
 0x224   : > { %3999 = vmatprep.mubr.f32.mxu0 %v555_v37  ;;  %v1299_v37 = vld [vmem:[%s7085_s8 + $0x2218] sm:$0xff] }
 0x226   : > { %2205 = vmatmul.mubr.f32.gmra.mrb[196].mxu1 %v1188_v39  ;;  %v1298_v39 = vld [vmem:[%s7085_s8 + $0x2210] sm:$0xff] }
 0x227   : > { %4000 = vmatmul.mubr.f32.gmra.mrb[68].mxu0 %v554_v40  ;;  %2209 = vmatprep.mubr.f32.mxu1 %v1199_v42  ;;  %v664_v40 = vld [vmem:[%s7085_s8 + $0xe40] sm:$0xff]  ;;  %v1309_v42 = vld [vmem:[%s7085_s8 + $0x2268] sm:$0xff] }
 0x228   : > { %4004 = vmatprep.mubr.f32.mxu0 %v565_v43  ;;  %v675_v43 = vld [vmem:[%s7085_s8 + $0xe98] sm:$0xff] }
 0x22a   : > { %2210 = vmatmul.mubr.f32.gmra.mrb[198].mxu1 %v1198_v45  ;;  %v1308_v45 = vld [vmem:[%s7085_s8 + $0x2260] sm:$0xff] }
 0x22b   : > { %4005 = vmatmul.mubr.f32.gmra.mrb[70].mxu0 %v564_v46  ;;  %2214 = vmatprep.mubr.f32.mxu1 %v1209_v47  ;;  %v674_v46 = vld [vmem:[%s7085_s8 + $0xe90] sm:$0xff]  ;;  %v1319_v47 = vld [vmem:[%s7085_s8 + $0x22b8] sm:$0xff] }
 0x22c   : > { %4009 = vmatprep.mubr.f32.mxu0 %v575_v48  ;;  %v685_v48 = vld [vmem:[%s7085_s8 + $0xee8] sm:$0xff] }
 0x22e   : > { %2215 = vmatmul.mubr.f32.gmra.mrb[200].mxu1 %v1208_v49  ;;  %v1318_v49 = vld [vmem:[%s7085_s8 + $0x22b0] sm:$0xff] }
 0x22f   : > { %4010 = vmatmul.mubr.f32.gmra.mrb[72].mxu0 %v574_v51  ;;  %2219 = vmatprep.mubr.f32.mxu1 %v1219_v52  ;;  %v684_v51 = vld [vmem:[%s7085_s8 + $0xee0] sm:$0xff]  ;;  %v1329_v52 = vld [vmem:[%s7085_s8 + $0x2308] sm:$0xff] }
 0x230   : > { %4014 = vmatprep.mubr.f32.mxu0 %v585_v53  ;;  %v695_v53 = vld [vmem:[%s7085_s8 + $0xf38] sm:$0xff] }
 0x232   : > { %2220 = vmatmul.mubr.f32.gmra.mrb[202].mxu1 %v1218_v54  ;;  %v1328_v54 = vld [vmem:[%s7085_s8 + $0x2300] sm:$0xff] }
 0x233   : > { %4015 = vmatmul.mubr.f32.gmra.mrb[74].mxu0 %v584_v55  ;;  %2224 = vmatprep.mubr.f32.mxu1 %v1229_v57  ;;  %v694_v55 = vld [vmem:[%s7085_s8 + $0xf30] sm:$0xff]  ;;  %v1339_v57 = vld [vmem:[%s7085_s8 + $0x2358] sm:$0xff] }
 0x234   : > { %4019 = vmatprep.mubr.f32.mxu0 %v595_v58  ;;  %v705_v58 = vld [vmem:[%s7085_s8 + $0xf88] sm:$0xff] }
 0x236   : > { %2225 = vmatmul.mubr.f32.gmra.mrb[204].mxu1 %v1228_v59  ;;  %v1338_v59 = vld [vmem:[%s7085_s8 + $0x2350] sm:$0xff] }
 0x237   : > { %4020 = vmatmul.mubr.f32.gmra.mrb[76].mxu0 %v594_v60  ;;  %2229 = vmatprep.mubr.f32.mxu1 %v1239_v61  ;;  %v704_v60 = vld [vmem:[%s7085_s8 + $0xf80] sm:$0xff]  ;;  %v1349_v61 = vld [vmem:[%s7085_s8 + $0x23a8] sm:$0xff] }
 0x238   : > { %4024 = vmatprep.mubr.f32.mxu0 %v605_v63  ;;  %v1636_v63 = vld [vmem:[#allocation6 + $0x4a0] sm:$0xff] }
 0x23a   : > { %2230 = vmatmul.mubr.f32.gmra.mrb[206].mxu1 %v1238_v1  ;;  %v1637_v1 = vld [vmem:[#allocation6 + $0x4a8] sm:$0xff] }
 0x23b   : > { %4025 = vmatmul.mubr.f32.gmra.mrb[78].mxu0 %v604_v2  ;;  %2234 = vmatprep.mubr.f32.mxu1 %v1249_v3  ;;  %v715_v2 = vld [vmem:[%s7085_s8 + $0xfd8] sm:$0xff]  ;;  %v5639_v3 = vpack.c.bf16 %v1637_v1, %v1636_v63  ;;  %v1448_v63 = vld [vmem:[%s7085_s8 + $0x26c0] sm:$0xff]  ;;  %v814_v1 = vld [vmem:[%s7085_s8 + $0x12f0] sm:$0xff] }
 0x23c   : > { %4029 = vmatprep.mubr.f32.mxu0 %v615_v4  ;;  %v1348_v4 = vld [vmem:[%s7085_s8 + $0x23a0] sm:$0xff] }
 0x23d   : > { %5640 = vmatpush1.bf16.msra.mxu0 %v5639_v3  ;;  %v825_v3 = vld [vmem:[%s7085_s8 + $0x1348] sm:$0xff] }
 0x23e   : > { %2235 = vmatmul.mubr.f32.gmra.mrb[208].mxu1 %v1248_v6  ;;  %v714_v6 = vld [vmem:[%s7085_s8 + $0xfd0] sm:$0xff]  ;;  %5641 = vmatprep.subr.bf16.mxu0 %v6915_v0 }
 0x23f   : > { %4030 = vmatmul.mubr.f32.gmra.mrb[80].mxu0 %v614_v7  ;;  %2239 = vmatprep.mubr.f32.mxu1 %v1259_v9  ;;  %v1359_v7 = vld [vmem:[%s7085_s8 + $0x23f8] sm:$0xff]  ;;  %v725_v9 = vld [vmem:[%s7085_s8 + $0x1028] sm:$0xff] }
 0x240   : > { %4034 = vmatprep.mubr.f32.mxu0 %v625_v10  ;;  %v1358_v10 = vld [vmem:[%s7085_s8 + $0x23f0] sm:$0xff] }
 0x242   : > { %2240 = vmatmul.mubr.f32.gmra.mrb[210].mxu1 %v1258_v11  ;;  %v724_v11 = vld [vmem:[%s7085_s8 + $0x1020] sm:$0xff] }
 0x243   : > { %4035 = vmatmul.mubr.f32.gmra.mrb[82].mxu0 %v624_v14  ;;  %2244 = vmatprep.mubr.f32.mxu1 %v1269_v15  ;;  %v1369_v14 = vld [vmem:[%s7085_s8 + $0x2448] sm:$0xff]  ;;  %v735_v15 = vld [vmem:[%s7085_s8 + $0x1078] sm:$0xff] }
 0x244   : > { %4039 = vmatprep.mubr.f32.mxu0 %v635_v19  ;;  %v1379_v19 = vld [vmem:[%s7085_s8 + $0x2498] sm:$0xff] }
 0x246   : > { %2245 = vmatmul.mubr.f32.gmra.mrb[212].mxu1 %v1268_v22  ;;  %v1378_v22 = vld [vmem:[%s7085_s8 + $0x2490] sm:$0xff] }
 0x247   : > { %4040 = vmatmul.mubr.f32.gmra.mrb[84].mxu0 %v634_v23  ;;  %2249 = vmatprep.mubr.f32.mxu1 %v1279_v25  ;;  %v744_v23 = vld [vmem:[%s7085_s8 + $0x10c0] sm:$0xff]  ;;  %v1389_v25 = vld [vmem:[%s7085_s8 + $0x24e8] sm:$0xff] }
 0x248   : > { %4044 = vmatprep.mubr.f32.mxu0 %v645_v26  ;;  %v755_v26 = vld [vmem:[%s7085_s8 + $0x1118] sm:$0xff] }
 0x24a   : > { %2250 = vmatmul.mubr.f32.gmra.mrb[214].mxu1 %v1278_v28  ;;  %v1388_v28 = vld [vmem:[%s7085_s8 + $0x24e0] sm:$0xff] }
 0x24b   : > { %4045 = vmatmul.mubr.f32.gmra.mrb[86].mxu0 %v644_v29  ;;  %2254 = vmatprep.mubr.f32.mxu1 %v1289_v31  ;;  %v754_v29 = vld [vmem:[%s7085_s8 + $0x1110] sm:$0xff]  ;;  %v1399_v31 = vld [vmem:[%s7085_s8 + $0x2538] sm:$0xff] }
 0x24c   : > { %4049 = vmatprep.mubr.f32.mxu0 %v655_v32  ;;  %v765_v32 = vld [vmem:[%s7085_s8 + $0x1168] sm:$0xff] }
 0x24e   : > { %2255 = vmatmul.mubr.f32.gmra.mrb[216].mxu1 %v1288_v33  ;;  %v1398_v33 = vld [vmem:[%s7085_s8 + $0x2530] sm:$0xff] }
 0x24f   : > { %4050 = vmatmul.mubr.f32.gmra.mrb[88].mxu0 %v654_v35  ;;  %2259 = vmatprep.mubr.f32.mxu1 %v1299_v37  ;;  %v764_v35 = vld [vmem:[%s7085_s8 + $0x1160] sm:$0xff]  ;;  %v1409_v37 = vld [vmem:[%s7085_s8 + $0x2588] sm:$0xff] }
 0x250   : > { %4054 = vmatprep.mubr.f32.mxu0 %v665_v38  ;;  %v775_v38 = vld [vmem:[%s7085_s8 + $0x11b8] sm:$0xff] }
 0x252   : > { %2260 = vmatmul.mubr.f32.gmra.mrb[218].mxu1 %v1298_v39  ;;  %v1408_v39 = vld [vmem:[%s7085_s8 + $0x2580] sm:$0xff] }
 0x253   : > { %4055 = vmatmul.mubr.f32.gmra.mrb[90].mxu0 %v664_v40  ;;  %2264 = vmatprep.mubr.f32.mxu1 %v1309_v42  ;;  %v774_v40 = vld [vmem:[%s7085_s8 + $0x11b0] sm:$0xff]  ;;  %v1419_v42 = vld [vmem:[%s7085_s8 + $0x25d8] sm:$0xff] }
 0x254   : > { %4059 = vmatprep.mubr.f32.mxu0 %v675_v43  ;;  %v785_v43 = vld [vmem:[%s7085_s8 + $0x1208] sm:$0xff] }
 0x256   : > { %2265 = vmatmul.mubr.f32.gmra.mrb[220].mxu1 %v1308_v45  ;;  %v1418_v45 = vld [vmem:[%s7085_s8 + $0x25d0] sm:$0xff] }
 0x257   : > { %4060 = vmatmul.mubr.f32.gmra.mrb[92].mxu0 %v674_v46  ;;  %2269 = vmatprep.mubr.f32.mxu1 %v1319_v47  ;;  %v784_v46 = vld [vmem:[%s7085_s8 + $0x1200] sm:$0xff]  ;;  %v1429_v47 = vld [vmem:[%s7085_s8 + $0x2628] sm:$0xff] }
 0x258   : > { %4064 = vmatprep.mubr.f32.mxu0 %v685_v48  ;;  %v1638_v48 = vld [vmem:[#allocation6 + $0x4b0] sm:$0xff] }
 0x25a   : > { %2270 = vmatmul.mubr.f32.gmra.mrb[222].mxu1 %v1318_v49  ;;  %v1639_v49 = vld [vmem:[#allocation6 + $0x4b8] sm:$0xff] }
 0x25b   : > { %4065 = vmatmul.mubr.f32.gmra.mrb[94].mxu0 %v684_v51  ;;  %2274 = vmatprep.mubr.f32.mxu1 %v1329_v52  ;;  %v795_v51 = vld [vmem:[%s7085_s8 + $0x1258] sm:$0xff]  ;;  %v5642_v52 = vpack.c.bf16 %v1639_v49, %v1638_v48  ;;  %v261_v48 = vld [vmem:[%s7085_s8 + $0x1a8] sm:$0xff] }
 0x25c   : > { %4069 = vmatprep.mubr.f32.mxu0 %v695_v53  ;;  %v1428_v53 = vld [vmem:[%s7085_s8 + $0x2620] sm:$0xff]  ;;  %v905_v49 = vld [vmem:[%s7085_s8 + $0x15c8] sm:$0xff] }
 0x25d   : > { %5643 = vmatpush1.bf16.msra.mxu0 %v5642_v52  ;;  %v271_v52 = vld [vmem:[%s7085_s8 + $0x1f8] sm:$0xff] }
 0x25e   : > { %2275 = vmatmul.mubr.f32.gmra.mrb[224].mxu1 %v1328_v54  ;;  %v794_v54 = vld [vmem:[%s7085_s8 + $0x1250] sm:$0xff]  ;;  %5644 = vmatprep.subr.bf16.mxu0 %v6915_v0 }
 0x25f   : > { %4070 = vmatmul.mubr.f32.gmra.mrb[96].mxu0 %v694_v55  ;;  %2279 = vmatprep.mubr.f32.mxu1 %v1339_v57  ;;  %v1439_v55 = vld [vmem:[%s7085_s8 + $0x2678] sm:$0xff]  ;;  %v805_v57 = vld [vmem:[%s7085_s8 + $0x12a8] sm:$0xff] }
 0x260   : > { %4074 = vmatprep.mubr.f32.mxu0 %v705_v58  ;;  %v1438_v58 = vld [vmem:[%s7085_s8 + $0x2670] sm:$0xff] }
 0x262   : > { %2280 = vmatmul.mubr.f32.gmra.mrb[226].mxu1 %v1338_v59  ;;  %v804_v59 = vld [vmem:[%s7085_s8 + $0x12a0] sm:$0xff] }
 0x263   : > { %4075 = vmatmul.mubr.f32.gmra.mrb[98].mxu0 %v704_v60  ;;  %2284 = vmatprep.mubr.f32.mxu1 %v1349_v61  ;;  %v1449_v60 = vld [vmem:[%s7085_s8 + $0x26c8] sm:$0xff]  ;;  %v815_v61 = vld [vmem:[%s7085_s8 + $0x12f8] sm:$0xff] }
 0x264   : > { %4079 = vmatprep.mubr.f32.mxu0 %v715_v2  ;;  %v1459_v2 = vld [vmem:[%s7085_s8 + $0x2718] sm:$0xff] }
 0x266   : > { %2285 = vmatmul.mubr.f32.gmra.mrb[228].mxu1 %v1348_v4  ;;  %v1458_v4 = vld [vmem:[%s7085_s8 + $0x2710] sm:$0xff] }
 0x267   : > { %4080 = vmatmul.mubr.f32.gmra.mrb[100].mxu0 %v714_v6  ;;  %2289 = vmatprep.mubr.f32.mxu1 %v1359_v7  ;;  %v824_v6 = vld [vmem:[%s7085_s8 + $0x1340] sm:$0xff]  ;;  %v1469_v7 = vld [vmem:[%s7085_s8 + $0x2768] sm:$0xff] }
 0x268   : > { %4084 = vmatprep.mubr.f32.mxu0 %v725_v9  ;;  %v835_v9 = vld [vmem:[%s7085_s8 + $0x1398] sm:$0xff] }
 0x26a   : > { %2290 = vmatmul.mubr.f32.gmra.mrb[230].mxu1 %v1358_v10  ;;  %v1468_v10 = vld [vmem:[%s7085_s8 + $0x2760] sm:$0xff] }
 0x26b   : > { %4085 = vmatmul.mubr.f32.gmra.mrb[102].mxu0 %v724_v11  ;;  %2294 = vmatprep.mubr.f32.mxu1 %v1369_v14  ;;  %v834_v11 = vld [vmem:[%s7085_s8 + $0x1390] sm:$0xff]  ;;  %v1479_v14 = vld [vmem:[%s7085_s8 + $0x27b8] sm:$0xff] }
 0x26c   : > { %4089 = vmatprep.mubr.f32.mxu0 %v735_v15  ;;  %v845_v15 = vld [vmem:[%s7085_s8 + $0x13e8] sm:$0xff] }
 0x26e   : > { %2295 = vmatmul.mubr.f32.gmra.mrb[232].mxu1 %v1368_v16  ;;  %v1478_v16 = vld [vmem:[%s7085_s8 + $0x27b0] sm:$0xff] }
 0x26f   : > { %4090 = vmatmul.mubr.f32.gmra.mrb[104].mxu0 %v734_v17  ;;  %2299 = vmatprep.mubr.f32.mxu1 %v1379_v19  ;;  %v844_v17 = vld [vmem:[%s7085_s8 + $0x13e0] sm:$0xff]  ;;  %v211_v19 = vld [vmem:[%s7085_s8 + $0x18] sm:$0xff] }
 0x270   : > { %4094 = vmatprep.mubr.f32.mxu0 %v745_v21  ;;  %v855_v21 = vld [vmem:[%s7085_s8 + $0x1438] sm:$0xff] }
 0x272   : > { %2300 = vmatmul.mubr.f32.gmra.mrb[234].mxu1 %v1378_v22  ;;  %v210_v22 = vld [vmem:[%s7085_s8 + $0x10] sm:$0xff] }
 0x273   : > { %4095 = vmatmul.mubr.f32.gmra.mrb[106].mxu0 %v744_v23  ;;  %2304 = vmatprep.mubr.f32.mxu1 %v1389_v25  ;;  %v854_v23 = vld [vmem:[%s7085_s8 + $0x1430] sm:$0xff]  ;;  %v221_v25 = vld [vmem:[%s7085_s8 + $0x68] sm:$0xff] }
 0x274   : > { %4099 = vmatprep.mubr.f32.mxu0 %v755_v26  ;;  %v865_v26 = vld [vmem:[%s7085_s8 + $0x1488] sm:$0xff] }
 0x276   : > { %2305 = vmatmul.mubr.f32.gmra.mrb[236].mxu1 %v1388_v28  ;;  %v220_v28 = vld [vmem:[%s7085_s8 + $0x60] sm:$0xff] }
 0x277   : > { %4100 = vmatmul.mubr.f32.gmra.mrb[108].mxu0 %v754_v29  ;;  %2309 = vmatprep.mubr.f32.mxu1 %v1399_v31  ;;  %v864_v29 = vld [vmem:[%s7085_s8 + $0x1480] sm:$0xff]  ;;  %v231_v31 = vld [vmem:[%s7085_s8 + $0xb8] sm:$0xff] }
 0x278   : > { %4104 = vmatprep.mubr.f32.mxu0 %v765_v32  ;;  %v1640_v32 = vld [vmem:[#allocation6 + $0x4c0] sm:$0xff] }
 0x27a   : > { %2310 = vmatmul.mubr.f32.gmra.mrb[238].mxu1 %v1398_v33  ;;  %v1641_v33 = vld [vmem:[#allocation6 + $0x4c8] sm:$0xff] }
 0x27b   : > { %4105 = vmatmul.mubr.f32.gmra.mrb[110].mxu0 %v764_v35  ;;  %2314 = vmatprep.mubr.f32.mxu1 %v1409_v37  ;;  %v875_v35 = vld [vmem:[%s7085_s8 + $0x14d8] sm:$0xff]  ;;  %v5645_v37 = vpack.c.bf16 %v1641_v33, %v1640_v32  ;;  %v1004_v32 = vld [vmem:[%s7085_s8 + $0x18e0] sm:$0xff] }
 0x27c   : > { %4109 = vmatprep.mubr.f32.mxu0 %v775_v38  ;;  %v874_v38 = vld [vmem:[%s7085_s8 + $0x14d0] sm:$0xff]  ;;  %v371_v33 = vld [vmem:[%s7085_s8 + $0x518] sm:$0xff] }
 0x27d   : > { %5646 = vmatpush1.bf16.msra.mxu0 %v5645_v37  ;;  %v1014_v37 = vld [vmem:[%s7085_s8 + $0x1930] sm:$0xff] }
 0x27e   : > { %2315 = vmatmul.mubr.f32.gmra.mrb[240].mxu1 %v1408_v39  ;;  %v241_v39 = vld [vmem:[%s7085_s8 + $0x108] sm:$0xff]  ;;  %5647 = vmatprep.subr.bf16.mxu0 %v6915_v0 }
 0x27f   : > { %4110 = vmatmul.mubr.f32.gmra.mrb[112].mxu0 %v774_v40  ;;  %2319 = vmatprep.mubr.f32.mxu1 %v1419_v42  ;;  %v885_v40 = vld [vmem:[%s7085_s8 + $0x1528] sm:$0xff]  ;;  %v240_v42 = vld [vmem:[%s7085_s8 + $0x100] sm:$0xff] }
 0x280   : > { %4114 = vmatprep.mubr.f32.mxu0 %v785_v43  ;;  %v884_v43 = vld [vmem:[%s7085_s8 + $0x1520] sm:$0xff] }
 0x282   : > { %2320 = vmatmul.mubr.f32.gmra.mrb[242].mxu1 %v1418_v45  ;;  %v251_v45 = vld [vmem:[%s7085_s8 + $0x158] sm:$0xff] }
 0x283   : > { %4115 = vmatmul.mubr.f32.gmra.mrb[114].mxu0 %v784_v46  ;;  %2324 = vmatprep.mubr.f32.mxu1 %v1429_v47  ;;  %v250_v46 = vld [vmem:[%s7085_s8 + $0x150] sm:$0xff] }
 0x284   : > { %4119 = vmatprep.mubr.f32.mxu0 %v795_v51  ;;  %v894_v47 = vld [vmem:[%s7085_s8 + $0x1570] sm:$0xff]  ;;  %v904_v51 = vld [vmem:[%s7085_s8 + $0x15c0] sm:$0xff] }
 0x286   : > { %2325 = vmatmul.mubr.f32.gmra.mrb[244].mxu1 %v1428_v53  ;;  %v915_v53 = vld [vmem:[%s7085_s8 + $0x1618] sm:$0xff] }
 0x287   : > { %4120 = vmatmul.mubr.f32.gmra.mrb[116].mxu0 %v794_v54  ;;  %2329 = vmatprep.mubr.f32.mxu1 %v1439_v55  ;;  %v914_v54 = vld [vmem:[%s7085_s8 + $0x1610] sm:$0xff]  ;;  %v281_v55 = vld [vmem:[%s7085_s8 + $0x248] sm:$0xff] }
 0x288   : > { %4124 = vmatprep.mubr.f32.mxu0 %v805_v57  ;;  %v925_v57 = vld [vmem:[%s7085_s8 + $0x1668] sm:$0xff] }
 0x28a   : > { %2330 = vmatmul.mubr.f32.gmra.mrb[246].mxu1 %v1438_v58  ;;  %v924_v58 = vld [vmem:[%s7085_s8 + $0x1660] sm:$0xff] }
 0x28b   : > { %4125 = vmatmul.mubr.f32.gmra.mrb[118].mxu0 %v804_v59  ;;  %2334 = vmatprep.mubr.f32.mxu1 %v1449_v60  ;;  %v291_v59 = vld [vmem:[%s7085_s8 + $0x298] sm:$0xff] }
 0x28c   : > { %4129 = vmatprep.mubr.f32.mxu0 %v815_v61  ;;  %v935_v60 = vld [vmem:[%s7085_s8 + $0x16b8] sm:$0xff]  ;;  %v934_v61 = vld [vmem:[%s7085_s8 + $0x16b0] sm:$0xff] }
 0x28e   : > { %2335 = vmatmul.mubr.f32.gmra.mrb[248].mxu1 %v1448_v63  ;;  %v301_v63 = vld [vmem:[%s7085_s8 + $0x2e8] sm:$0xff] }
 0x28f   : > { %4130 = vmatmul.mubr.f32.gmra.mrb[120].mxu0 %v814_v1  ;;  %2339 = vmatprep.mubr.f32.mxu1 %v1459_v2  ;;  %v945_v1 = vld [vmem:[%s7085_s8 + $0x1708] sm:$0xff]  ;;  %v944_v2 = vld [vmem:[%s7085_s8 + $0x1700] sm:$0xff] }
 0x290   : > { %4134 = vmatprep.mubr.f32.mxu0 %v825_v3  ;;  %v311_v3 = vld [vmem:[%s7085_s8 + $0x338] sm:$0xff] }
 0x292   : > { %2340 = vmatmul.mubr.f32.gmra.mrb[250].mxu1 %v1458_v4  ;;  %v1642_v4 = vld [vmem:[#allocation6 + $0x4d0] sm:$0xff] }
 0x293   : > { %4135 = vmatmul.mubr.f32.gmra.mrb[122].mxu0 %v824_v6  ;;  %2344 = vmatprep.mubr.f32.mxu1 %v1469_v7  ;;  %v1643_v6 = vld [vmem:[#allocation6 + $0x4d8] sm:$0xff] }
 0x294   : > { %4139 = vmatprep.mubr.f32.mxu0 %v835_v9  ;;  %v955_v7 = vld [vmem:[%s7085_s8 + $0x1758] sm:$0xff]  ;;  %v310_v9 = vld [vmem:[%s7085_s8 + $0x330] sm:$0xff] }
 0x296   : > { %2345 = vmatmul.mubr.f32.gmra.mrb[252].mxu1 %v1468_v10  ;;  %v954_v10 = vld [vmem:[%s7085_s8 + $0x1750] sm:$0xff] }
 0x297   : > { %4140 = vmatmul.mubr.f32.gmra.mrb[124].mxu0 %v834_v11  ;;  %2349 = vmatprep.mubr.f32.mxu1 %v1479_v14  ;;  %v321_v11 = vld [vmem:[%s7085_s8 + $0x388] sm:$0xff] }
 0x298   : > { %4144 = vmatprep.mubr.f32.mxu0 %v845_v15  ;;  %v965_v14 = vld [vmem:[%s7085_s8 + $0x17a8] sm:$0xff]  ;;  %v964_v15 = vld [vmem:[%s7085_s8 + $0x17a0] sm:$0xff] }
 0x29a   : > { %2350 = vmatmul.mubr.f32.gmra.mrb[254].mxu1 %v1478_v16  ;;  %v331_v16 = vld [vmem:[%s7085_s8 + $0x3d8] sm:$0xff] }
 0x29b   : > { %4145 = vmatmul.mubr.f32.gmra.mrb[126].mxu0 %v844_v17  ;;  %2419 = vmatprep.mubr.f32.mxu1 %v211_v19  ;;  %v975_v17 = vld [vmem:[%s7085_s8 + $0x17f8] sm:$0xff]  ;;  %v974_v19 = vld [vmem:[%s7085_s8 + $0x17f0] sm:$0xff] }
 0x29c   : > { %4149 = vmatprep.mubr.f32.mxu0 %v855_v21  ;;  %v341_v21 = vld [vmem:[%s7085_s8 + $0x428] sm:$0xff] }
 0x29e   : > { %2420 = vmatmul.mubr.f32.vlgmr.msra.gmra.mrb[0].mxu1 %v210_v22  ;;  %v985_v22 = vld [vmem:[%s7085_s8 + $0x1848] sm:$0xff] }
 0x29f   : > { %4150 = vmatmul.mubr.f32.gmra.mrb[128].mxu0 %v854_v23  ;;  %5672 = vmatpush1.bf16.msra.mxu1 %v7097_v8  ;;  %v230_v8 = vld [vmem:[%s7085_s8 + $0xb0] sm:$0xff]  ;;  %v984_v23 = vld [vmem:[%s7085_s8 + $0x1840] sm:$0xff] }
 0x2a0   : > { %2424 = vmatprep.mubr.f32.mxu1 %v221_v25  ;;  %4154 = vmatprep.mubr.f32.mxu0 %v865_v26  ;;  %v351_v25 = vld [vmem:[%s7085_s8 + $0x478] sm:$0xff] }
 0x2a1   : > { %5657 = vmatprep.subr.bf16.mxu1 %v6915_v0  ;;  %v995_v26 = vld [vmem:[%s7085_s8 + $0x1898] sm:$0xff] }
 0x2a2   : > { %2425 = vmatmul.mubr.f32.gmra.mrb[2].mxu1 %v220_v28  ;;  %v994_v28 = vld [vmem:[%s7085_s8 + $0x1890] sm:$0xff] }
 0x2a3   : > { %4155 = vmatmul.mubr.f32.gmra.mrb[130].mxu0 %v864_v29  ;;  %2429 = vmatprep.mubr.f32.mxu1 %v231_v31  ;;  %v361_v29 = vld [vmem:[%s7085_s8 + $0x4c8] sm:$0xff] }
 0x2a4   : > { %4159 = vmatprep.mubr.f32.mxu0 %v875_v35  ;;  %5673 = vmatpush1.bf16.msra.mxu1 %v7101_v12  ;;  %v895_v12 = vld [vmem:[%s7085_s8 + $0x1578] sm:$0xff]  ;;  %v1005_v31 = vld [vmem:[%s7085_s8 + $0x18e8] sm:$0xff] }
 0x2a5   : > { %5658 = vmatprep.subr.bf16.mxu1 %v6915_v0  ;;  %v1015_v35 = vld [vmem:[%s7085_s8 + $0x1938] sm:$0xff] }
 0x2a6   : > { %2430 = vmatmul.mubr.f32.gmra.mrb[4].mxu1 %v230_v8  ;;  %v381_v8 = vld [vmem:[%s7085_s8 + $0x568] sm:$0xff] }
 0x2a7   : > { %4160 = vmatmul.mubr.f32.gmra.mrb[132].mxu0 %v874_v38  ;;  %2434 = vmatprep.mubr.f32.mxu1 %v241_v39  ;;  %v1025_v38 = vld [vmem:[%s7085_s8 + $0x1988] sm:$0xff]  ;;  %v1024_v39 = vld [vmem:[%s7085_s8 + $0x1980] sm:$0xff] }
 0x2a8   : > { %4164 = vmatprep.mubr.f32.mxu0 %v885_v40  ;;  %5674 = vmatpush1.bf16.msra.mxu1 %v7106_v18  ;;  %v260_v18 = vld [vmem:[%s7085_s8 + $0x1a0] sm:$0xff]  ;;  %v391_v40 = vld [vmem:[%s7085_s8 + $0x5b8] sm:$0xff] }
 0x2a9   : > { %5659 = vmatprep.subr.bf16.mxu1 %v6915_v0 }
 0x2aa   : > { %2435 = vmatmul.mubr.f32.gmra.mrb[6].mxu1 %v240_v42  ;;  %v1644_v42 = vld [vmem:[#allocation6 + $0x4e0] sm:$0xff] }
 0x2ab   : > { %4165 = vmatmul.mubr.f32.gmra.mrb[134].mxu0 %v884_v43  ;;  %2439 = vmatprep.mubr.f32.mxu1 %v251_v45  ;;  %v1645_v43 = vld [vmem:[#allocation6 + $0x4e8] sm:$0xff]  ;;  %v1035_v45 = vld [vmem:[%s7085_s8 + $0x19d8] sm:$0xff] }
 0x2ac   : > { %4169 = vmatprep.mubr.f32.mxu0 %v895_v12  ;;  %5675 = vmatpush1.bf16.msra.mxu1 %v7111_v24  ;;  %v270_v24 = vld [vmem:[%s7085_s8 + $0x1f0] sm:$0xff]  ;;  %v5651_v12 = vpack.c.bf16 %v1645_v43, %v1644_v42  ;;  %v541_v43 = vld [vmem:[%s7085_s8 + $0xa68] sm:$0xff] }
 0x2ad   : > { %5660 = vmatprep.subr.bf16.mxu1 %v6915_v0  ;;  %v1174_v42 = vld [vmem:[%s7085_s8 + $0x1e30] sm:$0xff] }
 0x2ae   : > { %2440 = vmatmul.mubr.f32.gmra.mrb[8].mxu1 %v250_v46  ;;  %v1034_v46 = vld [vmem:[%s7085_s8 + $0x19d0] sm:$0xff] }
 0x2af   : > { %4170 = vmatmul.mubr.f32.gmra.mrb[136].mxu0 %v894_v47  ;;  %2444 = vmatprep.mubr.f32.mxu1 %v261_v48  ;;  %v401_v47 = vld [vmem:[%s7085_s8 + $0x608] sm:$0xff] }
 0x2b0   : > { %4174 = vmatprep.mubr.f32.mxu0 %v905_v49  ;;  %5676 = vmatpush1.bf16.msra.mxu1 %v7116_v30  ;;  %v280_v30 = vld [vmem:[%s7085_s8 + $0x240] sm:$0xff]  ;;  %v1045_v48 = vld [vmem:[%s7085_s8 + $0x1a28] sm:$0xff] }
 0x2b1   : > { %5661 = vmatprep.subr.bf16.mxu1 %v6915_v0  ;;  %v400_v49 = vld [vmem:[%s7085_s8 + $0x600] sm:$0xff] }
 0x2b2   : > { %2445 = vmatmul.mubr.f32.gmra.mrb[10].mxu1 %v260_v18  ;;  %v1044_v18 = vld [vmem:[%s7085_s8 + $0x1a20] sm:$0xff] }
 0x2b3   : > { %4175 = vmatmul.mubr.f32.gmra.mrb[138].mxu0 %v904_v51  ;;  %2449 = vmatprep.mubr.f32.mxu1 %v271_v52  ;;  %v411_v51 = vld [vmem:[%s7085_s8 + $0x658] sm:$0xff] }
 0x2b4   : > { %4179 = vmatprep.mubr.f32.mxu0 %v915_v53  ;;  %5677 = vmatpush1.bf16.msra.mxu1 %v7121_v36  ;;  %v290_v36 = vld [vmem:[%s7085_s8 + $0x290] sm:$0xff]  ;;  %v1055_v52 = vld [vmem:[%s7085_s8 + $0x1a78] sm:$0xff] }
 0x2b5   : > { %5662 = vmatprep.subr.bf16.mxu1 %v6915_v0  ;;  %v410_v53 = vld [vmem:[%s7085_s8 + $0x650] sm:$0xff] }
 0x2b6   : > { %2450 = vmatmul.mubr.f32.gmra.mrb[12].mxu1 %v270_v24  ;;  %v421_v24 = vld [vmem:[%s7085_s8 + $0x6a8] sm:$0xff] }
 0x2b7   : > { %4180 = vmatmul.mubr.f32.gmra.mrb[140].mxu0 %v914_v54  ;;  %2454 = vmatprep.mubr.f32.mxu1 %v281_v55  ;;  %v1065_v54 = vld [vmem:[%s7085_s8 + $0x1ac8] sm:$0xff]  ;;  %v420_v55 = vld [vmem:[%s7085_s8 + $0x6a0] sm:$0xff] }
 0x2b8   : > { %4184 = vmatprep.mubr.f32.mxu0 %v925_v57  ;;  %5678 = vmatpush1.bf16.msra.mxu1 %v7128_v44  ;;  %v300_v44 = vld [vmem:[%s7085_s8 + $0x2e0] sm:$0xff] }
 0x2b9   : > { %5663 = vmatprep.subr.bf16.mxu1 %v6915_v0  ;;  %v1064_v57 = vld [vmem:[%s7085_s8 + $0x1ac0] sm:$0xff] }
 0x2ba   : > { %2455 = vmatmul.mubr.f32.gmra.mrb[14].mxu1 %v280_v30  ;;  %v431_v30 = vld [vmem:[%s7085_s8 + $0x6f8] sm:$0xff] }
 0x2bb   : > { %4185 = vmatmul.mubr.f32.gmra.mrb[142].mxu0 %v924_v58  ;;  %2459 = vmatprep.mubr.f32.mxu1 %v291_v59  ;;  %v1075_v58 = vld [vmem:[%s7085_s8 + $0x1b18] sm:$0xff]  ;;  %v430_v59 = vld [vmem:[%s7085_s8 + $0x6f0] sm:$0xff] }
 0x2bc   : > { %4189 = vmatprep.mubr.f32.mxu0 %v935_v60  ;;  %5679 = vmatpush1.bf16.msra.mxu1 %v7133_v50  ;;  %v5648_v50 = vpack.c.bf16 %v1643_v6, %v1642_v4  ;;  %v1074_v60 = vld [vmem:[%s7085_s8 + $0x1b10] sm:$0xff]  ;;  %v461_v6 = vld [vmem:[%s7085_s8 + $0x7e8] sm:$0xff] }
 0x2bd   : > { %5664 = vmatprep.subr.bf16.mxu1 %v6915_v0  ;;  %v1094_v4 = vld [vmem:[%s7085_s8 + $0x1bb0] sm:$0xff] }
 0x2be   : > { %2460 = vmatmul.mubr.f32.gmra.mrb[16].mxu1 %v290_v36  ;;  %5649 = vmatpush1.bf16.msra.mxu0 %v5648_v50  ;;  %v441_v36 = vld [vmem:[%s7085_s8 + $0x748] sm:$0xff]  ;;  %v460_v50 = vld [vmem:[%s7085_s8 + $0x7e0] sm:$0xff] }
 0x2bf   : > { %4190 = vmatmul.mubr.f32.gmra.mrb[144].mxu0 %v934_v61  ;;  %2464 = vmatprep.mubr.f32.mxu1 %v301_v63  ;;  %v1085_v61 = vld [vmem:[%s7085_s8 + $0x1b68] sm:$0xff]  ;;  %v440_v63 = vld [vmem:[%s7085_s8 + $0x740] sm:$0xff] }
 0x2c0   : > { %4194 = vmatprep.mubr.f32.mxu0 %v945_v1  ;;  %5680 = vmatpush1.bf16.msra.mxu1 %v7138_v56  ;;  %v320_v56 = vld [vmem:[%s7085_s8 + $0x380] sm:$0xff] }
 0x2c1   : > { %5665 = vmatprep.subr.bf16.mxu1 %v6915_v0  ;;  %5650 = vmatprep.subr.bf16.mxu0 %v6915_v0  ;;  %v1084_v1 = vld [vmem:[%s7085_s8 + $0x1b60] sm:$0xff] }
 0x2c2   : > { %2465 = vmatmul.mubr.f32.gmra.mrb[18].mxu1 %v300_v44  ;;  %5652 = vmatpush1.bf16.msra.mxu0 %v5651_v12  ;;  %v451_v44 = vld [vmem:[%s7085_s8 + $0x798] sm:$0xff]  ;;  %v540_v12 = vld [vmem:[%s7085_s8 + $0xa60] sm:$0xff] }
 0x2c3   : > { %4195 = vmatmul.mubr.f32.gmra.mrb[146].mxu0 %v944_v2  ;;  %2469 = vmatprep.mubr.f32.mxu1 %v311_v3  ;;  %v1095_v2 = vld [vmem:[%s7085_s8 + $0x1bb8] sm:$0xff]  ;;  %v450_v3 = vld [vmem:[%s7085_s8 + $0x790] sm:$0xff] }
 0x2c4   : > { %4199 = vmatprep.mubr.f32.mxu0 %v955_v7  ;;  %5681 = vmatpush1.bf16.msra.mxu1 %v7143_v62  ;;  %v330_v62 = vld [vmem:[%s7085_s8 + $0x3d0] sm:$0xff]  ;;  %v1105_v7 = vld [vmem:[%s7085_s8 + $0x1c08] sm:$0xff] }
 0x2c5   : > { %5666 = vmatprep.subr.bf16.mxu1 %v6915_v0  ;;  %5653 = vmatprep.subr.bf16.mxu0 %v6915_v0 }
 0x2c6   : > { %2470 = vmatmul.mubr.f32.gmra.mrb[20].mxu1 %v310_v9  ;;  %v1104_v9 = vld [vmem:[%s7085_s8 + $0x1c00] sm:$0xff] }
 0x2c7   : > { %4200 = vmatmul.mubr.f32.gmra.mrb[148].mxu0 %v954_v10  ;;  %2474 = vmatprep.mubr.f32.mxu1 %v321_v11  ;;  %v471_v10 = vld [vmem:[%s7085_s8 + $0x838] sm:$0xff] }
 0x2c8   : > { %4204 = vmatprep.mubr.f32.mxu0 %v965_v14  ;;  %5682 = vmatpush1.bf16.msra.mxu1 %v7148_v5  ;;  %v340_v5 = vld [vmem:[%s7085_s8 + $0x420] sm:$0xff]  ;;  %v1115_v11 = vld [vmem:[%s7085_s8 + $0x1c58] sm:$0xff]  ;;  %v1646_v14 = vld [vmem:[#allocation6 + $0x4f0] sm:$0xff] }
 0x2c9   : > { %5667 = vmatprep.subr.bf16.mxu1 %v6915_v0 }
 0x2ca   : > { %2475 = vmatmul.mubr.f32.gmra.mrb[22].mxu1 %v320_v56  ;;  %v1647_v56 = vld [vmem:[#allocation6 + $0x4f8] sm:$0xff] }
 0x2cb   : > { %4205 = vmatmul.mubr.f32.gmra.mrb[150].mxu0 %v964_v15  ;;  %2479 = vmatprep.mubr.f32.mxu1 %v331_v16  ;;  %v470_v15 = vld [vmem:[%s7085_s8 + $0x830] sm:$0xff]  ;;  %v5654_v16 = vpack.c.bf16 %v1647_v56, %v1646_v14  ;;  %v1264_v14 = vld [vmem:[%s7085_s8 + $0x2100] sm:$0xff]  ;;  %v631_v56 = vld [vmem:[%s7085_s8 + $0xd38] sm:$0xff] }
 0x2cc   : > { %4209 = vmatprep.mubr.f32.mxu0 %v975_v17  ;;  %5683 = vmatpush1.bf16.msra.mxu1 %v7153_v13  ;;  %v350_v13 = vld [vmem:[%s7085_s8 + $0x470] sm:$0xff] }
 0x2cd   : > { %5668 = vmatprep.subr.bf16.mxu1 %v6915_v0  ;;  %v1114_v17 = vld [vmem:[%s7085_s8 + $0x1c50] sm:$0xff]  ;;  %5655 = vmatpush1.bf16.msra.mxu0 %v5654_v16 }
 0x2ce   : > { %2480 = vmatmul.mubr.f32.gmra.mrb[24].mxu1 %v330_v62  ;;  %v481_v62 = vld [vmem:[%s7085_s8 + $0x888] sm:$0xff]  ;;  %v630_v16 = vld [vmem:[%s7085_s8 + $0xd30] sm:$0xff] }
 0x2cf   : > { %4210 = vmatmul.mubr.f32.gmra.mrb[152].mxu0 %v974_v19  ;;  %2484 = vmatprep.mubr.f32.mxu1 %v341_v21  ;;  %v1125_v19 = vld [vmem:[%s7085_s8 + $0x1ca8] sm:$0xff]  ;;  %v480_v21 = vld [vmem:[%s7085_s8 + $0x880] sm:$0xff] }
 0x2d0   : > { %4214 = vmatprep.mubr.f32.mxu0 %v985_v22  ;;  %5684 = vmatpush1.bf16.msra.mxu1 %v7158_v20  ;;  %v360_v20 = vld [vmem:[%s7085_s8 + $0x4c0] sm:$0xff] }
 0x2d1   : > { %5669 = vmatprep.subr.bf16.mxu1 %v6915_v0  ;;  %v1124_v22 = vld [vmem:[%s7085_s8 + $0x1ca0] sm:$0xff] }
 0x2d2   : > { %2485 = vmatmul.mubr.f32.gmra.mrb[26].mxu1 %v340_v5  ;;  %v491_v5 = vld [vmem:[%s7085_s8 + $0x8d8] sm:$0xff] }
 0x2d3   : > { %4215 = vmatmul.mubr.f32.gmra.mrb[154].mxu0 %v984_v23  ;;  %2489 = vmatprep.mubr.f32.mxu1 %v351_v25  ;;  %v1135_v23 = vld [vmem:[%s7085_s8 + $0x1cf8] sm:$0xff]  ;;  %v490_v25 = vld [vmem:[%s7085_s8 + $0x8d0] sm:$0xff] }
 0x2d4   : > { %4219 = vmatprep.mubr.f32.mxu0 %v995_v26  ;;  %5685 = vmatpush1.bf16.msra.mxu1 %v7163_v27  ;;  %v370_v27 = vld [vmem:[%s7085_s8 + $0x510] sm:$0xff] }
 0x2d5   : > { %5670 = vmatprep.subr.bf16.mxu1 %v6915_v0  ;;  %v1134_v26 = vld [vmem:[%s7085_s8 + $0x1cf0] sm:$0xff] }
 0x2d6   : > { %2490 = vmatmul.mubr.f32.gmra.mrb[28].mxu1 %v350_v13  ;;  %v501_v13 = vld [vmem:[%s7085_s8 + $0x928] sm:$0xff] }
 0x2d7   : > { %4220 = vmatmul.mubr.f32.gmra.mrb[156].mxu0 %v994_v28  ;;  %2494 = vmatprep.mubr.f32.mxu1 %v361_v29  ;;  %v1145_v28 = vld [vmem:[%s7085_s8 + $0x1d48] sm:$0xff]  ;;  %v500_v29 = vld [vmem:[%s7085_s8 + $0x920] sm:$0xff] }
 0x2d8   : > { %4224 = vmatprep.mubr.f32.mxu0 %v1005_v31  ;;  %5686 = vmatpush1.bf16.msra.mxu1 %v7168_v34  ;;  %v380_v34 = vld [vmem:[%s7085_s8 + $0x560] sm:$0xff] }
 0x2d9   : > { %5671 = vmatprep.subr.bf16.mxu1 %v6915_v0  ;;  %v1054_v0 = vld [vmem:[%s7085_s8 + $0x1a70] sm:$0xff]  ;;  %v1144_v31 = vld [vmem:[%s7085_s8 + $0x1d40] sm:$0xff] }
 0x2da   : > { %2495 = vmatmul.mubr.f32.gmra.mrb[30].mxu1 %v360_v20  ;;  %v511_v20 = vld [vmem:[%s7085_s8 + $0x978] sm:$0xff] }
 0x2db   : > { %4225 = vmatmul.mubr.f32.gmra.mrb[158].mxu0 %v1004_v32  ;;  %2499 = vmatprep.mubr.f32.mxu1 %v371_v33  ;;  %v1155_v32 = vld [vmem:[%s7085_s8 + $0x1d98] sm:$0xff]  ;;  %v510_v33 = vld [vmem:[%s7085_s8 + $0x970] sm:$0xff] }
 0x2dc   : > { %4229 = vmatprep.mubr.f32.mxu0 %v1015_v35  ;;  %5687 = vmatpush1.bf16.msra.mxu1 %v7173_v41  ;;  %v390_v41 = vld [vmem:[%s7085_s8 + $0x5b0] sm:$0xff] }
 0x2dd   : > { %v1154_v35 = vld [vmem:[%s7085_s8 + $0x1d90] sm:$0xff] }
 0x2de   : > { %2500 = vmatmul.mubr.f32.gmra.mrb[32].mxu1 %v370_v27  ;;  %v521_v27 = vld [vmem:[%s7085_s8 + $0x9c8] sm:$0xff] }
 0x2df   : > { %4230 = vmatmul.mubr.f32.gmra.mrb[160].mxu0 %v1014_v37  ;;  %2504 = vmatprep.mubr.f32.mxu1 %v381_v8  ;;  %v1165_v37 = vld [vmem:[%s7085_s8 + $0x1de8] sm:$0xff]  ;;  %v520_v8 = vld [vmem:[%s7085_s8 + $0x9c0] sm:$0xff] }
 0x2e0   : > { %4234 = vmatprep.mubr.f32.mxu0 %v1025_v38  ;;  %v1164_v38 = vld [vmem:[%s7085_s8 + $0x1de0] sm:$0xff] }
 0x2e2   : > { %2505 = vmatmul.mubr.f32.gmra.mrb[34].mxu1 %v380_v34  ;;  %v531_v34 = vld [vmem:[%s7085_s8 + $0xa18] sm:$0xff] }
 0x2e3   : > { %4235 = vmatmul.mubr.f32.gmra.mrb[162].mxu0 %v1024_v39  ;;  %2509 = vmatprep.mubr.f32.mxu1 %v391_v40  ;;  %v1175_v39 = vld [vmem:[%s7085_s8 + $0x1e38] sm:$0xff]  ;;  %v530_v40 = vld [vmem:[%s7085_s8 + $0xa10] sm:$0xff] }
 0x2e4   : > { %4239 = vmatprep.mubr.f32.mxu0 %v1035_v45  ;;  %v1185_v45 = vld [vmem:[%s7085_s8 + $0x1e88] sm:$0xff] }
 0x2e6   : > { %2510 = vmatmul.mubr.f32.gmra.mrb[36].mxu1 %v390_v41  ;;  %v1184_v41 = vld [vmem:[%s7085_s8 + $0x1e80] sm:$0xff] }
 0x2e7   : > { %4240 = vmatmul.mubr.f32.gmra.mrb[164].mxu0 %v1034_v46  ;;  %2514 = vmatprep.mubr.f32.mxu1 %v401_v47  ;;  %v551_v46 = vld [vmem:[%s7085_s8 + $0xab8] sm:$0xff] }
 0x2e8   : > { %4244 = vmatprep.mubr.f32.mxu0 %v1045_v48  ;;  %v1195_v47 = vld [vmem:[%s7085_s8 + $0x1ed8] sm:$0xff]  ;;  %v550_v48 = vld [vmem:[%s7085_s8 + $0xab0] sm:$0xff] }
 0x2ea   : > { %2515 = vmatmul.mubr.f32.gmra.mrb[38].mxu1 %v400_v49  ;;  %v1194_v49 = vld [vmem:[%s7085_s8 + $0x1ed0] sm:$0xff] }
 0x2eb   : > { %4245 = vmatmul.mubr.f32.gmra.mrb[166].mxu0 %v1044_v18  ;;  %2519 = vmatprep.mubr.f32.mxu1 %v411_v51  ;;  %v561_v18 = vld [vmem:[%s7085_s8 + $0xb08] sm:$0xff] }
 0x2ec   : > { %4249 = vmatprep.mubr.f32.mxu0 %v1055_v52  ;;  %v1205_v51 = vld [vmem:[%s7085_s8 + $0x1f28] sm:$0xff]  ;;  %v560_v52 = vld [vmem:[%s7085_s8 + $0xb00] sm:$0xff] }
 0x2ee   : > { %2520 = vmatmul.mubr.f32.gmra.mrb[40].mxu1 %v410_v53  ;;  %v1204_v53 = vld [vmem:[%s7085_s8 + $0x1f20] sm:$0xff] }
 0x2ef   : > { %4250 = vmatmul.mubr.f32.gmra.mrb[168].mxu0 %v1054_v0  ;;  %2524 = vmatprep.mubr.f32.mxu1 %v421_v24  ;;  %v571_v0 = vld [vmem:[%s7085_s8 + $0xb58] sm:$0xff] }
 0x2f0   : > { %4254 = vmatprep.mubr.f32.mxu0 %v1065_v54  ;;  %v1215_v24 = vld [vmem:[%s7085_s8 + $0x1f78] sm:$0xff]  ;;  %v570_v54 = vld [vmem:[%s7085_s8 + $0xb50] sm:$0xff] }
 0x2f2   : > { %2525 = vmatmul.mubr.f32.gmra.mrb[42].mxu1 %v420_v55  ;;  %v1214_v55 = vld [vmem:[%s7085_s8 + $0x1f70] sm:$0xff] }
 0x2f3   : > { %4255 = vmatmul.mubr.f32.gmra.mrb[170].mxu0 %v1064_v57  ;;  %2529 = vmatprep.mubr.f32.mxu1 %v431_v30  ;;  %v581_v57 = vld [vmem:[%s7085_s8 + $0xba8] sm:$0xff] }
 0x2f4   : > { %4259 = vmatprep.mubr.f32.mxu0 %v1075_v58  ;;  %v1225_v30 = vld [vmem:[%s7085_s8 + $0x1fc8] sm:$0xff]  ;;  %v580_v58 = vld [vmem:[%s7085_s8 + $0xba0] sm:$0xff] }
 0x2f6   : > { %2530 = vmatmul.mubr.f32.gmra.mrb[44].mxu1 %v430_v59  ;;  %v1224_v59 = vld [vmem:[%s7085_s8 + $0x1fc0] sm:$0xff] }
 0x2f7   : > { %4260 = vmatmul.mubr.f32.gmra.mrb[172].mxu0 %v1074_v60  ;;  %2534 = vmatprep.mubr.f32.mxu1 %v441_v36  ;;  %v591_v60 = vld [vmem:[%s7085_s8 + $0xbf8] sm:$0xff] }
 0x2f8   : > { %4264 = vmatprep.mubr.f32.mxu0 %v1085_v61  ;;  %v1235_v36 = vld [vmem:[%s7085_s8 + $0x2018] sm:$0xff]  ;;  %v590_v61 = vld [vmem:[%s7085_s8 + $0xbf0] sm:$0xff] }
 0x2fa   : > { %2535 = vmatmul.mubr.f32.gmra.mrb[46].mxu1 %v440_v63  ;;  %v1234_v63 = vld [vmem:[%s7085_s8 + $0x2010] sm:$0xff] }
 0x2fb   : > { %4265 = vmatmul.mubr.f32.gmra.mrb[174].mxu0 %v1084_v1  ;;  %2539 = vmatprep.mubr.f32.mxu1 %v451_v44  ;;  %v601_v1 = vld [vmem:[%s7085_s8 + $0xc48] sm:$0xff] }
 0x2fc   : > { %4269 = vmatprep.mubr.f32.mxu0 %v1095_v2  ;;  %v1245_v44 = vld [vmem:[%s7085_s8 + $0x2068] sm:$0xff]  ;;  %v600_v2 = vld [vmem:[%s7085_s8 + $0xc40] sm:$0xff] }
 0x2fe   : > { %2540 = vmatmul.mubr.f32.gmra.mrb[48].mxu1 %v450_v3  ;;  %v1244_v3 = vld [vmem:[%s7085_s8 + $0x2060] sm:$0xff] }
 0x2ff   : > { %4270 = vmatmul.mubr.f32.gmra.mrb[176].mxu0 %v1094_v4  ;;  %2544 = vmatprep.mubr.f32.mxu1 %v461_v6  ;;  %v611_v4 = vld [vmem:[%s7085_s8 + $0xc98] sm:$0xff] }
 0x300   : > { %4274 = vmatprep.mubr.f32.mxu0 %v1105_v7  ;;  %v1255_v6 = vld [vmem:[%s7085_s8 + $0x20b8] sm:$0xff]  ;;  %v610_v7 = vld [vmem:[%s7085_s8 + $0xc90] sm:$0xff] }
 0x302   : > { %2545 = vmatmul.mubr.f32.gmra.mrb[50].mxu1 %v460_v50  ;;  %v1254_v50 = vld [vmem:[%s7085_s8 + $0x20b0] sm:$0xff] }
 0x303   : > { %4275 = vmatmul.mubr.f32.gmra.mrb[178].mxu0 %v1104_v9  ;;  %2549 = vmatprep.mubr.f32.mxu1 %v471_v10  ;;  %v621_v9 = vld [vmem:[%s7085_s8 + $0xce8] sm:$0xff] }
 0x304   : > { %4279 = vmatprep.mubr.f32.mxu0 %v1115_v11  ;;  %v1265_v10 = vld [vmem:[%s7085_s8 + $0x2108] sm:$0xff]  ;;  %v620_v11 = vld [vmem:[%s7085_s8 + $0xce0] sm:$0xff] }
 0x306   : > { %2550 = vmatmul.mubr.f32.gmra.mrb[52].mxu1 %v470_v15  ;;  %v1275_v15 = vld [vmem:[%s7085_s8 + $0x2158] sm:$0xff] }
 0x307   : > { %4280 = vmatmul.mubr.f32.gmra.mrb[180].mxu0 %v1114_v17  ;;  %2554 = vmatprep.mubr.f32.mxu1 %v481_v62  ;;  %v1274_v17 = vld [vmem:[%s7085_s8 + $0x2150] sm:$0xff]  ;;  %v641_v62 = vld [vmem:[%s7085_s8 + $0xd88] sm:$0xff] }
 0x308   : > { %4284 = vmatprep.mubr.f32.mxu0 %v1125_v19  ;;  %v1285_v19 = vld [vmem:[%s7085_s8 + $0x21a8] sm:$0xff] }
 0x30a   : > { %2555 = vmatmul.mubr.f32.gmra.mrb[54].mxu1 %v480_v21  ;;  %v640_v21 = vld [vmem:[%s7085_s8 + $0xd80] sm:$0xff] }
 0x30b   : > { %4285 = vmatmul.mubr.f32.gmra.mrb[182].mxu0 %v1124_v22  ;;  %2559 = vmatprep.mubr.f32.mxu1 %v491_v5  ;;  %v1284_v22 = vld [vmem:[%s7085_s8 + $0x21a0] sm:$0xff]  ;;  %v651_v5 = vld [vmem:[%s7085_s8 + $0xdd8] sm:$0xff] }
 0x30c   : > { %4289 = vmatprep.mubr.f32.mxu0 %v1135_v23  ;;  %v1295_v23 = vld [vmem:[%s7085_s8 + $0x21f8] sm:$0xff] }
 0x30e   : > { %2560 = vmatmul.mubr.f32.gmra.mrb[56].mxu1 %v490_v25  ;;  %v650_v25 = vld [vmem:[%s7085_s8 + $0xdd0] sm:$0xff] }
 0x30f   : > { %4290 = vmatmul.mubr.f32.gmra.mrb[184].mxu0 %v1134_v26  ;;  %2564 = vmatprep.mubr.f32.mxu1 %v501_v13  ;;  %v1294_v26 = vld [vmem:[%s7085_s8 + $0x21f0] sm:$0xff]  ;;  %v661_v13 = vld [vmem:[%s7085_s8 + $0xe28] sm:$0xff] }
 0x310   : > { %4294 = vmatprep.mubr.f32.mxu0 %v1145_v28  ;;  %v1305_v28 = vld [vmem:[%s7085_s8 + $0x2248] sm:$0xff] }
 0x312   : > { %2565 = vmatmul.mubr.f32.gmra.mrb[58].mxu1 %v500_v29  ;;  %v660_v29 = vld [vmem:[%s7085_s8 + $0xe20] sm:$0xff] }
 0x313   : > { %4295 = vmatmul.mubr.f32.gmra.mrb[186].mxu0 %v1144_v31  ;;  %2569 = vmatprep.mubr.f32.mxu1 %v511_v20  ;;  %v1304_v31 = vld [vmem:[%s7085_s8 + $0x2240] sm:$0xff]  ;;  %v671_v20 = vld [vmem:[%s7085_s8 + $0xe78] sm:$0xff] }
 0x314   : > { %4299 = vmatprep.mubr.f32.mxu0 %v1155_v32  ;;  %v1315_v32 = vld [vmem:[%s7085_s8 + $0x2298] sm:$0xff] }
 0x316   : > { %2570 = vmatmul.mubr.f32.gmra.mrb[60].mxu1 %v510_v33  ;;  %v670_v33 = vld [vmem:[%s7085_s8 + $0xe70] sm:$0xff] }
 0x317   : > { %4300 = vmatmul.mubr.f32.gmra.mrb[188].mxu0 %v1154_v35  ;;  %2574 = vmatprep.mubr.f32.mxu1 %v521_v27  ;;  %v1314_v35 = vld [vmem:[%s7085_s8 + $0x2290] sm:$0xff]  ;;  %v681_v27 = vld [vmem:[%s7085_s8 + $0xec8] sm:$0xff] }
 0x318   : > { %4304 = vmatprep.mubr.f32.mxu0 %v1165_v37  ;;  %v1325_v37 = vld [vmem:[%s7085_s8 + $0x22e8] sm:$0xff] }
 0x31a   : > { %2575 = vmatmul.mubr.f32.gmra.mrb[62].mxu1 %v520_v8  ;;  %v680_v8 = vld [vmem:[%s7085_s8 + $0xec0] sm:$0xff] }
 0x31b   : > { %4305 = vmatmul.mubr.f32.gmra.mrb[190].mxu0 %v1164_v38  ;;  %2579 = vmatprep.mubr.f32.mxu1 %v531_v34  ;;  %v1324_v38 = vld [vmem:[%s7085_s8 + $0x22e0] sm:$0xff]  ;;  %v691_v34 = vld [vmem:[%s7085_s8 + $0xf18] sm:$0xff] }
 0x31c   : > { %4309 = vmatprep.mubr.f32.mxu0 %v1175_v39  ;;  %v1335_v39 = vld [vmem:[%s7085_s8 + $0x2338] sm:$0xff] }
 0x31e   : > { %2580 = vmatmul.mubr.f32.gmra.mrb[64].mxu1 %v530_v40  ;;  %v690_v40 = vld [vmem:[%s7085_s8 + $0xf10] sm:$0xff] }
 0x31f   : > { %4310 = vmatmul.mubr.f32.gmra.mrb[192].mxu0 %v1174_v42  ;;  %2584 = vmatprep.mubr.f32.mxu1 %v541_v43  ;;  %v1334_v42 = vld [vmem:[%s7085_s8 + $0x2330] sm:$0xff]  ;;  %v701_v43 = vld [vmem:[%s7085_s8 + $0xf68] sm:$0xff] }
 0x320   : > { %4314 = vmatprep.mubr.f32.mxu0 %v1185_v45  ;;  %v1345_v45 = vld [vmem:[%s7085_s8 + $0x2388] sm:$0xff] }
 0x322   : > { %2585 = vmatmul.mubr.f32.gmra.mrb[66].mxu1 %v540_v12  ;;  %v700_v12 = vld [vmem:[%s7085_s8 + $0xf60] sm:$0xff] }
 0x323   : > { %4315 = vmatmul.mubr.f32.gmra.mrb[194].mxu0 %v1184_v41  ;;  %2589 = vmatprep.mubr.f32.mxu1 %v551_v46  ;;  %v1344_v41 = vld [vmem:[%s7085_s8 + $0x2380] sm:$0xff]  ;;  %v711_v46 = vld [vmem:[%s7085_s8 + $0xfb8] sm:$0xff] }
 0x324   : > { %4319 = vmatprep.mubr.f32.mxu0 %v1195_v47  ;;  %v1355_v47 = vld [vmem:[%s7085_s8 + $0x23d8] sm:$0xff] }
 0x326   : > { %2590 = vmatmul.mubr.f32.gmra.mrb[68].mxu1 %v550_v48  ;;  %v710_v48 = vld [vmem:[%s7085_s8 + $0xfb0] sm:$0xff] }
 0x327   : > { %4320 = vmatmul.mubr.f32.gmra.mrb[196].mxu0 %v1194_v49  ;;  %2594 = vmatprep.mubr.f32.mxu1 %v561_v18  ;;  %v1354_v49 = vld [vmem:[%s7085_s8 + $0x23d0] sm:$0xff]  ;;  %v721_v18 = vld [vmem:[%s7085_s8 + $0x1008] sm:$0xff] }
 0x328   : > { %4324 = vmatprep.mubr.f32.mxu0 %v1205_v51  ;;  %v1365_v51 = vld [vmem:[%s7085_s8 + $0x2428] sm:$0xff] }
 0x32a   : > { %2595 = vmatmul.mubr.f32.gmra.mrb[70].mxu1 %v560_v52  ;;  %v720_v52 = vld [vmem:[%s7085_s8 + $0x1000] sm:$0xff] }
 0x32b   : > { %4325 = vmatmul.mubr.f32.gmra.mrb[198].mxu0 %v1204_v53  ;;  %2599 = vmatprep.mubr.f32.mxu1 %v571_v0  ;;  %v1364_v53 = vld [vmem:[%s7085_s8 + $0x2420] sm:$0xff]  ;;  %v731_v0 = vld [vmem:[%s7085_s8 + $0x1058] sm:$0xff] }
 0x32c   : > { %4329 = vmatprep.mubr.f32.mxu0 %v1215_v24  ;;  %v1375_v24 = vld [vmem:[%s7085_s8 + $0x2478] sm:$0xff] }
 0x32e   : > { %2600 = vmatmul.mubr.f32.gmra.mrb[72].mxu1 %v570_v54  ;;  %v730_v54 = vld [vmem:[%s7085_s8 + $0x1050] sm:$0xff] }
 0x32f   : > { %4330 = vmatmul.mubr.f32.gmra.mrb[200].mxu0 %v1214_v55  ;;  %2604 = vmatprep.mubr.f32.mxu1 %v581_v57  ;;  %v1374_v55 = vld [vmem:[%s7085_s8 + $0x2470] sm:$0xff]  ;;  %v741_v57 = vld [vmem:[%s7085_s8 + $0x10a8] sm:$0xff] }
 0x330   : > { %4334 = vmatprep.mubr.f32.mxu0 %v1225_v30  ;;  %v1385_v30 = vld [vmem:[%s7085_s8 + $0x24c8] sm:$0xff] }
 0x332   : > { %2605 = vmatmul.mubr.f32.gmra.mrb[74].mxu1 %v580_v58  ;;  %v740_v58 = vld [vmem:[%s7085_s8 + $0x10a0] sm:$0xff] }
 0x333   : > { %4335 = vmatmul.mubr.f32.gmra.mrb[202].mxu0 %v1224_v59  ;;  %2609 = vmatprep.mubr.f32.mxu1 %v591_v60  ;;  %v1384_v59 = vld [vmem:[%s7085_s8 + $0x24c0] sm:$0xff]  ;;  %v751_v60 = vld [vmem:[%s7085_s8 + $0x10f8] sm:$0xff] }
 0x334   : > { %4339 = vmatprep.mubr.f32.mxu0 %v1235_v36 }
 0x336   : > { %2610 = vmatmul.mubr.f32.gmra.mrb[76].mxu1 %v590_v61  ;;  %v1395_v61 = vld [vmem:[%s7085_s8 + $0x2518] sm:$0xff] }
 0x337   : > { %4340 = vmatmul.mubr.f32.gmra.mrb[204].mxu0 %v1234_v63  ;;  %2614 = vmatprep.mubr.f32.mxu1 %v601_v1  ;;  %v750_v1 = vld [vmem:[%s7085_s8 + $0x10f0] sm:$0xff] }
 0x338   : > { %4344 = vmatprep.mubr.f32.mxu0 %v1245_v44  ;;  %v1394_v44 = vld [vmem:[%s7085_s8 + $0x2510] sm:$0xff] }
 0x33a   : > { %2615 = vmatmul.mubr.f32.gmra.mrb[78].mxu1 %v600_v2  ;;  %v761_v2 = vld [vmem:[%s7085_s8 + $0x1148] sm:$0xff] }
 0x33b   : > { %4345 = vmatmul.mubr.f32.gmra.mrb[206].mxu0 %v1244_v3  ;;  %2619 = vmatprep.mubr.f32.mxu1 %v611_v4  ;;  %v1405_v4 = vld [vmem:[%s7085_s8 + $0x2568] sm:$0xff] }
 0x33c   : > { %4349 = vmatprep.mubr.f32.mxu0 %v1255_v6 }
 0x33e   : > { %2620 = vmatmul.mubr.f32.gmra.mrb[80].mxu1 %v610_v7  ;;  %v760_v7 = vld [vmem:[%s7085_s8 + $0x1140] sm:$0xff] }
 0x33f   : > { %4350 = vmatmul.mubr.f32.gmra.mrb[208].mxu0 %v1254_v50  ;;  %2624 = vmatprep.mubr.f32.mxu1 %v621_v9  ;;  %v1404_v50 = vld [vmem:[%s7085_s8 + $0x2560] sm:$0xff]  ;;  %v771_v9 = vld [vmem:[%s7085_s8 + $0x1198] sm:$0xff] }
 0x340   : > { %4354 = vmatprep.mubr.f32.mxu0 %v1265_v10 }
 0x342   : > { %2625 = vmatmul.mubr.f32.gmra.mrb[82].mxu1 %v620_v11  ;;  %v1415_v11 = vld [vmem:[%s7085_s8 + $0x25b8] sm:$0xff] }
 0x343   : > { %4355 = vmatmul.mubr.f32.gmra.mrb[210].mxu0 %v1264_v14  ;;  %2629 = vmatprep.mubr.f32.mxu1 %v631_v56  ;;  %v770_v56 = vld [vmem:[%s7085_s8 + $0x1190] sm:$0xff] }
 0x344   : > { %4359 = vmatprep.mubr.f32.mxu0 %v1275_v15  ;;  %v1414_v15 = vld [vmem:[%s7085_s8 + $0x25b0] sm:$0xff] }
 0x346   : > { %2630 = vmatmul.mubr.f32.gmra.mrb[84].mxu1 %v630_v16  ;;  %v781_v16 = vld [vmem:[%s7085_s8 + $0x11e8] sm:$0xff] }
 0x347   : > { %4360 = vmatmul.mubr.f32.gmra.mrb[212].mxu0 %v1274_v17  ;;  %2634 = vmatprep.mubr.f32.mxu1 %v641_v62  ;;  %v1425_v62 = vld [vmem:[%s7085_s8 + $0x2608] sm:$0xff] }
 0x348   : > { %4364 = vmatprep.mubr.f32.mxu0 %v1285_v19 }
 0x34a   : > { %2635 = vmatmul.mubr.f32.gmra.mrb[86].mxu1 %v640_v21  ;;  %v780_v21 = vld [vmem:[%s7085_s8 + $0x11e0] sm:$0xff] }
 0x34b   : > { %4365 = vmatmul.mubr.f32.gmra.mrb[214].mxu0 %v1284_v22  ;;  %2639 = vmatprep.mubr.f32.mxu1 %v651_v5  ;;  %v1424_v22 = vld [vmem:[%s7085_s8 + $0x2600] sm:$0xff]  ;;  %v791_v5 = vld [vmem:[%s7085_s8 + $0x1238] sm:$0xff] }
 0x34c   : > { %4369 = vmatprep.mubr.f32.mxu0 %v1295_v23 }
 0x34e   : > { %2640 = vmatmul.mubr.f32.gmra.mrb[88].mxu1 %v650_v25  ;;  %v1435_v25 = vld [vmem:[%s7085_s8 + $0x2658] sm:$0xff] }
 0x34f   : > { %4370 = vmatmul.mubr.f32.gmra.mrb[216].mxu0 %v1294_v26  ;;  %2644 = vmatprep.mubr.f32.mxu1 %v661_v13  ;;  %v790_v13 = vld [vmem:[%s7085_s8 + $0x1230] sm:$0xff] }
 0x350   : > { %4374 = vmatprep.mubr.f32.mxu0 %v1305_v28  ;;  %v1434_v28 = vld [vmem:[%s7085_s8 + $0x2650] sm:$0xff] }
 0x352   : > { %2645 = vmatmul.mubr.f32.gmra.mrb[90].mxu1 %v660_v29  ;;  %v801_v29 = vld [vmem:[%s7085_s8 + $0x1288] sm:$0xff] }
 0x353   : > { %4375 = vmatmul.mubr.f32.gmra.mrb[218].mxu0 %v1304_v31  ;;  %2649 = vmatprep.mubr.f32.mxu1 %v671_v20  ;;  %v1445_v20 = vld [vmem:[%s7085_s8 + $0x26a8] sm:$0xff] }
 0x354   : > { %4379 = vmatprep.mubr.f32.mxu0 %v1315_v32 }
 0x356   : > { %2650 = vmatmul.mubr.f32.gmra.mrb[92].mxu1 %v670_v33  ;;  %v800_v33 = vld [vmem:[%s7085_s8 + $0x1280] sm:$0xff] }
 0x357   : > { %4380 = vmatmul.mubr.f32.gmra.mrb[220].mxu0 %v1314_v35  ;;  %2654 = vmatprep.mubr.f32.mxu1 %v681_v27  ;;  %v1444_v35 = vld [vmem:[%s7085_s8 + $0x26a0] sm:$0xff]  ;;  %v811_v27 = vld [vmem:[%s7085_s8 + $0x12d8] sm:$0xff] }
 0x358   : > { %4384 = vmatprep.mubr.f32.mxu0 %v1325_v37 }
 0x35a   : > { %2655 = vmatmul.mubr.f32.gmra.mrb[94].mxu1 %v680_v8  ;;  %v1455_v8 = vld [vmem:[%s7085_s8 + $0x26f8] sm:$0xff] }
 0x35b   : > { %4385 = vmatmul.mubr.f32.gmra.mrb[222].mxu0 %v1324_v38  ;;  %2659 = vmatprep.mubr.f32.mxu1 %v691_v34  ;;  %v810_v34 = vld [vmem:[%s7085_s8 + $0x12d0] sm:$0xff] }
 0x35c   : > { %4389 = vmatprep.mubr.f32.mxu0 %v1335_v39  ;;  %v1454_v39 = vld [vmem:[%s7085_s8 + $0x26f0] sm:$0xff] }
 0x35e   : > { %2660 = vmatmul.mubr.f32.gmra.mrb[96].mxu1 %v690_v40  ;;  %v821_v40 = vld [vmem:[%s7085_s8 + $0x1328] sm:$0xff] }
 0x35f   : > { %4390 = vmatmul.mubr.f32.gmra.mrb[224].mxu0 %v1334_v42  ;;  %2664 = vmatprep.mubr.f32.mxu1 %v701_v43  ;;  %v1465_v43 = vld [vmem:[%s7085_s8 + $0x2748] sm:$0xff] }
 0x360   : > { %4394 = vmatprep.mubr.f32.mxu0 %v1345_v45 }
 0x362   : > { %2665 = vmatmul.mubr.f32.gmra.mrb[98].mxu1 %v700_v12  ;;  %v820_v12 = vld [vmem:[%s7085_s8 + $0x1320] sm:$0xff] }
 0x363   : > { %4395 = vmatmul.mubr.f32.gmra.mrb[226].mxu0 %v1344_v41  ;;  %2669 = vmatprep.mubr.f32.mxu1 %v711_v46  ;;  %v1464_v41 = vld [vmem:[%s7085_s8 + $0x2740] sm:$0xff]  ;;  %v831_v46 = vld [vmem:[%s7085_s8 + $0x1378] sm:$0xff] }
 0x364   : > { %4399 = vmatprep.mubr.f32.mxu0 %v1355_v47 }
 0x366   : > { %2670 = vmatmul.mubr.f32.gmra.mrb[100].mxu1 %v710_v48  ;;  %v1475_v48 = vld [vmem:[%s7085_s8 + $0x2798] sm:$0xff] }
 0x367   : > { %4400 = vmatmul.mubr.f32.gmra.mrb[228].mxu0 %v1354_v49  ;;  %2674 = vmatprep.mubr.f32.mxu1 %v721_v18  ;;  %v830_v18 = vld [vmem:[%s7085_s8 + $0x1370] sm:$0xff] }
 0x368   : > { %4404 = vmatprep.mubr.f32.mxu0 %v1365_v51  ;;  %v1474_v51 = vld [vmem:[%s7085_s8 + $0x2790] sm:$0xff] }
 0x36a   : > { %2675 = vmatmul.mubr.f32.gmra.mrb[102].mxu1 %v720_v52  ;;  %v841_v52 = vld [vmem:[%s7085_s8 + $0x13c8] sm:$0xff] }
 0x36b   : > { %4405 = vmatmul.mubr.f32.gmra.mrb[230].mxu0 %v1364_v53  ;;  %2679 = vmatprep.mubr.f32.mxu1 %v731_v0  ;;  %v1485_v0 = vld [vmem:[%s7085_s8 + $0x27e8] sm:$0xff] }
 0x36c   : > { %4409 = vmatprep.mubr.f32.mxu0 %v1375_v24 }
 0x36e   : > { %2680 = vmatmul.mubr.f32.gmra.mrb[104].mxu1 %v730_v54  ;;  %v840_v54 = vld [vmem:[%s7085_s8 + $0x13c0] sm:$0xff] }
 0x36f   : > { %4410 = vmatmul.mubr.f32.gmra.mrb[232].mxu0 %v1374_v55  ;;  %2684 = vmatprep.mubr.f32.mxu1 %v741_v57  ;;  %v1484_v55 = vld [vmem:[%s7085_s8 + $0x27e0] sm:$0xff]  ;;  %v851_v57 = vld [vmem:[%s7085_s8 + $0x1418] sm:$0xff] }
 0x370   : > { %4414 = vmatprep.mubr.f32.mxu0 %v1385_v30 }
 0x371   : > { %v7984_v36 = vpop.f32.mrb[0].mxu1 }
 0x372   : > { %v2423_v63 = vpop.f32.mrb[1].mxu1  ;;  %2685 = vmatmul.mubr.f32.gmra.mrb[106].mxu1 %v740_v58  ;;  %v217_v58 = vld [vmem:[%s7085_s8 + $0x48] sm:$0xff] }
 0x373   : > { %4415 = vmatmul.mubr.f32.gmra.mrb[234].mxu0 %v1384_v59  ;;  %2689 = vmatprep.mubr.f32.mxu1 %v751_v60  ;;  %v850_v60 = vld [vmem:[%s7085_s8 + $0x1410] sm:$0xff]  ;;  %v861_v63 = vld [vmem:[%s7085_s8 + $0x1468] sm:$0xff] }
 0x374   : > { %4419 = vmatprep.mubr.f32.mxu0 %v1395_v61  ;;  %v216_v61 = vld [vmem:[%s7085_s8 + $0x40] sm:$0xff] }
 0x375   : > { %v7990_v3 = vpop.f32.mrb[2].mxu1 }
 0x376   : > { %v2428_v6 = vpop.f32.mrb[3].mxu1  ;;  %2690 = vmatmul.mubr.f32.gmra.mrb[108].mxu1 %v750_v1 }
 0x377   : > { %4420 = vmatmul.mubr.f32.gmra.mrb[236].mxu0 %v1394_v44  ;;  %2694 = vmatprep.mubr.f32.mxu1 %v761_v2  ;;  %v227_v44 = vld [vmem:[%s7085_s8 + $0x98] sm:$0xff]  ;;  %v226_v6 = vld [vmem:[%s7085_s8 + $0x90] sm:$0xff] }
 0x378   : > { %4424 = vmatprep.mubr.f32.mxu0 %v1405_v4  ;;  %v860_v4 = vld [vmem:[%s7085_s8 + $0x1460] sm:$0xff] }
 0x379   : > { %v7996_v10 = vpop.f32.mrb[4].mxu1 }
 0x37a   : > { %v2433_v14 = vpop.f32.mrb[5].mxu1  ;;  %2695 = vmatmul.mubr.f32.gmra.mrb[110].mxu1 %v760_v7  ;;  %v871_v7 = vld [vmem:[%s7085_s8 + $0x14b8] sm:$0xff] }
 0x37b   : > { %4425 = vmatmul.mubr.f32.gmra.mrb[238].mxu0 %v1404_v50  ;;  %2699 = vmatprep.mubr.f32.mxu1 %v771_v9  ;;  %v237_v9 = vld [vmem:[%s7085_s8 + $0xe8] sm:$0xff]  ;;  %v870_v14 = vld [vmem:[%s7085_s8 + $0x14b0] sm:$0xff] }
 0x37c   : > { %4429 = vmatprep.mubr.f32.mxu0 %v1415_v11 }
 0x37d   : > { %v8002_v17 = vpop.f32.mrb[6].mxu1 }
 0x37e   : > { %v2438_v19 = vpop.f32.mrb[7].mxu1  ;;  %2700 = vmatmul.mubr.f32.gmra.mrb[112].mxu1 %v770_v56  ;;  %v236_v56 = vld [vmem:[%s7085_s8 + $0xe0] sm:$0xff] }
 0x37f   : > { %4430 = vmatmul.mubr.f32.gmra.mrb[240].mxu0 %v1414_v15  ;;  %2704 = vmatprep.mubr.f32.mxu1 %v781_v16  ;;  %v881_v15 = vld [vmem:[%s7085_s8 + $0x1508] sm:$0xff] }
 0x380   : > { %4434 = vmatprep.mubr.f32.mxu0 %v1425_v62  ;;  %v247_v62 = vld [vmem:[%s7085_s8 + $0x138] sm:$0xff] }
 0x381   : > { %v8008_v23 = vpop.f32.mrb[8].mxu1 }
 0x382   : > { %v2443_v26 = vpop.f32.mrb[9].mxu1  ;;  %2705 = vmatmul.mubr.f32.gmra.mrb[114].mxu1 %v780_v21  ;;  %v880_v21 = vld [vmem:[%s7085_s8 + $0x1500] sm:$0xff] }
 0x383   : > { %4435 = vmatmul.mubr.f32.gmra.mrb[242].mxu0 %v1424_v22  ;;  %2709 = vmatprep.mubr.f32.mxu1 %v791_v5  ;;  %v246_v22 = vld [vmem:[%s7085_s8 + $0x130] sm:$0xff]  ;;  %v891_v5 = vld [vmem:[%s7085_s8 + $0x1558] sm:$0xff]  ;;  %v257_v26 = vld [vmem:[%s7085_s8 + $0x188] sm:$0xff] }
 0x384   : > { %4439 = vmatprep.mubr.f32.mxu0 %v1435_v25 }
 0x385   : > { %v8014_v31 = vpop.f32.mrb[10].mxu1 }
 0x386   : > { %v2448_v32 = vpop.f32.mrb[11].mxu1  ;;  %2710 = vmatmul.mubr.f32.gmra.mrb[116].mxu1 %v790_v13 }
 0x387   : > { %4440 = vmatmul.mubr.f32.gmra.mrb[244].mxu0 %v1434_v28  ;;  %2714 = vmatprep.mubr.f32.mxu1 %v801_v29  ;;  %v890_v28 = vld [vmem:[%s7085_s8 + $0x1550] sm:$0xff]  ;;  %v256_v29 = vld [vmem:[%s7085_s8 + $0x180] sm:$0xff] }
 0x388   : > { %4444 = vmatprep.mubr.f32.mxu0 %v1445_v20  ;;  %v901_v20 = vld [vmem:[%s7085_s8 + $0x15a8] sm:$0xff] }
 0x389   : > { %v8020_v37 = vpop.f32.mrb[12].mxu1 }
 0x38a   : > { %v2453_v38 = vpop.f32.mrb[13].mxu1  ;;  %2715 = vmatmul.mubr.f32.gmra.mrb[118].mxu1 %v800_v33  ;;  %v267_v33 = vld [vmem:[%s7085_s8 + $0x1d8] sm:$0xff] }
 0x38b   : > { %4445 = vmatmul.mubr.f32.gmra.mrb[246].mxu0 %v1444_v35  ;;  %2719 = vmatprep.mubr.f32.mxu1 %v811_v27  ;;  %v900_v27 = vld [vmem:[%s7085_s8 + $0x15a0] sm:$0xff]  ;;  %v911_v38 = vld [vmem:[%s7085_s8 + $0x15f8] sm:$0xff] }
 0x38c   : > { %4449 = vmatprep.mubr.f32.mxu0 %v1455_v8  ;;  %v266_v8 = vld [vmem:[%s7085_s8 + $0x1d0] sm:$0xff] }
 0x38d   : > { %v8026_v42 = vpop.f32.mrb[14].mxu1 }
 0x38e   : > { %v2458_v45 = vpop.f32.mrb[15].mxu1  ;;  %2720 = vmatmul.mubr.f32.gmra.mrb[120].mxu1 %v810_v34 }
 0x38f   : > { %4450 = vmatmul.mubr.f32.gmra.mrb[248].mxu0 %v1454_v39  ;;  %2724 = vmatprep.mubr.f32.mxu1 %v821_v40  ;;  %v277_v39 = vld [vmem:[%s7085_s8 + $0x228] sm:$0xff]  ;;  %v276_v45 = vld [vmem:[%s7085_s8 + $0x220] sm:$0xff] }
 0x390   : > { %4454 = vmatprep.mubr.f32.mxu0 %v1465_v43  ;;  %v910_v43 = vld [vmem:[%s7085_s8 + $0x15f0] sm:$0xff] }
 0x391   : > { %v8032_v47 = vpop.f32.mrb[16].mxu1 }
 0x392   : > { %v2463_v49 = vpop.f32.mrb[17].mxu1  ;;  %2725 = vmatmul.mubr.f32.gmra.mrb[122].mxu1 %v820_v12  ;;  %v921_v12 = vld [vmem:[%s7085_s8 + $0x1648] sm:$0xff] }
 0x393   : > { %4455 = vmatmul.mubr.f32.gmra.mrb[250].mxu0 %v1464_v41  ;;  %2729 = vmatprep.mubr.f32.mxu1 %v831_v46  ;;  %v287_v46 = vld [vmem:[%s7085_s8 + $0x278] sm:$0xff]  ;;  %v920_v49 = vld [vmem:[%s7085_s8 + $0x1640] sm:$0xff] }
 0x394   : > { %4459 = vmatprep.mubr.f32.mxu0 %v1475_v48 }
 0x395   : > { %v8038_v53 = vpop.f32.mrb[18].mxu1 }
 0x396   : > { %v2468_v24 = vpop.f32.mrb[19].mxu1  ;;  %2730 = vmatmul.mubr.f32.gmra.mrb[124].mxu1 %v830_v18  ;;  %v286_v18 = vld [vmem:[%s7085_s8 + $0x270] sm:$0xff] }
 0x397   : > { %4460 = vmatmul.mubr.f32.gmra.mrb[252].mxu0 %v1474_v51  ;;  %2734 = vmatprep.mubr.f32.mxu1 %v841_v52  ;;  %v931_v51 = vld [vmem:[%s7085_s8 + $0x1698] sm:$0xff] }
 0x398   : > { %4464 = vmatprep.mubr.f32.mxu0 %v1485_v0  ;;  %v297_v0 = vld [vmem:[%s7085_s8 + $0x2c8] sm:$0xff] }
 0x399   : > { %v8044_v30 = vpop.f32.mrb[20].mxu1 }
 0x39a   : > { %v2473_v59 = vpop.f32.mrb[21].mxu1  ;;  %2735 = vmatmul.mubr.f32.gmra.mrb[126].mxu1 %v840_v54  ;;  %v930_v54 = vld [vmem:[%s7085_s8 + $0x1690] sm:$0xff] }
 0x39b   : > { %4465 = vmatmul.mubr.f32.gmra.mrb[254].mxu0 %v1484_v55  ;;  %2739 = vmatprep.mubr.f32.mxu1 %v851_v57  ;;  %v296_v55 = vld [vmem:[%s7085_s8 + $0x2c0] sm:$0xff]  ;;  %v941_v57 = vld [vmem:[%s7085_s8 + $0x16e8] sm:$0xff]  ;;  %v307_v59 = vld [vmem:[%s7085_s8 + $0x318] sm:$0xff] }
 0x39c   : > { %4534 = vmatprep.mubr.f32.mxu0 %v217_v58 }
 0x39d   : > { %v8050_v1 = vpop.f32.mrb[22].mxu1 }
 0x39e   : > { %v2478_v2 = vpop.f32.mrb[23].mxu1  ;;  %2740 = vmatmul.mubr.f32.gmra.mrb[128].mxu1 %v850_v60 }
 0x39f   : > { %4535 = vmatmul.mubr.f32.vlgmr.msra.gmra.mrb[0].mxu0 %v216_v61  ;;  %2744 = vmatprep.mubr.f32.mxu1 %v861_v63  ;;  %v940_v61 = vld [vmem:[%s7085_s8 + $0x16e0] sm:$0xff]  ;;  %v306_v63 = vld [vmem:[%s7085_s8 + $0x310] sm:$0xff] }
 0x3a0   : > { %4539 = vmatprep.mubr.f32.mxu0 %v227_v44  ;;  %v951_v44 = vld [vmem:[%s7085_s8 + $0x1738] sm:$0xff] }
 0x3a1   : > { %v8056_v50 = vpop.f32.mrb[24].mxu1 }
 0x3a2   : > { %v2483_v11 = vpop.f32.mrb[25].mxu1  ;;  %2745 = vmatmul.mubr.f32.gmra.mrb[130].mxu1 %v860_v4  ;;  %v317_v4 = vld [vmem:[%s7085_s8 + $0x368] sm:$0xff] }
 0x3a3   : > { %4540 = vmatmul.mubr.f32.gmra.mrb[2].mxu0 %v226_v6  ;;  %2749 = vmatprep.mubr.f32.mxu1 %v871_v7  ;;  %v950_v7 = vld [vmem:[%s7085_s8 + $0x1730] sm:$0xff]  ;;  %v961_v11 = vld [vmem:[%s7085_s8 + $0x1788] sm:$0xff] }
 0x3a4   : > { %4544 = vmatprep.mubr.f32.mxu0 %v237_v9  ;;  %v316_v9 = vld [vmem:[%s7085_s8 + $0x360] sm:$0xff] }
 0x3a5   : > { %v8062_v16 = vpop.f32.mrb[26].mxu1 }
 0x3a6   : > { %v2488_v19 = vpop.f32.mrb[27].mxu1  ;;  %2750 = vmatmul.mubr.f32.gmra.mrb[132].mxu1 %v870_v14 }
 0x3a7   : > { %4545 = vmatmul.mubr.f32.gmra.mrb[4].mxu0 %v236_v56  ;;  %2754 = vmatprep.mubr.f32.mxu1 %v881_v15  ;;  %v327_v56 = vld [vmem:[%s7085_s8 + $0x3b8] sm:$0xff]  ;;  %v326_v19 = vld [vmem:[%s7085_s8 + $0x3b0] sm:$0xff] }
 0x3a8   : > { %4549 = vmatprep.mubr.f32.mxu0 %v247_v62  ;;  %v960_v62 = vld [vmem:[%s7085_s8 + $0x1780] sm:$0xff] }
 0x3a9   : > { %v8068_v25 = vpop.f32.mrb[28].mxu1 }
 0x3aa   : > { %v2493_v13 = vpop.f32.mrb[29].mxu1  ;;  %2755 = vmatmul.mubr.f32.gmra.mrb[134].mxu1 %v880_v21  ;;  %v971_v21 = vld [vmem:[%s7085_s8 + $0x17d8] sm:$0xff] }
 0x3ab   : > { %4550 = vmatmul.mubr.f32.gmra.mrb[6].mxu0 %v246_v22  ;;  %2759 = vmatprep.mubr.f32.mxu1 %v891_v5  ;;  %v337_v5 = vld [vmem:[%s7085_s8 + $0x408] sm:$0xff]  ;;  %v970_v13 = vld [vmem:[%s7085_s8 + $0x17d0] sm:$0xff] }
 0x3ac   : > { %4554 = vmatprep.mubr.f32.mxu0 %v257_v26 }
 0x3ad   : > { %v8074_v32 = vpop.f32.mrb[30].mxu1 }
 0x3ae   : > { %v2498_v35 = vpop.f32.mrb[31].mxu1  ;;  %2760 = vmatmul.mubr.f32.gmra.mrb[136].mxu1 %v890_v28  ;;  %v336_v28 = vld [vmem:[%s7085_s8 + $0x400] sm:$0xff] }
 0x3af   : > { %4555 = vmatmul.mubr.f32.gmra.mrb[8].mxu0 %v256_v29  ;;  %2764 = vmatprep.mubr.f32.mxu1 %v901_v20  ;;  %v981_v29 = vld [vmem:[%s7085_s8 + $0x1828] sm:$0xff] }
 0x3b0   : > { %4559 = vmatprep.mubr.f32.mxu0 %v267_v33  ;;  %v347_v33 = vld [vmem:[%s7085_s8 + $0x458] sm:$0xff] }
 0x3b1   : > { %v8080_v34 = vpop.f32.mrb[32].mxu1 }
 0x3b2   : > { %v2503_v40 = vpop.f32.mrb[33].mxu1  ;;  %2765 = vmatmul.mubr.f32.gmra.mrb[138].mxu1 %v900_v27  ;;  %v980_v27 = vld [vmem:[%s7085_s8 + $0x1820] sm:$0xff] }
 0x3b3   : > { %4560 = vmatmul.mubr.f32.gmra.mrb[10].mxu0 %v266_v8  ;;  %2769 = vmatprep.mubr.f32.mxu1 %v911_v38  ;;  %v346_v8 = vld [vmem:[%s7085_s8 + $0x450] sm:$0xff]  ;;  %v991_v38 = vld [vmem:[%s7085_s8 + $0x1878] sm:$0xff]  ;;  %v357_v40 = vld [vmem:[%s7085_s8 + $0x4a8] sm:$0xff] }
 0x3b4   : > { %4564 = vmatprep.mubr.f32.mxu0 %v277_v39 }
 0x3b5   : > { %v8086_v41 = vpop.f32.mrb[34].mxu1 }
 0x3b6   : > { %v2508_v48 = vpop.f32.mrb[35].mxu1  ;;  %2770 = vmatmul.mubr.f32.gmra.mrb[140].mxu1 %v910_v43 }
 0x3b7   : > { %4565 = vmatmul.mubr.f32.gmra.mrb[12].mxu0 %v276_v45  ;;  %2774 = vmatprep.mubr.f32.mxu1 %v921_v12  ;;  %v990_v45 = vld [vmem:[%s7085_s8 + $0x1870] sm:$0xff]  ;;  %v356_v12 = vld [vmem:[%s7085_s8 + $0x4a0] sm:$0xff] }
 0x3b8   : > { %4569 = vmatprep.mubr.f32.mxu0 %v287_v46  ;;  %v1001_v46 = vld [vmem:[%s7085_s8 + $0x18c8] sm:$0xff] }
 0x3b9   : > { %v8092_v52 = vpop.f32.mrb[36].mxu1 }
 0x3ba   : > { %v2513_v24 = vpop.f32.mrb[37].mxu1  ;;  %2775 = vmatmul.mubr.f32.gmra.mrb[142].mxu1 %v920_v49  ;;  %v367_v49 = vld [vmem:[%s7085_s8 + $0x4f8] sm:$0xff] }
 0x3bb   : > { %4570 = vmatmul.mubr.f32.gmra.mrb[14].mxu0 %v286_v18  ;;  %2779 = vmatprep.mubr.f32.mxu1 %v931_v51  ;;  %v1000_v51 = vld [vmem:[%s7085_s8 + $0x18c0] sm:$0xff]  ;;  %v1011_v24 = vld [vmem:[%s7085_s8 + $0x1918] sm:$0xff] }
 0x3bc   : > { %4574 = vmatprep.mubr.f32.mxu0 %v297_v0  ;;  %v366_v0 = vld [vmem:[%s7085_s8 + $0x4f0] sm:$0xff] }
 0x3bd   : > { %v8098_v58 = vpop.f32.mrb[38].mxu1 }
 0x3be   : > { %v2518_v60 = vpop.f32.mrb[39].mxu1  ;;  %2780 = vmatmul.mubr.f32.gmra.mrb[144].mxu1 %v930_v54 }
 0x3bf   : > { %4575 = vmatmul.mubr.f32.gmra.mrb[16].mxu0 %v296_v55  ;;  %2784 = vmatprep.mubr.f32.mxu1 %v941_v57  ;;  %v377_v55 = vld [vmem:[%s7085_s8 + $0x548] sm:$0xff]  ;;  %v376_v60 = vld [vmem:[%s7085_s8 + $0x540] sm:$0xff] }
 0x3c0   : > { %4579 = vmatprep.mubr.f32.mxu0 %v307_v59  ;;  %v1010_v59 = vld [vmem:[%s7085_s8 + $0x1910] sm:$0xff] }
 0x3c1   : > { %v8104_v2 = vpop.f32.mrb[40].mxu1 }
 0x3c2   : > { %v2523_v6 = vpop.f32.mrb[41].mxu1  ;;  %2785 = vmatmul.mubr.f32.gmra.mrb[146].mxu1 %v940_v61  ;;  %v1021_v61 = vld [vmem:[%s7085_s8 + $0x1968] sm:$0xff] }
 0x3c3   : > { %4580 = vmatmul.mubr.f32.gmra.mrb[18].mxu0 %v306_v63  ;;  %2789 = vmatprep.mubr.f32.mxu1 %v951_v44  ;;  %v387_v44 = vld [vmem:[%s7085_s8 + $0x598] sm:$0xff]  ;;  %v1020_v6 = vld [vmem:[%s7085_s8 + $0x1960] sm:$0xff] }
 0x3c4   : > { %4584 = vmatprep.mubr.f32.mxu0 %v317_v4 }
 0x3c5   : > { %v8110_v14 = vpop.f32.mrb[42].mxu1 }
 0x3c6   : > { %v2528_v15 = vpop.f32.mrb[43].mxu1  ;;  %2790 = vmatmul.mubr.f32.gmra.mrb[148].mxu1 %v950_v7  ;;  %v386_v7 = vld [vmem:[%s7085_s8 + $0x590] sm:$0xff] }
 0x3c7   : > { %4585 = vmatmul.mubr.f32.gmra.mrb[20].mxu0 %v316_v9  ;;  %2794 = vmatprep.mubr.f32.mxu1 %v961_v11  ;;  %v1031_v9 = vld [vmem:[%s7085_s8 + $0x19b8] sm:$0xff] }
 0x3c8   : > { %4589 = vmatprep.mubr.f32.mxu0 %v327_v56  ;;  %v397_v56 = vld [vmem:[%s7085_s8 + $0x5e8] sm:$0xff] }
 0x3c9   : > { %v8116_v22 = vpop.f32.mrb[44].mxu1 }
 0x3ca   : > { %v2533_v26 = vpop.f32.mrb[45].mxu1  ;;  %2795 = vmatmul.mubr.f32.gmra.mrb[150].mxu1 %v960_v62  ;;  %v1030_v62 = vld [vmem:[%s7085_s8 + $0x19b0] sm:$0xff] }
 0x3cb   : > { %4590 = vmatmul.mubr.f32.gmra.mrb[22].mxu0 %v326_v19  ;;  %2799 = vmatprep.mubr.f32.mxu1 %v971_v21  ;;  %v396_v19 = vld [vmem:[%s7085_s8 + $0x5e0] sm:$0xff]  ;;  %v1041_v21 = vld [vmem:[%s7085_s8 + $0x1a08] sm:$0xff]  ;;  %v407_v26 = vld [vmem:[%s7085_s8 + $0x638] sm:$0xff] }
 0x3cc   : > { %4594 = vmatprep.mubr.f32.mxu0 %v337_v5 }
 0x3cd   : > { %v8122_v20 = vpop.f32.mrb[46].mxu1 }
 0x3ce   : > { %v2538_v35 = vpop.f32.mrb[47].mxu1  ;;  %2800 = vmatmul.mubr.f32.gmra.mrb[152].mxu1 %v970_v13 }
 0x3cf   : > { %4595 = vmatmul.mubr.f32.gmra.mrb[24].mxu0 %v336_v28  ;;  %2804 = vmatprep.mubr.f32.mxu1 %v981_v29  ;;  %v1040_v28 = vld [vmem:[%s7085_s8 + $0x1a00] sm:$0xff]  ;;  %v406_v29 = vld [vmem:[%s7085_s8 + $0x630] sm:$0xff] }
 0x3d0   : > { %4599 = vmatprep.mubr.f32.mxu0 %v347_v33  ;;  %v1051_v33 = vld [vmem:[%s7085_s8 + $0x1a58] sm:$0xff] }
 0x3d1   : > { %v8128_v39 = vpop.f32.mrb[48].mxu1 }
 0x3d2   : > { %v2543_v43 = vpop.f32.mrb[49].mxu1  ;;  %2805 = vmatmul.mubr.f32.gmra.mrb[154].mxu1 %v980_v27  ;;  %v417_v27 = vld [vmem:[%s7085_s8 + $0x688] sm:$0xff] }
 0x3d3   : > { %4600 = vmatmul.mubr.f32.gmra.mrb[26].mxu0 %v346_v8  ;;  %2809 = vmatprep.mubr.f32.mxu1 %v991_v38  ;;  %v1050_v38 = vld [vmem:[%s7085_s8 + $0x1a50] sm:$0xff]  ;;  %v1061_v43 = vld [vmem:[%s7085_s8 + $0x1aa8] sm:$0xff] }
 0x3d4   : > { %4604 = vmatprep.mubr.f32.mxu0 %v357_v40  ;;  %v416_v40 = vld [vmem:[%s7085_s8 + $0x680] sm:$0xff] }
 0x3d5   : > { %v8134_v48 = vpop.f32.mrb[50].mxu1 }
 0x3d6   : > { %v2548_v18 = vpop.f32.mrb[51].mxu1  ;;  %2810 = vmatmul.mubr.f32.gmra.mrb[156].mxu1 %v990_v45 }
 0x3d7   : > { %4605 = vmatmul.mubr.f32.gmra.mrb[28].mxu0 %v356_v12  ;;  %2814 = vmatprep.mubr.f32.mxu1 %v1001_v46  ;;  %v427_v12 = vld [vmem:[%s7085_s8 + $0x6d8] sm:$0xff]  ;;  %v426_v18 = vld [vmem:[%s7085_s8 + $0x6d0] sm:$0xff] }
 0x3d8   : > { %4609 = vmatprep.mubr.f32.mxu0 %v367_v49  ;;  %v1060_v49 = vld [vmem:[%s7085_s8 + $0x1aa0] sm:$0xff] }
 0x3d9   : > { %v8140_v54 = vpop.f32.mrb[52].mxu1 }
 0x3da   : > { %v2553_v57 = vpop.f32.mrb[53].mxu1  ;;  %2815 = vmatmul.mubr.f32.gmra.mrb[158].mxu1 %v1000_v51  ;;  %v1071_v51 = vld [vmem:[%s7085_s8 + $0x1af8] sm:$0xff] }
 0x3db   : > { %4610 = vmatmul.mubr.f32.gmra.mrb[30].mxu0 %v366_v0  ;;  %2819 = vmatprep.mubr.f32.mxu1 %v1011_v24  ;;  %v437_v24 = vld [vmem:[%s7085_s8 + $0x728] sm:$0xff]  ;;  %v1070_v57 = vld [vmem:[%s7085_s8 + $0x1af0] sm:$0xff] }
 0x3dc   : > { %4614 = vmatprep.mubr.f32.mxu0 %v377_v55 }
 0x3dd   : > { %v8146_v63 = vpop.f32.mrb[54].mxu1 }
 0x3de   : > { %v2558_v4 = vpop.f32.mrb[55].mxu1  ;;  %2820 = vmatmul.mubr.f32.gmra.mrb[160].mxu1 %v1010_v59  ;;  %v436_v59 = vld [vmem:[%s7085_s8 + $0x720] sm:$0xff] }
 0x3df   : > { %4615 = vmatmul.mubr.f32.gmra.mrb[32].mxu0 %v376_v60  ;;  %2824 = vmatprep.mubr.f32.mxu1 %v1021_v61  ;;  %v1081_v60 = vld [vmem:[%s7085_s8 + $0x1b48] sm:$0xff] }
 0x3e0   : > { %4619 = vmatprep.mubr.f32.mxu0 %v387_v44  ;;  %v447_v44 = vld [vmem:[%s7085_s8 + $0x778] sm:$0xff] }
 0x3e1   : > { %v8152_v11 = vpop.f32.mrb[56].mxu1 }
 0x3e2   : > { %v2563_v15 = vpop.f32.mrb[57].mxu1  ;;  %2825 = vmatmul.mubr.f32.gmra.mrb[162].mxu1 %v1020_v6  ;;  %v1080_v6 = vld [vmem:[%s7085_s8 + $0x1b40] sm:$0xff] }
 0x3e3   : > { %4620 = vmatmul.mubr.f32.gmra.mrb[34].mxu0 %v386_v7  ;;  %2829 = vmatprep.mubr.f32.mxu1 %v1031_v9  ;;  %v446_v7 = vld [vmem:[%s7085_s8 + $0x770] sm:$0xff]  ;;  %v1091_v9 = vld [vmem:[%s7085_s8 + $0x1b98] sm:$0xff]  ;;  %v457_v15 = vld [vmem:[%s7085_s8 + $0x7c8] sm:$0xff] }
 0x3e4   : > { %4624 = vmatprep.mubr.f32.mxu0 %v397_v56 }
 0x3e5   : > { %v8158_v5 = vpop.f32.mrb[58].mxu1 }
 0x3e6   : > { %v2568_v13 = vpop.f32.mrb[59].mxu1  ;;  %2830 = vmatmul.mubr.f32.gmra.mrb[164].mxu1 %v1030_v62 }
 0x3e7   : > { %4625 = vmatmul.mubr.f32.gmra.mrb[36].mxu0 %v396_v19  ;;  %2834 = vmatprep.mubr.f32.mxu1 %v1041_v21  ;;  %v1090_v19 = vld [vmem:[%s7085_s8 + $0x1b90] sm:$0xff]  ;;  %v456_v21 = vld [vmem:[%s7085_s8 + $0x7c0] sm:$0xff] }
 0x3e8   : > { %4629 = vmatprep.mubr.f32.mxu0 %v407_v26  ;;  %v1101_v26 = vld [vmem:[%s7085_s8 + $0x1be8] sm:$0xff] }
 0x3e9   : > { %v8164_v35 = vpop.f32.mrb[60].mxu1 }
 0x3ea   : > { %v2573_v8 = vpop.f32.mrb[61].mxu1  ;;  %2835 = vmatmul.mubr.f32.gmra.mrb[166].mxu1 %v1040_v28  ;;  %v467_v28 = vld [vmem:[%s7085_s8 + $0x818] sm:$0xff] }
 0x3eb   : > { %4630 = vmatmul.mubr.f32.gmra.mrb[38].mxu0 %v406_v29  ;;  %2839 = vmatprep.mubr.f32.mxu1 %v1051_v33  ;;  %v1100_v33 = vld [vmem:[%s7085_s8 + $0x1be0] sm:$0xff]  ;;  %v1111_v8 = vld [vmem:[%s7085_s8 + $0x1c38] sm:$0xff] }
 0x3ec   : > { %4634 = vmatprep.mubr.f32.mxu0 %v417_v27  ;;  %v466_v27 = vld [vmem:[%s7085_s8 + $0x810] sm:$0xff] }
 0x3ed   : > { %v8170_v45 = vpop.f32.mrb[62].mxu1 }
 0x3ee   : > { %v2578_v46 = vpop.f32.mrb[63].mxu1  ;;  %2840 = vmatmul.mubr.f32.gmra.mrb[168].mxu1 %v1050_v38 }
 0x3ef   : > { %4635 = vmatmul.mubr.f32.gmra.mrb[40].mxu0 %v416_v40  ;;  %2844 = vmatprep.mubr.f32.mxu1 %v1061_v43  ;;  %v477_v40 = vld [vmem:[%s7085_s8 + $0x868] sm:$0xff]  ;;  %v476_v46 = vld [vmem:[%s7085_s8 + $0x860] sm:$0xff] }
 0x3f0   : > { %4639 = vmatprep.mubr.f32.mxu0 %v427_v12  ;;  %v1110_v12 = vld [vmem:[%s7085_s8 + $0x1c30] sm:$0xff] }
 0x3f1   : > { %v8176_v0 = vpop.f32.mrb[64].mxu1 }
 0x3f2   : > { %v2583_v55 = vpop.f32.mrb[65].mxu1  ;;  %2845 = vmatmul.mubr.f32.gmra.mrb[170].mxu1 %v1060_v49  ;;  %v1121_v49 = vld [vmem:[%s7085_s8 + $0x1c88] sm:$0xff] }
 0x3f3   : > { %4640 = vmatmul.mubr.f32.gmra.mrb[42].mxu0 %v426_v18  ;;  %2849 = vmatprep.mubr.f32.mxu1 %v1071_v51  ;;  %v487_v51 = vld [vmem:[%s7085_s8 + $0x8b8] sm:$0xff]  ;;  %v1120_v55 = vld [vmem:[%s7085_s8 + $0x1c80] sm:$0xff] }
 0x3f4   : > { %4644 = vmatprep.mubr.f32.mxu0 %v437_v24 }
 0x3f5   : > { %v8182_v61 = vpop.f32.mrb[66].mxu1 }
 0x3f6   : > { %v2588_v4 = vpop.f32.mrb[67].mxu1  ;;  %2850 = vmatmul.mubr.f32.gmra.mrb[172].mxu1 %v1070_v57  ;;  %v486_v57 = vld [vmem:[%s7085_s8 + $0x8b0] sm:$0xff] }
 0x3f7   : > { %4645 = vmatmul.mubr.f32.gmra.mrb[44].mxu0 %v436_v59  ;;  %2854 = vmatprep.mubr.f32.mxu1 %v1081_v60  ;;  %v1131_v59 = vld [vmem:[%s7085_s8 + $0x1cd8] sm:$0xff] }
 0x3f8   : > { %4649 = vmatprep.mubr.f32.mxu0 %v447_v44  ;;  %v497_v44 = vld [vmem:[%s7085_s8 + $0x908] sm:$0xff] }
 0x3f9   : > { %v8188_v56 = vpop.f32.mrb[68].mxu1 }
 0x3fa   : > { %v2593_v62 = vpop.f32.mrb[69].mxu1  ;;  %2855 = vmatmul.mubr.f32.gmra.mrb[174].mxu1 %v1080_v6  ;;  %v1130_v6 = vld [vmem:[%s7085_s8 + $0x1cd0] sm:$0xff] }
 0x3fb   : > { %4650 = vmatmul.mubr.f32.gmra.mrb[46].mxu0 %v446_v7  ;;  %2859 = vmatprep.mubr.f32.mxu1 %v1091_v9  ;;  %v496_v7 = vld [vmem:[%s7085_s8 + $0x900] sm:$0xff]  ;;  %v1141_v9 = vld [vmem:[%s7085_s8 + $0x1d28] sm:$0xff]  ;;  %v507_v62 = vld [vmem:[%s7085_s8 + $0x958] sm:$0xff] }
 0x3fc   : > { %4654 = vmatprep.mubr.f32.mxu0 %v457_v15 }
 0x3fd   : > { %v8194_v13 = vpop.f32.mrb[70].mxu1 }
 0x3fe   : > { %v2598_v29 = vpop.f32.mrb[71].mxu1  ;;  %2860 = vmatmul.mubr.f32.gmra.mrb[176].mxu1 %v1090_v19 }
 0x3ff   : > { %4655 = vmatmul.mubr.f32.gmra.mrb[48].mxu0 %v456_v21  ;;  %2864 = vmatprep.mubr.f32.mxu1 %v1101_v26  ;;  %v1140_v21 = vld [vmem:[%s7085_s8 + $0x1d20] sm:$0xff]  ;;  %v506_v26 = vld [vmem:[%s7085_s8 + $0x950] sm:$0xff] }
 0x400   : > { %4659 = vmatprep.mubr.f32.mxu0 %v467_v28  ;;  %v1151_v28 = vld [vmem:[%s7085_s8 + $0x1d78] sm:$0xff] }
 0x401   : > { %v8200_v38 = vpop.f32.mrb[72].mxu1 }
 0x402   : > { %v2603_v43 = vpop.f32.mrb[73].mxu1  ;;  %2865 = vmatmul.mubr.f32.gmra.mrb[178].mxu1 %v1100_v33  ;;  %v517_v33 = vld [vmem:[%s7085_s8 + $0x9a8] sm:$0xff] }
 0x403   : > { %4660 = vmatmul.mubr.f32.gmra.mrb[50].mxu0 %v466_v27  ;;  %2869 = vmatprep.mubr.f32.mxu1 %v1111_v8  ;;  %v1150_v8 = vld [vmem:[%s7085_s8 + $0x1d70] sm:$0xff]  ;;  %v1161_v43 = vld [vmem:[%s7085_s8 + $0x1dc8] sm:$0xff] }
 0x404   : > { %4664 = vmatprep.mubr.f32.mxu0 %v477_v40  ;;  %v516_v40 = vld [vmem:[%s7085_s8 + $0x9a0] sm:$0xff] }
 0x405   : > { %v8206_v18 = vpop.f32.mrb[74].mxu1 }
 0x406   : > { %v2608_v24 = vpop.f32.mrb[75].mxu1  ;;  %2870 = vmatmul.mubr.f32.gmra.mrb[180].mxu1 %v1110_v12 }
 0x407   : > { %4665 = vmatmul.mubr.f32.gmra.mrb[52].mxu0 %v476_v46  ;;  %2874 = vmatprep.mubr.f32.mxu1 %v1121_v49  ;;  %v527_v46 = vld [vmem:[%s7085_s8 + $0x9f8] sm:$0xff]  ;;  %v526_v24 = vld [vmem:[%s7085_s8 + $0x9f0] sm:$0xff] }
 0x408   : > { %4669 = vmatprep.mubr.f32.mxu0 %v487_v51  ;;  %v1160_v51 = vld [vmem:[%s7085_s8 + $0x1dc0] sm:$0xff] }
 0x409   : > { %v8212_v60 = vpop.f32.mrb[76].mxu1 }
 0x40a   : > { %v2613_v4 = vpop.f32.mrb[77].mxu1  ;;  %2875 = vmatmul.mubr.f32.gmra.mrb[182].mxu1 %v1120_v55  ;;  %v1171_v55 = vld [vmem:[%s7085_s8 + $0x1e18] sm:$0xff] }
 0x40b   : > { %4670 = vmatmul.mubr.f32.gmra.mrb[54].mxu0 %v486_v57  ;;  %2879 = vmatprep.mubr.f32.mxu1 %v1131_v59  ;;  %v537_v59 = vld [vmem:[%s7085_s8 + $0xa48] sm:$0xff]  ;;  %v1170_v4 = vld [vmem:[%s7085_s8 + $0x1e10] sm:$0xff] }
 0x40c   : > { %4674 = vmatprep.mubr.f32.mxu0 %v497_v44 }
 0x40d   : > { %v8218_v15 = vpop.f32.mrb[78].mxu1 }
 0x40e   : > { %v2618_v19 = vpop.f32.mrb[79].mxu1  ;;  %2880 = vmatmul.mubr.f32.gmra.mrb[184].mxu1 %v1130_v6  ;;  %v536_v6 = vld [vmem:[%s7085_s8 + $0xa40] sm:$0xff] }
 0x40f   : > { %4675 = vmatmul.mubr.f32.gmra.mrb[56].mxu0 %v496_v7  ;;  %2884 = vmatprep.mubr.f32.mxu1 %v1141_v9  ;;  %v1181_v7 = vld [vmem:[%s7085_s8 + $0x1e68] sm:$0xff] }
 0x410   : > { %4679 = vmatprep.mubr.f32.mxu0 %v507_v62  ;;  %v547_v62 = vld [vmem:[%s7085_s8 + $0xa98] sm:$0xff] }
 0x411   : > { %v8224_v29 = vpop.f32.mrb[80].mxu1 }
 0x412   : > { %v2623_v27 = vpop.f32.mrb[81].mxu1  ;;  %2885 = vmatmul.mubr.f32.gmra.mrb[186].mxu1 %v1140_v21  ;;  %v1180_v21 = vld [vmem:[%s7085_s8 + $0x1e60] sm:$0xff] }
 0x413   : > { %4680 = vmatmul.mubr.f32.gmra.mrb[58].mxu0 %v506_v26  ;;  %2889 = vmatprep.mubr.f32.mxu1 %v1151_v28  ;;  %v546_v26 = vld [vmem:[%s7085_s8 + $0xa90] sm:$0xff]  ;;  %v1191_v28 = vld [vmem:[%s7085_s8 + $0x1eb8] sm:$0xff]  ;;  %v557_v27 = vld [vmem:[%s7085_s8 + $0xae8] sm:$0xff] }
 0x414   : > { %4684 = vmatprep.mubr.f32.mxu0 %v517_v33 }
 0x415   : > { %v8230_v12 = vpop.f32.mrb[82].mxu1 }
 0x416   : > { %v2628_v49 = vpop.f32.mrb[83].mxu1  ;;  %2890 = vmatmul.mubr.f32.gmra.mrb[188].mxu1 %v1150_v8 }
 0x417   : > { %4685 = vmatmul.mubr.f32.gmra.mrb[60].mxu0 %v516_v40  ;;  %2894 = vmatprep.mubr.f32.mxu1 %v1161_v43  ;;  %v1190_v40 = vld [vmem:[%s7085_s8 + $0x1eb0] sm:$0xff]  ;;  %v556_v43 = vld [vmem:[%s7085_s8 + $0xae0] sm:$0xff] }
 0x418   : > { %4689 = vmatprep.mubr.f32.mxu0 %v527_v46  ;;  %v1201_v46 = vld [vmem:[%s7085_s8 + $0x1f08] sm:$0xff] }
 0x419   : > { %v8236_v57 = vpop.f32.mrb[84].mxu1 }
 0x41a   : > { %v2633_v44 = vpop.f32.mrb[85].mxu1  ;;  %2895 = vmatmul.mubr.f32.gmra.mrb[190].mxu1 %v1160_v51  ;;  %v567_v51 = vld [vmem:[%s7085_s8 + $0xb38] sm:$0xff] }
 0x41b   : > { %4690 = vmatmul.mubr.f32.gmra.mrb[62].mxu0 %v526_v24  ;;  %2899 = vmatprep.mubr.f32.mxu1 %v1171_v55  ;;  %v1200_v55 = vld [vmem:[%s7085_s8 + $0x1f00] sm:$0xff]  ;;  %v1211_v44 = vld [vmem:[%s7085_s8 + $0x1f58] sm:$0xff] }
 0x41c   : > { %4694 = vmatprep.mubr.f32.mxu0 %v537_v59  ;;  %v566_v59 = vld [vmem:[%s7085_s8 + $0xb30] sm:$0xff] }
 0x41d   : > { %v8242_v9 = vpop.f32.mrb[86].mxu1 }
 0x41e   : > { %v2638_v19 = vpop.f32.mrb[87].mxu1  ;;  %2900 = vmatmul.mubr.f32.gmra.mrb[192].mxu1 %v1170_v4 }
 0x41f   : > { %4695 = vmatmul.mubr.f32.gmra.mrb[64].mxu0 %v536_v6  ;;  %2904 = vmatprep.mubr.f32.mxu1 %v1181_v7  ;;  %v577_v6 = vld [vmem:[%s7085_s8 + $0xb88] sm:$0xff]  ;;  %v576_v19 = vld [vmem:[%s7085_s8 + $0xb80] sm:$0xff] }
 0x420   : > { %4699 = vmatprep.mubr.f32.mxu0 %v547_v62  ;;  %v1210_v62 = vld [vmem:[%s7085_s8 + $0x1f50] sm:$0xff] }
 0x421   : > { %v8248_v33 = vpop.f32.mrb[88].mxu1 }
 0x422   : > { %v2643_v8 = vpop.f32.mrb[89].mxu1  ;;  %2905 = vmatmul.mubr.f32.gmra.mrb[194].mxu1 %v1180_v21  ;;  %v1221_v21 = vld [vmem:[%s7085_s8 + $0x1fa8] sm:$0xff] }
 0x423   : > { %4700 = vmatmul.mubr.f32.gmra.mrb[66].mxu0 %v546_v26  ;;  %2909 = vmatprep.mubr.f32.mxu1 %v1191_v28  ;;  %v587_v28 = vld [vmem:[%s7085_s8 + $0xbd8] sm:$0xff]  ;;  %v1220_v8 = vld [vmem:[%s7085_s8 + $0x1fa0] sm:$0xff] }
 0x424   : > { %4704 = vmatprep.mubr.f32.mxu0 %v557_v27 }
 0x425   : > { %v8254_v49 = vpop.f32.mrb[90].mxu1 }
 0x426   : > { %v2648_v24 = vpop.f32.mrb[91].mxu1  ;;  %2910 = vmatmul.mubr.f32.gmra.mrb[196].mxu1 %v1190_v40  ;;  %v586_v40 = vld [vmem:[%s7085_s8 + $0xbd0] sm:$0xff] }
 0x427   : > { %4705 = vmatmul.mubr.f32.gmra.mrb[68].mxu0 %v556_v43  ;;  %2914 = vmatprep.mubr.f32.mxu1 %v1201_v46  ;;  %v1231_v43 = vld [vmem:[%s7085_s8 + $0x1ff8] sm:$0xff] }
 0x428   : > { %4709 = vmatprep.mubr.f32.mxu0 %v567_v51  ;;  %v597_v51 = vld [vmem:[%s7085_s8 + $0xc28] sm:$0xff] }
 0x429   : > { %v8260_v4 = vpop.f32.mrb[92].mxu1 }
 0x42a   : > { %v2653_v7 = vpop.f32.mrb[93].mxu1  ;;  %2915 = vmatmul.mubr.f32.gmra.mrb[198].mxu1 %v1200_v55  ;;  %v1230_v55 = vld [vmem:[%s7085_s8 + $0x1ff0] sm:$0xff] }
 0x42b   : > { %4710 = vmatmul.mubr.f32.gmra.mrb[70].mxu0 %v566_v59  ;;  %2919 = vmatprep.mubr.f32.mxu1 %v1211_v44  ;;  %v596_v59 = vld [vmem:[%s7085_s8 + $0xc20] sm:$0xff]  ;;  %v1241_v44 = vld [vmem:[%s7085_s8 + $0x2048] sm:$0xff]  ;;  %v607_v7 = vld [vmem:[%s7085_s8 + $0xc78] sm:$0xff] }
 0x42c   : > { %4714 = vmatprep.mubr.f32.mxu0 %v577_v6 }
 0x42d   : > { %v8266_v26 = vpop.f32.mrb[94].mxu1 }
 0x42e   : > { %v2658_v27 = vpop.f32.mrb[95].mxu1  ;;  %2920 = vmatmul.mubr.f32.gmra.mrb[200].mxu1 %v1210_v62 }
 0x42f   : > { %4715 = vmatmul.mubr.f32.gmra.mrb[72].mxu0 %v576_v19  ;;  %2924 = vmatprep.mubr.f32.mxu1 %v1221_v21  ;;  %v1240_v19 = vld [vmem:[%s7085_s8 + $0x2040] sm:$0xff]  ;;  %v606_v21 = vld [vmem:[%s7085_s8 + $0xc70] sm:$0xff] }
 0x430   : > { %4719 = vmatprep.mubr.f32.mxu0 %v587_v28  ;;  %v1251_v28 = vld [vmem:[%s7085_s8 + $0x2098] sm:$0xff] }
 0x431   : > { %v8272_v46 = vpop.f32.mrb[96].mxu1 }
 0x432   : > { %v2663_v24 = vpop.f32.mrb[97].mxu1  ;;  %2925 = vmatmul.mubr.f32.gmra.mrb[202].mxu1 %v1220_v8  ;;  %v617_v8 = vld [vmem:[%s7085_s8 + $0xcc8] sm:$0xff] }
 0x433   : > { %4720 = vmatmul.mubr.f32.gmra.mrb[74].mxu0 %v586_v40  ;;  %2929 = vmatprep.mubr.f32.mxu1 %v1231_v43  ;;  %v1250_v43 = vld [vmem:[%s7085_s8 + $0x2090] sm:$0xff]  ;;  %v1261_v24 = vld [vmem:[%s7085_s8 + $0x20e8] sm:$0xff] }
 0x434   : > { %4724 = vmatprep.mubr.f32.mxu0 %v597_v51  ;;  %v616_v51 = vld [vmem:[%s7085_s8 + $0xcc0] sm:$0xff] }
 0x435   : > { %v8278_v6 = vpop.f32.mrb[98].mxu1 }
 0x436   : > { %v2668_v62 = vpop.f32.mrb[99].mxu1  ;;  %2930 = vmatmul.mubr.f32.gmra.mrb[204].mxu1 %v1230_v55 }
 0x437   : > { %4725 = vmatmul.mubr.f32.gmra.mrb[76].mxu0 %v596_v59  ;;  %2934 = vmatprep.mubr.f32.mxu1 %v1241_v44  ;;  %v627_v59 = vld [vmem:[%s7085_s8 + $0xd18] sm:$0xff]  ;;  %v626_v62 = vld [vmem:[%s7085_s8 + $0xd10] sm:$0xff] }
 0x438   : > { %4729 = vmatprep.mubr.f32.mxu0 %v607_v7  ;;  %v1260_v7 = vld [vmem:[%s7085_s8 + $0x20e0] sm:$0xff] }
 0x439   : > { %v8284_v27 = vpop.f32.mrb[100].mxu1 }
 0x43a   : > { %v2673_v40 = vpop.f32.mrb[101].mxu1  ;;  %2935 = vmatmul.mubr.f32.gmra.mrb[206].mxu1 %v1240_v19  ;;  %v1271_v19 = vld [vmem:[%s7085_s8 + $0x2138] sm:$0xff] }
 0x43b   : > { %4730 = vmatmul.mubr.f32.gmra.mrb[78].mxu0 %v606_v21  ;;  %2939 = vmatprep.mubr.f32.mxu1 %v1251_v28  ;;  %v637_v28 = vld [vmem:[%s7085_s8 + $0xd68] sm:$0xff]  ;;  %v1270_v40 = vld [vmem:[%s7085_s8 + $0x2130] sm:$0xff] }
 0x43c   : > { %4734 = vmatprep.mubr.f32.mxu0 %v617_v8 }
 0x43d   : > { %v8290_v55 = vpop.f32.mrb[102].mxu1 }
 0x43e   : > { %9057 = vst [vmem:[#allocation12_spill] sm:$0xff] %v8290_v55  ;;  %v2678_v44 = vpop.f32.mrb[103].mxu1  ;;  %2940 = vmatmul.mubr.f32.gmra.mrb[208].mxu1 %v1250_v43  ;;  %v636_v43 = vld [vmem:[%s7085_s8 + $0xd60] sm:$0xff] }
 0x43f   : > { %4735 = vmatmul.mubr.f32.gmra.mrb[80].mxu0 %v616_v51  ;;  %2944 = vmatprep.mubr.f32.mxu1 %v1261_v24  ;;  %v1281_v51 = vld [vmem:[%s7085_s8 + $0x2188] sm:$0xff] }
 0x440   : > { %4739 = vmatprep.mubr.f32.mxu0 %v627_v59  ;;  %v647_v59 = vld [vmem:[%s7085_s8 + $0xdb8] sm:$0xff] }
 0x441   : > { %v8296_v21 = vpop.f32.mrb[104].mxu1 }
 0x442   : > { %9058 = vst [vmem:[#allocation13_spill] sm:$0xff] %v8296_v21  ;;  %v2683_v8 = vpop.f32.mrb[105].mxu1  ;;  %2945 = vmatmul.mubr.f32.gmra.mrb[210].mxu1 %v1260_v7  ;;  %v1280_v7 = vld [vmem:[%s7085_s8 + $0x2180] sm:$0xff] }
 0x443   : > { %4740 = vmatmul.mubr.f32.gmra.mrb[82].mxu0 %v626_v62  ;;  %2949 = vmatprep.mubr.f32.mxu1 %v1271_v19  ;;  %v646_v62 = vld [vmem:[%s7085_s8 + $0xdb0] sm:$0xff]  ;;  %v1291_v19 = vld [vmem:[%s7085_s8 + $0x21d8] sm:$0xff] }
 0x444   : > { %4744 = vmatprep.mubr.f32.mxu0 %v637_v28  ;;  %v657_v28 = vld [vmem:[%s7085_s8 + $0xe08] sm:$0xff] }
 0x445   : > { %v8302_v24 = vpop.f32.mrb[106].mxu1 }
 0x446   : > { %9059 = vst [vmem:[#allocation14_spill] sm:$0xff] %v8302_v24  ;;  %v2688_v44 = vpop.f32.mrb[107].mxu1  ;;  %2950 = vmatmul.mubr.f32.gmra.mrb[212].mxu1 %v1270_v40  ;;  %v1290_v40 = vld [vmem:[%s7085_s8 + $0x21d0] sm:$0xff] }
 0x447   : > { %4745 = vmatmul.mubr.f32.gmra.mrb[84].mxu0 %v636_v43  ;;  %2954 = vmatprep.mubr.f32.mxu1 %v1281_v51  ;;  %v656_v43 = vld [vmem:[%s7085_s8 + $0xe00] sm:$0xff]  ;;  %v1301_v51 = vld [vmem:[%s7085_s8 + $0x2228] sm:$0xff] }
 0x448   : > { %4749 = vmatprep.mubr.f32.mxu0 %v647_v59  ;;  %v667_v59 = vld [vmem:[%s7085_s8 + $0xe58] sm:$0xff] }
 0x449   : > { %v8308_v8 = vpop.f32.mrb[108].mxu1 }
 0x44a   : > { %9060 = vst [vmem:[#allocation15_spill] sm:$0xff] %v8308_v8  ;;  %v2693_v21 = vpop.f32.mrb[109].mxu1  ;;  %2955 = vmatmul.mubr.f32.gmra.mrb[214].mxu1 %v1280_v7  ;;  %v666_v7 = vld [vmem:[%s7085_s8 + $0xe50] sm:$0xff] }
 0x44b   : > { %4750 = vmatmul.mubr.f32.gmra.mrb[86].mxu0 %v646_v62  ;;  %2959 = vmatprep.mubr.f32.mxu1 %v1291_v19  ;;  %v1300_v21 = vld [vmem:[%s7085_s8 + $0x2220] sm:$0xff]  ;;  %v1311_v62 = vld [vmem:[%s7085_s8 + $0x2278] sm:$0xff] }
 0x44c   : > { %4754 = vmatprep.mubr.f32.mxu0 %v657_v28  ;;  %v677_v28 = vld [vmem:[%s7085_s8 + $0xea8] sm:$0xff] }
 0x44d   : > { %v8314_v44 = vpop.f32.mrb[110].mxu1 }
 0x44e   : > { %9061 = vst [vmem:[#allocation16_spill] sm:$0xff] %v8314_v44  ;;  %v2698_v24 = vpop.f32.mrb[111].mxu1  ;;  %2960 = vmatmul.mubr.f32.gmra.mrb[216].mxu1 %v1290_v40  ;;  %v676_v40 = vld [vmem:[%s7085_s8 + $0xea0] sm:$0xff] }
 0x44f   : > { %4755 = vmatmul.mubr.f32.gmra.mrb[88].mxu0 %v656_v43  ;;  %2964 = vmatprep.mubr.f32.mxu1 %v1301_v51  ;;  %v1310_v24 = vld [vmem:[%s7085_s8 + $0x2270] sm:$0xff]  ;;  %v1321_v43 = vld [vmem:[%s7085_s8 + $0x22c8] sm:$0xff] }
 0x450   : > { %4759 = vmatprep.mubr.f32.mxu0 %v667_v59  ;;  %v687_v59 = vld [vmem:[%s7085_s8 + $0xef8] sm:$0xff] }
 0x451   : > { %v8320_v19 = vpop.f32.mrb[112].mxu1 }
 0x452   : > { %9062 = vst [vmem:[#allocation17_spill] sm:$0xff] %v8320_v19  ;;  %v2703_v8 = vpop.f32.mrb[113].mxu1  ;;  %2965 = vmatmul.mubr.f32.gmra.mrb[218].mxu1 %v1300_v21  ;;  %v686_v21 = vld [vmem:[%s7085_s8 + $0xef0] sm:$0xff] }
 0x453   : > { %4760 = vmatmul.mubr.f32.gmra.mrb[90].mxu0 %v666_v7  ;;  %2969 = vmatprep.mubr.f32.mxu1 %v1311_v62  ;;  %v1320_v8 = vld [vmem:[%s7085_s8 + $0x22c0] sm:$0xff]  ;;  %v1331_v7 = vld [vmem:[%s7085_s8 + $0x2318] sm:$0xff] }
 0x454   : > { %4764 = vmatprep.mubr.f32.mxu0 %v677_v28  ;;  %v697_v28 = vld [vmem:[%s7085_s8 + $0xf48] sm:$0xff] }
 0x455   : > { %v8326_v51 = vpop.f32.mrb[114].mxu1 }
 0x456   : > { %9063 = vst [vmem:[#allocation18_spill] sm:$0xff] %v8326_v51  ;;  %v2708_v44 = vpop.f32.mrb[115].mxu1  ;;  %2970 = vmatmul.mubr.f32.gmra.mrb[220].mxu1 %v1310_v24  ;;  %v696_v24 = vld [vmem:[%s7085_s8 + $0xf40] sm:$0xff] }
 0x457   : > { %4765 = vmatmul.mubr.f32.gmra.mrb[92].mxu0 %v676_v40  ;;  %2974 = vmatprep.mubr.f32.mxu1 %v1321_v43  ;;  %v1330_v44 = vld [vmem:[%s7085_s8 + $0x2310] sm:$0xff]  ;;  %v1341_v40 = vld [vmem:[%s7085_s8 + $0x2368] sm:$0xff] }
 0x458   : > { %4769 = vmatprep.mubr.f32.mxu0 %v687_v59  ;;  %v707_v59 = vld [vmem:[%s7085_s8 + $0xf98] sm:$0xff] }
 0x459   : > { %v8332_v62 = vpop.f32.mrb[116].mxu1 }
 0x45a   : > { %9064 = vst [vmem:[#allocation19_spill] sm:$0xff] %v8332_v62  ;;  %v2713_v19 = vpop.f32.mrb[117].mxu1  ;;  %2975 = vmatmul.mubr.f32.gmra.mrb[222].mxu1 %v1320_v8  ;;  %v706_v8 = vld [vmem:[%s7085_s8 + $0xf90] sm:$0xff] }
 0x45b   : > { %4770 = vmatmul.mubr.f32.gmra.mrb[94].mxu0 %v686_v21  ;;  %2979 = vmatprep.mubr.f32.mxu1 %v1331_v7  ;;  %v1340_v19 = vld [vmem:[%s7085_s8 + $0x2360] sm:$0xff]  ;;  %v1351_v21 = vld [vmem:[%s7085_s8 + $0x23b8] sm:$0xff] }
 0x45c   : > { %4774 = vmatprep.mubr.f32.mxu0 %v697_v28  ;;  %v717_v28 = vld [vmem:[%s7085_s8 + $0xfe8] sm:$0xff] }
 0x45d   : > { %v8338_v43 = vpop.f32.mrb[118].mxu1 }
 0x45e   : > { %9065 = vst [vmem:[#allocation20_spill] sm:$0xff] %v8338_v43  ;;  %v2718_v51 = vpop.f32.mrb[119].mxu1  ;;  %2980 = vmatmul.mubr.f32.gmra.mrb[224].mxu1 %v1330_v44  ;;  %v716_v44 = vld [vmem:[%s7085_s8 + $0xfe0] sm:$0xff] }
 0x45f   : > { %4775 = vmatmul.mubr.f32.gmra.mrb[96].mxu0 %v696_v24  ;;  %2984 = vmatprep.mubr.f32.mxu1 %v1341_v40  ;;  %v1350_v51 = vld [vmem:[%s7085_s8 + $0x23b0] sm:$0xff]  ;;  %v1361_v24 = vld [vmem:[%s7085_s8 + $0x2408] sm:$0xff] }
 0x460   : > { %4779 = vmatprep.mubr.f32.mxu0 %v707_v59  ;;  %v727_v59 = vld [vmem:[%s7085_s8 + $0x1038] sm:$0xff] }
 0x461   : > { %v8344_v7 = vpop.f32.mrb[120].mxu1 }
 0x462   : > { %9066 = vst [vmem:[#allocation21_spill] sm:$0xff] %v8344_v7  ;;  %v2723_v62 = vpop.f32.mrb[121].mxu1  ;;  %2985 = vmatmul.mubr.f32.gmra.mrb[226].mxu1 %v1340_v19  ;;  %v726_v19 = vld [vmem:[%s7085_s8 + $0x1030] sm:$0xff] }
 0x463   : > { %4780 = vmatmul.mubr.f32.gmra.mrb[98].mxu0 %v706_v8  ;;  %2989 = vmatprep.mubr.f32.mxu1 %v1351_v21  ;;  %v1360_v62 = vld [vmem:[%s7085_s8 + $0x2400] sm:$0xff]  ;;  %v1371_v8 = vld [vmem:[%s7085_s8 + $0x2458] sm:$0xff] }
 0x464   : > { %4784 = vmatprep.mubr.f32.mxu0 %v717_v28  ;;  %v737_v28 = vld [vmem:[%s7085_s8 + $0x1088] sm:$0xff] }
 0x465   : > { %v8350_v40 = vpop.f32.mrb[122].mxu1 }
 0x466   : > { %9067 = vst [vmem:[#allocation22_spill] sm:$0xff] %v8350_v40  ;;  %v2728_v43 = vpop.f32.mrb[123].mxu1  ;;  %2990 = vmatmul.mubr.f32.gmra.mrb[228].mxu1 %v1350_v51  ;;  %v736_v51 = vld [vmem:[%s7085_s8 + $0x1080] sm:$0xff]  ;;  %v8365_v40 = vstv %s1648_s19 }
 0x467   : > { %4785 = vmatmul.mubr.f32.gmra.mrb[100].mxu0 %v716_v44  ;;  %2994 = vmatprep.mubr.f32.mxu1 %v1361_v24  ;;  %v1370_v43 = vld [vmem:[%s7085_s8 + $0x2450] sm:$0xff]  ;;  %v1381_v44 = vld [vmem:[%s7085_s8 + $0x24a8] sm:$0xff] }
 0x468   : > { %4789 = vmatprep.mubr.f32.mxu0 %v727_v59  ;;  %v747_v59 = vld [vmem:[%s7085_s8 + $0x10d8] sm:$0xff] }
 0x469   : > { %v8356_v21 = vpop.f32.mrb[124].mxu1 }
 0x46a   : > { %9068 = vst [vmem:[#allocation23_spill] sm:$0xff] %v8356_v21  ;;  %v2733_v7 = vpop.f32.mrb[125].mxu1  ;;  %2995 = vmatmul.mubr.f32.gmra.mrb[230].mxu1 %v1360_v62  ;;  %v746_v62 = vld [vmem:[%s7085_s8 + $0x10d0] sm:$0xff] }
 0x46b   : > { %4790 = vmatmul.mubr.f32.gmra.mrb[102].mxu0 %v726_v19  ;;  %2999 = vmatprep.mubr.f32.mxu1 %v1371_v8  ;;  %v1380_v7 = vld [vmem:[%s7085_s8 + $0x24a0] sm:$0xff]  ;;  %v1391_v19 = vld [vmem:[%s7085_s8 + $0x24f8] sm:$0xff]  ;;  %v5688_v8 = vadd.f32 %v7984_v36, %v8365_v40 }
 0x46c   : > { %4794 = vmatprep.mubr.f32.mxu0 %v737_v28  ;;  %v757_v28 = vld [vmem:[%s7085_s8 + $0x1128] sm:$0xff]  ;;  %v767_v36 = vld [vmem:[%s7085_s8 + $0x1178] sm:$0xff] }
 0x46d   : > { %v8362_v24 = vpop.f32.mrb[126].mxu1 }
 0x46e   : > { %9069 = vst [vmem:[#allocation24_spill] sm:$0xff] %v8362_v24  ;;  %v2738_v21 = vpop.f32.mrb[127].mxu1  ;;  %3000 = vmatmul.mubr.f32.gmra.mrb[232].mxu1 %v1370_v43  ;;  %v1390_v43 = vld [vmem:[%s7085_s8 + $0x24f0] sm:$0xff] }
 0x46f   : > { %4795 = vmatmul.mubr.f32.gmra.mrb[104].mxu0 %v736_v51  ;;  %3004 = vmatprep.mubr.f32.mxu1 %v1381_v44  ;;  %v756_v51 = vld [vmem:[%s7085_s8 + $0x1120] sm:$0xff]  ;;  %v1401_v44 = vld [vmem:[%s7085_s8 + $0x2548] sm:$0xff] }
 0x470   : > { %4799 = vmatprep.mubr.f32.mxu0 %v747_v59  ;;  %v5690_v59 = vadd.f32 %v7990_v3, %v8365_v40  ;;  %v1411_v3 = vld [vmem:[%s7085_s8 + $0x2598] sm:$0xff] }
 0x472   : > { %v4536_v24 = vpop.f32.mrb[0].mxu0  ;;  %3005 = vmatmul.mubr.f32.gmra.mrb[234].mxu1 %v1380_v7 }
 0x473   : > { %v5689_v55 = vadd.f32 %v5688_v8, %v4536_v24  ;;  %v4538_v21 = vpop.f32.mrb[1].mxu0  ;;  %4800 = vmatmul.mubr.f32.gmra.mrb[106].mxu0 %v746_v62  ;;  %3009 = vmatprep.mubr.f32.mxu1 %v1391_v19  ;;  %v1400_v19 = vld [vmem:[%s7085_s8 + $0x2540] sm:$0xff]  ;;  %v766_v8 = vld [vmem:[%s7085_s8 + $0x1170] sm:$0xff] }
 0x474   : > { %4804 = vmatprep.mubr.f32.mxu0 %v757_v28  ;;  %v5692_v28 = vadd.f32 %v7996_v10, %v8365_v40  ;;  %v5694_v10 = vadd.f32 %v8002_v17, %v8365_v40  ;;  %v5696_v17 = vadd.f32 %v8008_v23, %v8365_v40  ;;  %v5698_v23 = vadd.f32 %v8014_v31, %v8365_v40 }
 0x475   : > { %5175 = vst [vmem:[%s8379_s4] sm:$0xff] %v5689_v55  ;;  %v777_v55 = vld [vmem:[%s7085_s8 + $0x11c8] sm:$0xff]  ;;  %v5700_v31 = vadd.f32 %v8020_v37, %v8365_v40  ;;  %v5702_v37 = vadd.f32 %v8026_v42, %v8365_v40  ;;  %v5704_v42 = vadd.f32 %v8032_v47, %v8365_v40  ;;  %v5706_v47 = vadd.f32 %v8038_v53, %v8365_v40 }
 0x476   : > { %v4541_v24 = vpop.f32.mrb[2].mxu0  ;;  %3010 = vmatmul.mubr.f32.gmra.mrb[236].mxu1 %v1390_v43  ;;  %v5708_v53 = vadd.f32 %v8044_v30, %v8365_v40  ;;  %v5710_v30 = vadd.f32 %v8050_v1, %v8365_v40  ;;  %v5712_v1 = vadd.f32 %v8056_v50, %v8365_v40  ;;  %v5714_v50 = vadd.f32 %v8062_v16, %v8365_v40 }
 0x477   : > { %v5691_v7 = vadd.f32 %v5690_v59, %v4541_v24  ;;  %v4543_v62 = vpop.f32.mrb[3].mxu0  ;;  %4805 = vmatmul.mubr.f32.gmra.mrb[108].mxu0 %v756_v51  ;;  %3014 = vmatprep.mubr.f32.mxu1 %v1401_v44  ;;  %v1410_v51 = vld [vmem:[%s7085_s8 + $0x2590] sm:$0xff]  ;;  %v776_v44 = vld [vmem:[%s7085_s8 + $0x11c0] sm:$0xff]  ;;  %v787_v24 = vld [vmem:[%s7085_s8 + $0x1218] sm:$0xff]  ;;  %v5716_v16 = vadd.f32 %v8068_v25, %v8365_v40  ;;  %v5718_v25 = vadd.f32 %v8074_v32, %v8365_v40 }
 0x478   : > { %4809 = vmatprep.mubr.f32.mxu0 %v767_v36  ;;  %v1421_v36 = vld [vmem:[%s7085_s8 + $0x25e8] sm:$0xff]  ;;  %v5720_v32 = vadd.f32 %v8080_v34, %v8365_v40  ;;  %v5722_v34 = vadd.f32 %v8086_v41, %v8365_v40  ;;  %v5724_v41 = vadd.f32 %v8092_v52, %v8365_v40  ;;  %v5726_v52 = vadd.f32 %v8098_v58, %v8365_v40 }
 0x479   : > { %5176 = vst [vmem:[%s8379_s4 + $0x8] sm:$0xff] %v5691_v7  ;;  %v5728_v58 = vadd.f32 %v8104_v2, %v8365_v40  ;;  %v5730_v2 = vadd.f32 %v8110_v14, %v8365_v40  ;;  %v5732_v14 = vadd.f32 %v8116_v22, %v8365_v40  ;;  %v5734_v22 = vadd.f32 %v8122_v20, %v8365_v40 }
 0x47a   : > { %v4546_v21 = vpop.f32.mrb[4].mxu0  ;;  %3015 = vmatmul.mubr.f32.gmra.mrb[238].mxu1 %v1400_v19  ;;  %v5736_v20 = vadd.f32 %v8128_v39, %v8365_v40  ;;  %v5738_v39 = vadd.f32 %v8134_v48, %v8365_v40  ;;  %v5740_v48 = vadd.f32 %v8140_v54, %v8365_v40  ;;  %v5742_v54 = vadd.f32 %v8146_v63, %v8365_v40 }
 0x47b   : > { %v5693_v43 = vadd.f32 %v5692_v28, %v4546_v21  ;;  %v4548_v59 = vpop.f32.mrb[5].mxu0  ;;  %4810 = vmatmul.mubr.f32.gmra.mrb[110].mxu0 %v766_v8  ;;  %3019 = vmatprep.mubr.f32.mxu1 %v1411_v3  ;;  %v1420_v8 = vld [vmem:[%s7085_s8 + $0x25e0] sm:$0xff]  ;;  %v786_v3 = vld [vmem:[%s7085_s8 + $0x1210] sm:$0xff]  ;;  %v1431_v28 = vld [vmem:[%s7085_s8 + $0x2638] sm:$0xff]  ;;  %v5744_v63 = vadd.f32 %v8152_v11, %v8365_v40  ;;  %v5746_v11 = vadd.f32 %v8158_v5, %v8365_v40 }
 0x47c   : > { %4814 = vmatprep.mubr.f32.mxu0 %v777_v55  ;;  %v797_v55 = vld [vmem:[%s7085_s8 + $0x1268] sm:$0xff]  ;;  %v5748_v5 = vadd.f32 %v8164_v35, %v8365_v40  ;;  %v5750_v35 = vadd.f32 %v8170_v45, %v8365_v40  ;;  %v5752_v45 = vadd.f32 %v8176_v0, %v8365_v40  ;;  %v5754_v0 = vadd.f32 %v8182_v61, %v8365_v40 }
 0x47d   : > { %5177 = vst [vmem:[%s8379_s4 + $0x10] sm:$0xff] %v5693_v43  ;;  %v5756_v61 = vadd.f32 %v8188_v56, %v8365_v40  ;;  %v5758_v56 = vadd.f32 %v8194_v13, %v8365_v40  ;;  %v5760_v13 = vadd.f32 %v8200_v38, %v8365_v40  ;;  %v5762_v38 = vadd.f32 %v8206_v18, %v8365_v40 }
 0x47e   : > { %v4551_v7 = vpop.f32.mrb[6].mxu0  ;;  %3020 = vmatmul.mubr.f32.gmra.mrb[240].mxu1 %v1410_v51  ;;  %v1430_v51 = vld [vmem:[%s7085_s8 + $0x2630] sm:$0xff]  ;;  %v5764_v18 = vadd.f32 %v8212_v60, %v8365_v40  ;;  %v5766_v60 = vadd.f32 %v8218_v15, %v8365_v40  ;;  %v5768_v15 = vadd.f32 %v8224_v29, %v8365_v40  ;;  %v5770_v29 = vadd.f32 %v8230_v12, %v8365_v40 }
 0x47f   : > { %v5695_v62 = vadd.f32 %v5694_v10, %v4551_v7  ;;  %v4553_v19 = vpop.f32.mrb[7].mxu0  ;;  %4815 = vmatmul.mubr.f32.gmra.mrb[112].mxu0 %v776_v44  ;;  %3024 = vmatprep.mubr.f32.mxu1 %v1421_v36  ;;  %v796_v44 = vld [vmem:[%s7085_s8 + $0x1260] sm:$0xff]  ;;  %v1441_v36 = vld [vmem:[%s7085_s8 + $0x2688] sm:$0xff]  ;;  %v807_v10 = vld [vmem:[%s7085_s8 + $0x12b8] sm:$0xff]  ;;  %v5772_v12 = vadd.f32 %v8236_v57, %v8365_v40  ;;  %v5774_v57 = vadd.f32 %v8242_v9, %v8365_v40 }
 0x480   : > { %4819 = vmatprep.mubr.f32.mxu0 %v787_v24  ;;  %v1440_v19 = vld [vmem:[%s7085_s8 + $0x2680] sm:$0xff]  ;;  %v5776_v9 = vadd.f32 %v8248_v33, %v8365_v40  ;;  %v5778_v33 = vadd.f32 %v8254_v49, %v8365_v40  ;;  %v5780_v49 = vadd.f32 %v8260_v4, %v8365_v40  ;;  %v5782_v4 = vadd.f32 %v8266_v26, %v8365_v40 }
 0x481   : > { %5178 = vst [vmem:[%s8379_s4 + $0x18] sm:$0xff] %v5695_v62  ;;  %v5784_v26 = vadd.f32 %v8272_v46, %v8365_v40  ;;  %v5786_v46 = vadd.f32 %v8278_v6, %v8365_v40  ;;  %v5788_v6 = vadd.f32 %v8284_v27, %v8365_v40 }
 0x482   : > { %v4556_v21 = vpop.f32.mrb[8].mxu0  ;;  %3025 = vmatmul.mubr.f32.gmra.mrb[242].mxu1 %v1420_v8  ;;  %v806_v8 = vld [vmem:[%s7085_s8 + $0x12b0] sm:$0xff] }
 0x483   : > { %v5697_v43 = vadd.f32 %v5696_v17, %v4556_v21  ;;  %v4558_v59 = vpop.f32.mrb[9].mxu0  ;;  %4820 = vmatmul.mubr.f32.gmra.mrb[114].mxu0 %v786_v3  ;;  %3029 = vmatprep.mubr.f32.mxu1 %v1431_v28  ;;  %v1451_v3 = vld [vmem:[%s7085_s8 + $0x26d8] sm:$0xff]  ;;  %v817_v28 = vld [vmem:[%s7085_s8 + $0x1308] sm:$0xff] }
 0x484   : > { %4824 = vmatprep.mubr.f32.mxu0 %v797_v55  ;;  %v816_v59 = vld [vmem:[%s7085_s8 + $0x1300] sm:$0xff] }
 0x485   : > { %5179 = vst [vmem:[%s8379_s4 + $0x20] sm:$0xff] %v5697_v43  ;;  %v1450_v43 = vld [vmem:[%s7085_s8 + $0x26d0] sm:$0xff] }
 0x486   : > { %v4561_v24 = vpop.f32.mrb[10].mxu0  ;;  %3030 = vmatmul.mubr.f32.gmra.mrb[244].mxu1 %v1430_v51  ;;  %v1461_v51 = vld [vmem:[%s7085_s8 + $0x2728] sm:$0xff] }
 0x487   : > { %v5699_v7 = vadd.f32 %v5698_v23, %v4561_v24  ;;  %v4563_v62 = vpop.f32.mrb[11].mxu0  ;;  %4825 = vmatmul.mubr.f32.gmra.mrb[116].mxu0 %v796_v44  ;;  %3034 = vmatprep.mubr.f32.mxu1 %v1441_v36  ;;  %v827_v44 = vld [vmem:[%s7085_s8 + $0x1358] sm:$0xff]  ;;  %v1460_v24 = vld [vmem:[%s7085_s8 + $0x2720] sm:$0xff] }
 0x488   : > { %4829 = vmatprep.mubr.f32.mxu0 %v807_v10  ;;  %v1471_v62 = vld [vmem:[%s7085_s8 + $0x2778] sm:$0xff] }
 0x489   : > { %5180 = vst [vmem:[%s8379_s4 + $0x28] sm:$0xff] %v5699_v7  ;;  %v826_v7 = vld [vmem:[%s7085_s8 + $0x1350] sm:$0xff] }
 0x48a   : > { %v4566_v17 = vpop.f32.mrb[12].mxu0  ;;  %3035 = vmatmul.mubr.f32.gmra.mrb[246].mxu1 %v1440_v19  ;;  %v837_v19 = vld [vmem:[%s7085_s8 + $0x13a8] sm:$0xff] }
 0x48b   : > { %v5701_v55 = vadd.f32 %v5700_v31, %v4566_v17  ;;  %v4568_v21 = vpop.f32.mrb[13].mxu0  ;;  %4830 = vmatmul.mubr.f32.gmra.mrb[118].mxu0 %v806_v8  ;;  %3039 = vmatprep.mubr.f32.mxu1 %v1451_v3  ;;  %v836_v17 = vld [vmem:[%s7085_s8 + $0x13a0] sm:$0xff] }
 0x48c   : > { %4834 = vmatprep.mubr.f32.mxu0 %v817_v28  ;;  %v1470_v28 = vld [vmem:[%s7085_s8 + $0x2770] sm:$0xff]  ;;  %v847_v21 = vld [vmem:[%s7085_s8 + $0x13f8] sm:$0xff] }
 0x48d   : > { %5181 = vst [vmem:[%s8379_s4 + $0x30] sm:$0xff] %v5701_v55  ;;  %v1481_v55 = vld [vmem:[%s7085_s8 + $0x27c8] sm:$0xff] }
 0x48e   : > { %v4571_v36 = vpop.f32.mrb[14].mxu0  ;;  %3040 = vmatmul.mubr.f32.gmra.mrb[248].mxu1 %v1450_v43 }
 0x48f   : > { %v5703_v23 = vadd.f32 %v5702_v37, %v4571_v36  ;;  %v4573_v10 = vpop.f32.mrb[15].mxu0  ;;  %4835 = vmatmul.mubr.f32.gmra.mrb[120].mxu0 %v816_v59  ;;  %3044 = vmatprep.mubr.f32.mxu1 %v1461_v51  ;;  %v1480_v37 = vld [vmem:[%s7085_s8 + $0x27c0] sm:$0xff]  ;;  %v853_v36 = vld [vmem:[%s7085_s8 + $0x1428] sm:$0xff] }
 0x490   : > { %4839 = vmatprep.mubr.f32.mxu0 %v827_v44  ;;  %v846_v44 = vld [vmem:[%s7085_s8 + $0x13f0] sm:$0xff] }
 0x491   : > { %5182 = vst [vmem:[%s8379_s4 + $0x38] sm:$0xff] %v5703_v23  ;;  %v857_v23 = vld [vmem:[%s7085_s8 + $0x1448] sm:$0xff] }
 0x492   : > { %v4576_v8 = vpop.f32.mrb[16].mxu0  ;;  %3045 = vmatmul.mubr.f32.gmra.mrb[250].mxu1 %v1460_v24 }
 0x493   : > { %v5705_v3 = vadd.f32 %v5704_v42, %v4576_v8  ;;  %v4578_v31 = vpop.f32.mrb[17].mxu0  ;;  %4840 = vmatmul.mubr.f32.gmra.mrb[122].mxu0 %v826_v7  ;;  %3049 = vmatprep.mubr.f32.mxu1 %v1471_v62  ;;  %v852_v62 = vld [vmem:[%s7085_s8 + $0x1420] sm:$0xff]  ;;  %v867_v8 = vld [vmem:[%s7085_s8 + $0x1498] sm:$0xff] }
 0x494   : > { %4844 = vmatprep.mubr.f32.mxu0 %v837_v19  ;;  %v856_v42 = vld [vmem:[%s7085_s8 + $0x1440] sm:$0xff]  ;;  %v863_v19 = vld [vmem:[%s7085_s8 + $0x1478] sm:$0xff] }
 0x495   : > { %5183 = vst [vmem:[%s8379_s4 + $0x40] sm:$0xff] %v5705_v3 }
 0x496   : > { %v4581_v43 = vpop.f32.mrb[18].mxu0  ;;  %3050 = vmatmul.mubr.f32.gmra.mrb[252].mxu1 %v1470_v28 }
 0x497   : > { %v5707_v59 = vadd.f32 %v5706_v47, %v4581_v43  ;;  %v4583_v51 = vpop.f32.mrb[19].mxu0  ;;  %4845 = vmatmul.mubr.f32.gmra.mrb[124].mxu0 %v836_v17  ;;  %3054 = vmatprep.mubr.f32.mxu1 %v1481_v55  ;;  %v862_v17 = vld [vmem:[%s7085_s8 + $0x1470] sm:$0xff]  ;;  %v873_v47 = vld [vmem:[%s7085_s8 + $0x14c8] sm:$0xff] }
 0x498   : > { %4849 = vmatprep.mubr.f32.mxu0 %v847_v21  ;;  %v866_v55 = vld [vmem:[%s7085_s8 + $0x1490] sm:$0xff]  ;;  %v877_v21 = vld [vmem:[%s7085_s8 + $0x14e8] sm:$0xff] }
 0x499   : > { %5184 = vst [vmem:[%s8379_s4 + $0x48] sm:$0xff] %v5707_v59 }
 0x49a   : > { %v4586_v10 = vpop.f32.mrb[20].mxu0  ;;  %3055 = vmatmul.mubr.f32.gmra.mrb[254].mxu1 %v1480_v37  ;;  %v872_v37 = vld [vmem:[%s7085_s8 + $0x14c0] sm:$0xff] }
 0x49b   : > { %v5709_v24 = vadd.f32 %v5708_v53, %v4586_v10  ;;  %v4588_v7 = vpop.f32.mrb[21].mxu0  ;;  %4850 = vmatmul.mubr.f32.gmra.mrb[126].mxu0 %v846_v44  ;;  %3444 = vmatprep.mubr.f32.mxu1 %v853_v36  ;;  %v876_v44 = vld [vmem:[%s7085_s8 + $0x14e0] sm:$0xff]  ;;  %v883_v36 = vld [vmem:[%s7085_s8 + $0x1518] sm:$0xff] }
 0x49c   : > { %4854 = vmatprep.mubr.f32.mxu0 %v857_v23  ;;  %v887_v53 = vld [vmem:[%s7085_s8 + $0x1538] sm:$0xff]  ;;  %v882_v7 = vld [vmem:[%s7085_s8 + $0x1510] sm:$0xff] }
 0x49d   : > { %5185 = vst [vmem:[%s8379_s4 + $0x50] sm:$0xff] %v5709_v24 }
 0x49e   : > { %v4591_v3 = vpop.f32.mrb[22].mxu0  ;;  %3445 = vmatmul.mubr.f32.vlgmr.msra.gmra.mrb[128].mxu1 %v852_v62  ;;  %v886_v62 = vld [vmem:[%s7085_s8 + $0x1530] sm:$0xff] }
 0x49f   : > { %v5711_v31 = vadd.f32 %v5710_v30, %v4591_v3  ;;  %v4593_v28 = vpop.f32.mrb[23].mxu0  ;;  %4855 = vmatmul.mubr.f32.gmra.mrb[128].mxu0 %v856_v42  ;;  %3449 = vmatprep.mubr.f32.mxu1 %v863_v19  ;;  %v893_v42 = vld [vmem:[%s7085_s8 + $0x1568] sm:$0xff] }
 0x4a0   : > { %4859 = vmatprep.mubr.f32.mxu0 %v867_v8  ;;  %v897_v19 = vld [vmem:[%s7085_s8 + $0x1588] sm:$0xff]  ;;  %v896_v28 = vld [vmem:[%s7085_s8 + $0x1580] sm:$0xff] }
 0x4a1   : > { %5186 = vst [vmem:[%s8379_s4 + $0x58] sm:$0xff] %v5711_v31  ;;  %v892_v31 = vld [vmem:[%s7085_s8 + $0x1560] sm:$0xff] }
 0x4a2   : > { %v4596_v43 = vpop.f32.mrb[24].mxu0  ;;  %3450 = vmatmul.mubr.f32.gmra.mrb[130].mxu1 %v862_v17  ;;  %v903_v17 = vld [vmem:[%s7085_s8 + $0x15b8] sm:$0xff] }
 0x4a3   : > { %v5713_v59 = vadd.f32 %v5712_v1, %v4596_v43  ;;  %v4598_v51 = vpop.f32.mrb[25].mxu0  ;;  %4860 = vmatmul.mubr.f32.gmra.mrb[130].mxu0 %v866_v55  ;;  %3454 = vmatprep.mubr.f32.mxu1 %v873_v47  ;;  %v907_v55 = vld [vmem:[%s7085_s8 + $0x15d8] sm:$0xff]  ;;  %v902_v43 = vld [vmem:[%s7085_s8 + $0x15b0] sm:$0xff] }
 0x4a4   : > { %4864 = vmatprep.mubr.f32.mxu0 %v877_v21  ;;  %v913_v51 = vld [vmem:[%s7085_s8 + $0x1608] sm:$0xff] }
 0x4a5   : > { %5187 = vst [vmem:[%s8379_s4 + $0x60] sm:$0xff] %v5713_v59  ;;  %v906_v59 = vld [vmem:[%s7085_s8 + $0x15d0] sm:$0xff] }
 0x4a6   : > { %v4601_v23 = vpop.f32.mrb[26].mxu0  ;;  %3455 = vmatmul.mubr.f32.gmra.mrb[132].mxu1 %v872_v37  ;;  %v917_v37 = vld [vmem:[%s7085_s8 + $0x1628] sm:$0xff] }
 0x4a7   : > { %v5715_v10 = vadd.f32 %v5714_v50, %v4601_v23  ;;  %v4603_v24 = vpop.f32.mrb[27].mxu0  ;;  %4865 = vmatmul.mubr.f32.gmra.mrb[132].mxu0 %v876_v44  ;;  %3459 = vmatprep.mubr.f32.mxu1 %v883_v36  ;;  %v916_v23 = vld [vmem:[%s7085_s8 + $0x1620] sm:$0xff] }
 0x4a8   : > { %4869 = vmatprep.mubr.f32.mxu0 %v887_v53  ;;  %v912_v53 = vld [vmem:[%s7085_s8 + $0x1600] sm:$0xff]  ;;  %v927_v24 = vld [vmem:[%s7085_s8 + $0x1678] sm:$0xff] }
 0x4a9   : > { %5188 = vst [vmem:[%s8379_s4 + $0x68] sm:$0xff] %v5715_v10  ;;  %v923_v10 = vld [vmem:[%s7085_s8 + $0x1658] sm:$0xff] }
 0x4aa   : > { %v4606_v30 = vpop.f32.mrb[28].mxu0  ;;  %3460 = vmatmul.mubr.f32.gmra.mrb[134].mxu1 %v882_v7 }
 0x4ab   : > { %v5717_v8 = vadd.f32 %v5716_v16, %v4606_v30  ;;  %v4608_v3 = vpop.f32.mrb[29].mxu0  ;;  %4870 = vmatmul.mubr.f32.gmra.mrb[134].mxu0 %v886_v62  ;;  %3464 = vmatprep.mubr.f32.mxu1 %v893_v42  ;;  %v922_v16 = vld [vmem:[%s7085_s8 + $0x1650] sm:$0xff]  ;;  %v933_v30 = vld [vmem:[%s7085_s8 + $0x16a8] sm:$0xff] }
 0x4ac   : > { %4874 = vmatprep.mubr.f32.mxu0 %v897_v19  ;;  %v926_v19 = vld [vmem:[%s7085_s8 + $0x1670] sm:$0xff] }
 0x4ad   : > { %5189 = vst [vmem:[%s8379_s4 + $0x70] sm:$0xff] %v5717_v8  ;;  %v937_v8 = vld [vmem:[%s7085_s8 + $0x16c8] sm:$0xff] }
 0x4ae   : > { %v4611_v47 = vpop.f32.mrb[30].mxu0  ;;  %3465 = vmatmul.mubr.f32.gmra.mrb[136].mxu1 %v892_v31 }
 0x4af   : > { %v5719_v1 = vadd.f32 %v5718_v25, %v4611_v47  ;;  %v4613_v21 = vpop.f32.mrb[31].mxu0  ;;  %4875 = vmatmul.mubr.f32.gmra.mrb[136].mxu0 %v896_v28  ;;  %3469 = vmatprep.mubr.f32.mxu1 %v903_v17  ;;  %v932_v17 = vld [vmem:[%s7085_s8 + $0x16a0] sm:$0xff]  ;;  %v947_v47 = vld [vmem:[%s7085_s8 + $0x1718] sm:$0xff] }
 0x4b0   : > { %4879 = vmatprep.mubr.f32.mxu0 %v907_v55  ;;  %v936_v25 = vld [vmem:[%s7085_s8 + $0x16c0] sm:$0xff]  ;;  %v943_v55 = vld [vmem:[%s7085_s8 + $0x16f8] sm:$0xff] }
 0x4b1   : > { %5190 = vst [vmem:[%s8379_s4 + $0x78] sm:$0xff] %v5719_v1 }
 0x4b2   : > { %v4616_v44 = vpop.f32.mrb[32].mxu0  ;;  %3470 = vmatmul.mubr.f32.gmra.mrb[138].mxu1 %v902_v43 }
 0x4b3   : > { %v5721_v36 = vadd.f32 %v5720_v32, %v4616_v44  ;;  %v4618_v50 = vpop.f32.mrb[33].mxu0  ;;  %4880 = vmatmul.mubr.f32.gmra.mrb[138].mxu0 %v906_v59  ;;  %3474 = vmatprep.mubr.f32.mxu1 %v913_v51  ;;  %v942_v59 = vld [vmem:[%s7085_s8 + $0x16f0] sm:$0xff]  ;;  %v953_v32 = vld [vmem:[%s7085_s8 + $0x1748] sm:$0xff] }
 0x4b4   : > { %4884 = vmatprep.mubr.f32.mxu0 %v917_v37  ;;  %v946_v51 = vld [vmem:[%s7085_s8 + $0x1710] sm:$0xff]  ;;  %v957_v37 = vld [vmem:[%s7085_s8 + $0x1768] sm:$0xff] }
 0x4b5   : > { %5191 = vst [vmem:[%s8379_s4 + $0x80] sm:$0xff] %v5721_v36 }
 0x4b6   : > { %v4621_v7 = vpop.f32.mrb[34].mxu0  ;;  %3475 = vmatmul.mubr.f32.gmra.mrb[140].mxu1 %v912_v53  ;;  %v952_v53 = vld [vmem:[%s7085_s8 + $0x1740] sm:$0xff] }
 0x4b7   : > { %v5723_v62 = vadd.f32 %v5722_v34, %v4621_v7  ;;  %v4623_v42 = vpop.f32.mrb[35].mxu0  ;;  %4885 = vmatmul.mubr.f32.gmra.mrb[140].mxu0 %v916_v23  ;;  %3479 = vmatprep.mubr.f32.mxu1 %v923_v10  ;;  %v956_v23 = vld [vmem:[%s7085_s8 + $0x1760] sm:$0xff]  ;;  %v963_v10 = vld [vmem:[%s7085_s8 + $0x1798] sm:$0xff] }
 0x4b8   : > { %4889 = vmatprep.mubr.f32.mxu0 %v927_v24  ;;  %v967_v34 = vld [vmem:[%s7085_s8 + $0x17b8] sm:$0xff]  ;;  %v962_v42 = vld [vmem:[%s7085_s8 + $0x1790] sm:$0xff] }
 0x4b9   : > { %5192 = vst [vmem:[%s8379_s4 + $0x88] sm:$0xff] %v5723_v62 }
 0x4ba   : > { %v4626_v3 = vpop.f32.mrb[36].mxu0  ;;  %3480 = vmatmul.mubr.f32.gmra.mrb[142].mxu1 %v922_v16  ;;  %v966_v16 = vld [vmem:[%s7085_s8 + $0x17b0] sm:$0xff] }
 0x4bb   : > { %v5725_v31 = vadd.f32 %v5724_v41, %v4626_v3  ;;  %v4628_v28 = vpop.f32.mrb[37].mxu0  ;;  %4890 = vmatmul.mubr.f32.gmra.mrb[142].mxu0 %v926_v19  ;;  %3484 = vmatprep.mubr.f32.mxu1 %v933_v30  ;;  %v973_v19 = vld [vmem:[%s7085_s8 + $0x17e8] sm:$0xff] }
 0x4bc   : > { %4894 = vmatprep.mubr.f32.mxu0 %v937_v8  ;;  %v977_v30 = vld [vmem:[%s7085_s8 + $0x1808] sm:$0xff]  ;;  %v976_v28 = vld [vmem:[%s7085_s8 + $0x1800] sm:$0xff] }
 0x4bd   : > { %5193 = vst [vmem:[%s8379_s4 + $0x90] sm:$0xff] %v5725_v31  ;;  %v972_v31 = vld [vmem:[%s7085_s8 + $0x17e0] sm:$0xff] }
 0x4be   : > { %v4631_v1 = vpop.f32.mrb[38].mxu0  ;;  %3485 = vmatmul.mubr.f32.gmra.mrb[144].mxu1 %v932_v17  ;;  %v983_v17 = vld [vmem:[%s7085_s8 + $0x1838] sm:$0xff] }
 0x4bf   : > { %v5727_v21 = vadd.f32 %v5726_v52, %v4631_v1  ;;  %v4633_v43 = vpop.f32.mrb[39].mxu0  ;;  %4895 = vmatmul.mubr.f32.gmra.mrb[144].mxu0 %v936_v25  ;;  %3489 = vmatprep.mubr.f32.mxu1 %v943_v55  ;;  %v987_v25 = vld [vmem:[%s7085_s8 + $0x1858] sm:$0xff]  ;;  %v982_v1 = vld [vmem:[%s7085_s8 + $0x1830] sm:$0xff] }
 0x4c0   : > { %4899 = vmatprep.mubr.f32.mxu0 %v947_v47  ;;  %v993_v43 = vld [vmem:[%s7085_s8 + $0x1888] sm:$0xff] }
 0x4c1   : > { %5194 = vst [vmem:[%s8379_s4 + $0x98] sm:$0xff] %v5727_v21  ;;  %v986_v21 = vld [vmem:[%s7085_s8 + $0x1850] sm:$0xff] }
 0x4c2   : > { %v4636_v44 = vpop.f32.mrb[40].mxu0  ;;  %3490 = vmatmul.mubr.f32.gmra.mrb[146].mxu1 %v942_v59  ;;  %v997_v59 = vld [vmem:[%s7085_s8 + $0x18a8] sm:$0xff] }
 0x4c3   : > { %v5729_v36 = vadd.f32 %v5728_v58, %v4636_v44  ;;  %v4638_v50 = vpop.f32.mrb[41].mxu0  ;;  %4900 = vmatmul.mubr.f32.gmra.mrb[146].mxu0 %v946_v51  ;;  %3494 = vmatprep.mubr.f32.mxu1 %v953_v32  ;;  %v996_v44 = vld [vmem:[%s7085_s8 + $0x18a0] sm:$0xff] }
 0x4c4   : > { %4904 = vmatprep.mubr.f32.mxu0 %v957_v37  ;;  %v992_v37 = vld [vmem:[%s7085_s8 + $0x1880] sm:$0xff]  ;;  %v1007_v50 = vld [vmem:[%s7085_s8 + $0x18f8] sm:$0xff] }
 0x4c5   : > { %5195 = vst [vmem:[%s8379_s4 + $0xa0] sm:$0xff] %v5729_v36  ;;  %v1003_v36 = vld [vmem:[%s7085_s8 + $0x18d8] sm:$0xff] }
 0x4c6   : > { %v4641_v24 = vpop.f32.mrb[42].mxu0  ;;  %3495 = vmatmul.mubr.f32.gmra.mrb[148].mxu1 %v952_v53 }
 0x4c7   : > { %v5731_v7 = vadd.f32 %v5730_v2, %v4641_v24  ;;  %v4643_v62 = vpop.f32.mrb[43].mxu0  ;;  %4905 = vmatmul.mubr.f32.gmra.mrb[148].mxu0 %v956_v23  ;;  %3499 = vmatprep.mubr.f32.mxu1 %v963_v10  ;;  %v1002_v2 = vld [vmem:[%s7085_s8 + $0x18d0] sm:$0xff]  ;;  %v1013_v24 = vld [vmem:[%s7085_s8 + $0x1928] sm:$0xff] }
 0x4c8   : > { %4909 = vmatprep.mubr.f32.mxu0 %v967_v34  ;;  %v1006_v34 = vld [vmem:[%s7085_s8 + $0x18f0] sm:$0xff] }
 0x4c9   : > { %5196 = vst [vmem:[%s8379_s4 + $0xa8] sm:$0xff] %v5731_v7  ;;  %v1017_v7 = vld [vmem:[%s7085_s8 + $0x1948] sm:$0xff] }
 0x4ca   : > { %v4646_v41 = vpop.f32.mrb[44].mxu0  ;;  %3500 = vmatmul.mubr.f32.gmra.mrb[150].mxu1 %v962_v42 }
 0x4cb   : > { %v5733_v8 = vadd.f32 %v5732_v14, %v4646_v41  ;;  %v4648_v3 = vpop.f32.mrb[45].mxu0  ;;  %4910 = vmatmul.mubr.f32.gmra.mrb[150].mxu0 %v966_v16  ;;  %3504 = vmatprep.mubr.f32.mxu1 %v973_v19  ;;  %v1012_v19 = vld [vmem:[%s7085_s8 + $0x1920] sm:$0xff]  ;;  %v1027_v41 = vld [vmem:[%s7085_s8 + $0x1998] sm:$0xff] }
 0x4cc   : > { %4914 = vmatprep.mubr.f32.mxu0 %v977_v30  ;;  %v1016_v14 = vld [vmem:[%s7085_s8 + $0x1940] sm:$0xff]  ;;  %v1023_v30 = vld [vmem:[%s7085_s8 + $0x1978] sm:$0xff] }
 0x4cd   : > { %5197 = vst [vmem:[%s8379_s4 + $0xb0] sm:$0xff] %v5733_v8 }
 0x4ce   : > { %v4651_v55 = vpop.f32.mrb[46].mxu0  ;;  %3505 = vmatmul.mubr.f32.gmra.mrb[152].mxu1 %v972_v31 }
 0x4cf   : > { %v5735_v52 = vadd.f32 %v5734_v22, %v4651_v55  ;;  %v4653_v47 = vpop.f32.mrb[47].mxu0  ;;  %4915 = vmatmul.mubr.f32.gmra.mrb[152].mxu0 %v976_v28  ;;  %3509 = vmatprep.mubr.f32.mxu1 %v983_v17  ;;  %v1022_v28 = vld [vmem:[%s7085_s8 + $0x1970] sm:$0xff]  ;;  %v1033_v22 = vld [vmem:[%s7085_s8 + $0x19c8] sm:$0xff] }
 0x4d0   : > { %4919 = vmatprep.mubr.f32.mxu0 %v987_v25  ;;  %v1026_v17 = vld [vmem:[%s7085_s8 + $0x1990] sm:$0xff]  ;;  %v1037_v25 = vld [vmem:[%s7085_s8 + $0x19e8] sm:$0xff] }
 0x4d1   : > { %5198 = vst [vmem:[%s8379_s4 + $0xb8] sm:$0xff] %v5735_v52 }
 0x4d2   : > { %v4656_v51 = vpop.f32.mrb[48].mxu0  ;;  %3510 = vmatmul.mubr.f32.gmra.mrb[154].mxu1 %v982_v1  ;;  %v1032_v1 = vld [vmem:[%s7085_s8 + $0x19c0] sm:$0xff] }
 0x4d3   : > { %v5737_v32 = vadd.f32 %v5736_v20, %v4656_v51  ;;  %v4658_v58 = vpop.f32.mrb[49].mxu0  ;;  %4920 = vmatmul.mubr.f32.gmra.mrb[154].mxu0 %v986_v21  ;;  %3514 = vmatprep.mubr.f32.mxu1 %v993_v43  ;;  %v1036_v21 = vld [vmem:[%s7085_s8 + $0x19e0] sm:$0xff]  ;;  %v1043_v43 = vld [vmem:[%s7085_s8 + $0x1a18] sm:$0xff] }
 0x4d4   : > { %4924 = vmatprep.mubr.f32.mxu0 %v997_v59  ;;  %v1047_v20 = vld [vmem:[%s7085_s8 + $0x1a38] sm:$0xff]  ;;  %v1042_v58 = vld [vmem:[%s7085_s8 + $0x1a10] sm:$0xff] }
 0x4d5   : > { %5199 = vst [vmem:[%s8379_s4 + $0xc0] sm:$0xff] %v5737_v32 }
 0x4d6   : > { %v4661_v53 = vpop.f32.mrb[50].mxu0  ;;  %3515 = vmatmul.mubr.f32.gmra.mrb[156].mxu1 %v992_v37  ;;  %v1046_v37 = vld [vmem:[%s7085_s8 + $0x1a30] sm:$0xff] }
 0x4d7   : > { %v5739_v23 = vadd.f32 %v5738_v39, %v4661_v53  ;;  %v4663_v10 = vpop.f32.mrb[51].mxu0  ;;  %4925 = vmatmul.mubr.f32.gmra.mrb[156].mxu0 %v996_v44  ;;  %3519 = vmatprep.mubr.f32.mxu1 %v1003_v36  ;;  %v1053_v44 = vld [vmem:[%s7085_s8 + $0x1a68] sm:$0xff] }
 0x4d8   : > { %4929 = vmatprep.mubr.f32.mxu0 %v1007_v50  ;;  %v1057_v36 = vld [vmem:[%s7085_s8 + $0x1a88] sm:$0xff]  ;;  %v1056_v10 = vld [vmem:[%s7085_s8 + $0x1a80] sm:$0xff] }
 0x4d9   : > { %5200 = vst [vmem:[%s8379_s4 + $0xc8] sm:$0xff] %v5739_v23  ;;  %v1052_v23 = vld [vmem:[%s7085_s8 + $0x1a60] sm:$0xff] }
 0x4da   : > { %v4666_v62 = vpop.f32.mrb[52].mxu0  ;;  %3520 = vmatmul.mubr.f32.gmra.mrb[158].mxu1 %v1002_v2  ;;  %v1063_v2 = vld [vmem:[%s7085_s8 + $0x1ab8] sm:$0xff] }
 0x4db   : > { %v5741_v42 = vadd.f32 %v5740_v48, %v4666_v62  ;;  %v4668_v16 = vpop.f32.mrb[53].mxu0  ;;  %4930 = vmatmul.mubr.f32.gmra.mrb[158].mxu0 %v1006_v34  ;;  %3524 = vmatprep.mubr.f32.mxu1 %v1013_v24  ;;  %v1067_v34 = vld [vmem:[%s7085_s8 + $0x1ad8] sm:$0xff]  ;;  %v1062_v62 = vld [vmem:[%s7085_s8 + $0x1ab0] sm:$0xff] }
 0x4dc   : > { %4934 = vmatprep.mubr.f32.mxu0 %v1017_v7  ;;  %v1073_v16 = vld [vmem:[%s7085_s8 + $0x1b08] sm:$0xff] }
 0x4dd   : > { %5201 = vst [vmem:[%s8379_s4 + $0xd0] sm:$0xff] %v5741_v42  ;;  %v1066_v42 = vld [vmem:[%s7085_s8 + $0x1ad0] sm:$0xff] }
 0x4de   : > { %v4671_v8 = vpop.f32.mrb[54].mxu0  ;;  %3525 = vmatmul.mubr.f32.gmra.mrb[160].mxu1 %v1012_v19  ;;  %v1077_v19 = vld [vmem:[%s7085_s8 + $0x1b28] sm:$0xff] }
 0x4df   : > { %v5743_v3 = vadd.f32 %v5742_v54, %v4671_v8  ;;  %v4673_v31 = vpop.f32.mrb[55].mxu0  ;;  %4935 = vmatmul.mubr.f32.gmra.mrb[160].mxu0 %v1016_v14  ;;  %3529 = vmatprep.mubr.f32.mxu1 %v1023_v30  ;;  %v1076_v8 = vld [vmem:[%s7085_s8 + $0x1b20] sm:$0xff] }
 0x4e0   : > { %4939 = vmatprep.mubr.f32.mxu0 %v1027_v41  ;;  %v1072_v41 = vld [vmem:[%s7085_s8 + $0x1b00] sm:$0xff]  ;;  %v1087_v31 = vld [vmem:[%s7085_s8 + $0x1b78] sm:$0xff] }
 0x4e1   : > { %5202 = vst [vmem:[%s8379_s4 + $0xd8] sm:$0xff] %v5743_v3  ;;  %v1083_v3 = vld [vmem:[%s7085_s8 + $0x1b58] sm:$0xff] }
 0x4e2   : > { %v4676_v55 = vpop.f32.mrb[56].mxu0  ;;  %3530 = vmatmul.mubr.f32.gmra.mrb[162].mxu1 %v1022_v28 }
 0x4e3   : > { %v5745_v52 = vadd.f32 %v5744_v63, %v4676_v55  ;;  %v4678_v47 = vpop.f32.mrb[57].mxu0  ;;  %4940 = vmatmul.mubr.f32.gmra.mrb[162].mxu0 %v1026_v17  ;;  %3534 = vmatprep.mubr.f32.mxu1 %v1033_v22  ;;  %v1082_v63 = vld [vmem:[%s7085_s8 + $0x1b50] sm:$0xff]  ;;  %v1093_v55 = vld [vmem:[%s7085_s8 + $0x1ba8] sm:$0xff] }
 0x4e4   : > { %4944 = vmatprep.mubr.f32.mxu0 %v1037_v25  ;;  %v1086_v25 = vld [vmem:[%s7085_s8 + $0x1b70] sm:$0xff] }
 0x4e5   : > { %5203 = vst [vmem:[%s8379_s4 + $0xe0] sm:$0xff] %v5745_v52  ;;  %v1097_v52 = vld [vmem:[%s7085_s8 + $0x1bc8] sm:$0xff] }
 0x4e6   : > { %v4681_v59 = vpop.f32.mrb[58].mxu0  ;;  %3535 = vmatmul.mubr.f32.gmra.mrb[164].mxu1 %v1032_v1 }
 0x4e7   : > { %v5747_v51 = vadd.f32 %v5746_v11, %v4681_v59  ;;  %v4683_v32 = vpop.f32.mrb[59].mxu0  ;;  %4945 = vmatmul.mubr.f32.gmra.mrb[164].mxu0 %v1036_v21  ;;  %3539 = vmatprep.mubr.f32.mxu1 %v1043_v43  ;;  %v1092_v43 = vld [vmem:[%s7085_s8 + $0x1ba0] sm:$0xff]  ;;  %v1107_v59 = vld [vmem:[%s7085_s8 + $0x1c18] sm:$0xff] }
 0x4e8   : > { %4949 = vmatprep.mubr.f32.mxu0 %v1047_v20  ;;  %v1096_v11 = vld [vmem:[%s7085_s8 + $0x1bc0] sm:$0xff]  ;;  %v1103_v20 = vld [vmem:[%s7085_s8 + $0x1bf8] sm:$0xff] }
 0x4e9   : > { %5204 = vst [vmem:[%s8379_s4 + $0xe8] sm:$0xff] %v5747_v51 }
 0x4ea   : > { %v4686_v39 = vpop.f32.mrb[60].mxu0  ;;  %3540 = vmatmul.mubr.f32.gmra.mrb[166].mxu1 %v1042_v58 }
 0x4eb   : > { %v5749_v50 = vadd.f32 %v5748_v5, %v4686_v39  ;;  %v4688_v53 = vpop.f32.mrb[61].mxu0  ;;  %4950 = vmatmul.mubr.f32.gmra.mrb[166].mxu0 %v1046_v37  ;;  %3544 = vmatprep.mubr.f32.mxu1 %v1053_v44  ;;  %v1102_v37 = vld [vmem:[%s7085_s8 + $0x1bf0] sm:$0xff]  ;;  %v1113_v5 = vld [vmem:[%s7085_s8 + $0x1c48] sm:$0xff] }
 0x4ec   : > { %4954 = vmatprep.mubr.f32.mxu0 %v1057_v36  ;;  %v1106_v44 = vld [vmem:[%s7085_s8 + $0x1c10] sm:$0xff]  ;;  %v1117_v36 = vld [vmem:[%s7085_s8 + $0x1c68] sm:$0xff] }
 0x4ed   : > { %5205 = vst [vmem:[%s8379_s4 + $0xf0] sm:$0xff] %v5749_v50 }
 0x4ee   : > { %v4691_v24 = vpop.f32.mrb[62].mxu0  ;;  %3545 = vmatmul.mubr.f32.gmra.mrb[168].mxu1 %v1052_v23  ;;  %v1112_v23 = vld [vmem:[%s7085_s8 + $0x1c40] sm:$0xff] }
 0x4ef   : > { %v5751_v48 = vadd.f32 %v5750_v35, %v4691_v24  ;;  %v4693_v7 = vpop.f32.mrb[63].mxu0  ;;  %4955 = vmatmul.mubr.f32.gmra.mrb[168].mxu0 %v1056_v10  ;;  %3549 = vmatprep.mubr.f32.mxu1 %v1063_v2  ;;  %v1116_v10 = vld [vmem:[%s7085_s8 + $0x1c60] sm:$0xff]  ;;  %v1123_v2 = vld [vmem:[%s7085_s8 + $0x1c98] sm:$0xff] }
 0x4f0   : > { %4959 = vmatprep.mubr.f32.mxu0 %v1067_v34  ;;  %v1127_v35 = vld [vmem:[%s7085_s8 + $0x1cb8] sm:$0xff]  ;;  %v1122_v7 = vld [vmem:[%s7085_s8 + $0x1c90] sm:$0xff] }
 0x4f1   : > { %5206 = vst [vmem:[%s8379_s4 + $0xf8] sm:$0xff] %v5751_v48 }
 0x4f2   : > { %v4696_v14 = vpop.f32.mrb[64].mxu0  ;;  %3550 = vmatmul.mubr.f32.gmra.mrb[170].mxu1 %v1062_v62  ;;  %v1126_v62 = vld [vmem:[%s7085_s8 + $0x1cb0] sm:$0xff] }
 0x4f3   : > { %v5753_v30 = vadd.f32 %v5752_v45, %v4696_v14  ;;  %v4698_v54 = vpop.f32.mrb[65].mxu0  ;;  %4960 = vmatmul.mubr.f32.gmra.mrb[170].mxu0 %v1066_v42  ;;  %3554 = vmatprep.mubr.f32.mxu1 %v1073_v16  ;;  %v1133_v42 = vld [vmem:[%s7085_s8 + $0x1ce8] sm:$0xff] }
 0x4f4   : > { %4964 = vmatprep.mubr.f32.mxu0 %v1077_v19  ;;  %v1137_v16 = vld [vmem:[%s7085_s8 + $0x1d08] sm:$0xff]  ;;  %v1136_v54 = vld [vmem:[%s7085_s8 + $0x1d00] sm:$0xff] }
 0x4f5   : > { %5207 = vst [vmem:[%s8379_s4 + $0x100] sm:$0xff] %v5753_v30  ;;  %v1132_v30 = vld [vmem:[%s7085_s8 + $0x1ce0] sm:$0xff] }
 0x4f6   : > { %v4701_v28 = vpop.f32.mrb[66].mxu0  ;;  %3555 = vmatmul.mubr.f32.gmra.mrb[172].mxu1 %v1072_v41  ;;  %v1143_v41 = vld [vmem:[%s7085_s8 + $0x1d38] sm:$0xff] }
 0x4f7   : > { %v5755_v17 = vadd.f32 %v5754_v0, %v4701_v28  ;;  %v4703_v22 = vpop.f32.mrb[67].mxu0  ;;  %4965 = vmatmul.mubr.f32.gmra.mrb[172].mxu0 %v1076_v8  ;;  %3559 = vmatprep.mubr.f32.mxu1 %v1083_v3  ;;  %v1147_v8 = vld [vmem:[%s7085_s8 + $0x1d58] sm:$0xff]  ;;  %v1142_v28 = vld [vmem:[%s7085_s8 + $0x1d30] sm:$0xff] }
 0x4f8   : > { %4969 = vmatprep.mubr.f32.mxu0 %v1087_v31  ;;  %v1153_v22 = vld [vmem:[%s7085_s8 + $0x1d88] sm:$0xff] }
 0x4f9   : > { %5208 = vst [vmem:[%s8379_s4 + $0x108] sm:$0xff] %v5755_v17  ;;  %v1146_v17 = vld [vmem:[%s7085_s8 + $0x1d50] sm:$0xff] }
 0x4fa   : > { %v4706_v47 = vpop.f32.mrb[68].mxu0  ;;  %3560 = vmatmul.mubr.f32.gmra.mrb[174].mxu1 %v1082_v63  ;;  %v1157_v63 = vld [vmem:[%s7085_s8 + $0x1da8] sm:$0xff] }
 0x4fb   : > { %v5757_v1 = vadd.f32 %v5756_v61, %v4706_v47  ;;  %v4708_v21 = vpop.f32.mrb[69].mxu0  ;;  %4970 = vmatmul.mubr.f32.gmra.mrb[174].mxu0 %v1086_v25  ;;  %3564 = vmatprep.mubr.f32.mxu1 %v1093_v55  ;;  %v1156_v47 = vld [vmem:[%s7085_s8 + $0x1da0] sm:$0xff] }
 0x4fc   : > { %4974 = vmatprep.mubr.f32.mxu0 %v1097_v52  ;;  %v1152_v52 = vld [vmem:[%s7085_s8 + $0x1d80] sm:$0xff]  ;;  %v1167_v21 = vld [vmem:[%s7085_s8 + $0x1df8] sm:$0xff] }
 0x4fd   : > { %5209 = vst [vmem:[%s8379_s4 + $0x110] sm:$0xff] %v5757_v1  ;;  %v1163_v1 = vld [vmem:[%s7085_s8 + $0x1dd8] sm:$0xff] }
 0x4fe   : > { %v4711_v51 = vpop.f32.mrb[70].mxu0  ;;  %3565 = vmatmul.mubr.f32.gmra.mrb[176].mxu1 %v1092_v43 }
 0x4ff   : > { %v5759_v32 = vadd.f32 %v5758_v56, %v4711_v51  ;;  %v4713_v58 = vpop.f32.mrb[71].mxu0  ;;  %4975 = vmatmul.mubr.f32.gmra.mrb[176].mxu0 %v1096_v11  ;;  %3569 = vmatprep.mubr.f32.mxu1 %v1103_v20  ;;  %v1162_v56 = vld [vmem:[%s7085_s8 + $0x1dd0] sm:$0xff]  ;;  %v1173_v51 = vld [vmem:[%s7085_s8 + $0x1e28] sm:$0xff] }
 0x500   : > { %4979 = vmatprep.mubr.f32.mxu0 %v1107_v59  ;;  %v1166_v59 = vld [vmem:[%s7085_s8 + $0x1df0] sm:$0xff] }
 0x501   : > { %5210 = vst [vmem:[%s8379_s4 + $0x118] sm:$0xff] %v5759_v32  ;;  %v1177_v32 = vld [vmem:[%s7085_s8 + $0x1e48] sm:$0xff] }
 0x502   : > { %v4716_v39 = vpop.f32.mrb[72].mxu0  ;;  %3570 = vmatmul.mubr.f32.gmra.mrb[178].mxu1 %v1102_v37 }
 0x503   : > { %v5761_v50 = vadd.f32 %v5760_v13, %v4716_v39  ;;  %v4718_v53 = vpop.f32.mrb[73].mxu0  ;;  %4980 = vmatmul.mubr.f32.gmra.mrb[178].mxu0 %v1106_v44  ;;  %3574 = vmatprep.mubr.f32.mxu1 %v1113_v5  ;;  %v1172_v5 = vld [vmem:[%s7085_s8 + $0x1e20] sm:$0xff]  ;;  %v1187_v39 = vld [vmem:[%s7085_s8 + $0x1e98] sm:$0xff] }
 0x504   : > { %4984 = vmatprep.mubr.f32.mxu0 %v1117_v36  ;;  %v1176_v13 = vld [vmem:[%s7085_s8 + $0x1e40] sm:$0xff]  ;;  %v1183_v36 = vld [vmem:[%s7085_s8 + $0x1e78] sm:$0xff] }
 0x505   : > { %5211 = vst [vmem:[%s8379_s4 + $0x120] sm:$0xff] %v5761_v50 }
 0x506   : > { %v4721_v34 = vpop.f32.mrb[74].mxu0  ;;  %3575 = vmatmul.mubr.f32.gmra.mrb[180].mxu1 %v1112_v23 }
 0x507   : > { %v5763_v24 = vadd.f32 %v5762_v38, %v4721_v34  ;;  %v4723_v48 = vpop.f32.mrb[75].mxu0  ;;  %4985 = vmatmul.mubr.f32.gmra.mrb[180].mxu0 %v1116_v10  ;;  %3579 = vmatprep.mubr.f32.mxu1 %v1123_v2  ;;  %v1182_v10 = vld [vmem:[%s7085_s8 + $0x1e70] sm:$0xff]  ;;  %v1193_v38 = vld [vmem:[%s7085_s8 + $0x1ec8] sm:$0xff] }
 0x508   : > { %4989 = vmatprep.mubr.f32.mxu0 %v1127_v35  ;;  %v1186_v2 = vld [vmem:[%s7085_s8 + $0x1e90] sm:$0xff]  ;;  %v1197_v35 = vld [vmem:[%s7085_s8 + $0x1ee8] sm:$0xff] }
 0x509   : > { %5212 = vst [vmem:[%s8379_s4 + $0x128] sm:$0xff] %v5763_v24 }
 0x50a   : > { %v4726_v45 = vpop.f32.mrb[76].mxu0  ;;  %3580 = vmatmul.mubr.f32.gmra.mrb[182].mxu1 %v1122_v7  ;;  %v1192_v7 = vld [vmem:[%s7085_s8 + $0x1ec0] sm:$0xff] }
 0x50b   : > { %v5765_v19 = vadd.f32 %v5764_v18, %v4726_v45  ;;  %v4728_v14 = vpop.f32.mrb[77].mxu0  ;;  %4990 = vmatmul.mubr.f32.gmra.mrb[182].mxu0 %v1126_v62  ;;  %3584 = vmatprep.mubr.f32.mxu1 %v1133_v42  ;;  %v1196_v62 = vld [vmem:[%s7085_s8 + $0x1ee0] sm:$0xff]  ;;  %v1203_v42 = vld [vmem:[%s7085_s8 + $0x1f18] sm:$0xff] }
 0x50c   : > { %4994 = vmatprep.mubr.f32.mxu0 %v1137_v16  ;;  %v1207_v18 = vld [vmem:[%s7085_s8 + $0x1f38] sm:$0xff]  ;;  %v1202_v14 = vld [vmem:[%s7085_s8 + $0x1f10] sm:$0xff] }
 0x50d   : > { %5213 = vst [vmem:[%s8379_s4 + $0x130] sm:$0xff] %v5765_v19 }
 0x50e   : > { %v4731_v3 = vpop.f32.mrb[78].mxu0  ;;  %3585 = vmatmul.mubr.f32.gmra.mrb[184].mxu1 %v1132_v30  ;;  %v1206_v30 = vld [vmem:[%s7085_s8 + $0x1f30] sm:$0xff] }
 0x50f   : > { %v5767_v0 = vadd.f32 %v5766_v60, %v4731_v3  ;;  %v4733_v31 = vpop.f32.mrb[79].mxu0  ;;  %4995 = vmatmul.mubr.f32.gmra.mrb[184].mxu0 %v1136_v54  ;;  %3589 = vmatprep.mubr.f32.mxu1 %v1143_v41  ;;  %v1213_v54 = vld [vmem:[%s7085_s8 + $0x1f68] sm:$0xff] }
 0x510   : > { %4999 = vmatprep.mubr.f32.mxu0 %v1147_v8  ;;  %v1217_v41 = vld [vmem:[%s7085_s8 + $0x1f88] sm:$0xff]  ;;  %v1216_v31 = vld [vmem:[%s7085_s8 + $0x1f80] sm:$0xff] }
 0x511   : > { %5214 = vst [vmem:[%s8379_s4 + $0x138] sm:$0xff] %v5767_v0  ;;  %v1212_v0 = vld [vmem:[%s7085_s8 + $0x1f60] sm:$0xff] }
 0x512   : > { %v4736_v25 = vpop.f32.mrb[80].mxu0  ;;  %3590 = vmatmul.mubr.f32.gmra.mrb[186].mxu1 %v1142_v28  ;;  %v1223_v28 = vld [vmem:[%s7085_s8 + $0x1fb8] sm:$0xff] }
 0x513   : > { %v5769_v55 = vadd.f32 %v5768_v15, %v4736_v25  ;;  %v4738_v61 = vpop.f32.mrb[81].mxu0  ;;  %5000 = vmatmul.mubr.f32.gmra.mrb[186].mxu0 %v1146_v17  ;;  %3594 = vmatprep.mubr.f32.mxu1 %v1153_v22  ;;  %v1227_v17 = vld [vmem:[%s7085_s8 + $0x1fd8] sm:$0xff]  ;;  %v1222_v25 = vld [vmem:[%s7085_s8 + $0x1fb0] sm:$0xff] }
 0x514   : > { %5004 = vmatprep.mubr.f32.mxu0 %v1157_v63  ;;  %v1233_v61 = vld [vmem:[%s7085_s8 + $0x2008] sm:$0xff] }
 0x515   : > { %5215 = vst [vmem:[%s8379_s4 + $0x140] sm:$0xff] %v5769_v55  ;;  %v1226_v55 = vld [vmem:[%s7085_s8 + $0x1fd0] sm:$0xff] }
 0x516   : > { %v4741_v43 = vpop.f32.mrb[82].mxu0  ;;  %3595 = vmatmul.mubr.f32.gmra.mrb[188].mxu1 %v1152_v52  ;;  %v1237_v52 = vld [vmem:[%s7085_s8 + $0x2028] sm:$0xff] }
 0x517   : > { %v5771_v11 = vadd.f32 %v5770_v29, %v4741_v43  ;;  %v4743_v20 = vpop.f32.mrb[83].mxu0  ;;  %5005 = vmatmul.mubr.f32.gmra.mrb[188].mxu0 %v1156_v47  ;;  %3599 = vmatprep.mubr.f32.mxu1 %v1163_v1  ;;  %v1236_v43 = vld [vmem:[%s7085_s8 + $0x2020] sm:$0xff] }
 0x518   : > { %5009 = vmatprep.mubr.f32.mxu0 %v1167_v21  ;;  %v1232_v21 = vld [vmem:[%s7085_s8 + $0x2000] sm:$0xff]  ;;  %v1247_v20 = vld [vmem:[%s7085_s8 + $0x2078] sm:$0xff] }
 0x519   : > { %5216 = vst [vmem:[%s8379_s4 + $0x148] sm:$0xff] %v5771_v11  ;;  %v1243_v11 = vld [vmem:[%s7085_s8 + $0x2058] sm:$0xff] }
 0x51a   : > { %v4746_v58 = vpop.f32.mrb[84].mxu0  ;;  %3600 = vmatmul.mubr.f32.gmra.mrb[190].mxu1 %v1162_v56 }
 0x51b   : > { %v5773_v37 = vadd.f32 %v5772_v12, %v4746_v58  ;;  %v4748_v44 = vpop.f32.mrb[85].mxu0  ;;  %5010 = vmatmul.mubr.f32.gmra.mrb[190].mxu0 %v1166_v59  ;;  %3604 = vmatprep.mubr.f32.mxu1 %v1173_v51  ;;  %v1242_v12 = vld [vmem:[%s7085_s8 + $0x2050] sm:$0xff]  ;;  %v1253_v58 = vld [vmem:[%s7085_s8 + $0x20a8] sm:$0xff] }
 0x51c   : > { %5014 = vmatprep.mubr.f32.mxu0 %v1177_v32  ;;  %v1246_v32 = vld [vmem:[%s7085_s8 + $0x2070] sm:$0xff] }
 0x51d   : > { %5217 = vst [vmem:[%s8379_s4 + $0x150] sm:$0xff] %v5773_v37  ;;  %v1257_v37 = vld [vmem:[%s7085_s8 + $0x20c8] sm:$0xff] }
 0x51e   : > { %v4751_v50 = vpop.f32.mrb[86].mxu0  ;;  %3605 = vmatmul.mubr.f32.gmra.mrb[192].mxu1 %v1172_v5 }
 0x51f   : > { %v5775_v53 = vadd.f32 %v5774_v57, %v4751_v50  ;;  %v4753_v23 = vpop.f32.mrb[87].mxu0  ;;  %5015 = vmatmul.mubr.f32.gmra.mrb[192].mxu0 %v1176_v13  ;;  %3609 = vmatprep.mubr.f32.mxu1 %v1183_v36  ;;  %v1252_v36 = vld [vmem:[%s7085_s8 + $0x20a0] sm:$0xff] }
 0x520   : > { %5019 = vmatprep.mubr.f32.mxu0 %v1187_v39  ;;  %v1256_v57 = vld [vmem:[%s7085_s8 + $0x20c0] sm:$0xff]  ;;  %v1263_v39 = vld [vmem:[%s7085_s8 + $0x20f8] sm:$0xff] }
 0x521   : > { %5218 = vst [vmem:[%s8379_s4 + $0x158] sm:$0xff] %v5775_v53  ;;  %v9070_v50 = vld [vmem:[#allocation12_spill] sm:$0xff]  ;;  %v1267_v53 = vld [vmem:[%s7085_s8 + $0x2118] sm:$0xff] }
 0x522   : > { %v4756_v34 = vpop.f32.mrb[88].mxu0  ;;  %3610 = vmatmul.mubr.f32.gmra.mrb[194].mxu1 %v1182_v10  ;;  %v5790_v27 = vadd.f32 %v9070_v50, %v8365_v40  ;;  %v9077_v50 = vld [vmem:[#allocation19_spill] sm:$0xff] }
 0x523   : > { %v5777_v24 = vadd.f32 %v5776_v9, %v4756_v34  ;;  %v4758_v48 = vpop.f32.mrb[89].mxu0  ;;  %5020 = vmatmul.mubr.f32.gmra.mrb[194].mxu0 %v1186_v2  ;;  %3614 = vmatprep.mubr.f32.mxu1 %v1193_v38  ;;  %v1262_v38 = vld [vmem:[%s7085_s8 + $0x20f0] sm:$0xff]  ;;  %v9071_v34 = vld [vmem:[#allocation13_spill] sm:$0xff] }
 0x524   : > { %5024 = vmatprep.mubr.f32.mxu0 %v1197_v35  ;;  %v1266_v9 = vld [vmem:[%s7085_s8 + $0x2110] sm:$0xff]  ;;  %v1273_v35 = vld [vmem:[%s7085_s8 + $0x2148] sm:$0xff] }
 0x525   : > { %5219 = vst [vmem:[%s8379_s4 + $0x160] sm:$0xff] %v5777_v24  ;;  %v5792_v24 = vadd.f32 %v9071_v34, %v8365_v40  ;;  %v1277_v48 = vld [vmem:[%s7085_s8 + $0x2168] sm:$0xff]  ;;  %v9078_v34 = vld [vmem:[#allocation20_spill] sm:$0xff] }
 0x526   : > { %v4761_v16 = vpop.f32.mrb[90].mxu0  ;;  %3615 = vmatmul.mubr.f32.gmra.mrb[196].mxu1 %v1192_v7 }
 0x527   : > { %v5779_v45 = vadd.f32 %v5778_v33, %v4761_v16  ;;  %v4763_v19 = vpop.f32.mrb[91].mxu0  ;;  %5025 = vmatmul.mubr.f32.gmra.mrb[196].mxu0 %v1196_v62  ;;  %3619 = vmatprep.mubr.f32.mxu1 %v1203_v42  ;;  %v1272_v33 = vld [vmem:[%s7085_s8 + $0x2140] sm:$0xff]  ;;  %v1283_v16 = vld [vmem:[%s7085_s8 + $0x2198] sm:$0xff] }
 0x528   : > { %5029 = vmatprep.mubr.f32.mxu0 %v1207_v18  ;;  %v1276_v18 = vld [vmem:[%s7085_s8 + $0x2160] sm:$0xff] }
 0x529   : > { %5220 = vst [vmem:[%s8379_s4 + $0x168] sm:$0xff] %v5779_v45  ;;  %v9072_v45 = vld [vmem:[#allocation14_spill] sm:$0xff] }
 0x52a   : > { %v4766_v60 = vpop.f32.mrb[92].mxu0  ;;  %3620 = vmatmul.mubr.f32.gmra.mrb[198].mxu1 %v1202_v14  ;;  %v5794_v19 = vadd.f32 %v9072_v45, %v8365_v40  ;;  %v1287_v14 = vld [vmem:[%s7085_s8 + $0x21b8] sm:$0xff]  ;;  %v9079_v45 = vld [vmem:[#allocation21_spill] sm:$0xff] }
 0x52b   : > { %v5781_v8 = vadd.f32 %v5780_v49, %v4766_v60  ;;  %v4768_v3 = vpop.f32.mrb[93].mxu0  ;;  %5030 = vmatmul.mubr.f32.gmra.mrb[198].mxu0 %v1206_v30  ;;  %3624 = vmatprep.mubr.f32.mxu1 %v1213_v54  ;;  %v1286_v60 = vld [vmem:[%s7085_s8 + $0x21b0] sm:$0xff] }
 0x52c   : > { %5034 = vmatprep.mubr.f32.mxu0 %v1217_v41  ;;  %v1282_v41 = vld [vmem:[%s7085_s8 + $0x2190] sm:$0xff]  ;;  %v9073_v3 = vld [vmem:[#allocation15_spill] sm:$0xff] }
 0x52d   : > { %5221 = vst [vmem:[%s8379_s4 + $0x170] sm:$0xff] %v5781_v8  ;;  %v1293_v8 = vld [vmem:[%s7085_s8 + $0x21e8] sm:$0xff] }
 0x52e   : > { %v4771_v22 = vpop.f32.mrb[94].mxu0  ;;  %3625 = vmatmul.mubr.f32.gmra.mrb[200].mxu1 %v1212_v0  ;;  %v5796_v0 = vadd.f32 %v9073_v3, %v8365_v40  ;;  %v9080_v3 = vld [vmem:[#allocation22_spill] sm:$0xff] }
 0x52f   : > { %v5783_v15 = vadd.f32 %v5782_v4, %v4771_v22  ;;  %v4773_v63 = vpop.f32.mrb[95].mxu0  ;;  %5035 = vmatmul.mubr.f32.gmra.mrb[200].mxu0 %v1216_v31  ;;  %3629 = vmatprep.mubr.f32.mxu1 %v1223_v28  ;;  %v1297_v31 = vld [vmem:[%s7085_s8 + $0x2208] sm:$0xff]  ;;  %v1292_v22 = vld [vmem:[%s7085_s8 + $0x21e0] sm:$0xff] }
 0x530   : > { %5039 = vmatprep.mubr.f32.mxu0 %v1227_v17  ;;  %v1303_v63 = vld [vmem:[%s7085_s8 + $0x2238] sm:$0xff] }
 0x531   : > { %5222 = vst [vmem:[%s8379_s4 + $0x178] sm:$0xff] %v5783_v15  ;;  %v1296_v15 = vld [vmem:[%s7085_s8 + $0x2200] sm:$0xff] }
 0x532   : > { %v4776_v47 = vpop.f32.mrb[96].mxu0  ;;  %3630 = vmatmul.mubr.f32.gmra.mrb[202].mxu1 %v1222_v25  ;;  %v9074_v25 = vld [vmem:[#allocation16_spill] sm:$0xff] }
 0x533   : > { %v5785_v1 = vadd.f32 %v5784_v26, %v4776_v47  ;;  %v4778_v29 = vpop.f32.mrb[97].mxu0  ;;  %5040 = vmatmul.mubr.f32.gmra.mrb[202].mxu0 %v1226_v55  ;;  %3634 = vmatprep.mubr.f32.mxu1 %v1233_v61  ;;  %v5798_v55 = vadd.f32 %v9074_v25, %v8365_v40  ;;  %v1307_v61 = vld [vmem:[%s7085_s8 + $0x2258] sm:$0xff] }
 0x534   : > { %5044 = vmatprep.mubr.f32.mxu0 %v1237_v52  ;;  %v1306_v29 = vld [vmem:[%s7085_s8 + $0x2250] sm:$0xff]  ;;  %v9081_v25 = vld [vmem:[#allocation23_spill] sm:$0xff] }
 0x535   : > { %5223 = vst [vmem:[%s8379_s4 + $0x180] sm:$0xff] %v5785_v1  ;;  %v1302_v1 = vld [vmem:[%s7085_s8 + $0x2230] sm:$0xff] }
 0x536   : > { %v4781_v56 = vpop.f32.mrb[98].mxu0  ;;  %3635 = vmatmul.mubr.f32.gmra.mrb[204].mxu1 %v1232_v21  ;;  %v1313_v21 = vld [vmem:[%s7085_s8 + $0x2288] sm:$0xff] }
 0x537   : > { %v5787_v59 = vadd.f32 %v5786_v46, %v4781_v56  ;;  %v4783_v51 = vpop.f32.mrb[99].mxu0  ;;  %5045 = vmatmul.mubr.f32.gmra.mrb[204].mxu0 %v1236_v43  ;;  %3639 = vmatprep.mubr.f32.mxu1 %v1243_v11  ;;  %v9075_v43 = vld [vmem:[#allocation17_spill] sm:$0xff] }
 0x538   : > { %5049 = vmatprep.mubr.f32.mxu0 %v1247_v20  ;;  %v5800_v11 = vadd.f32 %v9075_v43, %v8365_v40  ;;  %v1317_v46 = vld [vmem:[%s7085_s8 + $0x22a8] sm:$0xff]  ;;  %v1312_v51 = vld [vmem:[%s7085_s8 + $0x2280] sm:$0xff] }
 0x539   : > { %5224 = vst [vmem:[%s8379_s4 + $0x188] sm:$0xff] %v5787_v59  ;;  %v9082_v43 = vld [vmem:[#allocation24_spill] sm:$0xff] }
 0x53a   : > { %v4786_v44 = vpop.f32.mrb[100].mxu0  ;;  %3640 = vmatmul.mubr.f32.gmra.mrb[206].mxu1 %v1242_v12  ;;  %v1316_v12 = vld [vmem:[%s7085_s8 + $0x22a0] sm:$0xff] }
 0x53b   : > { %v5789_v5 = vadd.f32 %v5788_v6, %v4786_v44  ;;  %v4788_v13 = vpop.f32.mrb[101].mxu0  ;;  %5050 = vmatmul.mubr.f32.gmra.mrb[206].mxu0 %v1246_v32  ;;  %3644 = vmatprep.mubr.f32.mxu1 %v1253_v58  ;;  %v1323_v32 = vld [vmem:[%s7085_s8 + $0x22d8] sm:$0xff]  ;;  %v9076_v58 = vld [vmem:[#allocation18_spill] sm:$0xff] }
 0x53c   : > { %5054 = vmatprep.mubr.f32.mxu0 %v1257_v37  ;;  %v5802_v6 = vadd.f32 %v9076_v58, %v8365_v40  ;;  %v1327_v37 = vld [vmem:[%s7085_s8 + $0x22f8] sm:$0xff] }
 0x53d   : > { %5225 = vst [vmem:[%s8379_s4 + $0x190] sm:$0xff] %v5789_v5 }
 0x53e   : > { %v4791_v23 = vpop.f32.mrb[102].mxu0  ;;  %3645 = vmatmul.mubr.f32.gmra.mrb[208].mxu1 %v1252_v36  ;;  %v1322_v36 = vld [vmem:[%s7085_s8 + $0x22d0] sm:$0xff] }
 0x53f   : > { %v5791_v10 = vadd.f32 %v5790_v27, %v4791_v23  ;;  %v4793_v2 = vpop.f32.mrb[103].mxu0  ;;  %5055 = vmatmul.mubr.f32.gmra.mrb[208].mxu0 %v1256_v57  ;;  %3649 = vmatprep.mubr.f32.mxu1 %v1263_v39  ;;  %v1326_v57 = vld [vmem:[%s7085_s8 + $0x22f0] sm:$0xff]  ;;  %v1333_v39 = vld [vmem:[%s7085_s8 + $0x2328] sm:$0xff]  ;;  %v5804_v27 = vadd.f32 %v9077_v50, %v8365_v40  ;;  %v1403_v50 = vld [vmem:[%s7085_s8 + $0x2558] sm:$0xff] }
 0x540   : > { %5059 = vmatprep.mubr.f32.mxu0 %v1267_v53  ;;  %v1337_v53 = vld [vmem:[%s7085_s8 + $0x2348] sm:$0xff] }
 0x541   : > { %5226 = vst [vmem:[%s8379_s4 + $0x198] sm:$0xff] %v5791_v10 }
 0x542   : > { %v4796_v7 = vpop.f32.mrb[104].mxu0  ;;  %3650 = vmatmul.mubr.f32.gmra.mrb[210].mxu1 %v1262_v38  ;;  %v1332_v38 = vld [vmem:[%s7085_s8 + $0x2320] sm:$0xff] }
 0x543   : > { %v5793_v62 = vadd.f32 %v5792_v24, %v4796_v7  ;;  %v4798_v42 = vpop.f32.mrb[105].mxu0  ;;  %5060 = vmatmul.mubr.f32.gmra.mrb[210].mxu0 %v1266_v9  ;;  %3654 = vmatprep.mubr.f32.mxu1 %v1273_v35  ;;  %v1336_v9 = vld [vmem:[%s7085_s8 + $0x2340] sm:$0xff]  ;;  %v1343_v35 = vld [vmem:[%s7085_s8 + $0x2378] sm:$0xff]  ;;  %v5806_v24 = vadd.f32 %v9078_v34, %v8365_v40  ;;  %v1406_v34 = vld [vmem:[%s7085_s8 + $0x2570] sm:$0xff] }
 0x544   : > { %5064 = vmatprep.mubr.f32.mxu0 %v1277_v48  ;;  %v1347_v48 = vld [vmem:[%s7085_s8 + $0x2398] sm:$0xff] }
 0x545   : > { %5227 = vst [vmem:[%s8379_s4 + $0x1a0] sm:$0xff] %v5793_v62 }
 0x546   : > { %v4801_v30 = vpop.f32.mrb[106].mxu0  ;;  %3655 = vmatmul.mubr.f32.gmra.mrb[212].mxu1 %v1272_v33  ;;  %v1342_v33 = vld [vmem:[%s7085_s8 + $0x2370] sm:$0xff] }
 0x547   : > { %v5795_v54 = vadd.f32 %v5794_v19, %v4801_v30  ;;  %v4803_v49 = vpop.f32.mrb[107].mxu0  ;;  %5065 = vmatmul.mubr.f32.gmra.mrb[212].mxu0 %v1276_v18  ;;  %3659 = vmatprep.mubr.f32.mxu1 %v1283_v16  ;;  %v1346_v18 = vld [vmem:[%s7085_s8 + $0x2390] sm:$0xff]  ;;  %v1353_v16 = vld [vmem:[%s7085_s8 + $0x23c8] sm:$0xff]  ;;  %v5808_v19 = vadd.f32 %v9079_v45, %v8365_v40 }
 0x548   : > { %5069 = vmatprep.mubr.f32.mxu0 %v1287_v14  ;;  %v1357_v14 = vld [vmem:[%s7085_s8 + $0x23e8] sm:$0xff] }
 0x549   : > { %5228 = vst [vmem:[%s8379_s4 + $0x1a8] sm:$0xff] %v5795_v54 }
 0x54a   : > { %v4806_v28 = vpop.f32.mrb[108].mxu0  ;;  %3660 = vmatmul.mubr.f32.gmra.mrb[214].mxu1 %v1282_v41  ;;  %v1352_v41 = vld [vmem:[%s7085_s8 + $0x23c0] sm:$0xff] }
 0x54b   : > { %v5797_v4 = vadd.f32 %v5796_v0, %v4806_v28  ;;  %v4808_v17 = vpop.f32.mrb[109].mxu0  ;;  %5070 = vmatmul.mubr.f32.gmra.mrb[214].mxu0 %v1286_v60  ;;  %3664 = vmatprep.mubr.f32.mxu1 %v1293_v8  ;;  %v1356_v60 = vld [vmem:[%s7085_s8 + $0x23e0] sm:$0xff]  ;;  %v1363_v8 = vld [vmem:[%s7085_s8 + $0x2418] sm:$0xff]  ;;  %v5810_v0 = vadd.f32 %v9080_v3, %v8365_v40  ;;  %v1422_v3 = vld [vmem:[%s7085_s8 + $0x25f0] sm:$0xff] }
 0x54c   : > { %5074 = vmatprep.mubr.f32.mxu0 %v1297_v31  ;;  %v1367_v31 = vld [vmem:[%s7085_s8 + $0x2438] sm:$0xff] }
 0x54d   : > { %5229 = vst [vmem:[%s8379_s4 + $0x1b0] sm:$0xff] %v5797_v4 }
 0x54e   : > { %v4811_v26 = vpop.f32.mrb[110].mxu0  ;;  %3665 = vmatmul.mubr.f32.gmra.mrb[216].mxu1 %v1292_v22  ;;  %v1362_v22 = vld [vmem:[%s7085_s8 + $0x2410] sm:$0xff] }
 0x54f   : > { %v5799_v52 = vadd.f32 %v5798_v55, %v4811_v26  ;;  %v4813_v47 = vpop.f32.mrb[111].mxu0  ;;  %5075 = vmatmul.mubr.f32.gmra.mrb[216].mxu0 %v1296_v15  ;;  %3669 = vmatprep.mubr.f32.mxu1 %v1303_v63  ;;  %v1366_v15 = vld [vmem:[%s7085_s8 + $0x2430] sm:$0xff]  ;;  %v1373_v63 = vld [vmem:[%s7085_s8 + $0x2468] sm:$0xff]  ;;  %v5812_v55 = vadd.f32 %v9081_v25, %v8365_v40 }
 0x550   : > { %5079 = vmatprep.mubr.f32.mxu0 %v1307_v61  ;;  %v1377_v61 = vld [vmem:[%s7085_s8 + $0x2488] sm:$0xff] }
 0x551   : > { %5230 = vst [vmem:[%s8379_s4 + $0x1b8] sm:$0xff] %v5799_v52 }
 0x552   : > { %v4816_v20 = vpop.f32.mrb[112].mxu0  ;;  %3670 = vmatmul.mubr.f32.gmra.mrb[218].mxu1 %v1302_v1  ;;  %v1372_v1 = vld [vmem:[%s7085_s8 + $0x2460] sm:$0xff] }
 0x553   : > { %v5801_v56 = vadd.f32 %v5800_v11, %v4816_v20  ;;  %v4818_v59 = vpop.f32.mrb[113].mxu0  ;;  %5080 = vmatmul.mubr.f32.gmra.mrb[218].mxu0 %v1306_v29  ;;  %3674 = vmatprep.mubr.f32.mxu1 %v1313_v21  ;;  %v1376_v29 = vld [vmem:[%s7085_s8 + $0x2480] sm:$0xff]  ;;  %v1383_v21 = vld [vmem:[%s7085_s8 + $0x24b8] sm:$0xff]  ;;  %v5814_v11 = vadd.f32 %v9082_v43, %v8365_v40 }
 0x554   : > { %5084 = vmatprep.mubr.f32.mxu0 %v1317_v46  ;;  %v1387_v46 = vld [vmem:[%s7085_s8 + $0x24d8] sm:$0xff] }
 0x555   : > { %5231 = vst [vmem:[%s8379_s4 + $0x1c0] sm:$0xff] %v5801_v56 }
 0x556   : > { %v4821_v44 = vpop.f32.mrb[114].mxu0  ;;  %3675 = vmatmul.mubr.f32.gmra.mrb[220].mxu1 %v1312_v51  ;;  %v1382_v51 = vld [vmem:[%s7085_s8 + $0x24b0] sm:$0xff] }
 0x557   : > { %v5803_v5 = vadd.f32 %v5802_v6, %v4821_v44  ;;  %v4823_v13 = vpop.f32.mrb[115].mxu0  ;;  %5085 = vmatmul.mubr.f32.gmra.mrb[220].mxu0 %v1316_v12  ;;  %3679 = vmatprep.mubr.f32.mxu1 %v1323_v32  ;;  %v1386_v12 = vld [vmem:[%s7085_s8 + $0x24d0] sm:$0xff]  ;;  %v1393_v32 = vld [vmem:[%s7085_s8 + $0x2508] sm:$0xff] }
 0x558   : > { %5089 = vmatprep.mubr.f32.mxu0 %v1327_v37  ;;  %v1397_v6 = vld [vmem:[%s7085_s8 + $0x2528] sm:$0xff] }
 0x559   : > { %5232 = vst [vmem:[%s8379_s4 + $0x1c8] sm:$0xff] %v5803_v5 }
 0x55a   : > { %v4826_v23 = vpop.f32.mrb[116].mxu0  ;;  %3680 = vmatmul.mubr.f32.gmra.mrb[222].mxu1 %v1322_v36  ;;  %v1392_v36 = vld [vmem:[%s7085_s8 + $0x2500] sm:$0xff] }
 0x55b   : > { %v5805_v10 = vadd.f32 %v5804_v27, %v4826_v23  ;;  %v4828_v2 = vpop.f32.mrb[117].mxu0  ;;  %5090 = vmatmul.mubr.f32.gmra.mrb[222].mxu0 %v1326_v57  ;;  %3684 = vmatprep.mubr.f32.mxu1 %v1333_v39  ;;  %v1396_v39 = vld [vmem:[%s7085_s8 + $0x2520] sm:$0xff] }
 0x55c   : > { %5094 = vmatprep.mubr.f32.mxu0 %v1337_v53  ;;  %v1407_v53 = vld [vmem:[%s7085_s8 + $0x2578] sm:$0xff] }
 0x55d   : > { %5233 = vst [vmem:[%s8379_s4 + $0x1d0] sm:$0xff] %v5805_v10 }
 0x55e   : > { %v4831_v7 = vpop.f32.mrb[118].mxu0  ;;  %3685 = vmatmul.mubr.f32.gmra.mrb[224].mxu1 %v1332_v38 }
 0x55f   : > { %v5807_v62 = vadd.f32 %v5806_v24, %v4831_v7  ;;  %v4833_v42 = vpop.f32.mrb[119].mxu0  ;;  %5095 = vmatmul.mubr.f32.gmra.mrb[224].mxu0 %v1336_v9  ;;  %3689 = vmatprep.mubr.f32.mxu1 %v1343_v35  ;;  %v1402_v9 = vld [vmem:[%s7085_s8 + $0x2550] sm:$0xff]  ;;  %v1413_v24 = vld [vmem:[%s7085_s8 + $0x25a8] sm:$0xff] }
 0x560   : > { %5099 = vmatprep.mubr.f32.mxu0 %v1347_v48  ;;  %v1417_v7 = vld [vmem:[%s7085_s8 + $0x25c8] sm:$0xff] }
 0x561   : > { %5234 = vst [vmem:[%s8379_s4 + $0x1d8] sm:$0xff] %v5807_v62 }
 0x562   : > { %v4836_v30 = vpop.f32.mrb[120].mxu0  ;;  %3690 = vmatmul.mubr.f32.gmra.mrb[226].mxu1 %v1342_v33 }
 0x563   : > { %v5809_v54 = vadd.f32 %v5808_v19, %v4836_v30  ;;  %v4838_v49 = vpop.f32.mrb[121].mxu0  ;;  %5100 = vmatmul.mubr.f32.gmra.mrb[226].mxu0 %v1346_v18  ;;  %3694 = vmatprep.mubr.f32.mxu1 %v1353_v16  ;;  %v1412_v16 = vld [vmem:[%s7085_s8 + $0x25a0] sm:$0xff] }
 0x564   : > { %5104 = vmatprep.mubr.f32.mxu0 %v1357_v14  ;;  %v1416_v19 = vld [vmem:[%s7085_s8 + $0x25c0] sm:$0xff]  ;;  %v1423_v14 = vld [vmem:[%s7085_s8 + $0x25f8] sm:$0xff] }
 0x565   : > { %5235 = vst [vmem:[%s8379_s4 + $0x1e0] sm:$0xff] %v5809_v54  ;;  %v1427_v54 = vld [vmem:[%s7085_s8 + $0x2618] sm:$0xff] }
 0x566   : > { %v4841_v28 = vpop.f32.mrb[122].mxu0  ;;  %3695 = vmatmul.mubr.f32.gmra.mrb[228].mxu1 %v1352_v41 }
 0x567   : > { %v5811_v4 = vadd.f32 %v5810_v0, %v4841_v28  ;;  %v4843_v17 = vpop.f32.mrb[123].mxu0  ;;  %5105 = vmatmul.mubr.f32.gmra.mrb[228].mxu0 %v1356_v60  ;;  %3699 = vmatprep.mubr.f32.mxu1 %v1363_v8  ;;  %v1433_v28 = vld [vmem:[%s7085_s8 + $0x2648] sm:$0xff] }
 0x568   : > { %5109 = vmatprep.mubr.f32.mxu0 %v1367_v31  ;;  %v1426_v31 = vld [vmem:[%s7085_s8 + $0x2610] sm:$0xff]  ;;  %v1437_v17 = vld [vmem:[%s7085_s8 + $0x2668] sm:$0xff] }
 0x569   : > { %5236 = vst [vmem:[%s8379_s4 + $0x1e8] sm:$0xff] %v5811_v4 }
 0x56a   : > { %v4846_v26 = vpop.f32.mrb[124].mxu0  ;;  %3700 = vmatmul.mubr.f32.gmra.mrb[230].mxu1 %v1362_v22 }
 0x56b   : > { %v5813_v52 = vadd.f32 %v5812_v55, %v4846_v26  ;;  %v4848_v47 = vpop.f32.mrb[125].mxu0  ;;  %5110 = vmatmul.mubr.f32.gmra.mrb[230].mxu0 %v1366_v15  ;;  %3704 = vmatprep.mubr.f32.mxu1 %v1373_v63  ;;  %v1432_v55 = vld [vmem:[%s7085_s8 + $0x2640] sm:$0xff] }
 0x56c   : > { %5114 = vmatprep.mubr.f32.mxu0 %v1377_v61  ;;  %v1436_v26 = vld [vmem:[%s7085_s8 + $0x2660] sm:$0xff] }
 0x56d   : > { %5237 = vst [vmem:[%s8379_s4 + $0x1f0] sm:$0xff] %v5813_v52  ;;  %v1443_v52 = vld [vmem:[%s7085_s8 + $0x2698] sm:$0xff] }
 0x56e   : > { %v4851_v20 = vpop.f32.mrb[126].mxu0  ;;  %3705 = vmatmul.mubr.f32.gmra.mrb[232].mxu1 %v1372_v1  ;;  %v1447_v1 = vld [vmem:[%s7085_s8 + $0x26b8] sm:$0xff] }
 0x56f   : > { %v5815_v56 = vadd.f32 %v5814_v11, %v4851_v20  ;;  %v4853_v59 = vpop.f32.mrb[127].mxu0  ;;  %5115 = vmatmul.mubr.f32.gmra.mrb[232].mxu0 %v1376_v29  ;;  %3709 = vmatprep.mubr.f32.mxu1 %v1383_v21 }
 0x570   : > { %5119 = vmatprep.mubr.f32.mxu0 %v1387_v46  ;;  %v1442_v46 = vld [vmem:[%s7085_s8 + $0x2690] sm:$0xff]  ;;  %v1453_v59 = vld [vmem:[%s7085_s8 + $0x26e8] sm:$0xff] }
 0x571   : > { %5238 = vst [vmem:[%s8379_s4 + $0x1f8] sm:$0xff] %v5815_v56  ;;  %v3446_v58 = vpop.f32.mrb[128].mxu1  ;;  %v1446_v56 = vld [vmem:[%s7085_s8 + $0x26b0] sm:$0xff] }
 0x572   : > { %v5816_v37 = vadd.f32 %v3446_v58, %v8365_v40  ;;  %v4856_v44 = vpop.f32.mrb[128].mxu0  ;;  %v3448_v5 = vpop.f32.mrb[129].mxu1  ;;  %3710 = vmatmul.mubr.f32.gmra.mrb[234].mxu1 %v1382_v51 }
 0x573   : > { %v4858_v13 = vpop.f32.mrb[129].mxu0  ;;  %5120 = vmatmul.mubr.f32.gmra.mrb[234].mxu0 %v1386_v12  ;;  %3714 = vmatprep.mubr.f32.mxu1 %v1393_v32  ;;  %v1457_v12 = vld [vmem:[%s7085_s8 + $0x2708] sm:$0xff] }
 0x574   : > { %v5817_v57 = vadd.f32 %v5816_v37, %v4856_v44  ;;  %5124 = vmatprep.mubr.f32.mxu0 %v1397_v6  ;;  %v1452_v44 = vld [vmem:[%s7085_s8 + $0x26e0] sm:$0xff] }
 0x575   : > { %v3451_v27 = vpop.f32.mrb[130].mxu1  ;;  %v1456_v13 = vld [vmem:[%s7085_s8 + $0x2700] sm:$0xff] }
 0x576   : > { %5239 = vst [vmem:[%s8379_s4 + $0x200] sm:$0xff] %v5817_v57  ;;  %v5818_v23 = vadd.f32 %v3451_v27, %v8365_v40  ;;  %v4861_v10 = vpop.f32.mrb[130].mxu0  ;;  %v3453_v2 = vpop.f32.mrb[131].mxu1  ;;  %3715 = vmatmul.mubr.f32.gmra.mrb[236].mxu1 %v1392_v36  ;;  %v1463_v36 = vld [vmem:[%s7085_s8 + $0x2738] sm:$0xff] }
 0x577   : > { %v4863_v38 = vpop.f32.mrb[131].mxu0  ;;  %5125 = vmatmul.mubr.f32.gmra.mrb[236].mxu0 %v1396_v39  ;;  %3719 = vmatprep.mubr.f32.mxu1 %v1403_v50  ;;  %v1467_v39 = vld [vmem:[%s7085_s8 + $0x2758] sm:$0xff] }
 0x578   : > { %v5819_v35 = vadd.f32 %v5818_v23, %v4861_v10  ;;  %5129 = vmatprep.mubr.f32.mxu0 %v1407_v53  ;;  %v1462_v10 = vld [vmem:[%s7085_s8 + $0x2730] sm:$0xff] }
 0x579   : > { %v3456_v48 = vpop.f32.mrb[132].mxu1  ;;  %v1466_v38 = vld [vmem:[%s7085_s8 + $0x2750] sm:$0xff] }
 0x57a   : > { %5240 = vst [vmem:[%s8379_s4 + $0x208] sm:$0xff] %v5819_v35  ;;  %v5820_v62 = vadd.f32 %v3456_v48, %v8365_v40  ;;  %v4866_v42 = vpop.f32.mrb[132].mxu0  ;;  %v3458_v33 = vpop.f32.mrb[133].mxu1  ;;  %3720 = vmatmul.mubr.f32.gmra.mrb[238].mxu1 %v1402_v9  ;;  %v1473_v9 = vld [vmem:[%s7085_s8 + $0x2788] sm:$0xff] }
 0x57b   : > { %v4868_v18 = vpop.f32.mrb[133].mxu0  ;;  %5130 = vmatmul.mubr.f32.gmra.mrb[238].mxu0 %v1406_v34  ;;  %3724 = vmatprep.mubr.f32.mxu1 %v1413_v24  ;;  %v1477_v34 = vld [vmem:[%s7085_s8 + $0x27a8] sm:$0xff] }
 0x57c   : > { %v5821_v45 = vadd.f32 %v5820_v62, %v4866_v42  ;;  %5134 = vmatprep.mubr.f32.mxu0 %v1417_v7  ;;  %v1472_v42 = vld [vmem:[%s7085_s8 + $0x2780] sm:$0xff] }
 0x57d   : > { %v3461_v30 = vpop.f32.mrb[134].mxu1  ;;  %v1476_v18 = vld [vmem:[%s7085_s8 + $0x27a0] sm:$0xff] }
 0x57e   : > { %5241 = vst [vmem:[%s8379_s4 + $0x210] sm:$0xff] %v5821_v45  ;;  %v5822_v49 = vadd.f32 %v3461_v30, %v8365_v40  ;;  %v4871_v41 = vpop.f32.mrb[134].mxu0  ;;  %v3463_v60 = vpop.f32.mrb[135].mxu1  ;;  %3725 = vmatmul.mubr.f32.gmra.mrb[240].mxu1 %v1412_v16  ;;  %v1483_v16 = vld [vmem:[%s7085_s8 + $0x27d8] sm:$0xff] }
 0x57f   : > { %v4873_v8 = vpop.f32.mrb[135].mxu0  ;;  %5135 = vmatmul.mubr.f32.gmra.mrb[240].mxu0 %v1416_v19  ;;  %3729 = vmatprep.mubr.f32.mxu1 %v1423_v14  ;;  %v1487_v19 = vld [vmem:[%s7085_s8 + $0x27f8] sm:$0xff] }
 0x580   : > { %v5823_v0 = vadd.f32 %v5822_v49, %v4871_v41  ;;  %5139 = vmatprep.mubr.f32.mxu0 %v1427_v54  ;;  %v1482_v41 = vld [vmem:[%s7085_s8 + $0x27d0] sm:$0xff] }
 0x581   : > { %v3466_v4 = vpop.f32.mrb[136].mxu1  ;;  %v1486_v8 = vld [vmem:[%s7085_s8 + $0x27f0] sm:$0xff] }
 0x582   : > { %5242 = vst [vmem:[%s8379_s4 + $0x218] sm:$0xff] %v5823_v0  ;;  %v5824_v22 = vadd.f32 %v3466_v4, %v8365_v40  ;;  %v4876_v15 = vpop.f32.mrb[136].mxu0  ;;  %v3468_v63 = vpop.f32.mrb[137].mxu1  ;;  %3730 = vmatmul.mubr.f32.gmra.mrb[242].mxu1 %v1422_v3 }
 0x583   : > { %v4878_v25 = vpop.f32.mrb[137].mxu0  ;;  %5140 = vmatmul.mubr.f32.gmra.mrb[242].mxu0 %v1426_v31  ;;  %3734 = vmatprep.mubr.f32.mxu1 %v1433_v28 }
 0x584   : > { %v5825_v61 = vadd.f32 %v5824_v22, %v4876_v15  ;;  %5144 = vmatprep.mubr.f32.mxu0 %v1437_v17 }
 0x585   : > { %v3471_v47 = vpop.f32.mrb[138].mxu1 }
 0x586   : > { %5243 = vst [vmem:[%s8379_s4 + $0x220] sm:$0xff] %v5825_v61  ;;  %v5826_v29 = vadd.f32 %v3471_v47, %v8365_v40  ;;  %v4881_v21 = vpop.f32.mrb[138].mxu0  ;;  %v3473_v43 = vpop.f32.mrb[139].mxu1  ;;  %3735 = vmatmul.mubr.f32.gmra.mrb[244].mxu1 %v1432_v55 }
 0x587   : > { %v4883_v11 = vpop.f32.mrb[139].mxu0  ;;  %5145 = vmatmul.mubr.f32.gmra.mrb[244].mxu0 %v1436_v26  ;;  %3739 = vmatprep.mubr.f32.mxu1 %v1443_v52 }
 0x588   : > { %v5827_v20 = vadd.f32 %v5826_v29, %v4881_v21  ;;  %5149 = vmatprep.mubr.f32.mxu0 %v1447_v1 }
 0x589   : > { %v3476_v51 = vpop.f32.mrb[140].mxu1 }
 0x58a   : > { %5244 = vst [vmem:[%s8379_s4 + $0x228] sm:$0xff] %v5827_v20  ;;  %v5828_v32 = vadd.f32 %v3476_v51, %v8365_v40  ;;  %v4886_v58 = vpop.f32.mrb[140].mxu0  ;;  %v3478_v6 = vpop.f32.mrb[141].mxu1  ;;  %3740 = vmatmul.mubr.f32.gmra.mrb[246].mxu1 %v1442_v46 }
 0x58b   : > { %v4888_v37 = vpop.f32.mrb[141].mxu0  ;;  %5150 = vmatmul.mubr.f32.gmra.mrb[246].mxu0 %v1446_v56  ;;  %3744 = vmatprep.mubr.f32.mxu1 %v1453_v59 }
 0x58c   : > { %v5829_v5 = vadd.f32 %v5828_v32, %v4886_v58  ;;  %5154 = vmatprep.mubr.f32.mxu0 %v1457_v12 }
 0x58d   : > { %v3481_v57 = vpop.f32.mrb[142].mxu1 }
 0x58e   : > { %5245 = vst [vmem:[%s8379_s4 + $0x230] sm:$0xff] %v5829_v5  ;;  %v5830_v50 = vadd.f32 %v3481_v57, %v8365_v40  ;;  %v4891_v27 = vpop.f32.mrb[142].mxu0  ;;  %v3483_v53 = vpop.f32.mrb[143].mxu1  ;;  %3745 = vmatmul.mubr.f32.gmra.mrb[248].mxu1 %v1452_v44 }
 0x58f   : > { %v4893_v23 = vpop.f32.mrb[143].mxu0  ;;  %5155 = vmatmul.mubr.f32.gmra.mrb[248].mxu0 %v1456_v13  ;;  %3749 = vmatprep.mubr.f32.mxu1 %v1463_v36 }
 0x590   : > { %v5831_v2 = vadd.f32 %v5830_v50, %v4891_v27  ;;  %5159 = vmatprep.mubr.f32.mxu0 %v1467_v39 }
 0x591   : > { %v3486_v35 = vpop.f32.mrb[144].mxu1 }
 0x592   : > { %5246 = vst [vmem:[%s8379_s4 + $0x238] sm:$0xff] %v5831_v2  ;;  %v5832_v24 = vadd.f32 %v3486_v35, %v8365_v40  ;;  %v4896_v48 = vpop.f32.mrb[144].mxu0  ;;  %v3488_v7 = vpop.f32.mrb[145].mxu1  ;;  %3750 = vmatmul.mubr.f32.gmra.mrb[250].mxu1 %v1462_v10 }
 0x593   : > { %v4898_v62 = vpop.f32.mrb[145].mxu0  ;;  %5160 = vmatmul.mubr.f32.gmra.mrb[250].mxu0 %v1466_v38  ;;  %3754 = vmatprep.mubr.f32.mxu1 %v1473_v9 }
 0x594   : > { %v5833_v33 = vadd.f32 %v5832_v24, %v4896_v48  ;;  %5164 = vmatprep.mubr.f32.mxu0 %v1477_v34 }
 0x595   : > { %v3491_v45 = vpop.f32.mrb[146].mxu1 }
 0x596   : > { %5247 = vst [vmem:[%s8379_s4 + $0x240] sm:$0xff] %v5833_v33  ;;  %v5834_v14 = vadd.f32 %v3491_v45, %v8365_v40  ;;  %v4901_v30 = vpop.f32.mrb[146].mxu0  ;;  %v3493_v54 = vpop.f32.mrb[147].mxu1  ;;  %3755 = vmatmul.mubr.f32.gmra.mrb[252].mxu1 %v1472_v42 }
 0x597   : > { %v4903_v49 = vpop.f32.mrb[147].mxu0  ;;  %5165 = vmatmul.mubr.f32.gmra.mrb[252].mxu0 %v1476_v18  ;;  %3759 = vmatprep.mubr.f32.mxu1 %v1483_v16 }
 0x598   : > { %v5835_v60 = vadd.f32 %v5834_v14, %v4901_v30  ;;  %5169 = vmatprep.mubr.f32.mxu0 %v1487_v19 }
 0x599   : > { %v3496_v3 = vpop.f32.mrb[148].mxu1 }
 0x59a   : > { %5248 = vst [vmem:[%s8379_s4 + $0x248] sm:$0xff] %v5835_v60  ;;  %v5836_v0 = vadd.f32 %v3496_v3, %v8365_v40  ;;  %v4906_v31 = vpop.f32.mrb[148].mxu0  ;;  %v3498_v28 = vpop.f32.mrb[149].mxu1  ;;  %3760 = vmatmul.mubr.f32.gmra.mrb[254].mxu1 %v1482_v41 }
 0x59b   : > { %v4908_v4 = vpop.f32.mrb[149].mxu0  ;;  %5170 = vmatmul.mubr.f32.gmra.mrb[254].mxu0 %v1486_v8 }
 0x59c   : > { %v5837_v17 = vadd.f32 %v5836_v0, %v4906_v31 }
 0x59d   : > { %v3501_v22 = vpop.f32.mrb[150].mxu1 }
 0x59e   : > { %5249 = vst [vmem:[%s8379_s4 + $0x250] sm:$0xff] %v5837_v17  ;;  %v5838_v15 = vadd.f32 %v3501_v22, %v8365_v40  ;;  %v4911_v63 = vpop.f32.mrb[150].mxu0  ;;  %v3503_v25 = vpop.f32.mrb[151].mxu1 }
 0x59f   : > { %v4913_v55 = vpop.f32.mrb[151].mxu0 }
 0x5a0   : > { %v5839_v61 = vadd.f32 %v5838_v15, %v4911_v63 }
 0x5a1   : > { %v3506_v26 = vpop.f32.mrb[152].mxu1 }
 0x5a2   : > { %5250 = vst [vmem:[%s8379_s4 + $0x258] sm:$0xff] %v5839_v61  ;;  %v5840_v52 = vadd.f32 %v3506_v26, %v8365_v40  ;;  %v4916_v47 = vpop.f32.mrb[152].mxu0  ;;  %v3508_v1 = vpop.f32.mrb[153].mxu1 }
 0x5a3   : > { %v4918_v29 = vpop.f32.mrb[153].mxu0 }
 0x5a4   : > { %v5841_v21 = vadd.f32 %v5840_v52, %v4916_v47 }
 0x5a5   : > { %v3511_v43 = vpop.f32.mrb[154].mxu1 }
 0x5a6   : > { %5251 = vst [vmem:[%s8379_s4 + $0x260] sm:$0xff] %v5841_v21  ;;  %v5842_v11 = vadd.f32 %v3511_v43, %v8365_v40  ;;  %v4921_v46 = vpop.f32.mrb[154].mxu0  ;;  %v3513_v20 = vpop.f32.mrb[155].mxu1 }
 0x5a7   : > { %v4923_v56 = vpop.f32.mrb[155].mxu0 }
 0x5a8   : > { %v5843_v59 = vadd.f32 %v5842_v11, %v4921_v46 }
 0x5a9   : > { %v3516_v51 = vpop.f32.mrb[156].mxu1 }
 0x5aa   : > { %5252 = vst [vmem:[%s8379_s4 + $0x268] sm:$0xff] %v5843_v59  ;;  %v5844_v12 = vadd.f32 %v3516_v51, %v8365_v40  ;;  %v4926_v32 = vpop.f32.mrb[156].mxu0  ;;  %v3518_v58 = vpop.f32.mrb[157].mxu1 }
 0x5ab   : > { %v4928_v6 = vpop.f32.mrb[157].mxu0 }
 0x5ac   : > { %v5845_v37 = vadd.f32 %v5844_v12, %v4926_v32 }
 0x5ad   : > { %v3521_v44 = vpop.f32.mrb[158].mxu1 }
 0x5ae   : > { %5253 = vst [vmem:[%s8379_s4 + $0x270] sm:$0xff] %v5845_v37  ;;  %v5846_v5 = vadd.f32 %v3521_v44, %v8365_v40  ;;  %v4931_v13 = vpop.f32.mrb[158].mxu0  ;;  %v3523_v36 = vpop.f32.mrb[159].mxu1 }
 0x5af   : > { %v4933_v57 = vpop.f32.mrb[159].mxu0 }
 0x5b0   : > { %v5847_v39 = vadd.f32 %v5846_v5, %v4931_v13 }
 0x5b1   : > { %v3526_v50 = vpop.f32.mrb[160].mxu1 }
 0x5b2   : > { %5254 = vst [vmem:[%s8379_s4 + $0x278] sm:$0xff] %v5847_v39  ;;  %v5848_v27 = vadd.f32 %v3526_v50, %v8365_v40  ;;  %v4936_v53 = vpop.f32.mrb[160].mxu0  ;;  %v3528_v23 = vpop.f32.mrb[161].mxu1 }
 0x5b3   : > { %v4938_v10 = vpop.f32.mrb[161].mxu0 }
 0x5b4   : > { %v5849_v2 = vadd.f32 %v5848_v27, %v4936_v53 }
 0x5b5   : > { %v3531_v38 = vpop.f32.mrb[162].mxu1 }
 0x5b6   : > { %5255 = vst [vmem:[%s8379_s4 + $0x280] sm:$0xff] %v5849_v2  ;;  %v5850_v9 = vadd.f32 %v3531_v38, %v8365_v40  ;;  %v4941_v35 = vpop.f32.mrb[162].mxu0  ;;  %v3533_v34 = vpop.f32.mrb[163].mxu1 }
 0x5b7   : > { %v4943_v24 = vpop.f32.mrb[163].mxu0 }
 0x5b8   : > { %v5851_v48 = vadd.f32 %v5850_v9, %v4941_v35 }
 0x5b9   : > { %v3536_v7 = vpop.f32.mrb[164].mxu1 }
 0x5ba   : > { %5256 = vst [vmem:[%s8379_s4 + $0x288] sm:$0xff] %v5851_v48  ;;  %v5852_v62 = vadd.f32 %v3536_v7, %v8365_v40  ;;  %v4946_v42 = vpop.f32.mrb[164].mxu0  ;;  %v3538_v33 = vpop.f32.mrb[165].mxu1 }
 0x5bb   : > { %v4948_v18 = vpop.f32.mrb[165].mxu0 }
 0x5bc   : > { %v5853_v16 = vadd.f32 %v5852_v62, %v4946_v42 }
 0x5bd   : > { %v3541_v45 = vpop.f32.mrb[166].mxu1 }
 0x5be   : > { %5257 = vst [vmem:[%s8379_s4 + $0x290] sm:$0xff] %v5853_v16  ;;  %v5854_v19 = vadd.f32 %v3541_v45, %v8365_v40  ;;  %v4951_v14 = vpop.f32.mrb[166].mxu0  ;;  %v3543_v30 = vpop.f32.mrb[167].mxu1 }
 0x5bf   : > { %v4953_v54 = vpop.f32.mrb[167].mxu0 }
 0x5c0   : > { %v5855_v49 = vadd.f32 %v5854_v19, %v4951_v14 }
 0x5c1   : > { %v3546_v41 = vpop.f32.mrb[168].mxu1 }
 0x5c2   : > { %5258 = vst [vmem:[%s8379_s4 + $0x298] sm:$0xff] %v5855_v49  ;;  %v5856_v60 = vadd.f32 %v3546_v41, %v8365_v40  ;;  %v4956_v8 = vpop.f32.mrb[168].mxu0  ;;  %v3548_v3 = vpop.f32.mrb[169].mxu1 }
 0x5c3   : > { %v4958_v0 = vpop.f32.mrb[169].mxu0 }
 0x5c4   : > { %v5857_v31 = vadd.f32 %v5856_v60, %v4956_v8 }
 0x5c5   : > { %v3551_v28 = vpop.f32.mrb[170].mxu1 }
 0x5c6   : > { %5259 = vst [vmem:[%s8379_s4 + $0x2a0] sm:$0xff] %v5857_v31  ;;  %v5858_v4 = vadd.f32 %v3551_v28, %v8365_v40  ;;  %v4961_v17 = vpop.f32.mrb[170].mxu0  ;;  %v3553_v22 = vpop.f32.mrb[171].mxu1 }
 0x5c7   : > { %v4963_v15 = vpop.f32.mrb[171].mxu0 }
 0x5c8   : > { %v5859_v63 = vadd.f32 %v5858_v4, %v4961_v17 }
 0x5c9   : > { %v3556_v25 = vpop.f32.mrb[172].mxu1 }
 0x5ca   : > { %5260 = vst [vmem:[%s8379_s4 + $0x2a8] sm:$0xff] %v5859_v63  ;;  %v5860_v55 = vadd.f32 %v3556_v25, %v8365_v40  ;;  %v4966_v61 = vpop.f32.mrb[172].mxu0  ;;  %v3558_v26 = vpop.f32.mrb[173].mxu1 }
 0x5cb   : > { %v4968_v52 = vpop.f32.mrb[173].mxu0 }
 0x5cc   : > { %v5861_v47 = vadd.f32 %v5860_v55, %v4966_v61 }
 0x5cd   : > { %v3561_v1 = vpop.f32.mrb[174].mxu1 }
 0x5ce   : > { %5261 = vst [vmem:[%s8379_s4 + $0x2b0] sm:$0xff] %v5861_v47  ;;  %v5862_v29 = vadd.f32 %v3561_v1, %v8365_v40  ;;  %v4971_v21 = vpop.f32.mrb[174].mxu0  ;;  %v3563_v43 = vpop.f32.mrb[175].mxu1 }
 0x5cf   : > { %v4973_v11 = vpop.f32.mrb[175].mxu0 }
 0x5d0   : > { %v5863_v46 = vadd.f32 %v5862_v29, %v4971_v21 }
 0x5d1   : > { %v3566_v20 = vpop.f32.mrb[176].mxu1 }
 0x5d2   : > { %5262 = vst [vmem:[%s8379_s4 + $0x2b8] sm:$0xff] %v5863_v46  ;;  %v5864_v56 = vadd.f32 %v3566_v20, %v8365_v40  ;;  %v4976_v59 = vpop.f32.mrb[176].mxu0  ;;  %v3568_v51 = vpop.f32.mrb[177].mxu1 }
 0x5d3   : > { %v4978_v12 = vpop.f32.mrb[177].mxu0 }
 0x5d4   : > { %v5865_v32 = vadd.f32 %v5864_v56, %v4976_v59 }
 0x5d5   : > { %v3571_v58 = vpop.f32.mrb[178].mxu1 }
 0x5d6   : > { %5263 = vst [vmem:[%s8379_s4 + $0x2c0] sm:$0xff] %v5865_v32  ;;  %v5866_v6 = vadd.f32 %v3571_v58, %v8365_v40  ;;  %v4981_v37 = vpop.f32.mrb[178].mxu0  ;;  %v3573_v44 = vpop.f32.mrb[179].mxu1 }
 0x5d7   : > { %v4983_v5 = vpop.f32.mrb[179].mxu0 }
 0x5d8   : > { %v5867_v13 = vadd.f32 %v5866_v6, %v4981_v37 }
 0x5d9   : > { %v3576_v36 = vpop.f32.mrb[180].mxu1 }
 0x5da   : > { %5264 = vst [vmem:[%s8379_s4 + $0x2c8] sm:$0xff] %v5867_v13  ;;  %v5868_v57 = vadd.f32 %v3576_v36, %v8365_v40  ;;  %v4986_v39 = vpop.f32.mrb[180].mxu0  ;;  %v3578_v50 = vpop.f32.mrb[181].mxu1 }
 0x5db   : > { %v4988_v27 = vpop.f32.mrb[181].mxu0 }
 0x5dc   : > { %v5869_v53 = vadd.f32 %v5868_v57, %v4986_v39 }
 0x5dd   : > { %v3581_v23 = vpop.f32.mrb[182].mxu1 }
 0x5de   : > { %5265 = vst [vmem:[%s8379_s4 + $0x2d0] sm:$0xff] %v5869_v53  ;;  %v5870_v10 = vadd.f32 %v3581_v23, %v8365_v40  ;;  %v4991_v2 = vpop.f32.mrb[182].mxu0  ;;  %v3583_v38 = vpop.f32.mrb[183].mxu1 }
 0x5df   : > { %v4993_v9 = vpop.f32.mrb[183].mxu0 }
 0x5e0   : > { %v5871_v35 = vadd.f32 %v5870_v10, %v4991_v2 }
 0x5e1   : > { %v3586_v34 = vpop.f32.mrb[184].mxu1 }
 0x5e2   : > { %5266 = vst [vmem:[%s8379_s4 + $0x2d8] sm:$0xff] %v5871_v35  ;;  %v5872_v24 = vadd.f32 %v3586_v34, %v8365_v40  ;;  %v4996_v48 = vpop.f32.mrb[184].mxu0  ;;  %v3588_v7 = vpop.f32.mrb[185].mxu1 }
 0x5e3   : > { %v4998_v62 = vpop.f32.mrb[185].mxu0 }
 0x5e4   : > { %v5873_v42 = vadd.f32 %v5872_v24, %v4996_v48 }
 0x5e5   : > { %v3591_v33 = vpop.f32.mrb[186].mxu1 }
 0x5e6   : > { %5267 = vst [vmem:[%s8379_s4 + $0x2e0] sm:$0xff] %v5873_v42  ;;  %v5874_v18 = vadd.f32 %v3591_v33, %v8365_v40  ;;  %v5001_v16 = vpop.f32.mrb[186].mxu0  ;;  %v3593_v45 = vpop.f32.mrb[187].mxu1 }
 0x5e7   : > { %v5003_v19 = vpop.f32.mrb[187].mxu0 }
 0x5e8   : > { %v5875_v14 = vadd.f32 %v5874_v18, %v5001_v16 }
 0x5e9   : > { %v3596_v30 = vpop.f32.mrb[188].mxu1 }
 0x5ea   : > { %5268 = vst [vmem:[%s8379_s4 + $0x2e8] sm:$0xff] %v5875_v14  ;;  %v5876_v54 = vadd.f32 %v3596_v30, %v8365_v40  ;;  %v5006_v49 = vpop.f32.mrb[188].mxu0  ;;  %v3598_v41 = vpop.f32.mrb[189].mxu1 }
 0x5eb   : > { %v5008_v60 = vpop.f32.mrb[189].mxu0 }
 0x5ec   : > { %v5877_v8 = vadd.f32 %v5876_v54, %v5006_v49 }
 0x5ed   : > { %v3601_v3 = vpop.f32.mrb[190].mxu1 }
 0x5ee   : > { %5269 = vst [vmem:[%s8379_s4 + $0x2f0] sm:$0xff] %v5877_v8  ;;  %v5878_v0 = vadd.f32 %v3601_v3, %v8365_v40  ;;  %v5011_v31 = vpop.f32.mrb[190].mxu0  ;;  %v3603_v28 = vpop.f32.mrb[191].mxu1 }
 0x5ef   : > { %v5013_v4 = vpop.f32.mrb[191].mxu0 }
 0x5f0   : > { %v5879_v17 = vadd.f32 %v5878_v0, %v5011_v31 }
 0x5f1   : > { %v3606_v22 = vpop.f32.mrb[192].mxu1 }
 0x5f2   : > { %5270 = vst [vmem:[%s8379_s4 + $0x2f8] sm:$0xff] %v5879_v17  ;;  %v5880_v15 = vadd.f32 %v3606_v22, %v8365_v40  ;;  %v5016_v63 = vpop.f32.mrb[192].mxu0  ;;  %v3608_v25 = vpop.f32.mrb[193].mxu1 }
 0x5f3   : > { %v5018_v55 = vpop.f32.mrb[193].mxu0 }
 0x5f4   : > { %v5881_v61 = vadd.f32 %v5880_v15, %v5016_v63 }
 0x5f5   : > { %v3611_v26 = vpop.f32.mrb[194].mxu1 }
 0x5f6   : > { %5271 = vst [vmem:[%s8379_s4 + $0x300] sm:$0xff] %v5881_v61  ;;  %v5882_v52 = vadd.f32 %v3611_v26, %v8365_v40  ;;  %v5021_v47 = vpop.f32.mrb[194].mxu0  ;;  %v3613_v1 = vpop.f32.mrb[195].mxu1 }
 0x5f7   : > { %v5023_v29 = vpop.f32.mrb[195].mxu0 }
 0x5f8   : > { %v5883_v21 = vadd.f32 %v5882_v52, %v5021_v47 }
 0x5f9   : > { %v3616_v43 = vpop.f32.mrb[196].mxu1 }
 0x5fa   : > { %5272 = vst [vmem:[%s8379_s4 + $0x308] sm:$0xff] %v5883_v21  ;;  %v5884_v11 = vadd.f32 %v3616_v43, %v8365_v40  ;;  %v5026_v46 = vpop.f32.mrb[196].mxu0  ;;  %v3618_v20 = vpop.f32.mrb[197].mxu1 }
 0x5fb   : > { %v5028_v56 = vpop.f32.mrb[197].mxu0 }
 0x5fc   : > { %v5885_v59 = vadd.f32 %v5884_v11, %v5026_v46 }
 0x5fd   : > { %v3621_v51 = vpop.f32.mrb[198].mxu1 }
 0x5fe   : > { %5273 = vst [vmem:[%s8379_s4 + $0x310] sm:$0xff] %v5885_v59  ;;  %v5886_v12 = vadd.f32 %v3621_v51, %v8365_v40  ;;  %v5031_v32 = vpop.f32.mrb[198].mxu0  ;;  %v3623_v58 = vpop.f32.mrb[199].mxu1 }
 0x5ff   : > { %v5033_v6 = vpop.f32.mrb[199].mxu0 }
 0x600   : > { %v5887_v37 = vadd.f32 %v5886_v12, %v5031_v32 }
 0x601   : > { %v3626_v44 = vpop.f32.mrb[200].mxu1 }
 0x602   : > { %5274 = vst [vmem:[%s8379_s4 + $0x318] sm:$0xff] %v5887_v37  ;;  %v5888_v5 = vadd.f32 %v3626_v44, %v8365_v40  ;;  %v5036_v13 = vpop.f32.mrb[200].mxu0  ;;  %v3628_v36 = vpop.f32.mrb[201].mxu1 }
 0x603   : > { %v5038_v57 = vpop.f32.mrb[201].mxu0 }
 0x604   : > { %v5889_v39 = vadd.f32 %v5888_v5, %v5036_v13 }
 0x605   : > { %v3631_v50 = vpop.f32.mrb[202].mxu1 }
 0x606   : > { %5275 = vst [vmem:[%s8379_s4 + $0x320] sm:$0xff] %v5889_v39  ;;  %v5890_v27 = vadd.f32 %v3631_v50, %v8365_v40  ;;  %v5041_v53 = vpop.f32.mrb[202].mxu0  ;;  %v3633_v23 = vpop.f32.mrb[203].mxu1 }
 0x607   : > { %v5043_v10 = vpop.f32.mrb[203].mxu0 }
 0x608   : > { %v5891_v2 = vadd.f32 %v5890_v27, %v5041_v53 }
 0x609   : > { %v3636_v38 = vpop.f32.mrb[204].mxu1 }
 0x60a   : > { %5276 = vst [vmem:[%s8379_s4 + $0x328] sm:$0xff] %v5891_v2  ;;  %v5892_v9 = vadd.f32 %v3636_v38, %v8365_v40  ;;  %v5046_v35 = vpop.f32.mrb[204].mxu0  ;;  %v3638_v34 = vpop.f32.mrb[205].mxu1 }
 0x60b   : > { %v5048_v24 = vpop.f32.mrb[205].mxu0 }
 0x60c   : > { %v5893_v48 = vadd.f32 %v5892_v9, %v5046_v35 }
 0x60d   : > { %v3641_v7 = vpop.f32.mrb[206].mxu1 }
 0x60e   : > { %5277 = vst [vmem:[%s8379_s4 + $0x330] sm:$0xff] %v5893_v48  ;;  %v5894_v62 = vadd.f32 %v3641_v7, %v8365_v40  ;;  %v5051_v42 = vpop.f32.mrb[206].mxu0  ;;  %v3643_v33 = vpop.f32.mrb[207].mxu1 }
 0x60f   : > { %v5053_v18 = vpop.f32.mrb[207].mxu0 }
 0x610   : > { %v5895_v16 = vadd.f32 %v5894_v62, %v5051_v42 }
 0x611   : > { %v3646_v45 = vpop.f32.mrb[208].mxu1 }
 0x612   : > { %5278 = vst [vmem:[%s8379_s4 + $0x338] sm:$0xff] %v5895_v16  ;;  %v5896_v19 = vadd.f32 %v3646_v45, %v8365_v40  ;;  %v5056_v14 = vpop.f32.mrb[208].mxu0  ;;  %v3648_v30 = vpop.f32.mrb[209].mxu1 }
 0x613   : > { %v5058_v54 = vpop.f32.mrb[209].mxu0 }
 0x614   : > { %v5897_v49 = vadd.f32 %v5896_v19, %v5056_v14 }
 0x615   : > { %v3651_v41 = vpop.f32.mrb[210].mxu1 }
 0x616   : > { %5279 = vst [vmem:[%s8379_s4 + $0x340] sm:$0xff] %v5897_v49  ;;  %v5898_v60 = vadd.f32 %v3651_v41, %v8365_v40  ;;  %v5061_v8 = vpop.f32.mrb[210].mxu0  ;;  %v3653_v3 = vpop.f32.mrb[211].mxu1 }
 0x617   : > { %v5063_v0 = vpop.f32.mrb[211].mxu0 }
 0x618   : > { %v5899_v31 = vadd.f32 %v5898_v60, %v5061_v8 }
 0x619   : > { %v3656_v28 = vpop.f32.mrb[212].mxu1 }
 0x61a   : > { %5280 = vst [vmem:[%s8379_s4 + $0x348] sm:$0xff] %v5899_v31  ;;  %v5900_v4 = vadd.f32 %v3656_v28, %v8365_v40  ;;  %v5066_v17 = vpop.f32.mrb[212].mxu0  ;;  %v3658_v22 = vpop.f32.mrb[213].mxu1 }
 0x61b   : > { %v5068_v15 = vpop.f32.mrb[213].mxu0 }
 0x61c   : > { %v5901_v63 = vadd.f32 %v5900_v4, %v5066_v17 }
 0x61d   : > { %v3661_v25 = vpop.f32.mrb[214].mxu1 }
 0x61e   : > { %5281 = vst [vmem:[%s8379_s4 + $0x350] sm:$0xff] %v5901_v63  ;;  %v5902_v55 = vadd.f32 %v3661_v25, %v8365_v40  ;;  %v5071_v61 = vpop.f32.mrb[214].mxu0  ;;  %v3663_v26 = vpop.f32.mrb[215].mxu1 }
 0x61f   : > { %v5073_v52 = vpop.f32.mrb[215].mxu0 }
 0x620   : > { %v5903_v47 = vadd.f32 %v5902_v55, %v5071_v61 }
 0x621   : > { %v3666_v1 = vpop.f32.mrb[216].mxu1 }
 0x622   : > { %5282 = vst [vmem:[%s8379_s4 + $0x358] sm:$0xff] %v5903_v47  ;;  %v5904_v29 = vadd.f32 %v3666_v1, %v8365_v40  ;;  %v5076_v21 = vpop.f32.mrb[216].mxu0  ;;  %v3668_v43 = vpop.f32.mrb[217].mxu1 }
 0x623   : > { %v5078_v11 = vpop.f32.mrb[217].mxu0 }
 0x624   : > { %v5905_v46 = vadd.f32 %v5904_v29, %v5076_v21 }
 0x625   : > { %v3671_v20 = vpop.f32.mrb[218].mxu1 }
 0x626   : > { %5283 = vst [vmem:[%s8379_s4 + $0x360] sm:$0xff] %v5905_v46  ;;  %v5906_v56 = vadd.f32 %v3671_v20, %v8365_v40  ;;  %v5081_v59 = vpop.f32.mrb[218].mxu0  ;;  %v3673_v51 = vpop.f32.mrb[219].mxu1 }
 0x627   : > { %v5083_v12 = vpop.f32.mrb[219].mxu0 }
 0x628   : > { %v5907_v32 = vadd.f32 %v5906_v56, %v5081_v59 }
 0x629   : > { %v3676_v58 = vpop.f32.mrb[220].mxu1 }
 0x62a   : > { %5284 = vst [vmem:[%s8379_s4 + $0x368] sm:$0xff] %v5907_v32  ;;  %v5908_v6 = vadd.f32 %v3676_v58, %v8365_v40  ;;  %v5086_v37 = vpop.f32.mrb[220].mxu0  ;;  %v3678_v44 = vpop.f32.mrb[221].mxu1 }
 0x62b   : > { %v5088_v5 = vpop.f32.mrb[221].mxu0 }
 0x62c   : > { %v5909_v13 = vadd.f32 %v5908_v6, %v5086_v37 }
 0x62d   : > { %v3681_v36 = vpop.f32.mrb[222].mxu1 }
 0x62e   : > { %5285 = vst [vmem:[%s8379_s4 + $0x370] sm:$0xff] %v5909_v13  ;;  %v5910_v57 = vadd.f32 %v3681_v36, %v8365_v40  ;;  %v5091_v39 = vpop.f32.mrb[222].mxu0  ;;  %v3683_v50 = vpop.f32.mrb[223].mxu1 }
 0x62f   : > { %v5093_v27 = vpop.f32.mrb[223].mxu0 }
 0x630   : > { %v5911_v53 = vadd.f32 %v5910_v57, %v5091_v39 }
 0x631   : > { %v3686_v23 = vpop.f32.mrb[224].mxu1 }
 0x632   : > { %5286 = vst [vmem:[%s8379_s4 + $0x378] sm:$0xff] %v5911_v53  ;;  %v5912_v10 = vadd.f32 %v3686_v23, %v8365_v40  ;;  %v5096_v2 = vpop.f32.mrb[224].mxu0  ;;  %v3688_v38 = vpop.f32.mrb[225].mxu1 }
 0x633   : > { %v5098_v9 = vpop.f32.mrb[225].mxu0 }
 0x634   : > { %v5913_v35 = vadd.f32 %v5912_v10, %v5096_v2 }
 0x635   : > { %v3691_v34 = vpop.f32.mrb[226].mxu1 }
 0x636   : > { %5287 = vst [vmem:[%s8379_s4 + $0x380] sm:$0xff] %v5913_v35  ;;  %v5914_v24 = vadd.f32 %v3691_v34, %v8365_v40  ;;  %v5101_v48 = vpop.f32.mrb[226].mxu0  ;;  %v3693_v7 = vpop.f32.mrb[227].mxu1 }
 0x637   : > { %v5103_v62 = vpop.f32.mrb[227].mxu0 }
 0x638   : > { %v5915_v42 = vadd.f32 %v5914_v24, %v5101_v48 }
 0x639   : > { %v3696_v33 = vpop.f32.mrb[228].mxu1 }
 0x63a   : > { %5288 = vst [vmem:[%s8379_s4 + $0x388] sm:$0xff] %v5915_v42  ;;  %v5916_v18 = vadd.f32 %v3696_v33, %v8365_v40  ;;  %v5106_v16 = vpop.f32.mrb[228].mxu0  ;;  %v3698_v45 = vpop.f32.mrb[229].mxu1 }
 0x63b   : > { %v5108_v19 = vpop.f32.mrb[229].mxu0 }
 0x63c   : > { %v5917_v14 = vadd.f32 %v5916_v18, %v5106_v16 }
 0x63d   : > { %v3701_v30 = vpop.f32.mrb[230].mxu1 }
 0x63e   : > { %5289 = vst [vmem:[%s8379_s4 + $0x390] sm:$0xff] %v5917_v14  ;;  %v5918_v54 = vadd.f32 %v3701_v30, %v8365_v40  ;;  %v5111_v49 = vpop.f32.mrb[230].mxu0  ;;  %v3703_v41 = vpop.f32.mrb[231].mxu1 }
 0x63f   : > { %v5113_v60 = vpop.f32.mrb[231].mxu0 }
 0x640   : > { %v5919_v8 = vadd.f32 %v5918_v54, %v5111_v49 }
 0x641   : > { %v3706_v3 = vpop.f32.mrb[232].mxu1 }
 0x642   : > { %5290 = vst [vmem:[%s8379_s4 + $0x398] sm:$0xff] %v5919_v8  ;;  %v5920_v0 = vadd.f32 %v3706_v3, %v8365_v40  ;;  %v5116_v31 = vpop.f32.mrb[232].mxu0  ;;  %v3708_v28 = vpop.f32.mrb[233].mxu1 }
 0x643   : > { %v5118_v4 = vpop.f32.mrb[233].mxu0 }
 0x644   : > { %v5921_v17 = vadd.f32 %v5920_v0, %v5116_v31 }
 0x645   : > { %v3711_v22 = vpop.f32.mrb[234].mxu1 }
 0x646   : > { %5291 = vst [vmem:[%s8379_s4 + $0x3a0] sm:$0xff] %v5921_v17  ;;  %v5922_v15 = vadd.f32 %v3711_v22, %v8365_v40  ;;  %v5121_v63 = vpop.f32.mrb[234].mxu0  ;;  %v3713_v25 = vpop.f32.mrb[235].mxu1 }
 0x647   : > { %v5123_v55 = vpop.f32.mrb[235].mxu0 }
 0x648   : > { %v5923_v61 = vadd.f32 %v5922_v15, %v5121_v63 }
 0x649   : > { %v3716_v26 = vpop.f32.mrb[236].mxu1 }
 0x64a   : > { %5292 = vst [vmem:[%s8379_s4 + $0x3a8] sm:$0xff] %v5923_v61  ;;  %v5924_v52 = vadd.f32 %v3716_v26, %v8365_v40  ;;  %v5126_v47 = vpop.f32.mrb[236].mxu0  ;;  %v3718_v1 = vpop.f32.mrb[237].mxu1 }
 0x64b   : > { %v5128_v29 = vpop.f32.mrb[237].mxu0 }
 0x64c   : > { %v5925_v21 = vadd.f32 %v5924_v52, %v5126_v47 }
 0x64d   : > { %v3721_v43 = vpop.f32.mrb[238].mxu1 }
 0x64e   : > { %5293 = vst [vmem:[%s8379_s4 + $0x3b0] sm:$0xff] %v5925_v21  ;;  %v5926_v11 = vadd.f32 %v3721_v43, %v8365_v40  ;;  %v5131_v46 = vpop.f32.mrb[238].mxu0  ;;  %v3723_v20 = vpop.f32.mrb[239].mxu1 }
 0x64f   : > { %v5133_v56 = vpop.f32.mrb[239].mxu0 }
 0x650   : > { %v5927_v59 = vadd.f32 %v5926_v11, %v5131_v46 }
 0x651   : > { %v3726_v51 = vpop.f32.mrb[240].mxu1 }
 0x652   : > { %5294 = vst [vmem:[%s8379_s4 + $0x3b8] sm:$0xff] %v5927_v59  ;;  %v5928_v12 = vadd.f32 %v3726_v51, %v8365_v40  ;;  %v5136_v32 = vpop.f32.mrb[240].mxu0  ;;  %v3728_v58 = vpop.f32.mrb[241].mxu1 }
 0x653   : > { %v5138_v6 = vpop.f32.mrb[241].mxu0 }
 0x654   : > { %v5929_v37 = vadd.f32 %v5928_v12, %v5136_v32 }
 0x655   : > { %v3731_v44 = vpop.f32.mrb[242].mxu1 }
 0x656   : > { %5295 = vst [vmem:[%s8379_s4 + $0x3c0] sm:$0xff] %v5929_v37  ;;  %v5930_v5 = vadd.f32 %v3731_v44, %v8365_v40  ;;  %v5141_v13 = vpop.f32.mrb[242].mxu0  ;;  %v3733_v36 = vpop.f32.mrb[243].mxu1 }
 0x657   : > { %v5143_v57 = vpop.f32.mrb[243].mxu0 }
 0x658   : > { %v5931_v39 = vadd.f32 %v5930_v5, %v5141_v13 }
 0x659   : > { %v3736_v50 = vpop.f32.mrb[244].mxu1 }
 0x65a   : > { %5296 = vst [vmem:[%s8379_s4 + $0x3c8] sm:$0xff] %v5931_v39  ;;  %v5932_v27 = vadd.f32 %v3736_v50, %v8365_v40  ;;  %v5146_v53 = vpop.f32.mrb[244].mxu0  ;;  %v3738_v23 = vpop.f32.mrb[245].mxu1 }
 0x65b   : > { %v5148_v10 = vpop.f32.mrb[245].mxu0 }
 0x65c   : > { %v5933_v2 = vadd.f32 %v5932_v27, %v5146_v53 }
 0x65d   : > { %v3741_v38 = vpop.f32.mrb[246].mxu1 }
 0x65e   : > { %5297 = vst [vmem:[%s8379_s4 + $0x3d0] sm:$0xff] %v5933_v2  ;;  %v5934_v9 = vadd.f32 %v3741_v38, %v8365_v40  ;;  %v5151_v35 = vpop.f32.mrb[246].mxu0  ;;  %v3743_v34 = vpop.f32.mrb[247].mxu1 }
 0x65f   : > { %v5153_v24 = vpop.f32.mrb[247].mxu0 }
 0x660   : > { %v5935_v48 = vadd.f32 %v5934_v9, %v5151_v35 }
 0x661   : > { %v3746_v7 = vpop.f32.mrb[248].mxu1 }
 0x662   : > { %5298 = vst [vmem:[%s8379_s4 + $0x3d8] sm:$0xff] %v5935_v48  ;;  %v5936_v62 = vadd.f32 %v3746_v7, %v8365_v40  ;;  %v5156_v42 = vpop.f32.mrb[248].mxu0  ;;  %v3748_v33 = vpop.f32.mrb[249].mxu1 }
 0x663   : > { %v5158_v18 = vpop.f32.mrb[249].mxu0 }
 0x664   : > { %v5937_v16 = vadd.f32 %v5936_v62, %v5156_v42 }
 0x665   : > { %v3751_v45 = vpop.f32.mrb[250].mxu1 }
 0x666   : > { %5299 = vst [vmem:[%s8379_s4 + $0x3e0] sm:$0xff] %v5937_v16  ;;  %v5938_v19 = vadd.f32 %v3751_v45, %v8365_v40  ;;  %v5161_v14 = vpop.f32.mrb[250].mxu0  ;;  %v3753_v30 = vpop.f32.mrb[251].mxu1 }
 0x667   : > { %v5163_v54 = vpop.f32.mrb[251].mxu0 }
 0x668   : > { %v5939_v49 = vadd.f32 %v5938_v19, %v5161_v14 }
 0x669   : > { %v3756_v41 = vpop.f32.mrb[252].mxu1 }
 0x66a   : > { %5300 = vst [vmem:[%s8379_s4 + $0x3e8] sm:$0xff] %v5939_v49  ;;  %v5940_v60 = vadd.f32 %v3756_v41, %v8365_v40  ;;  %v5166_v8 = vpop.f32.mrb[252].mxu0  ;;  %v3758_v3 = vpop.f32.mrb[253].mxu1 }
 0x66b   : > { %v5168_v0 = vpop.f32.mrb[253].mxu0 }
 0x66c   : > { %v5941_v31 = vadd.f32 %v5940_v60, %v5166_v8 }
 0x66d   : > { %v3761_v28 = vpop.f32.mrb[254].mxu1 }
 0x66e   : > { %5301 = vst [vmem:[%s8379_s4 + $0x3f0] sm:$0xff] %v5941_v31  ;;  %v5942_v4 = vadd.f32 %v3761_v28, %v8365_v40  ;;  %v5171_v17 = vpop.f32.mrb[254].mxu0  ;;  %v3763_v22 = vpop.f32.mrb[255].mxu1 }
 0x66f   : > { %v5173_v15 = vpop.f32.mrb[255].mxu0 }
 0x670   : > { %v5943_v63 = vadd.f32 %v5942_v4, %v5171_v17 }
 0x672   : > { %5302 = vst [vmem:[%s8379_s4 + $0x3f8] sm:$0xff] %v5943_v63 }
 0x673   : > { %6850 = shalt.err (!%p6847_p7)
}
 0x674   : > { %s6851_s29 = scalar_lea.hbm %s8992_s10, 16384  ;;  %s6855_s6 = scalar_lea.hbm %s9042_s3, 32768 }
 0x675   : > { %p6852_p9 = scmp.ne.s32.totalorder %s8992_s10, %s6851_s29  ;;  %p6856_p5 = scmp.lt.u32.totalorder %s8992_s10, %s9042_s3 }
 0x676   : > { %p6857_p11 = scmp.lt.u32.totalorder %s6855_s6, %s6851_s29  ;;  %p6859_p4 = scmp.lt.u32.totalorder %s6851_s29, %s8992_s10 }
 0x677   : > { %p6853_p2 = pnand %p6852_p9, %p7033_p12 }
 0x678   : > { %p6858_p1 = por %p6857_p11, %p6856_p5 }
 0x679   : > { %p6854_p0 = pneg %p6853_p2 }
 0x67a   : > { %p6860_p6 = por %p6859_p4, %p6858_p1 }
 0x67c   : > { %p6861_p8 = pnand %p6860_p6, %p6854_p0 }
 0x67e   : > { %6864 = shalt.err (!%p6861_p8)
}
 0x67f   : > { %s6917_s19 = smov 128   ;;  %s6918_s21 = smov 8  }
 0x680   : > { %6721 = dma.vmem_to_hbm [thread:$0]  (%p7033_p12), %s8994_s27, 16384, %s8992_s10, %s5304_s2, %s6917_s19, %s6917_s19, %s6918_s21  }
 0x681 PF: > { %s5332_s4 = sand.u32 1, %s6895_s14   ;;  %p9083_p10 = scmp.ne.s32.totalorder %s9047_s20, 0 }
 0x682   : > { %p9084_p13 = scmp.ge.s32.totalorder %s6907_s17, 2  ;;  %s5333_s23 = scalar_lea.sflag [#allocation5], %s5332_s4 }
 0x684   : > { %p6732_p3 = pnand %p9084_p13, %p9083_p10 }
 0x686   : > { %6890 = dma.done.wait (!%p6732_p3), %s5333_s23, 16384  }
 0x687   : > { %6892 = vsyncadd (!%p6732_p3), %s5333_s23, 4294950912  ;;  %p18_p7 = scmp.ge.s32.totalorder %s6998_s25, 4   ;;  %s9085_s14 = smov %s6899_s15 }
 0x688   : > { %s9086_s15 = smov %s6903_s16  ;;  %s9087_s16 = smov %s7029_s13 }
 0x689   : > { %s9088_s17 = smov %s6998_s25  ;;  %20 = sbr.rel (!%p18_p7) target bundleno = 8 (0x8), region = 81 }
 0x690   :  { %5338 = vsyncpa [#allocation4], 1 }
 0x691   :  { %5340 = vsyncpa [#allocation4 + $0x1], 1 }
 0x692   :  { %5341 = vsyncpa [#allocation7], 1 }
 0x693   :  { %5342 = vsyncpa [#allocation5], 1 }
 0x694   :  { %5344 = vsyncpa [#allocation5 + $0x1], 1 }

</bundles_post_ra>
